<compile_context>
chip_gen: v6e
topology: v6e:2x2x1
jax: 0.10.0
libtpu: 0.0.40
codegen_flags: <defaults>
</compile_context>

<pallas_src>
import math
import functools

import jax
import jax.numpy as jnp
from jax.experimental import pallas as pl
from jax.experimental.pallas import tpu as pltpu


# --------------------- packed small-parameter layout -------------------------

def _vec_layout(n_enc, n_dec):
    """Row index for every small (<=128-wide) bias / LayerNorm parameter."""
    idx = {}
    r = 0

    def add(name):
        nonlocal r
        idx[name] = r
        r += 1

    for l in range(n_enc):
        for n in ("in_b", "out_b", "n1w", "n1b", "ffb2", "n2w", "n2b"):
            add(f"enc{l}.{n}")
    add("enc_nw"); add("enc_nb")
    for l in range(n_dec):
        for n in ("in_b", "out_b", "n1w", "n1b", "q_b", "kv_b", "ca_out_b",
                  "n2w", "n2b", "ffb2", "n3w", "n3b"):
            add(f"dec{l}.{n}")
    add("dec_nw"); add("dec_nb")
    return idx, r


# ------------------------------- fused kernel --------------------------------

def _recformer_kernel(ids_ref, emb_ref, sa_inT_ref, sa_outT_ref,
                      ca_qT_ref, ca_kvT_ref, ca_outT_ref,
                      ffw1_ref, ffw2_ref, linT_ref, vecs_ref, ffb1_ref,
                      o_ref, *, S, E, H, n_enc, n_dec, eps, idx):
    Dh = E // H
    bf16 = jnp.bfloat16
    f32 = jnp.float32

    def vec(name, width=E):
        r = idx[name]
        return vecs_ref[r:r + 1, :width]                       # (1, width) f32

    def layer_norm(x, wname, bname):
        w, b = vec(wname), vec(bname)
        mu = jnp.mean(x, axis=-1, keepdims=True)
        var = jnp.mean((x - mu) ** 2, axis=-1, keepdims=True)  # biased, as PyTorch
        return (x - mu) * jax.lax.rsqrt(var + eps) * w + b

    def mha(q, k, v, outT, out_b):
        # q: (Sq, E) f32, k/v: (Sk, E) f32 (scale already folded into q weights).
        # outT: (E, E) bf16 value. Output projection is applied per head and
        # accumulated full-width (no lane-concatenation of 8-wide heads).
        acc = None
        for h in range(H):
            sl = slice(h * Dh, (h + 1) * Dh)
            s = jax.lax.dot_general(q[:, sl], k[:, sl],
                                    (((1,), (1,)), ((), ())),
                                    preferred_element_type=f32)    # (Sq, Sk)
            s = s - jnp.max(s, axis=-1, keepdims=True)
            p = jnp.exp(s)
            p = p * pl.reciprocal(jnp.sum(p, axis=-1, keepdims=True), approx=True)
            oh = jnp.dot(p, v[:, sl], preferred_element_type=f32)  # (Sq, Dh)
            c = jnp.dot(oh.astype(bf16), outT[sl, :],
                        preferred_element_type=f32)                # (Sq, E)
            acc = c if acc is None else acc + c
        return acc + out_b

    def self_attention(x, l_sa, pre):
        xb = x.astype(bf16)
        qkv = jnp.dot(xb, sa_inT_ref[l_sa],
                      preferred_element_type=f32) + vec(f"{pre}.in_b", 3 * E)
        q, k, v = qkv[:, :E], qkv[:, E:2 * E], qkv[:, 2 * E:]
        return mha(q, k, v, sa_outT_ref[l_sa], vec(f"{pre}.out_b"))

    def cross_attention(x, mem_bf, l, pre):
        xb = x.astype(bf16)
        q = jnp.dot(xb, ca_qT_ref[l],
                    preferred_element_type=f32) + vec(f"{pre}.q_b")
        kv = jnp.dot(mem_bf, ca_kvT_ref[l],
                     preferred_element_type=f32) + vec(f"{pre}.kv_b", 2 * E)
        k, v = kv[:, :E], kv[:, E:]
        return mha(q, k, v, ca_outT_ref[l], vec(f"{pre}.ca_out_b"))

    def ffn(x, l_ff, pre):
        xb = x.astype(bf16)
        h = jnp.dot(xb, ffw1_ref[l_ff],
                    preferred_element_type=f32) + ffb1_ref[l_ff:l_ff + 1, :]
        h = jnp.maximum(h, 0.0).astype(bf16)    # ReLU in f32 (v5e-safe), bf16 hidden
        return jnp.dot(h, ffw2_ref[l_ff],
                       preferred_element_type=f32) + vec(f"{pre}.ffb2")

    # -------- embedding: one-hot gather on the MXU (dropout = identity) -------
    ids = ids_ref[...]                                           # (S, 1) int32
    Vp = emb_ref.shape[0]
    iota = jax.lax.broadcasted_iota(jnp.int32, (S, Vp), 1)
    onehot = (iota == ids).astype(bf16)                          # (S, Vp)
    x0 = jnp.dot(onehot, emb_ref[...], preferred_element_type=f32)  # (S, E) f32

    # --------------------------------- encoder --------------------------------
    x = x0
    for l in range(n_enc):
        pre = f"enc{l}"
        x = layer_norm(x + self_attention(x, l, pre), f"{pre}.n1w", f"{pre}.n1b")
        x = layer_norm(x + ffn(x, l, pre), f"{pre}.n2w", f"{pre}.n2b")
    mem = layer_norm(x, "enc_nw", "enc_nb")                      # encoder final norm
    mem_bf = mem.astype(bf16)

    # --------------------------------- decoder --------------------------------
    y = x0
    for l in range(n_dec):
        pre = f"dec{l}"
        y = layer_norm(y + self_attention(y, n_enc + l, pre),
                       f"{pre}.n1w", f"{pre}.n1b")
        y = layer_norm(y + cross_attention(y, mem_bf, l, pre),
                       f"{pre}.n2w", f"{pre}.n2b")
        y = layer_norm(y + ffn(y, n_enc + l, pre),
                       f"{pre}.n3w", f"{pre}.n3b")
    y = layer_norm(y, "dec_nw", "dec_nb")                        # decoder final norm

    # ---- per-batch classifier partial; batch-mean + bias happen outside ------
    Lp = linT_ref.shape[1]
    part = jnp.dot(y.astype(bf16), linT_ref[...], preferred_element_type=f32)
    o_ref[...] = part.reshape(1, S, Lp)


# -------------------------------- host wrapper --------------------------------

def _whole_spec(shape):
    zeros = (0,) * len(shape)
    return pl.BlockSpec(tuple(shape), lambda b, z=zeros: z)


def recformer_forward(params, token_ids, *, num_heads, num_labels):
    S, B = token_ids.shape
    Vp, E = params['emb_pad'].shape
    n_dec = params['ca_qT'].shape[0]
    n_enc = params['sa_in_projT'].shape[0] - n_dec
    Lp = params['lin_wT_pad'].shape[1]

    # batch-major flat token ids: row = b*S + s
    ids_flat = jnp.transpose(token_ids).reshape(B * S, 1).astype(jnp.int32)

    weights = [params['emb_pad'],
               params['sa_in_projT'], params['sa_out_projT'],
               params['ca_qT'], params['ca_kvT'], params['ca_out_projT'],
               params['ff_w1T'], params['ff_w2T'], params['lin_wT_pad'],
               params['vecs'], params['ff_b1']]

    idx, _ = _vec_layout(n_enc, n_dec)
    kernel = functools.partial(_recformer_kernel, S=S, E=E, H=num_heads,
                               n_enc=n_enc, n_dec=n_dec, eps=1e-5, idx=idx)

    in_specs = [pl.BlockSpec((S, 1), lambda b: (b, 0))]
    in_specs += [_whole_spec(w.shape) for w in weights]

    partials = pl.pallas_call(
        kernel,
        grid=(B,),
        out_shape=jax.ShapeDtypeStruct((B, S, Lp), jnp.float32),
        in_specs=in_specs,
        out_specs=pl.BlockSpec((1, S, Lp), lambda b: (b, 0, 0)),
        compiler_params=pltpu.CompilerParams(
            dimension_semantics=("parallel",)),   # v7x: one batch per TensorCore
    )(ids_flat, *weights)

    # mean over the batch commutes with the linear classifier
    out = jnp.mean(partials, axis=0)[:, :num_labels] + params['lin_b'][None, :]
    return out


# ------------------------------- parameter init -------------------------------

def init_params(key, num_tokens, num_labels, dim_model, num_heads,
                n_enc, n_dec, dim_ff):
    E = dim_model
    Dh = E // num_heads
    scale_q = 1.0 / math.sqrt(Dh)
    keys = iter(jax.random.split(key, 256))

    def w(shape, s=0.02):
        return s * jax.random.normal(next(keys), shape, dtype=jnp.float32)

    bf16 = jnp.bfloat16

    # embedding: vocab padded to a multiple of 8, stored bf16
    V_pad = ((num_tokens + 7) // 8) * 8
    emb = w((num_tokens, E), s=1.0)
    emb_pad = jnp.zeros((V_pad, E), jnp.float32).at[:num_tokens].set(emb).astype(bf16)

    n_sa = n_enc + n_dec          # self-attn layers, order [enc..., dec...]
    n_ff = n_enc + n_dec          # FFN layers,        order [enc..., dec...]

    # self-attention: pre-transposed, 1/sqrt(Dh) folded into the Q columns
    sa_inT, sa_outT = [], []
    for _ in range(n_sa):
        ipT = jnp.transpose(w((3 * E, E)))                      # (E, 3E)
        ipT = jnp.concatenate([ipT[:, :E] * scale_q, ipT[:, E:]], axis=1)
        sa_inT.append(ipT)
        sa_outT.append(jnp.transpose(w((E, E))))
    sa_inT = jnp.stack(sa_inT).astype(bf16)                     # (n_sa, E, 3E)
    sa_outT = jnp.stack(sa_outT).astype(bf16)                   # (n_sa, E, E)

    # cross-attention (decoder layers only), Q scale folded in
    ca_qT, ca_kvT, ca_outT = [], [], []
    for _ in range(n_dec):
        ipT = jnp.transpose(w((3 * E, E)))                      # (E, 3E)
        ca_qT.append(ipT[:, :E] * scale_q)
        ca_kvT.append(ipT[:, E:])
        ca_outT.append(jnp.transpose(w((E, E))))
    ca_qT = jnp.stack(ca_qT).astype(bf16)                       # (n_dec, E, E)
    ca_kvT = jnp.stack(ca_kvT).astype(bf16)                     # (n_dec, E, 2E)
    ca_outT = jnp.stack(ca_outT).astype(bf16)                   # (n_dec, E, E)

    # FFN weights
    ff1, ff2 = [], []
    for _ in range(n_ff):
        ff1.append(jnp.transpose(w((dim_ff, E))))               # (E, FF)
        ff2.append(jnp.transpose(w((E, dim_ff))))               # (FF, E)
    ff_w1T = jnp.stack(ff1).astype(bf16)                        # (n_ff, E, FF)
    ff_w2T = jnp.stack(ff2).astype(bf16)                        # (n_ff, FF, E)

    # classifier: pre-transposed, lane-padded to a multiple of 128, bf16
    lin_w = w((num_labels, E))
    Lp = max(128, ((num_labels + 127) // 128) * 128)
    lin_wT_pad = (jnp.zeros((E, Lp), jnp.float32)
                  .at[:, :num_labels].set(jnp.transpose(lin_w)).astype(bf16))
    lin_b = jnp.zeros((num_labels,), jnp.float32)

    # --- packed small params (biases zero as before; LayerNorm w=1, b=0) ---
    # NOTE: if nonzero attention biases are ever used, the Q bias entries must
    # also be multiplied by scale_q (the scale is folded into Q weight + bias).
    idx, R = _vec_layout(n_enc, n_dec)
    Rp = ((R + 7) // 8) * 8
    vecs = jnp.zeros((Rp, 128), jnp.float32)
    ones_E = jnp.ones((E,), jnp.float32)

    def setrow(v, name, arr):
        return v.at[idx[name], :arr.shape[0]].set(arr)

    for l in range(n_enc):
        vecs = setrow(vecs, f"enc{l}.n1w", ones_E)
        vecs = setrow(vecs, f"enc{l}.n2w", ones_E)
    vecs = setrow(vecs, "enc_nw", ones_E)
    for l in range(n_dec):
        vecs = setrow(vecs, f"dec{l}.n1w", ones_E)
        vecs = setrow(vecs, f"dec{l}.n2w", ones_E)
        vecs = setrow(vecs, f"dec{l}.n3w", ones_E)
    vecs = setrow(vecs, "dec_nw", ones_E)

    ff_b1 = jnp.zeros((((n_ff + 7) // 8) * 8, dim_ff), jnp.float32)

    return dict(
        emb_pad=emb_pad,
        sa_in_projT=sa_inT, sa_out_projT=sa_outT,
        ca_qT=ca_qT, ca_kvT=ca_kvT, ca_out_projT=ca_outT,
        ff_w1T=ff_w1T, ff_w2T=ff_w2T,
        lin_wT_pad=lin_wT_pad, lin_b=lin_b,
        vecs=vecs, ff_b1=ff_b1,
    )


# ------------------------------------ main ------------------------------------

if __name__ == "__main__":
    NUM_TOKENS = 50
    NUM_LABELS = 5
    DIM_MODEL = 32
    NUM_HEADS = 4
    NUM_ENC_LAYERS = 2
    NUM_DEC_LAYERS = 2
    DIM_FF = 2048        # PyTorch nn.Transformer default dim_feedforward
    SEQ_LEN = 8
    BATCH = 2

    root = jax.random.PRNGKey(0)
    pkey, dkey = jax.random.split(root)
    params = init_params(pkey, NUM_TOKENS, NUM_LABELS, DIM_MODEL, NUM_HEADS,
                         NUM_ENC_LAYERS, NUM_DEC_LAYERS, DIM_FF)

    # input_tensor: (S, B) int32 token ids (embedding(...).squeeze(1) is a no-op here)
    token_ids = jax.random.randint(dkey, (SEQ_LEN, BATCH), 0, NUM_TOKENS,
                                   dtype=jnp.int32)

    fwd = jax.jit(functools.partial(recformer_forward,
                                    num_heads=NUM_HEADS, num_labels=NUM_LABELS))
    out = jax.block_until_ready(fwd(params, token_ids))
    assert out.shape == (SEQ_LEN, NUM_LABELS), out.shape
    assert bool(jnp.all(jnp.isfinite(out)))
    print("KERNEL_OK")
</pallas_src>

<mosaic_0001>
module attributes {stable_mosaic.version = 11 : i64} {
  func.func @_recformer_kernel(%arg0: i32, %arg1: memref<8x1xi32, #tpu.memory_space<vmem>>, %arg2: memref<56x32xbf16, #tpu.memory_space<vmem>>, %arg3: memref<4x32x96xbf16, #tpu.memory_space<vmem>>, %arg4: memref<4x32x32xbf16, #tpu.memory_space<vmem>>, %arg5: memref<2x32x32xbf16, #tpu.memory_space<vmem>>, %arg6: memref<2x32x64xbf16, #tpu.memory_space<vmem>>, %arg7: memref<2x32x32xbf16, #tpu.memory_space<vmem>>, %arg8: memref<4x32x2048xbf16, #tpu.memory_space<vmem>>, %arg9: memref<4x2048x32xbf16, #tpu.memory_space<vmem>>, %arg10: memref<32x128xbf16, #tpu.memory_space<vmem>>, %arg11: memref<48x128xf32, #tpu.memory_space<vmem>>, %arg12: memref<8x2048xf32, #tpu.memory_space<vmem>>, %arg13: memref<1x8x128xf32, #tpu.memory_space<vmem>>) attributes {dimension_semantics = [#tpu.dimension_semantics<parallel>], iteration_bounds = array<i64: 2>, scalar_prefetch = 0 : i64, scratch_operands = 0 : i64, tpu.core_type = #tpu.core_type<tc>, window_params = [{transform_indices = @transform_0, window_bounds = array<i64: 8, 1>}, {pipeline_mode = #tpu.pipeline_mode<synchronous>, transform_indices = @transform_1, window_bounds = array<i64: 56, 32>}, {pipeline_mode = #tpu.pipeline_mode<synchronous>, transform_indices = @transform_2, window_bounds = array<i64: 4, 32, 96>}, {pipeline_mode = #tpu.pipeline_mode<synchronous>, transform_indices = @transform_3, window_bounds = array<i64: 4, 32, 32>}, {pipeline_mode = #tpu.pipeline_mode<synchronous>, transform_indices = @transform_4, window_bounds = array<i64: 2, 32, 32>}, {pipeline_mode = #tpu.pipeline_mode<synchronous>, transform_indices = @transform_5, window_bounds = array<i64: 2, 32, 64>}, {pipeline_mode = #tpu.pipeline_mode<synchronous>, transform_indices = @transform_6, window_bounds = array<i64: 2, 32, 32>}, {pipeline_mode = #tpu.pipeline_mode<synchronous>, transform_indices = @transform_7, window_bounds = array<i64: 4, 32, 2048>}, {pipeline_mode = #tpu.pipeline_mode<synchronous>, transform_indices = @transform_8, window_bounds = array<i64: 4, 2048, 32>}, {pipeline_mode = #tpu.pipeline_mode<synchronous>, transform_indices = @transform_9, window_bounds = array<i64: 32, 128>}, {pipeline_mode = #tpu.pipeline_mode<synchronous>, transform_indices = @transform_10, window_bounds = array<i64: 48, 128>}, {pipeline_mode = #tpu.pipeline_mode<synchronous>, transform_indices = @transform_11, window_bounds = array<i64: 8, 2048>}, {transform_indices = @transform_12, window_bounds = array<i64: 1, 8, 128>}]} {
    %c0 = arith.constant 0 : index
    %c0_0 = arith.constant 0 : index
    %0 = vector.load %arg1[%c0, %c0_0] : memref<8x1xi32, #tpu.memory_space<vmem>>, vector<8x1xi32>
    %1 = tpu.iota {dimensions = array<i32: 1>} : vector<8x56xi32>
    %2 = vector.broadcast %0 : vector<8x1xi32> to vector<8x56xi32>
    %3 = arith.cmpi eq, %1, %2 : vector<8x56xi32>
    %4 = arith.extui %3 : vector<8x56xi1> to vector<8x56xi32>
    %5 = arith.sitofp %4 : vector<8x56xi32> to vector<8x56xf32>
    %6 = arith.truncf %5 : vector<8x56xf32> to vector<8x56xbf16>
    %c0_1 = arith.constant 0 : index
    %c0_2 = arith.constant 0 : index
    %7 = vector.load %arg2[%c0_1, %c0_2] : memref<56x32xbf16, #tpu.memory_space<vmem>>, vector<56x32xbf16>
    %cst = arith.constant dense<0.000000e+00> : vector<8x32xf32>
    %8 = tpu.matmul %6, %7, %cst {dimension_numbers = #tpu.dot_dimension_numbers<[1], [0], [0], [1], [0, 0, 1, 1], [], []>} : vector<8x56xbf16>, vector<56x32xbf16>, vector<8x32xf32> -> vector<8x32xf32>
    %9 = arith.truncf %8 : vector<8x32xf32> to vector<8x32xbf16>
    %c0_3 = arith.constant 0 : index
    %c0_4 = arith.constant 0 : index
    %c0_5 = arith.constant 0 : index
    %10 = vector.load %arg3[%c0_3, %c0_4, %c0_5] : memref<4x32x96xbf16, #tpu.memory_space<vmem>>, vector<1x32x96xbf16>
    %11 = vector.shape_cast %10 : vector<1x32x96xbf16> to vector<32x96xbf16>
    %cst_6 = arith.constant dense<0.000000e+00> : vector<8x96xf32>
    %12 = tpu.matmul %9, %11, %cst_6 {dimension_numbers = #tpu.dot_dimension_numbers<[1], [0], [0], [1], [0, 0, 1, 1], [], []>} : vector<8x32xbf16>, vector<32x96xbf16>, vector<8x96xf32> -> vector<8x96xf32>
    %c0_7 = arith.constant 0 : index
    %c0_8 = arith.constant 0 : index
    %13 = vector.load %arg11[%c0_7, %c0_8] : memref<48x128xf32, #tpu.memory_space<vmem>>, vector<1x96xf32>
    %14 = vector.broadcast %13 : vector<1x96xf32> to vector<8x96xf32>
    %15 = arith.addf %12, %14 : vector<8x96xf32>
    %16 = vector.extract_strided_slice %15 {offsets = [0, 0], sizes = [8, 32], strides = [1, 1]} : vector<8x96xf32> to vector<8x32xf32>
    %17 = vector.extract_strided_slice %15 {offsets = [0, 32], sizes = [8, 32], strides = [1, 1]} : vector<8x96xf32> to vector<8x32xf32>
    %18 = vector.extract_strided_slice %15 {offsets = [0, 64], sizes = [8, 32], strides = [1, 1]} : vector<8x96xf32> to vector<8x32xf32>
    %c0_9 = arith.constant 0 : index
    %c0_10 = arith.constant 0 : index
    %c0_11 = arith.constant 0 : index
    %19 = vector.load %arg4[%c0_9, %c0_10, %c0_11] : memref<4x32x32xbf16, #tpu.memory_space<vmem>>, vector<1x32x32xbf16>
    %20 = vector.shape_cast %19 : vector<1x32x32xbf16> to vector<32x32xbf16>
    %c1 = arith.constant 1 : index
    %c0_12 = arith.constant 0 : index
    %21 = vector.load %arg11[%c1, %c0_12] : memref<48x128xf32, #tpu.memory_space<vmem>>, vector<1x32xf32>
    %22 = vector.extract_strided_slice %16 {offsets = [0, 0], sizes = [8, 8], strides = [1, 1]} : vector<8x32xf32> to vector<8x8xf32>
    %23 = vector.extract_strided_slice %17 {offsets = [0, 0], sizes = [8, 8], strides = [1, 1]} : vector<8x32xf32> to vector<8x8xf32>
    %cst_13 = arith.constant dense<0.000000e+00> : vector<8x8xf32>
    %24 = tpu.matmul %22, %23, %cst_13 {dimension_numbers = #tpu.dot_dimension_numbers<[1], [1], [0], [0], [0, 0, 1, 0], [], []>} : vector<8x8xf32>, vector<8x8xf32>, vector<8x8xf32> -> vector<8x8xf32>
    %cst_14 = arith.constant dense<0xFF800000> : vector<8xf32>
    %25 = vector.multi_reduction <maximumf>, %24, %cst_14 [1] : vector<8x8xf32> to vector<8xf32>
    %26 = vector.shape_cast %25 : vector<8xf32> to vector<8x1xf32>
    %27 = vector.broadcast %26 : vector<8x1xf32> to vector<8x8xf32>
    %28 = arith.subf %24, %27 : vector<8x8xf32>
    %29 = math.exp %28 : vector<8x8xf32>
    %cst_15 = arith.constant dense<0.000000e+00> : vector<8xf32>
    %30 = vector.multi_reduction <add>, %29, %cst_15 [1] : vector<8x8xf32> to vector<8xf32>
    %31 = vector.shape_cast %30 : vector<8xf32> to vector<8x1xf32>
    %32 = tpu.reciprocal %31 {approx = true} : vector<8x1xf32> -> vector<8x1xf32>
    %33 = vector.broadcast %32 : vector<8x1xf32> to vector<8x8xf32>
    %34 = arith.mulf %29, %33 : vector<8x8xf32>
    %35 = vector.extract_strided_slice %18 {offsets = [0, 0], sizes = [8, 8], strides = [1, 1]} : vector<8x32xf32> to vector<8x8xf32>
    %cst_16 = arith.constant dense<0.000000e+00> : vector<8x8xf32>
    %36 = tpu.matmul %34, %35, %cst_16 {dimension_numbers = #tpu.dot_dimension_numbers<[1], [0], [0], [1], [0, 0, 1, 1], [], []>} : vector<8x8xf32>, vector<8x8xf32>, vector<8x8xf32> -> vector<8x8xf32>
    %37 = arith.truncf %36 : vector<8x8xf32> to vector<8x8xbf16>
    %38 = vector.extract_strided_slice %20 {offsets = [0, 0], sizes = [8, 32], strides = [1, 1]} : vector<32x32xbf16> to vector<8x32xbf16>
    %cst_17 = arith.constant dense<0.000000e+00> : vector<8x32xf32>
    %39 = tpu.matmul %37, %38, %cst_17 {dimension_numbers = #tpu.dot_dimension_numbers<[1], [0], [0], [1], [0, 0, 1, 1], [], []>} : vector<8x8xbf16>, vector<8x32xbf16>, vector<8x32xf32> -> vector<8x32xf32>
    %40 = vector.extract_strided_slice %16 {offsets = [0, 8], sizes = [8, 8], strides = [1, 1]} : vector<8x32xf32> to vector<8x8xf32>
    %41 = vector.extract_strided_slice %17 {offsets = [0, 8], sizes = [8, 8], strides = [1, 1]} : vector<8x32xf32> to vector<8x8xf32>
    %cst_18 = arith.constant dense<0.000000e+00> : vector<8x8xf32>
    %42 = tpu.matmul %40, %41, %cst_18 {dimension_numbers = #tpu.dot_dimension_numbers<[1], [1], [0], [0], [0, 0, 1, 0], [], []>} : vector<8x8xf32>, vector<8x8xf32>, vector<8x8xf32> -> vector<8x8xf32>
    %cst_19 = arith.constant dense<0xFF800000> : vector<8xf32>
    %43 = vector.multi_reduction <maximumf>, %42, %cst_19 [1] : vector<8x8xf32> to vector<8xf32>
    %44 = vector.shape_cast %43 : vector<8xf32> to vector<8x1xf32>
    %45 = vector.broadcast %44 : vector<8x1xf32> to vector<8x8xf32>
    %46 = arith.subf %42, %45 : vector<8x8xf32>
    %47 = math.exp %46 : vector<8x8xf32>
    %cst_20 = arith.constant dense<0.000000e+00> : vector<8xf32>
    %48 = vector.multi_reduction <add>, %47, %cst_20 [1] : vector<8x8xf32> to vector<8xf32>
    %49 = vector.shape_cast %48 : vector<8xf32> to vector<8x1xf32>
    %50 = tpu.reciprocal %49 {approx = true} : vector<8x1xf32> -> vector<8x1xf32>
    %51 = vector.broadcast %50 : vector<8x1xf32> to vector<8x8xf32>
    %52 = arith.mulf %47, %51 : vector<8x8xf32>
    %53 = vector.extract_strided_slice %18 {offsets = [0, 8], sizes = [8, 8], strides = [1, 1]} : vector<8x32xf32> to vector<8x8xf32>
    %cst_21 = arith.constant dense<0.000000e+00> : vector<8x8xf32>
    %54 = tpu.matmul %52, %53, %cst_21 {dimension_numbers = #tpu.dot_dimension_numbers<[1], [0], [0], [1], [0, 0, 1, 1], [], []>} : vector<8x8xf32>, vector<8x8xf32>, vector<8x8xf32> -> vector<8x8xf32>
    %55 = arith.truncf %54 : vector<8x8xf32> to vector<8x8xbf16>
    %56 = vector.extract_strided_slice %20 {offsets = [8, 0], sizes = [8, 32], strides = [1, 1]} : vector<32x32xbf16> to vector<8x32xbf16>
    %cst_22 = arith.constant dense<0.000000e+00> : vector<8x32xf32>
    %57 = tpu.matmul %55, %56, %cst_22 {dimension_numbers = #tpu.dot_dimension_numbers<[1], [0], [0], [1], [0, 0, 1, 1], [], []>} : vector<8x8xbf16>, vector<8x32xbf16>, vector<8x32xf32> -> vector<8x32xf32>
    %58 = arith.addf %39, %57 : vector<8x32xf32>
    %59 = vector.extract_strided_slice %16 {offsets = [0, 16], sizes = [8, 8], strides = [1, 1]} : vector<8x32xf32> to vector<8x8xf32>
    %60 = vector.extract_strided_slice %17 {offsets = [0, 16], sizes = [8, 8], strides = [1, 1]} : vector<8x32xf32> to vector<8x8xf32>
    %cst_23 = arith.constant dense<0.000000e+00> : vector<8x8xf32>
    %61 = tpu.matmul %59, %60, %cst_23 {dimension_numbers = #tpu.dot_dimension_numbers<[1], [1], [0], [0], [0, 0, 1, 0], [], []>} : vector<8x8xf32>, vector<8x8xf32>, vector<8x8xf32> -> vector<8x8xf32>
    %cst_24 = arith.constant dense<0xFF800000> : vector<8xf32>
    %62 = vector.multi_reduction <maximumf>, %61, %cst_24 [1] : vector<8x8xf32> to vector<8xf32>
    %63 = vector.shape_cast %62 : vector<8xf32> to vector<8x1xf32>
    %64 = vector.broadcast %63 : vector<8x1xf32> to vector<8x8xf32>
    %65 = arith.subf %61, %64 : vector<8x8xf32>
    %66 = math.exp %65 : vector<8x8xf32>
    %cst_25 = arith.constant dense<0.000000e+00> : vector<8xf32>
    %67 = vector.multi_reduction <add>, %66, %cst_25 [1] : vector<8x8xf32> to vector<8xf32>
    %68 = vector.shape_cast %67 : vector<8xf32> to vector<8x1xf32>
    %69 = tpu.reciprocal %68 {approx = true} : vector<8x1xf32> -> vector<8x1xf32>
    %70 = vector.broadcast %69 : vector<8x1xf32> to vector<8x8xf32>
    %71 = arith.mulf %66, %70 : vector<8x8xf32>
    %72 = vector.extract_strided_slice %18 {offsets = [0, 16], sizes = [8, 8], strides = [1, 1]} : vector<8x32xf32> to vector<8x8xf32>
    %cst_26 = arith.constant dense<0.000000e+00> : vector<8x8xf32>
    %73 = tpu.matmul %71, %72, %cst_26 {dimension_numbers = #tpu.dot_dimension_numbers<[1], [0], [0], [1], [0, 0, 1, 1], [], []>} : vector<8x8xf32>, vector<8x8xf32>, vector<8x8xf32> -> vector<8x8xf32>
    %74 = arith.truncf %73 : vector<8x8xf32> to vector<8x8xbf16>
    %75 = vector.extract_strided_slice %20 {offsets = [16, 0], sizes = [8, 32], strides = [1, 1]} : vector<32x32xbf16> to vector<8x32xbf16>
    %cst_27 = arith.constant dense<0.000000e+00> : vector<8x32xf32>
    %76 = tpu.matmul %74, %75, %cst_27 {dimension_numbers = #tpu.dot_dimension_numbers<[1], [0], [0], [1], [0, 0, 1, 1], [], []>} : vector<8x8xbf16>, vector<8x32xbf16>, vector<8x32xf32> -> vector<8x32xf32>
    %77 = arith.addf %58, %76 : vector<8x32xf32>
    %78 = vector.extract_strided_slice %16 {offsets = [0, 24], sizes = [8, 8], strides = [1, 1]} : vector<8x32xf32> to vector<8x8xf32>
    %79 = vector.extract_strided_slice %17 {offsets = [0, 24], sizes = [8, 8], strides = [1, 1]} : vector<8x32xf32> to vector<8x8xf32>
    %cst_28 = arith.constant dense<0.000000e+00> : vector<8x8xf32>
    %80 = tpu.matmul %78, %79, %cst_28 {dimension_numbers = #tpu.dot_dimension_numbers<[1], [1], [0], [0], [0, 0, 1, 0], [], []>} : vector<8x8xf32>, vector<8x8xf32>, vector<8x8xf32> -> vector<8x8xf32>
    %cst_29 = arith.constant dense<0xFF800000> : vector<8xf32>
    %81 = vector.multi_reduction <maximumf>, %80, %cst_29 [1] : vector<8x8xf32> to vector<8xf32>
    %82 = vector.shape_cast %81 : vector<8xf32> to vector<8x1xf32>
    %83 = vector.broadcast %82 : vector<8x1xf32> to vector<8x8xf32>
    %84 = arith.subf %80, %83 : vector<8x8xf32>
    %85 = math.exp %84 : vector<8x8xf32>
    %cst_30 = arith.constant dense<0.000000e+00> : vector<8xf32>
    %86 = vector.multi_reduction <add>, %85, %cst_30 [1] : vector<8x8xf32> to vector<8xf32>
    %87 = vector.shape_cast %86 : vector<8xf32> to vector<8x1xf32>
    %88 = tpu.reciprocal %87 {approx = true} : vector<8x1xf32> -> vector<8x1xf32>
    %89 = vector.broadcast %88 : vector<8x1xf32> to vector<8x8xf32>
    %90 = arith.mulf %85, %89 : vector<8x8xf32>
    %91 = vector.extract_strided_slice %18 {offsets = [0, 24], sizes = [8, 8], strides = [1, 1]} : vector<8x32xf32> to vector<8x8xf32>
    %cst_31 = arith.constant dense<0.000000e+00> : vector<8x8xf32>
    %92 = tpu.matmul %90, %91, %cst_31 {dimension_numbers = #tpu.dot_dimension_numbers<[1], [0], [0], [1], [0, 0, 1, 1], [], []>} : vector<8x8xf32>, vector<8x8xf32>, vector<8x8xf32> -> vector<8x8xf32>
    %93 = arith.truncf %92 : vector<8x8xf32> to vector<8x8xbf16>
    %94 = vector.extract_strided_slice %20 {offsets = [24, 0], sizes = [8, 32], strides = [1, 1]} : vector<32x32xbf16> to vector<8x32xbf16>
    %cst_32 = arith.constant dense<0.000000e+00> : vector<8x32xf32>
    %95 = tpu.matmul %93, %94, %cst_32 {dimension_numbers = #tpu.dot_dimension_numbers<[1], [0], [0], [1], [0, 0, 1, 1], [], []>} : vector<8x8xbf16>, vector<8x32xbf16>, vector<8x32xf32> -> vector<8x32xf32>
    %96 = arith.addf %77, %95 : vector<8x32xf32>
    %97 = vector.broadcast %21 : vector<1x32xf32> to vector<8x32xf32>
    %98 = arith.addf %96, %97 : vector<8x32xf32>
    %99 = arith.addf %8, %98 : vector<8x32xf32>
    %c2 = arith.constant 2 : index
    %c0_33 = arith.constant 0 : index
    %100 = vector.load %arg11[%c2, %c0_33] : memref<48x128xf32, #tpu.memory_space<vmem>>, vector<1x32xf32>
    %c3 = arith.constant 3 : index
    %c0_34 = arith.constant 0 : index
    %101 = vector.load %arg11[%c3, %c0_34] : memref<48x128xf32, #tpu.memory_space<vmem>>, vector<1x32xf32>
    %cst_35 = arith.constant dense<0.000000e+00> : vector<8xf32>
    %102 = vector.multi_reduction <add>, %99, %cst_35 [1] : vector<8x32xf32> to vector<8xf32>
    %103 = vector.shape_cast %102 : vector<8xf32> to vector<8x1xf32>
    %cst_36 = arith.constant 3.200000e+01 : f32
    %104 = vector.broadcast %cst_36 : f32 to vector<8x1xf32>
    %105 = arith.divf %103, %104 : vector<8x1xf32>
    %106 = vector.broadcast %105 : vector<8x1xf32> to vector<8x32xf32>
    %107 = arith.subf %99, %106 : vector<8x32xf32>
    %108 = arith.mulf %107, %107 : vector<8x32xf32>
    %cst_37 = arith.constant dense<0.000000e+00> : vector<8xf32>
    %109 = vector.multi_reduction <add>, %108, %cst_37 [1] : vector<8x32xf32> to vector<8xf32>
    %110 = vector.shape_cast %109 : vector<8xf32> to vector<8x1xf32>
    %cst_38 = arith.constant 3.200000e+01 : f32
    %111 = vector.broadcast %cst_38 : f32 to vector<8x1xf32>
    %112 = arith.divf %110, %111 : vector<8x1xf32>
    %113 = vector.broadcast %105 : vector<8x1xf32> to vector<8x32xf32>
    %114 = arith.subf %99, %113 : vector<8x32xf32>
    %cst_39 = arith.constant 9.99999974E-6 : f32
    %115 = vector.broadcast %cst_39 : f32 to vector<8x1xf32>
    %116 = arith.addf %112, %115 : vector<8x1xf32>
    %117 = math.rsqrt %116 : vector<8x1xf32>
    %118 = vector.broadcast %117 : vector<8x1xf32> to vector<8x32xf32>
    %119 = arith.mulf %114, %118 : vector<8x32xf32>
    %120 = vector.broadcast %100 : vector<1x32xf32> to vector<8x32xf32>
    %121 = arith.mulf %119, %120 : vector<8x32xf32>
    %122 = vector.broadcast %101 : vector<1x32xf32> to vector<8x32xf32>
    %123 = arith.addf %121, %122 : vector<8x32xf32>
    %124 = arith.truncf %123 : vector<8x32xf32> to vector<8x32xbf16>
    %c0_40 = arith.constant 0 : index
    %c0_41 = arith.constant 0 : index
    %c0_42 = arith.constant 0 : index
    %125 = vector.load %arg8[%c0_40, %c0_41, %c0_42] : memref<4x32x2048xbf16, #tpu.memory_space<vmem>>, vector<1x32x2048xbf16>
    %126 = vector.shape_cast %125 : vector<1x32x2048xbf16> to vector<32x2048xbf16>
    %cst_43 = arith.constant dense<0.000000e+00> : vector<8x2048xf32>
    %127 = tpu.matmul %124, %126, %cst_43 {dimension_numbers = #tpu.dot_dimension_numbers<[1], [0], [0], [1], [0, 0, 1, 1], [], []>} : vector<8x32xbf16>, vector<32x2048xbf16>, vector<8x2048xf32> -> vector<8x2048xf32>
    %c0_44 = arith.constant 0 : index
    %c0_45 = arith.constant 0 : index
    %128 = vector.load %arg12[%c0_44, %c0_45] : memref<8x2048xf32, #tpu.memory_space<vmem>>, vector<1x2048xf32>
    %129 = vector.broadcast %128 : vector<1x2048xf32> to vector<8x2048xf32>
    %130 = arith.addf %127, %129 : vector<8x2048xf32>
    %cst_46 = arith.constant 0.000000e+00 : f32
    %131 = vector.broadcast %cst_46 : f32 to vector<8x2048xf32>
    %132 = arith.maximumf %130, %131 : vector<8x2048xf32>
    %133 = arith.truncf %132 : vector<8x2048xf32> to vector<8x2048xbf16>
    %c0_47 = arith.constant 0 : index
    %c0_48 = arith.constant 0 : index
    %c0_49 = arith.constant 0 : index
    %134 = vector.load %arg9[%c0_47, %c0_48, %c0_49] : memref<4x2048x32xbf16, #tpu.memory_space<vmem>>, vector<1x2048x32xbf16>
    %135 = vector.shape_cast %134 : vector<1x2048x32xbf16> to vector<2048x32xbf16>
    %cst_50 = arith.constant dense<0.000000e+00> : vector<8x32xf32>
    %136 = tpu.matmul %133, %135, %cst_50 {dimension_numbers = #tpu.dot_dimension_numbers<[1], [0], [0], [1], [0, 0, 1, 1], [], []>} : vector<8x2048xbf16>, vector<2048x32xbf16>, vector<8x32xf32> -> vector<8x32xf32>
    %c4 = arith.constant 4 : index
    %c0_51 = arith.constant 0 : index
    %137 = vector.load %arg11[%c4, %c0_51] : memref<48x128xf32, #tpu.memory_space<vmem>>, vector<1x32xf32>
    %138 = vector.broadcast %137 : vector<1x32xf32> to vector<8x32xf32>
    %139 = arith.addf %136, %138 : vector<8x32xf32>
    %140 = arith.addf %123, %139 : vector<8x32xf32>
    %c5 = arith.constant 5 : index
    %c0_52 = arith.constant 0 : index
    %141 = vector.load %arg11[%c5, %c0_52] : memref<48x128xf32, #tpu.memory_space<vmem>>, vector<1x32xf32>
    %c6 = arith.constant 6 : index
    %c0_53 = arith.constant 0 : index
    %142 = vector.load %arg11[%c6, %c0_53] : memref<48x128xf32, #tpu.memory_space<vmem>>, vector<1x32xf32>
    %cst_54 = arith.constant dense<0.000000e+00> : vector<8xf32>
    %143 = vector.multi_reduction <add>, %140, %cst_54 [1] : vector<8x32xf32> to vector<8xf32>
    %144 = vector.shape_cast %143 : vector<8xf32> to vector<8x1xf32>
    %cst_55 = arith.constant 3.200000e+01 : f32
    %145 = vector.broadcast %cst_55 : f32 to vector<8x1xf32>
    %146 = arith.divf %144, %145 : vector<8x1xf32>
    %147 = vector.broadcast %146 : vector<8x1xf32> to vector<8x32xf32>
    %148 = arith.subf %140, %147 : vector<8x32xf32>
    %149 = arith.mulf %148, %148 : vector<8x32xf32>
    %cst_56 = arith.constant dense<0.000000e+00> : vector<8xf32>
    %150 = vector.multi_reduction <add>, %149, %cst_56 [1] : vector<8x32xf32> to vector<8xf32>
    %151 = vector.shape_cast %150 : vector<8xf32> to vector<8x1xf32>
    %cst_57 = arith.constant 3.200000e+01 : f32
    %152 = vector.broadcast %cst_57 : f32 to vector<8x1xf32>
    %153 = arith.divf %151, %152 : vector<8x1xf32>
    %154 = vector.broadcast %146 : vector<8x1xf32> to vector<8x32xf32>
    %155 = arith.subf %140, %154 : vector<8x32xf32>
    %cst_58 = arith.constant 9.99999974E-6 : f32
    %156 = vector.broadcast %cst_58 : f32 to vector<8x1xf32>
    %157 = arith.addf %153, %156 : vector<8x1xf32>
    %158 = math.rsqrt %157 : vector<8x1xf32>
    %159 = vector.broadcast %158 : vector<8x1xf32> to vector<8x32xf32>
    %160 = arith.mulf %155, %159 : vector<8x32xf32>
    %161 = vector.broadcast %141 : vector<1x32xf32> to vector<8x32xf32>
    %162 = arith.mulf %160, %161 : vector<8x32xf32>
    %163 = vector.broadcast %142 : vector<1x32xf32> to vector<8x32xf32>
    %164 = arith.addf %162, %163 : vector<8x32xf32>
    %165 = arith.truncf %164 : vector<8x32xf32> to vector<8x32xbf16>
    %c1_59 = arith.constant 1 : index
    %c0_60 = arith.constant 0 : index
    %c0_61 = arith.constant 0 : index
    %166 = vector.load %arg3[%c1_59, %c0_60, %c0_61] : memref<4x32x96xbf16, #tpu.memory_space<vmem>>, vector<1x32x96xbf16>
    %167 = vector.shape_cast %166 : vector<1x32x96xbf16> to vector<32x96xbf16>
    %cst_62 = arith.constant dense<0.000000e+00> : vector<8x96xf32>
    %168 = tpu.matmul %165, %167, %cst_62 {dimension_numbers = #tpu.dot_dimension_numbers<[1], [0], [0], [1], [0, 0, 1, 1], [], []>} : vector<8x32xbf16>, vector<32x96xbf16>, vector<8x96xf32> -> vector<8x96xf32>
    %c7 = arith.constant 7 : index
    %c0_63 = arith.constant 0 : index
    %169 = vector.load %arg11[%c7, %c0_63] : memref<48x128xf32, #tpu.memory_space<vmem>>, vector<1x96xf32>
    %170 = vector.broadcast %169 : vector<1x96xf32> to vector<8x96xf32>
    %171 = arith.addf %168, %170 : vector<8x96xf32>
    %172 = vector.extract_strided_slice %171 {offsets = [0, 0], sizes = [8, 32], strides = [1, 1]} : vector<8x96xf32> to vector<8x32xf32>
    %173 = vector.extract_strided_slice %171 {offsets = [0, 32], sizes = [8, 32], strides = [1, 1]} : vector<8x96xf32> to vector<8x32xf32>
    %174 = vector.extract_strided_slice %171 {offsets = [0, 64], sizes = [8, 32], strides = [1, 1]} : vector<8x96xf32> to vector<8x32xf32>
    %c1_64 = arith.constant 1 : index
    %c0_65 = arith.constant 0 : index
    %c0_66 = arith.constant 0 : index
    %175 = vector.load %arg4[%c1_64, %c0_65, %c0_66] : memref<4x32x32xbf16, #tpu.memory_space<vmem>>, vector<1x32x32xbf16>
    %176 = vector.shape_cast %175 : vector<1x32x32xbf16> to vector<32x32xbf16>
    %c8 = arith.constant 8 : index
    %c0_67 = arith.constant 0 : index
    %177 = vector.load %arg11[%c8, %c0_67] : memref<48x128xf32, #tpu.memory_space<vmem>>, vector<1x32xf32>
    %178 = vector.extract_strided_slice %172 {offsets = [0, 0], sizes = [8, 8], strides = [1, 1]} : vector<8x32xf32> to vector<8x8xf32>
    %179 = vector.extract_strided_slice %173 {offsets = [0, 0], sizes = [8, 8], strides = [1, 1]} : vector<8x32xf32> to vector<8x8xf32>
    %cst_68 = arith.constant dense<0.000000e+00> : vector<8x8xf32>
    %180 = tpu.matmul %178, %179, %cst_68 {dimension_numbers = #tpu.dot_dimension_numbers<[1], [1], [0], [0], [0, 0, 1, 0], [], []>} : vector<8x8xf32>, vector<8x8xf32>, vector<8x8xf32> -> vector<8x8xf32>
    %cst_69 = arith.constant dense<0xFF800000> : vector<8xf32>
    %181 = vector.multi_reduction <maximumf>, %180, %cst_69 [1] : vector<8x8xf32> to vector<8xf32>
    %182 = vector.shape_cast %181 : vector<8xf32> to vector<8x1xf32>
    %183 = vector.broadcast %182 : vector<8x1xf32> to vector<8x8xf32>
    %184 = arith.subf %180, %183 : vector<8x8xf32>
    %185 = math.exp %184 : vector<8x8xf32>
    %cst_70 = arith.constant dense<0.000000e+00> : vector<8xf32>
    %186 = vector.multi_reduction <add>, %185, %cst_70 [1] : vector<8x8xf32> to vector<8xf32>
    %187 = vector.shape_cast %186 : vector<8xf32> to vector<8x1xf32>
    %188 = tpu.reciprocal %187 {approx = true} : vector<8x1xf32> -> vector<8x1xf32>
    %189 = vector.broadcast %188 : vector<8x1xf32> to vector<8x8xf32>
    %190 = arith.mulf %185, %189 : vector<8x8xf32>
    %191 = vector.extract_strided_slice %174 {offsets = [0, 0], sizes = [8, 8], strides = [1, 1]} : vector<8x32xf32> to vector<8x8xf32>
    %cst_71 = arith.constant dense<0.000000e+00> : vector<8x8xf32>
    %192 = tpu.matmul %190, %191, %cst_71 {dimension_numbers = #tpu.dot_dimension_numbers<[1], [0], [0], [1], [0, 0, 1, 1], [], []>} : vector<8x8xf32>, vector<8x8xf32>, vector<8x8xf32> -> vector<8x8xf32>
    %193 = arith.truncf %192 : vector<8x8xf32> to vector<8x8xbf16>
    %194 = vector.extract_strided_slice %176 {offsets = [0, 0], sizes = [8, 32], strides = [1, 1]} : vector<32x32xbf16> to vector<8x32xbf16>
    %cst_72 = arith.constant dense<0.000000e+00> : vector<8x32xf32>
    %195 = tpu.matmul %193, %194, %cst_72 {dimension_numbers = #tpu.dot_dimension_numbers<[1], [0], [0], [1], [0, 0, 1, 1], [], []>} : vector<8x8xbf16>, vector<8x32xbf16>, vector<8x32xf32> -> vector<8x32xf32>
    %196 = vector.extract_strided_slice %172 {offsets = [0, 8], sizes = [8, 8], strides = [1, 1]} : vector<8x32xf32> to vector<8x8xf32>
    %197 = vector.extract_strided_slice %173 {offsets = [0, 8], sizes = [8, 8], strides = [1, 1]} : vector<8x32xf32> to vector<8x8xf32>
    %cst_73 = arith.constant dense<0.000000e+00> : vector<8x8xf32>
    %198 = tpu.matmul %196, %197, %cst_73 {dimension_numbers = #tpu.dot_dimension_numbers<[1], [1], [0], [0], [0, 0, 1, 0], [], []>} : vector<8x8xf32>, vector<8x8xf32>, vector<8x8xf32> -> vector<8x8xf32>
    %cst_74 = arith.constant dense<0xFF800000> : vector<8xf32>
    %199 = vector.multi_reduction <maximumf>, %198, %cst_74 [1] : vector<8x8xf32> to vector<8xf32>
    %200 = vector.shape_cast %199 : vector<8xf32> to vector<8x1xf32>
    %201 = vector.broadcast %200 : vector<8x1xf32> to vector<8x8xf32>
    %202 = arith.subf %198, %201 : vector<8x8xf32>
    %203 = math.exp %202 : vector<8x8xf32>
    %cst_75 = arith.constant dense<0.000000e+00> : vector<8xf32>
    %204 = vector.multi_reduction <add>, %203, %cst_75 [1] : vector<8x8xf32> to vector<8xf32>
    %205 = vector.shape_cast %204 : vector<8xf32> to vector<8x1xf32>
    %206 = tpu.reciprocal %205 {approx = true} : vector<8x1xf32> -> vector<8x1xf32>
    %207 = vector.broadcast %206 : vector<8x1xf32> to vector<8x8xf32>
    %208 = arith.mulf %203, %207 : vector<8x8xf32>
    %209 = vector.extract_strided_slice %174 {offsets = [0, 8], sizes = [8, 8], strides = [1, 1]} : vector<8x32xf32> to vector<8x8xf32>
    %cst_76 = arith.constant dense<0.000000e+00> : vector<8x8xf32>
    %210 = tpu.matmul %208, %209, %cst_76 {dimension_numbers = #tpu.dot_dimension_numbers<[1], [0], [0], [1], [0, 0, 1, 1], [], []>} : vector<8x8xf32>, vector<8x8xf32>, vector<8x8xf32> -> vector<8x8xf32>
    %211 = arith.truncf %210 : vector<8x8xf32> to vector<8x8xbf16>
    %212 = vector.extract_strided_slice %176 {offsets = [8, 0], sizes = [8, 32], strides = [1, 1]} : vector<32x32xbf16> to vector<8x32xbf16>
    %cst_77 = arith.constant dense<0.000000e+00> : vector<8x32xf32>
    %213 = tpu.matmul %211, %212, %cst_77 {dimension_numbers = #tpu.dot_dimension_numbers<[1], [0], [0], [1], [0, 0, 1, 1], [], []>} : vector<8x8xbf16>, vector<8x32xbf16>, vector<8x32xf32> -> vector<8x32xf32>
    %214 = arith.addf %195, %213 : vector<8x32xf32>
    %215 = vector.extract_strided_slice %172 {offsets = [0, 16], sizes = [8, 8], strides = [1, 1]} : vector<8x32xf32> to vector<8x8xf32>
    %216 = vector.extract_strided_slice %173 {offsets = [0, 16], sizes = [8, 8], strides = [1, 1]} : vector<8x32xf32> to vector<8x8xf32>
    %cst_78 = arith.constant dense<0.000000e+00> : vector<8x8xf32>
    %217 = tpu.matmul %215, %216, %cst_78 {dimension_numbers = #tpu.dot_dimension_numbers<[1], [1], [0], [0], [0, 0, 1, 0], [], []>} : vector<8x8xf32>, vector<8x8xf32>, vector<8x8xf32> -> vector<8x8xf32>
    %cst_79 = arith.constant dense<0xFF800000> : vector<8xf32>
    %218 = vector.multi_reduction <maximumf>, %217, %cst_79 [1] : vector<8x8xf32> to vector<8xf32>
    %219 = vector.shape_cast %218 : vector<8xf32> to vector<8x1xf32>
    %220 = vector.broadcast %219 : vector<8x1xf32> to vector<8x8xf32>
    %221 = arith.subf %217, %220 : vector<8x8xf32>
    %222 = math.exp %221 : vector<8x8xf32>
    %cst_80 = arith.constant dense<0.000000e+00> : vector<8xf32>
    %223 = vector.multi_reduction <add>, %222, %cst_80 [1] : vector<8x8xf32> to vector<8xf32>
    %224 = vector.shape_cast %223 : vector<8xf32> to vector<8x1xf32>
    %225 = tpu.reciprocal %224 {approx = true} : vector<8x1xf32> -> vector<8x1xf32>
    %226 = vector.broadcast %225 : vector<8x1xf32> to vector<8x8xf32>
    %227 = arith.mulf %222, %226 : vector<8x8xf32>
    %228 = vector.extract_strided_slice %174 {offsets = [0, 16], sizes = [8, 8], strides = [1, 1]} : vector<8x32xf32> to vector<8x8xf32>
    %cst_81 = arith.constant dense<0.000000e+00> : vector<8x8xf32>
    %229 = tpu.matmul %227, %228, %cst_81 {dimension_numbers = #tpu.dot_dimension_numbers<[1], [0], [0], [1], [0, 0, 1, 1], [], []>} : vector<8x8xf32>, vector<8x8xf32>, vector<8x8xf32> -> vector<8x8xf32>
    %230 = arith.truncf %229 : vector<8x8xf32> to vector<8x8xbf16>
    %231 = vector.extract_strided_slice %176 {offsets = [16, 0], sizes = [8, 32], strides = [1, 1]} : vector<32x32xbf16> to vector<8x32xbf16>
    %cst_82 = arith.constant dense<0.000000e+00> : vector<8x32xf32>
    %232 = tpu.matmul %230, %231, %cst_82 {dimension_numbers = #tpu.dot_dimension_numbers<[1], [0], [0], [1], [0, 0, 1, 1], [], []>} : vector<8x8xbf16>, vector<8x32xbf16>, vector<8x32xf32> -> vector<8x32xf32>
    %233 = arith.addf %214, %232 : vector<8x32xf32>
    %234 = vector.extract_strided_slice %172 {offsets = [0, 24], sizes = [8, 8], strides = [1, 1]} : vector<8x32xf32> to vector<8x8xf32>
    %235 = vector.extract_strided_slice %173 {offsets = [0, 24], sizes = [8, 8], strides = [1, 1]} : vector<8x32xf32> to vector<8x8xf32>
    %cst_83 = arith.constant dense<0.000000e+00> : vector<8x8xf32>
    %236 = tpu.matmul %234, %235, %cst_83 {dimension_numbers = #tpu.dot_dimension_numbers<[1], [1], [0], [0], [0, 0, 1, 0], [], []>} : vector<8x8xf32>, vector<8x8xf32>, vector<8x8xf32> -> vector<8x8xf32>
    %cst_84 = arith.constant dense<0xFF800000> : vector<8xf32>
    %237 = vector.multi_reduction <maximumf>, %236, %cst_84 [1] : vector<8x8xf32> to vector<8xf32>
    %238 = vector.shape_cast %237 : vector<8xf32> to vector<8x1xf32>
    %239 = vector.broadcast %238 : vector<8x1xf32> to vector<8x8xf32>
    %240 = arith.subf %236, %239 : vector<8x8xf32>
    %241 = math.exp %240 : vector<8x8xf32>
    %cst_85 = arith.constant dense<0.000000e+00> : vector<8xf32>
    %242 = vector.multi_reduction <add>, %241, %cst_85 [1] : vector<8x8xf32> to vector<8xf32>
    %243 = vector.shape_cast %242 : vector<8xf32> to vector<8x1xf32>
    %244 = tpu.reciprocal %243 {approx = true} : vector<8x1xf32> -> vector<8x1xf32>
    %245 = vector.broadcast %244 : vector<8x1xf32> to vector<8x8xf32>
    %246 = arith.mulf %241, %245 : vector<8x8xf32>
    %247 = vector.extract_strided_slice %174 {offsets = [0, 24], sizes = [8, 8], strides = [1, 1]} : vector<8x32xf32> to vector<8x8xf32>
    %cst_86 = arith.constant dense<0.000000e+00> : vector<8x8xf32>
    %248 = tpu.matmul %246, %247, %cst_86 {dimension_numbers = #tpu.dot_dimension_numbers<[1], [0], [0], [1], [0, 0, 1, 1], [], []>} : vector<8x8xf32>, vector<8x8xf32>, vector<8x8xf32> -> vector<8x8xf32>
    %249 = arith.truncf %248 : vector<8x8xf32> to vector<8x8xbf16>
    %250 = vector.extract_strided_slice %176 {offsets = [24, 0], sizes = [8, 32], strides = [1, 1]} : vector<32x32xbf16> to vector<8x32xbf16>
    %cst_87 = arith.constant dense<0.000000e+00> : vector<8x32xf32>
    %251 = tpu.matmul %249, %250, %cst_87 {dimension_numbers = #tpu.dot_dimension_numbers<[1], [0], [0], [1], [0, 0, 1, 1], [], []>} : vector<8x8xbf16>, vector<8x32xbf16>, vector<8x32xf32> -> vector<8x32xf32>
    %252 = arith.addf %233, %251 : vector<8x32xf32>
    %253 = vector.broadcast %177 : vector<1x32xf32> to vector<8x32xf32>
    %254 = arith.addf %252, %253 : vector<8x32xf32>
    %255 = arith.addf %164, %254 : vector<8x32xf32>
    %c9 = arith.constant 9 : index
    %c0_88 = arith.constant 0 : index
    %256 = vector.load %arg11[%c9, %c0_88] : memref<48x128xf32, #tpu.memory_space<vmem>>, vector<1x32xf32>
    %c10 = arith.constant 10 : index
    %c0_89 = arith.constant 0 : index
    %257 = vector.load %arg11[%c10, %c0_89] : memref<48x128xf32, #tpu.memory_space<vmem>>, vector<1x32xf32>
    %cst_90 = arith.constant dense<0.000000e+00> : vector<8xf32>
    %258 = vector.multi_reduction <add>, %255, %cst_90 [1] : vector<8x32xf32> to vector<8xf32>
    %259 = vector.shape_cast %258 : vector<8xf32> to vector<8x1xf32>
    %cst_91 = arith.constant 3.200000e+01 : f32
    %260 = vector.broadcast %cst_91 : f32 to vector<8x1xf32>
    %261 = arith.divf %259, %260 : vector<8x1xf32>
    %262 = vector.broadcast %261 : vector<8x1xf32> to vector<8x32xf32>
    %263 = arith.subf %255, %262 : vector<8x32xf32>
    %264 = arith.mulf %263, %263 : vector<8x32xf32>
    %cst_92 = arith.constant dense<0.000000e+00> : vector<8xf32>
    %265 = vector.multi_reduction <add>, %264, %cst_92 [1] : vector<8x32xf32> to vector<8xf32>
    %266 = vector.shape_cast %265 : vector<8xf32> to vector<8x1xf32>
    %cst_93 = arith.constant 3.200000e+01 : f32
    %267 = vector.broadcast %cst_93 : f32 to vector<8x1xf32>
    %268 = arith.divf %266, %267 : vector<8x1xf32>
    %269 = vector.broadcast %261 : vector<8x1xf32> to vector<8x32xf32>
    %270 = arith.subf %255, %269 : vector<8x32xf32>
    %cst_94 = arith.constant 9.99999974E-6 : f32
    %271 = vector.broadcast %cst_94 : f32 to vector<8x1xf32>
    %272 = arith.addf %268, %271 : vector<8x1xf32>
    %273 = math.rsqrt %272 : vector<8x1xf32>
    %274 = vector.broadcast %273 : vector<8x1xf32> to vector<8x32xf32>
    %275 = arith.mulf %270, %274 : vector<8x32xf32>
    %276 = vector.broadcast %256 : vector<1x32xf32> to vector<8x32xf32>
    %277 = arith.mulf %275, %276 : vector<8x32xf32>
    %278 = vector.broadcast %257 : vector<1x32xf32> to vector<8x32xf32>
    %279 = arith.addf %277, %278 : vector<8x32xf32>
    %280 = arith.truncf %279 : vector<8x32xf32> to vector<8x32xbf16>
    %c1_95 = arith.constant 1 : index
    %c0_96 = arith.constant 0 : index
    %c0_97 = arith.constant 0 : index
    %281 = vector.load %arg8[%c1_95, %c0_96, %c0_97] : memref<4x32x2048xbf16, #tpu.memory_space<vmem>>, vector<1x32x2048xbf16>
    %282 = vector.shape_cast %281 : vector<1x32x2048xbf16> to vector<32x2048xbf16>
    %cst_98 = arith.constant dense<0.000000e+00> : vector<8x2048xf32>
    %283 = tpu.matmul %280, %282, %cst_98 {dimension_numbers = #tpu.dot_dimension_numbers<[1], [0], [0], [1], [0, 0, 1, 1], [], []>} : vector<8x32xbf16>, vector<32x2048xbf16>, vector<8x2048xf32> -> vector<8x2048xf32>
    %c1_99 = arith.constant 1 : index
    %c0_100 = arith.constant 0 : index
    %284 = vector.load %arg12[%c1_99, %c0_100] : memref<8x2048xf32, #tpu.memory_space<vmem>>, vector<1x2048xf32>
    %285 = vector.broadcast %284 : vector<1x2048xf32> to vector<8x2048xf32>
    %286 = arith.addf %283, %285 : vector<8x2048xf32>
    %cst_101 = arith.constant 0.000000e+00 : f32
    %287 = vector.broadcast %cst_101 : f32 to vector<8x2048xf32>
    %288 = arith.maximumf %286, %287 : vector<8x2048xf32>
    %289 = arith.truncf %288 : vector<8x2048xf32> to vector<8x2048xbf16>
    %c1_102 = arith.constant 1 : index
    %c0_103 = arith.constant 0 : index
    %c0_104 = arith.constant 0 : index
    %290 = vector.load %arg9[%c1_102, %c0_103, %c0_104] : memref<4x2048x32xbf16, #tpu.memory_space<vmem>>, vector<1x2048x32xbf16>
    %291 = vector.shape_cast %290 : vector<1x2048x32xbf16> to vector<2048x32xbf16>
    %cst_105 = arith.constant dense<0.000000e+00> : vector<8x32xf32>
    %292 = tpu.matmul %289, %291, %cst_105 {dimension_numbers = #tpu.dot_dimension_numbers<[1], [0], [0], [1], [0, 0, 1, 1], [], []>} : vector<8x2048xbf16>, vector<2048x32xbf16>, vector<8x32xf32> -> vector<8x32xf32>
    %c11 = arith.constant 11 : index
    %c0_106 = arith.constant 0 : index
    %293 = vector.load %arg11[%c11, %c0_106] : memref<48x128xf32, #tpu.memory_space<vmem>>, vector<1x32xf32>
    %294 = vector.broadcast %293 : vector<1x32xf32> to vector<8x32xf32>
    %295 = arith.addf %292, %294 : vector<8x32xf32>
    %296 = arith.addf %279, %295 : vector<8x32xf32>
    %c12 = arith.constant 12 : index
    %c0_107 = arith.constant 0 : index
    %297 = vector.load %arg11[%c12, %c0_107] : memref<48x128xf32, #tpu.memory_space<vmem>>, vector<1x32xf32>
    %c13 = arith.constant 13 : index
    %c0_108 = arith.constant 0 : index
    %298 = vector.load %arg11[%c13, %c0_108] : memref<48x128xf32, #tpu.memory_space<vmem>>, vector<1x32xf32>
    %cst_109 = arith.constant dense<0.000000e+00> : vector<8xf32>
    %299 = vector.multi_reduction <add>, %296, %cst_109 [1] : vector<8x32xf32> to vector<8xf32>
    %300 = vector.shape_cast %299 : vector<8xf32> to vector<8x1xf32>
    %cst_110 = arith.constant 3.200000e+01 : f32
    %301 = vector.broadcast %cst_110 : f32 to vector<8x1xf32>
    %302 = arith.divf %300, %301 : vector<8x1xf32>
    %303 = vector.broadcast %302 : vector<8x1xf32> to vector<8x32xf32>
    %304 = arith.subf %296, %303 : vector<8x32xf32>
    %305 = arith.mulf %304, %304 : vector<8x32xf32>
    %cst_111 = arith.constant dense<0.000000e+00> : vector<8xf32>
    %306 = vector.multi_reduction <add>, %305, %cst_111 [1] : vector<8x32xf32> to vector<8xf32>
    %307 = vector.shape_cast %306 : vector<8xf32> to vector<8x1xf32>
    %cst_112 = arith.constant 3.200000e+01 : f32
    %308 = vector.broadcast %cst_112 : f32 to vector<8x1xf32>
    %309 = arith.divf %307, %308 : vector<8x1xf32>
    %310 = vector.broadcast %302 : vector<8x1xf32> to vector<8x32xf32>
    %311 = arith.subf %296, %310 : vector<8x32xf32>
    %cst_113 = arith.constant 9.99999974E-6 : f32
    %312 = vector.broadcast %cst_113 : f32 to vector<8x1xf32>
    %313 = arith.addf %309, %312 : vector<8x1xf32>
    %314 = math.rsqrt %313 : vector<8x1xf32>
    %315 = vector.broadcast %314 : vector<8x1xf32> to vector<8x32xf32>
    %316 = arith.mulf %311, %315 : vector<8x32xf32>
    %317 = vector.broadcast %297 : vector<1x32xf32> to vector<8x32xf32>
    %318 = arith.mulf %316, %317 : vector<8x32xf32>
    %319 = vector.broadcast %298 : vector<1x32xf32> to vector<8x32xf32>
    %320 = arith.addf %318, %319 : vector<8x32xf32>
    %c14 = arith.constant 14 : index
    %c0_114 = arith.constant 0 : index
    %321 = vector.load %arg11[%c14, %c0_114] : memref<48x128xf32, #tpu.memory_space<vmem>>, vector<1x32xf32>
    %c15 = arith.constant 15 : index
    %c0_115 = arith.constant 0 : index
    %322 = vector.load %arg11[%c15, %c0_115] : memref<48x128xf32, #tpu.memory_space<vmem>>, vector<1x32xf32>
    %cst_116 = arith.constant dense<0.000000e+00> : vector<8xf32>
    %323 = vector.multi_reduction <add>, %320, %cst_116 [1] : vector<8x32xf32> to vector<8xf32>
    %324 = vector.shape_cast %323 : vector<8xf32> to vector<8x1xf32>
    %cst_117 = arith.constant 3.200000e+01 : f32
    %325 = vector.broadcast %cst_117 : f32 to vector<8x1xf32>
    %326 = arith.divf %324, %325 : vector<8x1xf32>
    %327 = vector.broadcast %326 : vector<8x1xf32> to vector<8x32xf32>
    %328 = arith.subf %320, %327 : vector<8x32xf32>
    %329 = arith.mulf %328, %328 : vector<8x32xf32>
    %cst_118 = arith.constant dense<0.000000e+00> : vector<8xf32>
    %330 = vector.multi_reduction <add>, %329, %cst_118 [1] : vector<8x32xf32> to vector<8xf32>
    %331 = vector.shape_cast %330 : vector<8xf32> to vector<8x1xf32>
    %cst_119 = arith.constant 3.200000e+01 : f32
    %332 = vector.broadcast %cst_119 : f32 to vector<8x1xf32>
    %333 = arith.divf %331, %332 : vector<8x1xf32>
    %334 = vector.broadcast %326 : vector<8x1xf32> to vector<8x32xf32>
    %335 = arith.subf %320, %334 : vector<8x32xf32>
    %cst_120 = arith.constant 9.99999974E-6 : f32
    %336 = vector.broadcast %cst_120 : f32 to vector<8x1xf32>
    %337 = arith.addf %333, %336 : vector<8x1xf32>
    %338 = math.rsqrt %337 : vector<8x1xf32>
    %339 = vector.broadcast %338 : vector<8x1xf32> to vector<8x32xf32>
    %340 = arith.mulf %335, %339 : vector<8x32xf32>
    %341 = vector.broadcast %321 : vector<1x32xf32> to vector<8x32xf32>
    %342 = arith.mulf %340, %341 : vector<8x32xf32>
    %343 = vector.broadcast %322 : vector<1x32xf32> to vector<8x32xf32>
    %344 = arith.addf %342, %343 : vector<8x32xf32>
    %345 = arith.truncf %344 : vector<8x32xf32> to vector<8x32xbf16>
    %346 = arith.truncf %8 : vector<8x32xf32> to vector<8x32xbf16>
    %c2_121 = arith.constant 2 : index
    %c0_122 = arith.constant 0 : index
    %c0_123 = arith.constant 0 : index
    %347 = vector.load %arg3[%c2_121, %c0_122, %c0_123] : memref<4x32x96xbf16, #tpu.memory_space<vmem>>, vector<1x32x96xbf16>
    %348 = vector.shape_cast %347 : vector<1x32x96xbf16> to vector<32x96xbf16>
    %cst_124 = arith.constant dense<0.000000e+00> : vector<8x96xf32>
    %349 = tpu.matmul %346, %348, %cst_124 {dimension_numbers = #tpu.dot_dimension_numbers<[1], [0], [0], [1], [0, 0, 1, 1], [], []>} : vector<8x32xbf16>, vector<32x96xbf16>, vector<8x96xf32> -> vector<8x96xf32>
    %c16 = arith.constant 16 : index
    %c0_125 = arith.constant 0 : index
    %350 = vector.load %arg11[%c16, %c0_125] : memref<48x128xf32, #tpu.memory_space<vmem>>, vector<1x96xf32>
    %351 = vector.broadcast %350 : vector<1x96xf32> to vector<8x96xf32>
    %352 = arith.addf %349, %351 : vector<8x96xf32>
    %353 = vector.extract_strided_slice %352 {offsets = [0, 0], sizes = [8, 32], strides = [1, 1]} : vector<8x96xf32> to vector<8x32xf32>
    %354 = vector.extract_strided_slice %352 {offsets = [0, 32], sizes = [8, 32], strides = [1, 1]} : vector<8x96xf32> to vector<8x32xf32>
    %355 = vector.extract_strided_slice %352 {offsets = [0, 64], sizes = [8, 32], strides = [1, 1]} : vector<8x96xf32> to vector<8x32xf32>
    %c2_126 = arith.constant 2 : index
    %c0_127 = arith.constant 0 : index
    %c0_128 = arith.constant 0 : index
    %356 = vector.load %arg4[%c2_126, %c0_127, %c0_128] : memref<4x32x32xbf16, #tpu.memory_space<vmem>>, vector<1x32x32xbf16>
    %357 = vector.shape_cast %356 : vector<1x32x32xbf16> to vector<32x32xbf16>
    %c17 = arith.constant 17 : index
    %c0_129 = arith.constant 0 : index
    %358 = vector.load %arg11[%c17, %c0_129] : memref<48x128xf32, #tpu.memory_space<vmem>>, vector<1x32xf32>
    %359 = vector.extract_strided_slice %353 {offsets = [0, 0], sizes = [8, 8], strides = [1, 1]} : vector<8x32xf32> to vector<8x8xf32>
    %360 = vector.extract_strided_slice %354 {offsets = [0, 0], sizes = [8, 8], strides = [1, 1]} : vector<8x32xf32> to vector<8x8xf32>
    %cst_130 = arith.constant dense<0.000000e+00> : vector<8x8xf32>
    %361 = tpu.matmul %359, %360, %cst_130 {dimension_numbers = #tpu.dot_dimension_numbers<[1], [1], [0], [0], [0, 0, 1, 0], [], []>} : vector<8x8xf32>, vector<8x8xf32>, vector<8x8xf32> -> vector<8x8xf32>
    %cst_131 = arith.constant dense<0xFF800000> : vector<8xf32>
    %362 = vector.multi_reduction <maximumf>, %361, %cst_131 [1] : vector<8x8xf32> to vector<8xf32>
    %363 = vector.shape_cast %362 : vector<8xf32> to vector<8x1xf32>
    %364 = vector.broadcast %363 : vector<8x1xf32> to vector<8x8xf32>
    %365 = arith.subf %361, %364 : vector<8x8xf32>
    %366 = math.exp %365 : vector<8x8xf32>
    %cst_132 = arith.constant dense<0.000000e+00> : vector<8xf32>
    %367 = vector.multi_reduction <add>, %366, %cst_132 [1] : vector<8x8xf32> to vector<8xf32>
    %368 = vector.shape_cast %367 : vector<8xf32> to vector<8x1xf32>
    %369 = tpu.reciprocal %368 {approx = true} : vector<8x1xf32> -> vector<8x1xf32>
    %370 = vector.broadcast %369 : vector<8x1xf32> to vector<8x8xf32>
    %371 = arith.mulf %366, %370 : vector<8x8xf32>
    %372 = vector.extract_strided_slice %355 {offsets = [0, 0], sizes = [8, 8], strides = [1, 1]} : vector<8x32xf32> to vector<8x8xf32>
    %cst_133 = arith.constant dense<0.000000e+00> : vector<8x8xf32>
    %373 = tpu.matmul %371, %372, %cst_133 {dimension_numbers = #tpu.dot_dimension_numbers<[1], [0], [0], [1], [0, 0, 1, 1], [], []>} : vector<8x8xf32>, vector<8x8xf32>, vector<8x8xf32> -> vector<8x8xf32>
    %374 = arith.truncf %373 : vector<8x8xf32> to vector<8x8xbf16>
    %375 = vector.extract_strided_slice %357 {offsets = [0, 0], sizes = [8, 32], strides = [1, 1]} : vector<32x32xbf16> to vector<8x32xbf16>
    %cst_134 = arith.constant dense<0.000000e+00> : vector<8x32xf32>
    %376 = tpu.matmul %374, %375, %cst_134 {dimension_numbers = #tpu.dot_dimension_numbers<[1], [0], [0], [1], [0, 0, 1, 1], [], []>} : vector<8x8xbf16>, vector<8x32xbf16>, vector<8x32xf32> -> vector<8x32xf32>
    %377 = vector.extract_strided_slice %353 {offsets = [0, 8], sizes = [8, 8], strides = [1, 1]} : vector<8x32xf32> to vector<8x8xf32>
    %378 = vector.extract_strided_slice %354 {offsets = [0, 8], sizes = [8, 8], strides = [1, 1]} : vector<8x32xf32> to vector<8x8xf32>
    %cst_135 = arith.constant dense<0.000000e+00> : vector<8x8xf32>
    %379 = tpu.matmul %377, %378, %cst_135 {dimension_numbers = #tpu.dot_dimension_numbers<[1], [1], [0], [0], [0, 0, 1, 0], [], []>} : vector<8x8xf32>, vector<8x8xf32>, vector<8x8xf32> -> vector<8x8xf32>
    %cst_136 = arith.constant dense<0xFF800000> : vector<8xf32>
    %380 = vector.multi_reduction <maximumf>, %379, %cst_136 [1] : vector<8x8xf32> to vector<8xf32>
    %381 = vector.shape_cast %380 : vector<8xf32> to vector<8x1xf32>
    %382 = vector.broadcast %381 : vector<8x1xf32> to vector<8x8xf32>
    %383 = arith.subf %379, %382 : vector<8x8xf32>
    %384 = math.exp %383 : vector<8x8xf32>
    %cst_137 = arith.constant dense<0.000000e+00> : vector<8xf32>
    %385 = vector.multi_reduction <add>, %384, %cst_137 [1] : vector<8x8xf32> to vector<8xf32>
    %386 = vector.shape_cast %385 : vector<8xf32> to vector<8x1xf32>
    %387 = tpu.reciprocal %386 {approx = true} : vector<8x1xf32> -> vector<8x1xf32>
    %388 = vector.broadcast %387 : vector<8x1xf32> to vector<8x8xf32>
    %389 = arith.mulf %384, %388 : vector<8x8xf32>
    %390 = vector.extract_strided_slice %355 {offsets = [0, 8], sizes = [8, 8], strides = [1, 1]} : vector<8x32xf32> to vector<8x8xf32>
    %cst_138 = arith.constant dense<0.000000e+00> : vector<8x8xf32>
    %391 = tpu.matmul %389, %390, %cst_138 {dimension_numbers = #tpu.dot_dimension_numbers<[1], [0], [0], [1], [0, 0, 1, 1], [], []>} : vector<8x8xf32>, vector<8x8xf32>, vector<8x8xf32> -> vector<8x8xf32>
    %392 = arith.truncf %391 : vector<8x8xf32> to vector<8x8xbf16>
    %393 = vector.extract_strided_slice %357 {offsets = [8, 0], sizes = [8, 32], strides = [1, 1]} : vector<32x32xbf16> to vector<8x32xbf16>
    %cst_139 = arith.constant dense<0.000000e+00> : vector<8x32xf32>
    %394 = tpu.matmul %392, %393, %cst_139 {dimension_numbers = #tpu.dot_dimension_numbers<[1], [0], [0], [1], [0, 0, 1, 1], [], []>} : vector<8x8xbf16>, vector<8x32xbf16>, vector<8x32xf32> -> vector<8x32xf32>
    %395 = arith.addf %376, %394 : vector<8x32xf32>
    %396 = vector.extract_strided_slice %353 {offsets = [0, 16], sizes = [8, 8], strides = [1, 1]} : vector<8x32xf32> to vector<8x8xf32>
    %397 = vector.extract_strided_slice %354 {offsets = [0, 16], sizes = [8, 8], strides = [1, 1]} : vector<8x32xf32> to vector<8x8xf32>
    %cst_140 = arith.constant dense<0.000000e+00> : vector<8x8xf32>
    %398 = tpu.matmul %396, %397, %cst_140 {dimension_numbers = #tpu.dot_dimension_numbers<[1], [1], [0], [0], [0, 0, 1, 0], [], []>} : vector<8x8xf32>, vector<8x8xf32>, vector<8x8xf32> -> vector<8x8xf32>
    %cst_141 = arith.constant dense<0xFF800000> : vector<8xf32>
    %399 = vector.multi_reduction <maximumf>, %398, %cst_141 [1] : vector<8x8xf32> to vector<8xf32>
    %400 = vector.shape_cast %399 : vector<8xf32> to vector<8x1xf32>
    %401 = vector.broadcast %400 : vector<8x1xf32> to vector<8x8xf32>
    %402 = arith.subf %398, %401 : vector<8x8xf32>
    %403 = math.exp %402 : vector<8x8xf32>
    %cst_142 = arith.constant dense<0.000000e+00> : vector<8xf32>
    %404 = vector.multi_reduction <add>, %403, %cst_142 [1] : vector<8x8xf32> to vector<8xf32>
    %405 = vector.shape_cast %404 : vector<8xf32> to vector<8x1xf32>
    %406 = tpu.reciprocal %405 {approx = true} : vector<8x1xf32> -> vector<8x1xf32>
    %407 = vector.broadcast %406 : vector<8x1xf32> to vector<8x8xf32>
    %408 = arith.mulf %403, %407 : vector<8x8xf32>
    %409 = vector.extract_strided_slice %355 {offsets = [0, 16], sizes = [8, 8], strides = [1, 1]} : vector<8x32xf32> to vector<8x8xf32>
    %cst_143 = arith.constant dense<0.000000e+00> : vector<8x8xf32>
    %410 = tpu.matmul %408, %409, %cst_143 {dimension_numbers = #tpu.dot_dimension_numbers<[1], [0], [0], [1], [0, 0, 1, 1], [], []>} : vector<8x8xf32>, vector<8x8xf32>, vector<8x8xf32> -> vector<8x8xf32>
    %411 = arith.truncf %410 : vector<8x8xf32> to vector<8x8xbf16>
    %412 = vector.extract_strided_slice %357 {offsets = [16, 0], sizes = [8, 32], strides = [1, 1]} : vector<32x32xbf16> to vector<8x32xbf16>
    %cst_144 = arith.constant dense<0.000000e+00> : vector<8x32xf32>
    %413 = tpu.matmul %411, %412, %cst_144 {dimension_numbers = #tpu.dot_dimension_numbers<[1], [0], [0], [1], [0, 0, 1, 1], [], []>} : vector<8x8xbf16>, vector<8x32xbf16>, vector<8x32xf32> -> vector<8x32xf32>
    %414 = arith.addf %395, %413 : vector<8x32xf32>
    %415 = vector.extract_strided_slice %353 {offsets = [0, 24], sizes = [8, 8], strides = [1, 1]} : vector<8x32xf32> to vector<8x8xf32>
    %416 = vector.extract_strided_slice %354 {offsets = [0, 24], sizes = [8, 8], strides = [1, 1]} : vector<8x32xf32> to vector<8x8xf32>
    %cst_145 = arith.constant dense<0.000000e+00> : vector<8x8xf32>
    %417 = tpu.matmul %415, %416, %cst_145 {dimension_numbers = #tpu.dot_dimension_numbers<[1], [1], [0], [0], [0, 0, 1, 0], [], []>} : vector<8x8xf32>, vector<8x8xf32>, vector<8x8xf32> -> vector<8x8xf32>
    %cst_146 = arith.constant dense<0xFF800000> : vector<8xf32>
    %418 = vector.multi_reduction <maximumf>, %417, %cst_146 [1] : vector<8x8xf32> to vector<8xf32>
    %419 = vector.shape_cast %418 : vector<8xf32> to vector<8x1xf32>
    %420 = vector.broadcast %419 : vector<8x1xf32> to vector<8x8xf32>
    %421 = arith.subf %417, %420 : vector<8x8xf32>
    %422 = math.exp %421 : vector<8x8xf32>
    %cst_147 = arith.constant dense<0.000000e+00> : vector<8xf32>
    %423 = vector.multi_reduction <add>, %422, %cst_147 [1] : vector<8x8xf32> to vector<8xf32>
    %424 = vector.shape_cast %423 : vector<8xf32> to vector<8x1xf32>
    %425 = tpu.reciprocal %424 {approx = true} : vector<8x1xf32> -> vector<8x1xf32>
    %426 = vector.broadcast %425 : vector<8x1xf32> to vector<8x8xf32>
    %427 = arith.mulf %422, %426 : vector<8x8xf32>
    %428 = vector.extract_strided_slice %355 {offsets = [0, 24], sizes = [8, 8], strides = [1, 1]} : vector<8x32xf32> to vector<8x8xf32>
    %cst_148 = arith.constant dense<0.000000e+00> : vector<8x8xf32>
    %429 = tpu.matmul %427, %428, %cst_148 {dimension_numbers = #tpu.dot_dimension_numbers<[1], [0], [0], [1], [0, 0, 1, 1], [], []>} : vector<8x8xf32>, vector<8x8xf32>, vector<8x8xf32> -> vector<8x8xf32>
    %430 = arith.truncf %429 : vector<8x8xf32> to vector<8x8xbf16>
    %431 = vector.extract_strided_slice %357 {offsets = [24, 0], sizes = [8, 32], strides = [1, 1]} : vector<32x32xbf16> to vector<8x32xbf16>
    %cst_149 = arith.constant dense<0.000000e+00> : vector<8x32xf32>
    %432 = tpu.matmul %430, %431, %cst_149 {dimension_numbers = #tpu.dot_dimension_numbers<[1], [0], [0], [1], [0, 0, 1, 1], [], []>} : vector<8x8xbf16>, vector<8x32xbf16>, vector<8x32xf32> -> vector<8x32xf32>
    %433 = arith.addf %414, %432 : vector<8x32xf32>
    %434 = vector.broadcast %358 : vector<1x32xf32> to vector<8x32xf32>
    %435 = arith.addf %433, %434 : vector<8x32xf32>
    %436 = arith.addf %8, %435 : vector<8x32xf32>
    %c18 = arith.constant 18 : index
    %c0_150 = arith.constant 0 : index
    %437 = vector.load %arg11[%c18, %c0_150] : memref<48x128xf32, #tpu.memory_space<vmem>>, vector<1x32xf32>
    %c19 = arith.constant 19 : index
    %c0_151 = arith.constant 0 : index
    %438 = vector.load %arg11[%c19, %c0_151] : memref<48x128xf32, #tpu.memory_space<vmem>>, vector<1x32xf32>
    %cst_152 = arith.constant dense<0.000000e+00> : vector<8xf32>
    %439 = vector.multi_reduction <add>, %436, %cst_152 [1] : vector<8x32xf32> to vector<8xf32>
    %440 = vector.shape_cast %439 : vector<8xf32> to vector<8x1xf32>
    %cst_153 = arith.constant 3.200000e+01 : f32
    %441 = vector.broadcast %cst_153 : f32 to vector<8x1xf32>
    %442 = arith.divf %440, %441 : vector<8x1xf32>
    %443 = vector.broadcast %442 : vector<8x1xf32> to vector<8x32xf32>
    %444 = arith.subf %436, %443 : vector<8x32xf32>
    %445 = arith.mulf %444, %444 : vector<8x32xf32>
    %cst_154 = arith.constant dense<0.000000e+00> : vector<8xf32>
    %446 = vector.multi_reduction <add>, %445, %cst_154 [1] : vector<8x32xf32> to vector<8xf32>
    %447 = vector.shape_cast %446 : vector<8xf32> to vector<8x1xf32>
    %cst_155 = arith.constant 3.200000e+01 : f32
    %448 = vector.broadcast %cst_155 : f32 to vector<8x1xf32>
    %449 = arith.divf %447, %448 : vector<8x1xf32>
    %450 = vector.broadcast %442 : vector<8x1xf32> to vector<8x32xf32>
    %451 = arith.subf %436, %450 : vector<8x32xf32>
    %cst_156 = arith.constant 9.99999974E-6 : f32
    %452 = vector.broadcast %cst_156 : f32 to vector<8x1xf32>
    %453 = arith.addf %449, %452 : vector<8x1xf32>
    %454 = math.rsqrt %453 : vector<8x1xf32>
    %455 = vector.broadcast %454 : vector<8x1xf32> to vector<8x32xf32>
    %456 = arith.mulf %451, %455 : vector<8x32xf32>
    %457 = vector.broadcast %437 : vector<1x32xf32> to vector<8x32xf32>
    %458 = arith.mulf %456, %457 : vector<8x32xf32>
    %459 = vector.broadcast %438 : vector<1x32xf32> to vector<8x32xf32>
    %460 = arith.addf %458, %459 : vector<8x32xf32>
    %461 = arith.truncf %460 : vector<8x32xf32> to vector<8x32xbf16>
    %c0_157 = arith.constant 0 : index
    %c0_158 = arith.constant 0 : index
    %c0_159 = arith.constant 0 : index
    %462 = vector.load %arg5[%c0_157, %c0_158, %c0_159] : memref<2x32x32xbf16, #tpu.memory_space<vmem>>, vector<1x32x32xbf16>
    %463 = vector.shape_cast %462 : vector<1x32x32xbf16> to vector<32x32xbf16>
    %cst_160 = arith.constant dense<0.000000e+00> : vector<8x32xf32>
    %464 = tpu.matmul %461, %463, %cst_160 {dimension_numbers = #tpu.dot_dimension_numbers<[1], [0], [0], [1], [0, 0, 1, 1], [], []>} : vector<8x32xbf16>, vector<32x32xbf16>, vector<8x32xf32> -> vector<8x32xf32>
    %c20 = arith.constant 20 : index
    %c0_161 = arith.constant 0 : index
    %465 = vector.load %arg11[%c20, %c0_161] : memref<48x128xf32, #tpu.memory_space<vmem>>, vector<1x32xf32>
    %466 = vector.broadcast %465 : vector<1x32xf32> to vector<8x32xf32>
    %467 = arith.addf %464, %466 : vector<8x32xf32>
    %c0_162 = arith.constant 0 : index
    %c0_163 = arith.constant 0 : index
    %c0_164 = arith.constant 0 : index
    %468 = vector.load %arg6[%c0_162, %c0_163, %c0_164] : memref<2x32x64xbf16, #tpu.memory_space<vmem>>, vector<1x32x64xbf16>
    %469 = vector.shape_cast %468 : vector<1x32x64xbf16> to vector<32x64xbf16>
    %cst_165 = arith.constant dense<0.000000e+00> : vector<8x64xf32>
    %470 = tpu.matmul %345, %469, %cst_165 {dimension_numbers = #tpu.dot_dimension_numbers<[1], [0], [0], [1], [0, 0, 1, 1], [], []>} : vector<8x32xbf16>, vector<32x64xbf16>, vector<8x64xf32> -> vector<8x64xf32>
    %c21 = arith.constant 21 : index
    %c0_166 = arith.constant 0 : index
    %471 = vector.load %arg11[%c21, %c0_166] : memref<48x128xf32, #tpu.memory_space<vmem>>, vector<1x64xf32>
    %472 = vector.broadcast %471 : vector<1x64xf32> to vector<8x64xf32>
    %473 = arith.addf %470, %472 : vector<8x64xf32>
    %474 = vector.extract_strided_slice %473 {offsets = [0, 0], sizes = [8, 32], strides = [1, 1]} : vector<8x64xf32> to vector<8x32xf32>
    %475 = vector.extract_strided_slice %473 {offsets = [0, 32], sizes = [8, 32], strides = [1, 1]} : vector<8x64xf32> to vector<8x32xf32>
    %c0_167 = arith.constant 0 : index
    %c0_168 = arith.constant 0 : index
    %c0_169 = arith.constant 0 : index
    %476 = vector.load %arg7[%c0_167, %c0_168, %c0_169] : memref<2x32x32xbf16, #tpu.memory_space<vmem>>, vector<1x32x32xbf16>
    %477 = vector.shape_cast %476 : vector<1x32x32xbf16> to vector<32x32xbf16>
    %c22 = arith.constant 22 : index
    %c0_170 = arith.constant 0 : index
    %478 = vector.load %arg11[%c22, %c0_170] : memref<48x128xf32, #tpu.memory_space<vmem>>, vector<1x32xf32>
    %479 = vector.extract_strided_slice %467 {offsets = [0, 0], sizes = [8, 8], strides = [1, 1]} : vector<8x32xf32> to vector<8x8xf32>
    %480 = vector.extract_strided_slice %474 {offsets = [0, 0], sizes = [8, 8], strides = [1, 1]} : vector<8x32xf32> to vector<8x8xf32>
    %cst_171 = arith.constant dense<0.000000e+00> : vector<8x8xf32>
    %481 = tpu.matmul %479, %480, %cst_171 {dimension_numbers = #tpu.dot_dimension_numbers<[1], [1], [0], [0], [0, 0, 1, 0], [], []>} : vector<8x8xf32>, vector<8x8xf32>, vector<8x8xf32> -> vector<8x8xf32>
    %cst_172 = arith.constant dense<0xFF800000> : vector<8xf32>
    %482 = vector.multi_reduction <maximumf>, %481, %cst_172 [1] : vector<8x8xf32> to vector<8xf32>
    %483 = vector.shape_cast %482 : vector<8xf32> to vector<8x1xf32>
    %484 = vector.broadcast %483 : vector<8x1xf32> to vector<8x8xf32>
    %485 = arith.subf %481, %484 : vector<8x8xf32>
    %486 = math.exp %485 : vector<8x8xf32>
    %cst_173 = arith.constant dense<0.000000e+00> : vector<8xf32>
    %487 = vector.multi_reduction <add>, %486, %cst_173 [1] : vector<8x8xf32> to vector<8xf32>
    %488 = vector.shape_cast %487 : vector<8xf32> to vector<8x1xf32>
    %489 = tpu.reciprocal %488 {approx = true} : vector<8x1xf32> -> vector<8x1xf32>
    %490 = vector.broadcast %489 : vector<8x1xf32> to vector<8x8xf32>
    %491 = arith.mulf %486, %490 : vector<8x8xf32>
    %492 = vector.extract_strided_slice %475 {offsets = [0, 0], sizes = [8, 8], strides = [1, 1]} : vector<8x32xf32> to vector<8x8xf32>
    %cst_174 = arith.constant dense<0.000000e+00> : vector<8x8xf32>
    %493 = tpu.matmul %491, %492, %cst_174 {dimension_numbers = #tpu.dot_dimension_numbers<[1], [0], [0], [1], [0, 0, 1, 1], [], []>} : vector<8x8xf32>, vector<8x8xf32>, vector<8x8xf32> -> vector<8x8xf32>
    %494 = arith.truncf %493 : vector<8x8xf32> to vector<8x8xbf16>
    %495 = vector.extract_strided_slice %477 {offsets = [0, 0], sizes = [8, 32], strides = [1, 1]} : vector<32x32xbf16> to vector<8x32xbf16>
    %cst_175 = arith.constant dense<0.000000e+00> : vector<8x32xf32>
    %496 = tpu.matmul %494, %495, %cst_175 {dimension_numbers = #tpu.dot_dimension_numbers<[1], [0], [0], [1], [0, 0, 1, 1], [], []>} : vector<8x8xbf16>, vector<8x32xbf16>, vector<8x32xf32> -> vector<8x32xf32>
    %497 = vector.extract_strided_slice %467 {offsets = [0, 8], sizes = [8, 8], strides = [1, 1]} : vector<8x32xf32> to vector<8x8xf32>
    %498 = vector.extract_strided_slice %474 {offsets = [0, 8], sizes = [8, 8], strides = [1, 1]} : vector<8x32xf32> to vector<8x8xf32>
    %cst_176 = arith.constant dense<0.000000e+00> : vector<8x8xf32>
    %499 = tpu.matmul %497, %498, %cst_176 {dimension_numbers = #tpu.dot_dimension_numbers<[1], [1], [0], [0], [0, 0, 1, 0], [], []>} : vector<8x8xf32>, vector<8x8xf32>, vector<8x8xf32> -> vector<8x8xf32>
    %cst_177 = arith.constant dense<0xFF800000> : vector<8xf32>
    %500 = vector.multi_reduction <maximumf>, %499, %cst_177 [1] : vector<8x8xf32> to vector<8xf32>
    %501 = vector.shape_cast %500 : vector<8xf32> to vector<8x1xf32>
    %502 = vector.broadcast %501 : vector<8x1xf32> to vector<8x8xf32>
    %503 = arith.subf %499, %502 : vector<8x8xf32>
    %504 = math.exp %503 : vector<8x8xf32>
    %cst_178 = arith.constant dense<0.000000e+00> : vector<8xf32>
    %505 = vector.multi_reduction <add>, %504, %cst_178 [1] : vector<8x8xf32> to vector<8xf32>
    %506 = vector.shape_cast %505 : vector<8xf32> to vector<8x1xf32>
    %507 = tpu.reciprocal %506 {approx = true} : vector<8x1xf32> -> vector<8x1xf32>
    %508 = vector.broadcast %507 : vector<8x1xf32> to vector<8x8xf32>
    %509 = arith.mulf %504, %508 : vector<8x8xf32>
    %510 = vector.extract_strided_slice %475 {offsets = [0, 8], sizes = [8, 8], strides = [1, 1]} : vector<8x32xf32> to vector<8x8xf32>
    %cst_179 = arith.constant dense<0.000000e+00> : vector<8x8xf32>
    %511 = tpu.matmul %509, %510, %cst_179 {dimension_numbers = #tpu.dot_dimension_numbers<[1], [0], [0], [1], [0, 0, 1, 1], [], []>} : vector<8x8xf32>, vector<8x8xf32>, vector<8x8xf32> -> vector<8x8xf32>
    %512 = arith.truncf %511 : vector<8x8xf32> to vector<8x8xbf16>
    %513 = vector.extract_strided_slice %477 {offsets = [8, 0], sizes = [8, 32], strides = [1, 1]} : vector<32x32xbf16> to vector<8x32xbf16>
    %cst_180 = arith.constant dense<0.000000e+00> : vector<8x32xf32>
    %514 = tpu.matmul %512, %513, %cst_180 {dimension_numbers = #tpu.dot_dimension_numbers<[1], [0], [0], [1], [0, 0, 1, 1], [], []>} : vector<8x8xbf16>, vector<8x32xbf16>, vector<8x32xf32> -> vector<8x32xf32>
    %515 = arith.addf %496, %514 : vector<8x32xf32>
    %516 = vector.extract_strided_slice %467 {offsets = [0, 16], sizes = [8, 8], strides = [1, 1]} : vector<8x32xf32> to vector<8x8xf32>
    %517 = vector.extract_strided_slice %474 {offsets = [0, 16], sizes = [8, 8], strides = [1, 1]} : vector<8x32xf32> to vector<8x8xf32>
    %cst_181 = arith.constant dense<0.000000e+00> : vector<8x8xf32>
    %518 = tpu.matmul %516, %517, %cst_181 {dimension_numbers = #tpu.dot_dimension_numbers<[1], [1], [0], [0], [0, 0, 1, 0], [], []>} : vector<8x8xf32>, vector<8x8xf32>, vector<8x8xf32> -> vector<8x8xf32>
    %cst_182 = arith.constant dense<0xFF800000> : vector<8xf32>
    %519 = vector.multi_reduction <maximumf>, %518, %cst_182 [1] : vector<8x8xf32> to vector<8xf32>
    %520 = vector.shape_cast %519 : vector<8xf32> to vector<8x1xf32>
    %521 = vector.broadcast %520 : vector<8x1xf32> to vector<8x8xf32>
    %522 = arith.subf %518, %521 : vector<8x8xf32>
    %523 = math.exp %522 : vector<8x8xf32>
    %cst_183 = arith.constant dense<0.000000e+00> : vector<8xf32>
    %524 = vector.multi_reduction <add>, %523, %cst_183 [1] : vector<8x8xf32> to vector<8xf32>
    %525 = vector.shape_cast %524 : vector<8xf32> to vector<8x1xf32>
    %526 = tpu.reciprocal %525 {approx = true} : vector<8x1xf32> -> vector<8x1xf32>
    %527 = vector.broadcast %526 : vector<8x1xf32> to vector<8x8xf32>
    %528 = arith.mulf %523, %527 : vector<8x8xf32>
    %529 = vector.extract_strided_slice %475 {offsets = [0, 16], sizes = [8, 8], strides = [1, 1]} : vector<8x32xf32> to vector<8x8xf32>
    %cst_184 = arith.constant dense<0.000000e+00> : vector<8x8xf32>
    %530 = tpu.matmul %528, %529, %cst_184 {dimension_numbers = #tpu.dot_dimension_numbers<[1], [0], [0], [1], [0, 0, 1, 1], [], []>} : vector<8x8xf32>, vector<8x8xf32>, vector<8x8xf32> -> vector<8x8xf32>
    %531 = arith.truncf %530 : vector<8x8xf32> to vector<8x8xbf16>
    %532 = vector.extract_strided_slice %477 {offsets = [16, 0], sizes = [8, 32], strides = [1, 1]} : vector<32x32xbf16> to vector<8x32xbf16>
    %cst_185 = arith.constant dense<0.000000e+00> : vector<8x32xf32>
    %533 = tpu.matmul %531, %532, %cst_185 {dimension_numbers = #tpu.dot_dimension_numbers<[1], [0], [0], [1], [0, 0, 1, 1], [], []>} : vector<8x8xbf16>, vector<8x32xbf16>, vector<8x32xf32> -> vector<8x32xf32>
    %534 = arith.addf %515, %533 : vector<8x32xf32>
    %535 = vector.extract_strided_slice %467 {offsets = [0, 24], sizes = [8, 8], strides = [1, 1]} : vector<8x32xf32> to vector<8x8xf32>
    %536 = vector.extract_strided_slice %474 {offsets = [0, 24], sizes = [8, 8], strides = [1, 1]} : vector<8x32xf32> to vector<8x8xf32>
    %cst_186 = arith.constant dense<0.000000e+00> : vector<8x8xf32>
    %537 = tpu.matmul %535, %536, %cst_186 {dimension_numbers = #tpu.dot_dimension_numbers<[1], [1], [0], [0], [0, 0, 1, 0], [], []>} : vector<8x8xf32>, vector<8x8xf32>, vector<8x8xf32> -> vector<8x8xf32>
    %cst_187 = arith.constant dense<0xFF800000> : vector<8xf32>
    %538 = vector.multi_reduction <maximumf>, %537, %cst_187 [1] : vector<8x8xf32> to vector<8xf32>
    %539 = vector.shape_cast %538 : vector<8xf32> to vector<8x1xf32>
    %540 = vector.broadcast %539 : vector<8x1xf32> to vector<8x8xf32>
    %541 = arith.subf %537, %540 : vector<8x8xf32>
    %542 = math.exp %541 : vector<8x8xf32>
    %cst_188 = arith.constant dense<0.000000e+00> : vector<8xf32>
    %543 = vector.multi_reduction <add>, %542, %cst_188 [1] : vector<8x8xf32> to vector<8xf32>
    %544 = vector.shape_cast %543 : vector<8xf32> to vector<8x1xf32>
    %545 = tpu.reciprocal %544 {approx = true} : vector<8x1xf32> -> vector<8x1xf32>
    %546 = vector.broadcast %545 : vector<8x1xf32> to vector<8x8xf32>
    %547 = arith.mulf %542, %546 : vector<8x8xf32>
    %548 = vector.extract_strided_slice %475 {offsets = [0, 24], sizes = [8, 8], strides = [1, 1]} : vector<8x32xf32> to vector<8x8xf32>
    %cst_189 = arith.constant dense<0.000000e+00> : vector<8x8xf32>
    %549 = tpu.matmul %547, %548, %cst_189 {dimension_numbers = #tpu.dot_dimension_numbers<[1], [0], [0], [1], [0, 0, 1, 1], [], []>} : vector<8x8xf32>, vector<8x8xf32>, vector<8x8xf32> -> vector<8x8xf32>
    %550 = arith.truncf %549 : vector<8x8xf32> to vector<8x8xbf16>
    %551 = vector.extract_strided_slice %477 {offsets = [24, 0], sizes = [8, 32], strides = [1, 1]} : vector<32x32xbf16> to vector<8x32xbf16>
    %cst_190 = arith.constant dense<0.000000e+00> : vector<8x32xf32>
    %552 = tpu.matmul %550, %551, %cst_190 {dimension_numbers = #tpu.dot_dimension_numbers<[1], [0], [0], [1], [0, 0, 1, 1], [], []>} : vector<8x8xbf16>, vector<8x32xbf16>, vector<8x32xf32> -> vector<8x32xf32>
    %553 = arith.addf %534, %552 : vector<8x32xf32>
    %554 = vector.broadcast %478 : vector<1x32xf32> to vector<8x32xf32>
    %555 = arith.addf %553, %554 : vector<8x32xf32>
    %556 = arith.addf %460, %555 : vector<8x32xf32>
    %c23 = arith.constant 23 : index
    %c0_191 = arith.constant 0 : index
    %557 = vector.load %arg11[%c23, %c0_191] : memref<48x128xf32, #tpu.memory_space<vmem>>, vector<1x32xf32>
    %c24 = arith.constant 24 : index
    %c0_192 = arith.constant 0 : index
    %558 = vector.load %arg11[%c24, %c0_192] : memref<48x128xf32, #tpu.memory_space<vmem>>, vector<1x32xf32>
    %cst_193 = arith.constant dense<0.000000e+00> : vector<8xf32>
    %559 = vector.multi_reduction <add>, %556, %cst_193 [1] : vector<8x32xf32> to vector<8xf32>
    %560 = vector.shape_cast %559 : vector<8xf32> to vector<8x1xf32>
    %cst_194 = arith.constant 3.200000e+01 : f32
    %561 = vector.broadcast %cst_194 : f32 to vector<8x1xf32>
    %562 = arith.divf %560, %561 : vector<8x1xf32>
    %563 = vector.broadcast %562 : vector<8x1xf32> to vector<8x32xf32>
    %564 = arith.subf %556, %563 : vector<8x32xf32>
    %565 = arith.mulf %564, %564 : vector<8x32xf32>
    %cst_195 = arith.constant dense<0.000000e+00> : vector<8xf32>
    %566 = vector.multi_reduction <add>, %565, %cst_195 [1] : vector<8x32xf32> to vector<8xf32>
    %567 = vector.shape_cast %566 : vector<8xf32> to vector<8x1xf32>
    %cst_196 = arith.constant 3.200000e+01 : f32
    %568 = vector.broadcast %cst_196 : f32 to vector<8x1xf32>
    %569 = arith.divf %567, %568 : vector<8x1xf32>
    %570 = vector.broadcast %562 : vector<8x1xf32> to vector<8x32xf32>
    %571 = arith.subf %556, %570 : vector<8x32xf32>
    %cst_197 = arith.constant 9.99999974E-6 : f32
    %572 = vector.broadcast %cst_197 : f32 to vector<8x1xf32>
    %573 = arith.addf %569, %572 : vector<8x1xf32>
    %574 = math.rsqrt %573 : vector<8x1xf32>
    %575 = vector.broadcast %574 : vector<8x1xf32> to vector<8x32xf32>
    %576 = arith.mulf %571, %575 : vector<8x32xf32>
    %577 = vector.broadcast %557 : vector<1x32xf32> to vector<8x32xf32>
    %578 = arith.mulf %576, %577 : vector<8x32xf32>
    %579 = vector.broadcast %558 : vector<1x32xf32> to vector<8x32xf32>
    %580 = arith.addf %578, %579 : vector<8x32xf32>
    %581 = arith.truncf %580 : vector<8x32xf32> to vector<8x32xbf16>
    %c2_198 = arith.constant 2 : index
    %c0_199 = arith.constant 0 : index
    %c0_200 = arith.constant 0 : index
    %582 = vector.load %arg8[%c2_198, %c0_199, %c0_200] : memref<4x32x2048xbf16, #tpu.memory_space<vmem>>, vector<1x32x2048xbf16>
    %583 = vector.shape_cast %582 : vector<1x32x2048xbf16> to vector<32x2048xbf16>
    %cst_201 = arith.constant dense<0.000000e+00> : vector<8x2048xf32>
    %584 = tpu.matmul %581, %583, %cst_201 {dimension_numbers = #tpu.dot_dimension_numbers<[1], [0], [0], [1], [0, 0, 1, 1], [], []>} : vector<8x32xbf16>, vector<32x2048xbf16>, vector<8x2048xf32> -> vector<8x2048xf32>
    %c2_202 = arith.constant 2 : index
    %c0_203 = arith.constant 0 : index
    %585 = vector.load %arg12[%c2_202, %c0_203] : memref<8x2048xf32, #tpu.memory_space<vmem>>, vector<1x2048xf32>
    %586 = vector.broadcast %585 : vector<1x2048xf32> to vector<8x2048xf32>
    %587 = arith.addf %584, %586 : vector<8x2048xf32>
    %cst_204 = arith.constant 0.000000e+00 : f32
    %588 = vector.broadcast %cst_204 : f32 to vector<8x2048xf32>
    %589 = arith.maximumf %587, %588 : vector<8x2048xf32>
    %590 = arith.truncf %589 : vector<8x2048xf32> to vector<8x2048xbf16>
    %c2_205 = arith.constant 2 : index
    %c0_206 = arith.constant 0 : index
    %c0_207 = arith.constant 0 : index
    %591 = vector.load %arg9[%c2_205, %c0_206, %c0_207] : memref<4x2048x32xbf16, #tpu.memory_space<vmem>>, vector<1x2048x32xbf16>
    %592 = vector.shape_cast %591 : vector<1x2048x32xbf16> to vector<2048x32xbf16>
    %cst_208 = arith.constant dense<0.000000e+00> : vector<8x32xf32>
    %593 = tpu.matmul %590, %592, %cst_208 {dimension_numbers = #tpu.dot_dimension_numbers<[1], [0], [0], [1], [0, 0, 1, 1], [], []>} : vector<8x2048xbf16>, vector<2048x32xbf16>, vector<8x32xf32> -> vector<8x32xf32>
    %c25 = arith.constant 25 : index
    %c0_209 = arith.constant 0 : index
    %594 = vector.load %arg11[%c25, %c0_209] : memref<48x128xf32, #tpu.memory_space<vmem>>, vector<1x32xf32>
    %595 = vector.broadcast %594 : vector<1x32xf32> to vector<8x32xf32>
    %596 = arith.addf %593, %595 : vector<8x32xf32>
    %597 = arith.addf %580, %596 : vector<8x32xf32>
    %c26 = arith.constant 26 : index
    %c0_210 = arith.constant 0 : index
    %598 = vector.load %arg11[%c26, %c0_210] : memref<48x128xf32, #tpu.memory_space<vmem>>, vector<1x32xf32>
    %c27 = arith.constant 27 : index
    %c0_211 = arith.constant 0 : index
    %599 = vector.load %arg11[%c27, %c0_211] : memref<48x128xf32, #tpu.memory_space<vmem>>, vector<1x32xf32>
    %cst_212 = arith.constant dense<0.000000e+00> : vector<8xf32>
    %600 = vector.multi_reduction <add>, %597, %cst_212 [1] : vector<8x32xf32> to vector<8xf32>
    %601 = vector.shape_cast %600 : vector<8xf32> to vector<8x1xf32>
    %cst_213 = arith.constant 3.200000e+01 : f32
    %602 = vector.broadcast %cst_213 : f32 to vector<8x1xf32>
    %603 = arith.divf %601, %602 : vector<8x1xf32>
    %604 = vector.broadcast %603 : vector<8x1xf32> to vector<8x32xf32>
    %605 = arith.subf %597, %604 : vector<8x32xf32>
    %606 = arith.mulf %605, %605 : vector<8x32xf32>
    %cst_214 = arith.constant dense<0.000000e+00> : vector<8xf32>
    %607 = vector.multi_reduction <add>, %606, %cst_214 [1] : vector<8x32xf32> to vector<8xf32>
    %608 = vector.shape_cast %607 : vector<8xf32> to vector<8x1xf32>
    %cst_215 = arith.constant 3.200000e+01 : f32
    %609 = vector.broadcast %cst_215 : f32 to vector<8x1xf32>
    %610 = arith.divf %608, %609 : vector<8x1xf32>
    %611 = vector.broadcast %603 : vector<8x1xf32> to vector<8x32xf32>
    %612 = arith.subf %597, %611 : vector<8x32xf32>
    %cst_216 = arith.constant 9.99999974E-6 : f32
    %613 = vector.broadcast %cst_216 : f32 to vector<8x1xf32>
    %614 = arith.addf %610, %613 : vector<8x1xf32>
    %615 = math.rsqrt %614 : vector<8x1xf32>
    %616 = vector.broadcast %615 : vector<8x1xf32> to vector<8x32xf32>
    %617 = arith.mulf %612, %616 : vector<8x32xf32>
    %618 = vector.broadcast %598 : vector<1x32xf32> to vector<8x32xf32>
    %619 = arith.mulf %617, %618 : vector<8x32xf32>
    %620 = vector.broadcast %599 : vector<1x32xf32> to vector<8x32xf32>
    %621 = arith.addf %619, %620 : vector<8x32xf32>
    %622 = arith.truncf %621 : vector<8x32xf32> to vector<8x32xbf16>
    %c3_217 = arith.constant 3 : index
    %c0_218 = arith.constant 0 : index
    %c0_219 = arith.constant 0 : index
    %623 = vector.load %arg3[%c3_217, %c0_218, %c0_219] : memref<4x32x96xbf16, #tpu.memory_space<vmem>>, vector<1x32x96xbf16>
    %624 = vector.shape_cast %623 : vector<1x32x96xbf16> to vector<32x96xbf16>
    %cst_220 = arith.constant dense<0.000000e+00> : vector<8x96xf32>
    %625 = tpu.matmul %622, %624, %cst_220 {dimension_numbers = #tpu.dot_dimension_numbers<[1], [0], [0], [1], [0, 0, 1, 1], [], []>} : vector<8x32xbf16>, vector<32x96xbf16>, vector<8x96xf32> -> vector<8x96xf32>
    %c28 = arith.constant 28 : index
    %c0_221 = arith.constant 0 : index
    %626 = vector.load %arg11[%c28, %c0_221] : memref<48x128xf32, #tpu.memory_space<vmem>>, vector<1x96xf32>
    %627 = vector.broadcast %626 : vector<1x96xf32> to vector<8x96xf32>
    %628 = arith.addf %625, %627 : vector<8x96xf32>
    %629 = vector.extract_strided_slice %628 {offsets = [0, 0], sizes = [8, 32], strides = [1, 1]} : vector<8x96xf32> to vector<8x32xf32>
    %630 = vector.extract_strided_slice %628 {offsets = [0, 32], sizes = [8, 32], strides = [1, 1]} : vector<8x96xf32> to vector<8x32xf32>
    %631 = vector.extract_strided_slice %628 {offsets = [0, 64], sizes = [8, 32], strides = [1, 1]} : vector<8x96xf32> to vector<8x32xf32>
    %c3_222 = arith.constant 3 : index
    %c0_223 = arith.constant 0 : index
    %c0_224 = arith.constant 0 : index
    %632 = vector.load %arg4[%c3_222, %c0_223, %c0_224] : memref<4x32x32xbf16, #tpu.memory_space<vmem>>, vector<1x32x32xbf16>
    %633 = vector.shape_cast %632 : vector<1x32x32xbf16> to vector<32x32xbf16>
    %c29 = arith.constant 29 : index
    %c0_225 = arith.constant 0 : index
    %634 = vector.load %arg11[%c29, %c0_225] : memref<48x128xf32, #tpu.memory_space<vmem>>, vector<1x32xf32>
    %635 = vector.extract_strided_slice %629 {offsets = [0, 0], sizes = [8, 8], strides = [1, 1]} : vector<8x32xf32> to vector<8x8xf32>
    %636 = vector.extract_strided_slice %630 {offsets = [0, 0], sizes = [8, 8], strides = [1, 1]} : vector<8x32xf32> to vector<8x8xf32>
    %cst_226 = arith.constant dense<0.000000e+00> : vector<8x8xf32>
    %637 = tpu.matmul %635, %636, %cst_226 {dimension_numbers = #tpu.dot_dimension_numbers<[1], [1], [0], [0], [0, 0, 1, 0], [], []>} : vector<8x8xf32>, vector<8x8xf32>, vector<8x8xf32> -> vector<8x8xf32>
    %cst_227 = arith.constant dense<0xFF800000> : vector<8xf32>
    %638 = vector.multi_reduction <maximumf>, %637, %cst_227 [1] : vector<8x8xf32> to vector<8xf32>
    %639 = vector.shape_cast %638 : vector<8xf32> to vector<8x1xf32>
    %640 = vector.broadcast %639 : vector<8x1xf32> to vector<8x8xf32>
    %641 = arith.subf %637, %640 : vector<8x8xf32>
    %642 = math.exp %641 : vector<8x8xf32>
    %cst_228 = arith.constant dense<0.000000e+00> : vector<8xf32>
    %643 = vector.multi_reduction <add>, %642, %cst_228 [1] : vector<8x8xf32> to vector<8xf32>
    %644 = vector.shape_cast %643 : vector<8xf32> to vector<8x1xf32>
    %645 = tpu.reciprocal %644 {approx = true} : vector<8x1xf32> -> vector<8x1xf32>
    %646 = vector.broadcast %645 : vector<8x1xf32> to vector<8x8xf32>
    %647 = arith.mulf %642, %646 : vector<8x8xf32>
    %648 = vector.extract_strided_slice %631 {offsets = [0, 0], sizes = [8, 8], strides = [1, 1]} : vector<8x32xf32> to vector<8x8xf32>
    %cst_229 = arith.constant dense<0.000000e+00> : vector<8x8xf32>
    %649 = tpu.matmul %647, %648, %cst_229 {dimension_numbers = #tpu.dot_dimension_numbers<[1], [0], [0], [1], [0, 0, 1, 1], [], []>} : vector<8x8xf32>, vector<8x8xf32>, vector<8x8xf32> -> vector<8x8xf32>
    %650 = arith.truncf %649 : vector<8x8xf32> to vector<8x8xbf16>
    %651 = vector.extract_strided_slice %633 {offsets = [0, 0], sizes = [8, 32], strides = [1, 1]} : vector<32x32xbf16> to vector<8x32xbf16>
    %cst_230 = arith.constant dense<0.000000e+00> : vector<8x32xf32>
    %652 = tpu.matmul %650, %651, %cst_230 {dimension_numbers = #tpu.dot_dimension_numbers<[1], [0], [0], [1], [0, 0, 1, 1], [], []>} : vector<8x8xbf16>, vector<8x32xbf16>, vector<8x32xf32> -> vector<8x32xf32>
    %653 = vector.extract_strided_slice %629 {offsets = [0, 8], sizes = [8, 8], strides = [1, 1]} : vector<8x32xf32> to vector<8x8xf32>
    %654 = vector.extract_strided_slice %630 {offsets = [0, 8], sizes = [8, 8], strides = [1, 1]} : vector<8x32xf32> to vector<8x8xf32>
    %cst_231 = arith.constant dense<0.000000e+00> : vector<8x8xf32>
    %655 = tpu.matmul %653, %654, %cst_231 {dimension_numbers = #tpu.dot_dimension_numbers<[1], [1], [0], [0], [0, 0, 1, 0], [], []>} : vector<8x8xf32>, vector<8x8xf32>, vector<8x8xf32> -> vector<8x8xf32>
    %cst_232 = arith.constant dense<0xFF800000> : vector<8xf32>
    %656 = vector.multi_reduction <maximumf>, %655, %cst_232 [1] : vector<8x8xf32> to vector<8xf32>
    %657 = vector.shape_cast %656 : vector<8xf32> to vector<8x1xf32>
    %658 = vector.broadcast %657 : vector<8x1xf32> to vector<8x8xf32>
    %659 = arith.subf %655, %658 : vector<8x8xf32>
    %660 = math.exp %659 : vector<8x8xf32>
    %cst_233 = arith.constant dense<0.000000e+00> : vector<8xf32>
    %661 = vector.multi_reduction <add>, %660, %cst_233 [1] : vector<8x8xf32> to vector<8xf32>
    %662 = vector.shape_cast %661 : vector<8xf32> to vector<8x1xf32>
    %663 = tpu.reciprocal %662 {approx = true} : vector<8x1xf32> -> vector<8x1xf32>
    %664 = vector.broadcast %663 : vector<8x1xf32> to vector<8x8xf32>
    %665 = arith.mulf %660, %664 : vector<8x8xf32>
    %666 = vector.extract_strided_slice %631 {offsets = [0, 8], sizes = [8, 8], strides = [1, 1]} : vector<8x32xf32> to vector<8x8xf32>
    %cst_234 = arith.constant dense<0.000000e+00> : vector<8x8xf32>
    %667 = tpu.matmul %665, %666, %cst_234 {dimension_numbers = #tpu.dot_dimension_numbers<[1], [0], [0], [1], [0, 0, 1, 1], [], []>} : vector<8x8xf32>, vector<8x8xf32>, vector<8x8xf32> -> vector<8x8xf32>
    %668 = arith.truncf %667 : vector<8x8xf32> to vector<8x8xbf16>
    %669 = vector.extract_strided_slice %633 {offsets = [8, 0], sizes = [8, 32], strides = [1, 1]} : vector<32x32xbf16> to vector<8x32xbf16>
    %cst_235 = arith.constant dense<0.000000e+00> : vector<8x32xf32>
    %670 = tpu.matmul %668, %669, %cst_235 {dimension_numbers = #tpu.dot_dimension_numbers<[1], [0], [0], [1], [0, 0, 1, 1], [], []>} : vector<8x8xbf16>, vector<8x32xbf16>, vector<8x32xf32> -> vector<8x32xf32>
    %671 = arith.addf %652, %670 : vector<8x32xf32>
    %672 = vector.extract_strided_slice %629 {offsets = [0, 16], sizes = [8, 8], strides = [1, 1]} : vector<8x32xf32> to vector<8x8xf32>
    %673 = vector.extract_strided_slice %630 {offsets = [0, 16], sizes = [8, 8], strides = [1, 1]} : vector<8x32xf32> to vector<8x8xf32>
    %cst_236 = arith.constant dense<0.000000e+00> : vector<8x8xf32>
    %674 = tpu.matmul %672, %673, %cst_236 {dimension_numbers = #tpu.dot_dimension_numbers<[1], [1], [0], [0], [0, 0, 1, 0], [], []>} : vector<8x8xf32>, vector<8x8xf32>, vector<8x8xf32> -> vector<8x8xf32>
    %cst_237 = arith.constant dense<0xFF800000> : vector<8xf32>
    %675 = vector.multi_reduction <maximumf>, %674, %cst_237 [1] : vector<8x8xf32> to vector<8xf32>
    %676 = vector.shape_cast %675 : vector<8xf32> to vector<8x1xf32>
    %677 = vector.broadcast %676 : vector<8x1xf32> to vector<8x8xf32>
    %678 = arith.subf %674, %677 : vector<8x8xf32>
    %679 = math.exp %678 : vector<8x8xf32>
    %cst_238 = arith.constant dense<0.000000e+00> : vector<8xf32>
    %680 = vector.multi_reduction <add>, %679, %cst_238 [1] : vector<8x8xf32> to vector<8xf32>
    %681 = vector.shape_cast %680 : vector<8xf32> to vector<8x1xf32>
    %682 = tpu.reciprocal %681 {approx = true} : vector<8x1xf32> -> vector<8x1xf32>
    %683 = vector.broadcast %682 : vector<8x1xf32> to vector<8x8xf32>
    %684 = arith.mulf %679, %683 : vector<8x8xf32>
    %685 = vector.extract_strided_slice %631 {offsets = [0, 16], sizes = [8, 8], strides = [1, 1]} : vector<8x32xf32> to vector<8x8xf32>
    %cst_239 = arith.constant dense<0.000000e+00> : vector<8x8xf32>
    %686 = tpu.matmul %684, %685, %cst_239 {dimension_numbers = #tpu.dot_dimension_numbers<[1], [0], [0], [1], [0, 0, 1, 1], [], []>} : vector<8x8xf32>, vector<8x8xf32>, vector<8x8xf32> -> vector<8x8xf32>
    %687 = arith.truncf %686 : vector<8x8xf32> to vector<8x8xbf16>
    %688 = vector.extract_strided_slice %633 {offsets = [16, 0], sizes = [8, 32], strides = [1, 1]} : vector<32x32xbf16> to vector<8x32xbf16>
    %cst_240 = arith.constant dense<0.000000e+00> : vector<8x32xf32>
    %689 = tpu.matmul %687, %688, %cst_240 {dimension_numbers = #tpu.dot_dimension_numbers<[1], [0], [0], [1], [0, 0, 1, 1], [], []>} : vector<8x8xbf16>, vector<8x32xbf16>, vector<8x32xf32> -> vector<8x32xf32>
    %690 = arith.addf %671, %689 : vector<8x32xf32>
    %691 = vector.extract_strided_slice %629 {offsets = [0, 24], sizes = [8, 8], strides = [1, 1]} : vector<8x32xf32> to vector<8x8xf32>
    %692 = vector.extract_strided_slice %630 {offsets = [0, 24], sizes = [8, 8], strides = [1, 1]} : vector<8x32xf32> to vector<8x8xf32>
    %cst_241 = arith.constant dense<0.000000e+00> : vector<8x8xf32>
    %693 = tpu.matmul %691, %692, %cst_241 {dimension_numbers = #tpu.dot_dimension_numbers<[1], [1], [0], [0], [0, 0, 1, 0], [], []>} : vector<8x8xf32>, vector<8x8xf32>, vector<8x8xf32> -> vector<8x8xf32>
    %cst_242 = arith.constant dense<0xFF800000> : vector<8xf32>
    %694 = vector.multi_reduction <maximumf>, %693, %cst_242 [1] : vector<8x8xf32> to vector<8xf32>
    %695 = vector.shape_cast %694 : vector<8xf32> to vector<8x1xf32>
    %696 = vector.broadcast %695 : vector<8x1xf32> to vector<8x8xf32>
    %697 = arith.subf %693, %696 : vector<8x8xf32>
    %698 = math.exp %697 : vector<8x8xf32>
    %cst_243 = arith.constant dense<0.000000e+00> : vector<8xf32>
    %699 = vector.multi_reduction <add>, %698, %cst_243 [1] : vector<8x8xf32> to vector<8xf32>
    %700 = vector.shape_cast %699 : vector<8xf32> to vector<8x1xf32>
    %701 = tpu.reciprocal %700 {approx = true} : vector<8x1xf32> -> vector<8x1xf32>
    %702 = vector.broadcast %701 : vector<8x1xf32> to vector<8x8xf32>
    %703 = arith.mulf %698, %702 : vector<8x8xf32>
    %704 = vector.extract_strided_slice %631 {offsets = [0, 24], sizes = [8, 8], strides = [1, 1]} : vector<8x32xf32> to vector<8x8xf32>
    %cst_244 = arith.constant dense<0.000000e+00> : vector<8x8xf32>
    %705 = tpu.matmul %703, %704, %cst_244 {dimension_numbers = #tpu.dot_dimension_numbers<[1], [0], [0], [1], [0, 0, 1, 1], [], []>} : vector<8x8xf32>, vector<8x8xf32>, vector<8x8xf32> -> vector<8x8xf32>
    %706 = arith.truncf %705 : vector<8x8xf32> to vector<8x8xbf16>
    %707 = vector.extract_strided_slice %633 {offsets = [24, 0], sizes = [8, 32], strides = [1, 1]} : vector<32x32xbf16> to vector<8x32xbf16>
    %cst_245 = arith.constant dense<0.000000e+00> : vector<8x32xf32>
    %708 = tpu.matmul %706, %707, %cst_245 {dimension_numbers = #tpu.dot_dimension_numbers<[1], [0], [0], [1], [0, 0, 1, 1], [], []>} : vector<8x8xbf16>, vector<8x32xbf16>, vector<8x32xf32> -> vector<8x32xf32>
    %709 = arith.addf %690, %708 : vector<8x32xf32>
    %710 = vector.broadcast %634 : vector<1x32xf32> to vector<8x32xf32>
    %711 = arith.addf %709, %710 : vector<8x32xf32>
    %712 = arith.addf %621, %711 : vector<8x32xf32>
    %c30 = arith.constant 30 : index
    %c0_246 = arith.constant 0 : index
    %713 = vector.load %arg11[%c30, %c0_246] : memref<48x128xf32, #tpu.memory_space<vmem>>, vector<1x32xf32>
    %c31 = arith.constant 31 : index
    %c0_247 = arith.constant 0 : index
    %714 = vector.load %arg11[%c31, %c0_247] : memref<48x128xf32, #tpu.memory_space<vmem>>, vector<1x32xf32>
    %cst_248 = arith.constant dense<0.000000e+00> : vector<8xf32>
    %715 = vector.multi_reduction <add>, %712, %cst_248 [1] : vector<8x32xf32> to vector<8xf32>
    %716 = vector.shape_cast %715 : vector<8xf32> to vector<8x1xf32>
    %cst_249 = arith.constant 3.200000e+01 : f32
    %717 = vector.broadcast %cst_249 : f32 to vector<8x1xf32>
    %718 = arith.divf %716, %717 : vector<8x1xf32>
    %719 = vector.broadcast %718 : vector<8x1xf32> to vector<8x32xf32>
    %720 = arith.subf %712, %719 : vector<8x32xf32>
    %721 = arith.mulf %720, %720 : vector<8x32xf32>
    %cst_250 = arith.constant dense<0.000000e+00> : vector<8xf32>
    %722 = vector.multi_reduction <add>, %721, %cst_250 [1] : vector<8x32xf32> to vector<8xf32>
    %723 = vector.shape_cast %722 : vector<8xf32> to vector<8x1xf32>
    %cst_251 = arith.constant 3.200000e+01 : f32
    %724 = vector.broadcast %cst_251 : f32 to vector<8x1xf32>
    %725 = arith.divf %723, %724 : vector<8x1xf32>
    %726 = vector.broadcast %718 : vector<8x1xf32> to vector<8x32xf32>
    %727 = arith.subf %712, %726 : vector<8x32xf32>
    %cst_252 = arith.constant 9.99999974E-6 : f32
    %728 = vector.broadcast %cst_252 : f32 to vector<8x1xf32>
    %729 = arith.addf %725, %728 : vector<8x1xf32>
    %730 = math.rsqrt %729 : vector<8x1xf32>
    %731 = vector.broadcast %730 : vector<8x1xf32> to vector<8x32xf32>
    %732 = arith.mulf %727, %731 : vector<8x32xf32>
    %733 = vector.broadcast %713 : vector<1x32xf32> to vector<8x32xf32>
    %734 = arith.mulf %732, %733 : vector<8x32xf32>
    %735 = vector.broadcast %714 : vector<1x32xf32> to vector<8x32xf32>
    %736 = arith.addf %734, %735 : vector<8x32xf32>
    %737 = arith.truncf %736 : vector<8x32xf32> to vector<8x32xbf16>
    %c1_253 = arith.constant 1 : index
    %c0_254 = arith.constant 0 : index
    %c0_255 = arith.constant 0 : index
    %738 = vector.load %arg5[%c1_253, %c0_254, %c0_255] : memref<2x32x32xbf16, #tpu.memory_space<vmem>>, vector<1x32x32xbf16>
    %739 = vector.shape_cast %738 : vector<1x32x32xbf16> to vector<32x32xbf16>
    %cst_256 = arith.constant dense<0.000000e+00> : vector<8x32xf32>
    %740 = tpu.matmul %737, %739, %cst_256 {dimension_numbers = #tpu.dot_dimension_numbers<[1], [0], [0], [1], [0, 0, 1, 1], [], []>} : vector<8x32xbf16>, vector<32x32xbf16>, vector<8x32xf32> -> vector<8x32xf32>
    %c32 = arith.constant 32 : index
    %c0_257 = arith.constant 0 : index
    %741 = vector.load %arg11[%c32, %c0_257] : memref<48x128xf32, #tpu.memory_space<vmem>>, vector<1x32xf32>
    %742 = vector.broadcast %741 : vector<1x32xf32> to vector<8x32xf32>
    %743 = arith.addf %740, %742 : vector<8x32xf32>
    %c1_258 = arith.constant 1 : index
    %c0_259 = arith.constant 0 : index
    %c0_260 = arith.constant 0 : index
    %744 = vector.load %arg6[%c1_258, %c0_259, %c0_260] : memref<2x32x64xbf16, #tpu.memory_space<vmem>>, vector<1x32x64xbf16>
    %745 = vector.shape_cast %744 : vector<1x32x64xbf16> to vector<32x64xbf16>
    %cst_261 = arith.constant dense<0.000000e+00> : vector<8x64xf32>
    %746 = tpu.matmul %345, %745, %cst_261 {dimension_numbers = #tpu.dot_dimension_numbers<[1], [0], [0], [1], [0, 0, 1, 1], [], []>} : vector<8x32xbf16>, vector<32x64xbf16>, vector<8x64xf32> -> vector<8x64xf32>
    %c33 = arith.constant 33 : index
    %c0_262 = arith.constant 0 : index
    %747 = vector.load %arg11[%c33, %c0_262] : memref<48x128xf32, #tpu.memory_space<vmem>>, vector<1x64xf32>
    %748 = vector.broadcast %747 : vector<1x64xf32> to vector<8x64xf32>
    %749 = arith.addf %746, %748 : vector<8x64xf32>
    %750 = vector.extract_strided_slice %749 {offsets = [0, 0], sizes = [8, 32], strides = [1, 1]} : vector<8x64xf32> to vector<8x32xf32>
    %751 = vector.extract_strided_slice %749 {offsets = [0, 32], sizes = [8, 32], strides = [1, 1]} : vector<8x64xf32> to vector<8x32xf32>
    %c1_263 = arith.constant 1 : index
    %c0_264 = arith.constant 0 : index
    %c0_265 = arith.constant 0 : index
    %752 = vector.load %arg7[%c1_263, %c0_264, %c0_265] : memref<2x32x32xbf16, #tpu.memory_space<vmem>>, vector<1x32x32xbf16>
    %753 = vector.shape_cast %752 : vector<1x32x32xbf16> to vector<32x32xbf16>
    %c34 = arith.constant 34 : index
    %c0_266 = arith.constant 0 : index
    %754 = vector.load %arg11[%c34, %c0_266] : memref<48x128xf32, #tpu.memory_space<vmem>>, vector<1x32xf32>
    %755 = vector.extract_strided_slice %743 {offsets = [0, 0], sizes = [8, 8], strides = [1, 1]} : vector<8x32xf32> to vector<8x8xf32>
    %756 = vector.extract_strided_slice %750 {offsets = [0, 0], sizes = [8, 8], strides = [1, 1]} : vector<8x32xf32> to vector<8x8xf32>
    %cst_267 = arith.constant dense<0.000000e+00> : vector<8x8xf32>
    %757 = tpu.matmul %755, %756, %cst_267 {dimension_numbers = #tpu.dot_dimension_numbers<[1], [1], [0], [0], [0, 0, 1, 0], [], []>} : vector<8x8xf32>, vector<8x8xf32>, vector<8x8xf32> -> vector<8x8xf32>
    %cst_268 = arith.constant dense<0xFF800000> : vector<8xf32>
    %758 = vector.multi_reduction <maximumf>, %757, %cst_268 [1] : vector<8x8xf32> to vector<8xf32>
    %759 = vector.shape_cast %758 : vector<8xf32> to vector<8x1xf32>
    %760 = vector.broadcast %759 : vector<8x1xf32> to vector<8x8xf32>
    %761 = arith.subf %757, %760 : vector<8x8xf32>
    %762 = math.exp %761 : vector<8x8xf32>
    %cst_269 = arith.constant dense<0.000000e+00> : vector<8xf32>
    %763 = vector.multi_reduction <add>, %762, %cst_269 [1] : vector<8x8xf32> to vector<8xf32>
    %764 = vector.shape_cast %763 : vector<8xf32> to vector<8x1xf32>
    %765 = tpu.reciprocal %764 {approx = true} : vector<8x1xf32> -> vector<8x1xf32>
    %766 = vector.broadcast %765 : vector<8x1xf32> to vector<8x8xf32>
    %767 = arith.mulf %762, %766 : vector<8x8xf32>
    %768 = vector.extract_strided_slice %751 {offsets = [0, 0], sizes = [8, 8], strides = [1, 1]} : vector<8x32xf32> to vector<8x8xf32>
    %cst_270 = arith.constant dense<0.000000e+00> : vector<8x8xf32>
    %769 = tpu.matmul %767, %768, %cst_270 {dimension_numbers = #tpu.dot_dimension_numbers<[1], [0], [0], [1], [0, 0, 1, 1], [], []>} : vector<8x8xf32>, vector<8x8xf32>, vector<8x8xf32> -> vector<8x8xf32>
    %770 = arith.truncf %769 : vector<8x8xf32> to vector<8x8xbf16>
    %771 = vector.extract_strided_slice %753 {offsets = [0, 0], sizes = [8, 32], strides = [1, 1]} : vector<32x32xbf16> to vector<8x32xbf16>
    %cst_271 = arith.constant dense<0.000000e+00> : vector<8x32xf32>
    %772 = tpu.matmul %770, %771, %cst_271 {dimension_numbers = #tpu.dot_dimension_numbers<[1], [0], [0], [1], [0, 0, 1, 1], [], []>} : vector<8x8xbf16>, vector<8x32xbf16>, vector<8x32xf32> -> vector<8x32xf32>
    %773 = vector.extract_strided_slice %743 {offsets = [0, 8], sizes = [8, 8], strides = [1, 1]} : vector<8x32xf32> to vector<8x8xf32>
    %774 = vector.extract_strided_slice %750 {offsets = [0, 8], sizes = [8, 8], strides = [1, 1]} : vector<8x32xf32> to vector<8x8xf32>
    %cst_272 = arith.constant dense<0.000000e+00> : vector<8x8xf32>
    %775 = tpu.matmul %773, %774, %cst_272 {dimension_numbers = #tpu.dot_dimension_numbers<[1], [1], [0], [0], [0, 0, 1, 0], [], []>} : vector<8x8xf32>, vector<8x8xf32>, vector<8x8xf32> -> vector<8x8xf32>
    %cst_273 = arith.constant dense<0xFF800000> : vector<8xf32>
    %776 = vector.multi_reduction <maximumf>, %775, %cst_273 [1] : vector<8x8xf32> to vector<8xf32>
    %777 = vector.shape_cast %776 : vector<8xf32> to vector<8x1xf32>
    %778 = vector.broadcast %777 : vector<8x1xf32> to vector<8x8xf32>
    %779 = arith.subf %775, %778 : vector<8x8xf32>
    %780 = math.exp %779 : vector<8x8xf32>
    %cst_274 = arith.constant dense<0.000000e+00> : vector<8xf32>
    %781 = vector.multi_reduction <add>, %780, %cst_274 [1] : vector<8x8xf32> to vector<8xf32>
    %782 = vector.shape_cast %781 : vector<8xf32> to vector<8x1xf32>
    %783 = tpu.reciprocal %782 {approx = true} : vector<8x1xf32> -> vector<8x1xf32>
    %784 = vector.broadcast %783 : vector<8x1xf32> to vector<8x8xf32>
    %785 = arith.mulf %780, %784 : vector<8x8xf32>
    %786 = vector.extract_strided_slice %751 {offsets = [0, 8], sizes = [8, 8], strides = [1, 1]} : vector<8x32xf32> to vector<8x8xf32>
    %cst_275 = arith.constant dense<0.000000e+00> : vector<8x8xf32>
    %787 = tpu.matmul %785, %786, %cst_275 {dimension_numbers = #tpu.dot_dimension_numbers<[1], [0], [0], [1], [0, 0, 1, 1], [], []>} : vector<8x8xf32>, vector<8x8xf32>, vector<8x8xf32> -> vector<8x8xf32>
    %788 = arith.truncf %787 : vector<8x8xf32> to vector<8x8xbf16>
    %789 = vector.extract_strided_slice %753 {offsets = [8, 0], sizes = [8, 32], strides = [1, 1]} : vector<32x32xbf16> to vector<8x32xbf16>
    %cst_276 = arith.constant dense<0.000000e+00> : vector<8x32xf32>
    %790 = tpu.matmul %788, %789, %cst_276 {dimension_numbers = #tpu.dot_dimension_numbers<[1], [0], [0], [1], [0, 0, 1, 1], [], []>} : vector<8x8xbf16>, vector<8x32xbf16>, vector<8x32xf32> -> vector<8x32xf32>
    %791 = arith.addf %772, %790 : vector<8x32xf32>
    %792 = vector.extract_strided_slice %743 {offsets = [0, 16], sizes = [8, 8], strides = [1, 1]} : vector<8x32xf32> to vector<8x8xf32>
    %793 = vector.extract_strided_slice %750 {offsets = [0, 16], sizes = [8, 8], strides = [1, 1]} : vector<8x32xf32> to vector<8x8xf32>
    %cst_277 = arith.constant dense<0.000000e+00> : vector<8x8xf32>
    %794 = tpu.matmul %792, %793, %cst_277 {dimension_numbers = #tpu.dot_dimension_numbers<[1], [1], [0], [0], [0, 0, 1, 0], [], []>} : vector<8x8xf32>, vector<8x8xf32>, vector<8x8xf32> -> vector<8x8xf32>
    %cst_278 = arith.constant dense<0xFF800000> : vector<8xf32>
    %795 = vector.multi_reduction <maximumf>, %794, %cst_278 [1] : vector<8x8xf32> to vector<8xf32>
    %796 = vector.shape_cast %795 : vector<8xf32> to vector<8x1xf32>
    %797 = vector.broadcast %796 : vector<8x1xf32> to vector<8x8xf32>
    %798 = arith.subf %794, %797 : vector<8x8xf32>
    %799 = math.exp %798 : vector<8x8xf32>
    %cst_279 = arith.constant dense<0.000000e+00> : vector<8xf32>
    %800 = vector.multi_reduction <add>, %799, %cst_279 [1] : vector<8x8xf32> to vector<8xf32>
    %801 = vector.shape_cast %800 : vector<8xf32> to vector<8x1xf32>
    %802 = tpu.reciprocal %801 {approx = true} : vector<8x1xf32> -> vector<8x1xf32>
    %803 = vector.broadcast %802 : vector<8x1xf32> to vector<8x8xf32>
    %804 = arith.mulf %799, %803 : vector<8x8xf32>
    %805 = vector.extract_strided_slice %751 {offsets = [0, 16], sizes = [8, 8], strides = [1, 1]} : vector<8x32xf32> to vector<8x8xf32>
    %cst_280 = arith.constant dense<0.000000e+00> : vector<8x8xf32>
    %806 = tpu.matmul %804, %805, %cst_280 {dimension_numbers = #tpu.dot_dimension_numbers<[1], [0], [0], [1], [0, 0, 1, 1], [], []>} : vector<8x8xf32>, vector<8x8xf32>, vector<8x8xf32> -> vector<8x8xf32>
    %807 = arith.truncf %806 : vector<8x8xf32> to vector<8x8xbf16>
    %808 = vector.extract_strided_slice %753 {offsets = [16, 0], sizes = [8, 32], strides = [1, 1]} : vector<32x32xbf16> to vector<8x32xbf16>
    %cst_281 = arith.constant dense<0.000000e+00> : vector<8x32xf32>
    %809 = tpu.matmul %807, %808, %cst_281 {dimension_numbers = #tpu.dot_dimension_numbers<[1], [0], [0], [1], [0, 0, 1, 1], [], []>} : vector<8x8xbf16>, vector<8x32xbf16>, vector<8x32xf32> -> vector<8x32xf32>
    %810 = arith.addf %791, %809 : vector<8x32xf32>
    %811 = vector.extract_strided_slice %743 {offsets = [0, 24], sizes = [8, 8], strides = [1, 1]} : vector<8x32xf32> to vector<8x8xf32>
    %812 = vector.extract_strided_slice %750 {offsets = [0, 24], sizes = [8, 8], strides = [1, 1]} : vector<8x32xf32> to vector<8x8xf32>
    %cst_282 = arith.constant dense<0.000000e+00> : vector<8x8xf32>
    %813 = tpu.matmul %811, %812, %cst_282 {dimension_numbers = #tpu.dot_dimension_numbers<[1], [1], [0], [0], [0, 0, 1, 0], [], []>} : vector<8x8xf32>, vector<8x8xf32>, vector<8x8xf32> -> vector<8x8xf32>
    %cst_283 = arith.constant dense<0xFF800000> : vector<8xf32>
    %814 = vector.multi_reduction <maximumf>, %813, %cst_283 [1] : vector<8x8xf32> to vector<8xf32>
    %815 = vector.shape_cast %814 : vector<8xf32> to vector<8x1xf32>
    %816 = vector.broadcast %815 : vector<8x1xf32> to vector<8x8xf32>
    %817 = arith.subf %813, %816 : vector<8x8xf32>
    %818 = math.exp %817 : vector<8x8xf32>
    %cst_284 = arith.constant dense<0.000000e+00> : vector<8xf32>
    %819 = vector.multi_reduction <add>, %818, %cst_284 [1] : vector<8x8xf32> to vector<8xf32>
    %820 = vector.shape_cast %819 : vector<8xf32> to vector<8x1xf32>
    %821 = tpu.reciprocal %820 {approx = true} : vector<8x1xf32> -> vector<8x1xf32>
    %822 = vector.broadcast %821 : vector<8x1xf32> to vector<8x8xf32>
    %823 = arith.mulf %818, %822 : vector<8x8xf32>
    %824 = vector.extract_strided_slice %751 {offsets = [0, 24], sizes = [8, 8], strides = [1, 1]} : vector<8x32xf32> to vector<8x8xf32>
    %cst_285 = arith.constant dense<0.000000e+00> : vector<8x8xf32>
    %825 = tpu.matmul %823, %824, %cst_285 {dimension_numbers = #tpu.dot_dimension_numbers<[1], [0], [0], [1], [0, 0, 1, 1], [], []>} : vector<8x8xf32>, vector<8x8xf32>, vector<8x8xf32> -> vector<8x8xf32>
    %826 = arith.truncf %825 : vector<8x8xf32> to vector<8x8xbf16>
    %827 = vector.extract_strided_slice %753 {offsets = [24, 0], sizes = [8, 32], strides = [1, 1]} : vector<32x32xbf16> to vector<8x32xbf16>
    %cst_286 = arith.constant dense<0.000000e+00> : vector<8x32xf32>
    %828 = tpu.matmul %826, %827, %cst_286 {dimension_numbers = #tpu.dot_dimension_numbers<[1], [0], [0], [1], [0, 0, 1, 1], [], []>} : vector<8x8xbf16>, vector<8x32xbf16>, vector<8x32xf32> -> vector<8x32xf32>
    %829 = arith.addf %810, %828 : vector<8x32xf32>
    %830 = vector.broadcast %754 : vector<1x32xf32> to vector<8x32xf32>
    %831 = arith.addf %829, %830 : vector<8x32xf32>
    %832 = arith.addf %736, %831 : vector<8x32xf32>
    %c35 = arith.constant 35 : index
    %c0_287 = arith.constant 0 : index
    %833 = vector.load %arg11[%c35, %c0_287] : memref<48x128xf32, #tpu.memory_space<vmem>>, vector<1x32xf32>
    %c36 = arith.constant 36 : index
    %c0_288 = arith.constant 0 : index
    %834 = vector.load %arg11[%c36, %c0_288] : memref<48x128xf32, #tpu.memory_space<vmem>>, vector<1x32xf32>
    %cst_289 = arith.constant dense<0.000000e+00> : vector<8xf32>
    %835 = vector.multi_reduction <add>, %832, %cst_289 [1] : vector<8x32xf32> to vector<8xf32>
    %836 = vector.shape_cast %835 : vector<8xf32> to vector<8x1xf32>
    %cst_290 = arith.constant 3.200000e+01 : f32
    %837 = vector.broadcast %cst_290 : f32 to vector<8x1xf32>
    %838 = arith.divf %836, %837 : vector<8x1xf32>
    %839 = vector.broadcast %838 : vector<8x1xf32> to vector<8x32xf32>
    %840 = arith.subf %832, %839 : vector<8x32xf32>
    %841 = arith.mulf %840, %840 : vector<8x32xf32>
    %cst_291 = arith.constant dense<0.000000e+00> : vector<8xf32>
    %842 = vector.multi_reduction <add>, %841, %cst_291 [1] : vector<8x32xf32> to vector<8xf32>
    %843 = vector.shape_cast %842 : vector<8xf32> to vector<8x1xf32>
    %cst_292 = arith.constant 3.200000e+01 : f32
    %844 = vector.broadcast %cst_292 : f32 to vector<8x1xf32>
    %845 = arith.divf %843, %844 : vector<8x1xf32>
    %846 = vector.broadcast %838 : vector<8x1xf32> to vector<8x32xf32>
    %847 = arith.subf %832, %846 : vector<8x32xf32>
    %cst_293 = arith.constant 9.99999974E-6 : f32
    %848 = vector.broadcast %cst_293 : f32 to vector<8x1xf32>
    %849 = arith.addf %845, %848 : vector<8x1xf32>
    %850 = math.rsqrt %849 : vector<8x1xf32>
    %851 = vector.broadcast %850 : vector<8x1xf32> to vector<8x32xf32>
    %852 = arith.mulf %847, %851 : vector<8x32xf32>
    %853 = vector.broadcast %833 : vector<1x32xf32> to vector<8x32xf32>
    %854 = arith.mulf %852, %853 : vector<8x32xf32>
    %855 = vector.broadcast %834 : vector<1x32xf32> to vector<8x32xf32>
    %856 = arith.addf %854, %855 : vector<8x32xf32>
    %857 = arith.truncf %856 : vector<8x32xf32> to vector<8x32xbf16>
    %c3_294 = arith.constant 3 : index
    %c0_295 = arith.constant 0 : index
    %c0_296 = arith.constant 0 : index
    %858 = vector.load %arg8[%c3_294, %c0_295, %c0_296] : memref<4x32x2048xbf16, #tpu.memory_space<vmem>>, vector<1x32x2048xbf16>
    %859 = vector.shape_cast %858 : vector<1x32x2048xbf16> to vector<32x2048xbf16>
    %cst_297 = arith.constant dense<0.000000e+00> : vector<8x2048xf32>
    %860 = tpu.matmul %857, %859, %cst_297 {dimension_numbers = #tpu.dot_dimension_numbers<[1], [0], [0], [1], [0, 0, 1, 1], [], []>} : vector<8x32xbf16>, vector<32x2048xbf16>, vector<8x2048xf32> -> vector<8x2048xf32>
    %c3_298 = arith.constant 3 : index
    %c0_299 = arith.constant 0 : index
    %861 = vector.load %arg12[%c3_298, %c0_299] : memref<8x2048xf32, #tpu.memory_space<vmem>>, vector<1x2048xf32>
    %862 = vector.broadcast %861 : vector<1x2048xf32> to vector<8x2048xf32>
    %863 = arith.addf %860, %862 : vector<8x2048xf32>
    %cst_300 = arith.constant 0.000000e+00 : f32
    %864 = vector.broadcast %cst_300 : f32 to vector<8x2048xf32>
    %865 = arith.maximumf %863, %864 : vector<8x2048xf32>
    %866 = arith.truncf %865 : vector<8x2048xf32> to vector<8x2048xbf16>
    %c3_301 = arith.constant 3 : index
    %c0_302 = arith.constant 0 : index
    %c0_303 = arith.constant 0 : index
    %867 = vector.load %arg9[%c3_301, %c0_302, %c0_303] : memref<4x2048x32xbf16, #tpu.memory_space<vmem>>, vector<1x2048x32xbf16>
    %868 = vector.shape_cast %867 : vector<1x2048x32xbf16> to vector<2048x32xbf16>
    %cst_304 = arith.constant dense<0.000000e+00> : vector<8x32xf32>
    %869 = tpu.matmul %866, %868, %cst_304 {dimension_numbers = #tpu.dot_dimension_numbers<[1], [0], [0], [1], [0, 0, 1, 1], [], []>} : vector<8x2048xbf16>, vector<2048x32xbf16>, vector<8x32xf32> -> vector<8x32xf32>
    %c37 = arith.constant 37 : index
    %c0_305 = arith.constant 0 : index
    %870 = vector.load %arg11[%c37, %c0_305] : memref<48x128xf32, #tpu.memory_space<vmem>>, vector<1x32xf32>
    %871 = vector.broadcast %870 : vector<1x32xf32> to vector<8x32xf32>
    %872 = arith.addf %869, %871 : vector<8x32xf32>
    %873 = arith.addf %856, %872 : vector<8x32xf32>
    %c38 = arith.constant 38 : index
    %c0_306 = arith.constant 0 : index
    %874 = vector.load %arg11[%c38, %c0_306] : memref<48x128xf32, #tpu.memory_space<vmem>>, vector<1x32xf32>
    %c39 = arith.constant 39 : index
    %c0_307 = arith.constant 0 : index
    %875 = vector.load %arg11[%c39, %c0_307] : memref<48x128xf32, #tpu.memory_space<vmem>>, vector<1x32xf32>
    %cst_308 = arith.constant dense<0.000000e+00> : vector<8xf32>
    %876 = vector.multi_reduction <add>, %873, %cst_308 [1] : vector<8x32xf32> to vector<8xf32>
    %877 = vector.shape_cast %876 : vector<8xf32> to vector<8x1xf32>
    %cst_309 = arith.constant 3.200000e+01 : f32
    %878 = vector.broadcast %cst_309 : f32 to vector<8x1xf32>
    %879 = arith.divf %877, %878 : vector<8x1xf32>
    %880 = vector.broadcast %879 : vector<8x1xf32> to vector<8x32xf32>
    %881 = arith.subf %873, %880 : vector<8x32xf32>
    %882 = arith.mulf %881, %881 : vector<8x32xf32>
    %cst_310 = arith.constant dense<0.000000e+00> : vector<8xf32>
    %883 = vector.multi_reduction <add>, %882, %cst_310 [1] : vector<8x32xf32> to vector<8xf32>
    %884 = vector.shape_cast %883 : vector<8xf32> to vector<8x1xf32>
    %cst_311 = arith.constant 3.200000e+01 : f32
    %885 = vector.broadcast %cst_311 : f32 to vector<8x1xf32>
    %886 = arith.divf %884, %885 : vector<8x1xf32>
    %887 = vector.broadcast %879 : vector<8x1xf32> to vector<8x32xf32>
    %888 = arith.subf %873, %887 : vector<8x32xf32>
    %cst_312 = arith.constant 9.99999974E-6 : f32
    %889 = vector.broadcast %cst_312 : f32 to vector<8x1xf32>
    %890 = arith.addf %886, %889 : vector<8x1xf32>
    %891 = math.rsqrt %890 : vector<8x1xf32>
    %892 = vector.broadcast %891 : vector<8x1xf32> to vector<8x32xf32>
    %893 = arith.mulf %888, %892 : vector<8x32xf32>
    %894 = vector.broadcast %874 : vector<1x32xf32> to vector<8x32xf32>
    %895 = arith.mulf %893, %894 : vector<8x32xf32>
    %896 = vector.broadcast %875 : vector<1x32xf32> to vector<8x32xf32>
    %897 = arith.addf %895, %896 : vector<8x32xf32>
    %c40 = arith.constant 40 : index
    %c0_313 = arith.constant 0 : index
    %898 = vector.load %arg11[%c40, %c0_313] : memref<48x128xf32, #tpu.memory_space<vmem>>, vector<1x32xf32>
    %c41 = arith.constant 41 : index
    %c0_314 = arith.constant 0 : index
    %899 = vector.load %arg11[%c41, %c0_314] : memref<48x128xf32, #tpu.memory_space<vmem>>, vector<1x32xf32>
    %cst_315 = arith.constant dense<0.000000e+00> : vector<8xf32>
    %900 = vector.multi_reduction <add>, %897, %cst_315 [1] : vector<8x32xf32> to vector<8xf32>
    %901 = vector.shape_cast %900 : vector<8xf32> to vector<8x1xf32>
    %cst_316 = arith.constant 3.200000e+01 : f32
    %902 = vector.broadcast %cst_316 : f32 to vector<8x1xf32>
    %903 = arith.divf %901, %902 : vector<8x1xf32>
    %904 = vector.broadcast %903 : vector<8x1xf32> to vector<8x32xf32>
    %905 = arith.subf %897, %904 : vector<8x32xf32>
    %906 = arith.mulf %905, %905 : vector<8x32xf32>
    %cst_317 = arith.constant dense<0.000000e+00> : vector<8xf32>
    %907 = vector.multi_reduction <add>, %906, %cst_317 [1] : vector<8x32xf32> to vector<8xf32>
    %908 = vector.shape_cast %907 : vector<8xf32> to vector<8x1xf32>
    %cst_318 = arith.constant 3.200000e+01 : f32
    %909 = vector.broadcast %cst_318 : f32 to vector<8x1xf32>
    %910 = arith.divf %908, %909 : vector<8x1xf32>
    %911 = vector.broadcast %903 : vector<8x1xf32> to vector<8x32xf32>
    %912 = arith.subf %897, %911 : vector<8x32xf32>
    %cst_319 = arith.constant 9.99999974E-6 : f32
    %913 = vector.broadcast %cst_319 : f32 to vector<8x1xf32>
    %914 = arith.addf %910, %913 : vector<8x1xf32>
    %915 = math.rsqrt %914 : vector<8x1xf32>
    %916 = vector.broadcast %915 : vector<8x1xf32> to vector<8x32xf32>
    %917 = arith.mulf %912, %916 : vector<8x32xf32>
    %918 = vector.broadcast %898 : vector<1x32xf32> to vector<8x32xf32>
    %919 = arith.mulf %917, %918 : vector<8x32xf32>
    %920 = vector.broadcast %899 : vector<1x32xf32> to vector<8x32xf32>
    %921 = arith.addf %919, %920 : vector<8x32xf32>
    %922 = arith.truncf %921 : vector<8x32xf32> to vector<8x32xbf16>
    %c0_320 = arith.constant 0 : index
    %c0_321 = arith.constant 0 : index
    %923 = vector.load %arg10[%c0_320, %c0_321] : memref<32x128xbf16, #tpu.memory_space<vmem>>, vector<32x128xbf16>
    %cst_322 = arith.constant dense<0.000000e+00> : vector<8x128xf32>
    %924 = tpu.matmul %922, %923, %cst_322 {dimension_numbers = #tpu.dot_dimension_numbers<[1], [0], [0], [1], [0, 0, 1, 1], [], []>} : vector<8x32xbf16>, vector<32x128xbf16>, vector<8x128xf32> -> vector<8x128xf32>
    %925 = vector.shape_cast %924 : vector<8x128xf32> to vector<1x8x128xf32>
    %c0_323 = arith.constant 0 : index
    %c0_324 = arith.constant 0 : index
    %c0_325 = arith.constant 0 : index
    %926 = vector.load %arg13[%c0_323, %c0_324, %c0_325] : memref<1x8x128xf32, #tpu.memory_space<vmem>>, vector<1x8x128xf32>
    tpu.vector_store %arg13[%c0_323, %c0_324, %c0_325], %925 {strides = array<i32>} : memref<1x8x128xf32, #tpu.memory_space<vmem>>, vector<1x8x128xf32>,
    return
  }
  func.func @transform_0(%arg0: i32) -> (i32, i32) {
    %c0_i32 = arith.constant 0 : i32
    %c0_i32_0 = arith.constant 0 : i32
    return %arg0, %c0_i32 : i32, i32
  }
  func.func @transform_1(%arg0: i32) -> (i32, i32) {
    %c0_i32 = arith.constant 0 : i32
    %c0_i32_0 = arith.constant 0 : i32
    %c0_i32_1 = arith.constant 0 : i32
    return %c0_i32, %c0_i32_0 : i32, i32
  }
  func.func @transform_2(%arg0: i32) -> (i32, i32, i32) {
    %c0_i32 = arith.constant 0 : i32
    %c0_i32_0 = arith.constant 0 : i32
    %c0_i32_1 = arith.constant 0 : i32
    %c0_i32_2 = arith.constant 0 : i32
    return %c0_i32, %c0_i32_0, %c0_i32_1 : i32, i32, i32
  }
  func.func @transform_3(%arg0: i32) -> (i32, i32, i32) {
    %c0_i32 = arith.constant 0 : i32
    %c0_i32_0 = arith.constant 0 : i32
    %c0_i32_1 = arith.constant 0 : i32
    %c0_i32_2 = arith.constant 0 : i32
    return %c0_i32, %c0_i32_0, %c0_i32_1 : i32, i32, i32
  }
  func.func @transform_4(%arg0: i32) -> (i32, i32, i32) {
    %c0_i32 = arith.constant 0 : i32
    %c0_i32_0 = arith.constant 0 : i32
    %c0_i32_1 = arith.constant 0 : i32
    %c0_i32_2 = arith.constant 0 : i32
    return %c0_i32, %c0_i32_0, %c0_i32_1 : i32, i32, i32
  }
  func.func @transform_5(%arg0: i32) -> (i32, i32, i32) {
    %c0_i32 = arith.constant 0 : i32
    %c0_i32_0 = arith.constant 0 : i32
    %c0_i32_1 = arith.constant 0 : i32
    %c0_i32_2 = arith.constant 0 : i32
    return %c0_i32, %c0_i32_0, %c0_i32_1 : i32, i32, i32
  }
  func.func @transform_6(%arg0: i32) -> (i32, i32, i32) {
    %c0_i32 = arith.constant 0 : i32
    %c0_i32_0 = arith.constant 0 : i32
    %c0_i32_1 = arith.constant 0 : i32
    %c0_i32_2 = arith.constant 0 : i32
    return %c0_i32, %c0_i32_0, %c0_i32_1 : i32, i32, i32
  }
  func.func @transform_7(%arg0: i32) -> (i32, i32, i32) {
    %c0_i32 = arith.constant 0 : i32
    %c0_i32_0 = arith.constant 0 : i32
    %c0_i32_1 = arith.constant 0 : i32
    %c0_i32_2 = arith.constant 0 : i32
    return %c0_i32, %c0_i32_0, %c0_i32_1 : i32, i32, i32
  }
  func.func @transform_8(%arg0: i32) -> (i32, i32, i32) {
    %c0_i32 = arith.constant 0 : i32
    %c0_i32_0 = arith.constant 0 : i32
    %c0_i32_1 = arith.constant 0 : i32
    %c0_i32_2 = arith.constant 0 : i32
    return %c0_i32, %c0_i32_0, %c0_i32_1 : i32, i32, i32
  }
  func.func @transform_9(%arg0: i32) -> (i32, i32) {
    %c0_i32 = arith.constant 0 : i32
    %c0_i32_0 = arith.constant 0 : i32
    %c0_i32_1 = arith.constant 0 : i32
    return %c0_i32, %c0_i32_0 : i32, i32
  }
  func.func @transform_10(%arg0: i32) -> (i32, i32) {
    %c0_i32 = arith.constant 0 : i32
    %c0_i32_0 = arith.constant 0 : i32
    %c0_i32_1 = arith.constant 0 : i32
    return %c0_i32, %c0_i32_0 : i32, i32
  }
  func.func @transform_11(%arg0: i32) -> (i32, i32) {
    %c0_i32 = arith.constant 0 : i32
    %c0_i32_0 = arith.constant 0 : i32
    %c0_i32_1 = arith.constant 0 : i32
    return %c0_i32, %c0_i32_0 : i32, i32
  }
  func.func @transform_12(%arg0: i32) -> (i32, i32, i32) {
    %c0_i32 = arith.constant 0 : i32
    %c0_i32_0 = arith.constant 0 : i32
    %c0_i32_1 = arith.constant 0 : i32
    return %arg0, %c0_i32, %c0_i32_0 : i32, i32, i32
  }
}

</mosaic_0001>

<bundles_post_ra>
// kernel: recformer_forward.1
= control target key start
LH: loop header
LB: loop body
LE: loop exit
PB: predicated region body
PF: predicated region fallthrough
CT: control target
= control target key end

     0   :  { %s18459_s21 = smov 0   ;;  %s21761_s0 = inlined_call_operand.vmem [shape: s32[16,1], index: 0, kind: input, shape index: {}]   ;;  %s21762_s1 = inlined_call_operand.vmem [shape: bf16[56,32], index: 1, kind: input, shape index: {}]   ;;  %s21763_s2 = inlined_call_operand.vmem [shape: bf16[4,32,96], index: 2, kind: input, shape index: {}]   ;;  %s21764_s3 = inlined_call_operand.vmem [shape: bf16[4,32,32], index: 3, kind: input, shape index: {}]   ;;  %s21765_s4 = inlined_call_operand.vmem [shape: bf16[2,32,32], index: 4, kind: input, shape index: {}]   ;;  %s21766_s5 = inlined_call_operand.vmem [shape: bf16[2,32,64], index: 5, kind: input, shape index: {}]   ;;  %s21767_s6 = inlined_call_operand.vmem [shape: bf16[2,32,32], index: 6, kind: input, shape index: {}]   ;;  %s21768_s7 = inlined_call_operand.vmem [shape: bf16[4,32,2048], index: 7, kind: input, shape index: {}]   ;;  %s21769_s8 = inlined_call_operand.vmem [shape: bf16[4,2048,32], index: 8, kind: input, shape index: {}]   ;;  %s21770_s9 = inlined_call_operand.vmem [shape: bf16[32,128], index: 9, kind: input, shape index: {}]   ;;  %s21771_s10 = inlined_call_operand.vmem [shape: f32[48,128], index: 10, kind: input, shape index: {}]   ;;  %s21772_s11 = inlined_call_operand.vmem [shape: f32[8,2048], index: 11, kind: input, shape index: {}]   ;;  %s21773_s12 = inlined_call_operand.vmem [shape: f32[2,8,128], index: 12, kind: output, shape index: {}]  }
   0x1   :  { %21799 = sst [smem:[#allocation4_spill]] %s21761_s0 }
   0x2   :  { %21800 = sst [smem:[#allocation5_spill]] %s21762_s1 }
   0x3   :  { %21801 = sst [smem:[#allocation6_spill]] %s21773_s12 }
   0x4 LB: > { %21802 = sst [smem:[#allocation2_spill]] %s18378_s21  ;;  %s14581_s22 = sadd.s32 4294967295, %s18378_s21   ;;  %s18378_s21 = sphi %s18459_s21, %s22_s21  }
   0x5   : > { %p14585_p0 = scmp.ge.s32.totalorder %s18378_s21, 1  ;;  %p361_p1 = scmp.lt.s32.totalorder %s18378_s21, 3 }
   0x7   : > { %p362_p2 = pnand %p14585_p0, %p361_p1 }
   0x9   : > { %365 = sbr.rel (%p362_p2) target bundleno = 20541 (0x503d), region = 68 }
   0xe   : > { %p401_p3 = scmp.lt.s32.totalorder %s14581_s22, 1  ;;  %vm452_vm0 = vcmask 1043456   ;;  %v18380_v0 = vmov 0   ;;  %v18381_v1 = vmov 0.0   ;;  %s21803_s1 = sld [smem:[#allocation5_spill]]  ;;  %v411_v4 = vlaneseq  ;;  %v17722_v9 = vld [vmem:[%s21763_s2 + $0x8] sm:$0xff]  }
   0xf   : > { %17717 = vset.pattern.permute.xlu0 %v18380_v0  ;;  %17227 = vmatprep.subr.bf16.mxu0 %v18381_v1  ;;  %s21805_s0 = sld [smem:[#allocation4_spill]]  ;;  %vm18382_vm1 = vmmov 0   ;;  %vm448_vm3 = vcmask 457728   ;;  %v17723_v14 = vld [vmem:[%s21763_s2] sm:$0xff]   ;;  %vm518_vm4 = vcmask 261120   ;;  %s21793_s26 = smov 96  }
  0x10   : > { %s21822_s22 = smov (!%p401_p3, %s14581_s22), 1  ;;  %17239 = vmatprep.subr.bf16.mxu1 %v18381_v1  ;;  %17235 = vmatprep.mubr.msk.bf16.mxu0 %vm18382_vm1, %v18381_v1  ;;  %v412_v8 = vand.u32 127, %v411_v4  ;;  %v14594_v20 = vld [vmem:[%s21771_s10] ss:$0 sm:$0xff]  ;;  %s21787_s27 = smov 64   ;;  %vm570_vm5 = vcmask 64512  }
  0x11   : > { %21804 = sst [smem:[#allocation3_spill]] %s21822_s22  ;;  %s21774_s25 = sshll.u32 %s21822_s22, 3  ;;  %17243 = vmatprep.mubr.msk.bf16.mxu1 %vm18382_vm1, %v18381_v1  ;;  %17240 = vmatpush3.bf16.msra.mxu1 %v17722_v9  ;;  %v563_v52 = vld [vmem:[%s21764_s3 + $0x4] sm:$0xf]  ;;  %v562_v55 = vld [vmem:[%s21764_s3] sm:$0xf] }
  0x12   : > { %17241 = vmatprep.subr.bf16.mxu1 %v18381_v1  ;;  %s21791_s28 = smov 120   ;;  %s21795_s29 = smov 88   ;;  %v903_v53 = vsel %vm452_vm0, %v563_v52, 0  ;;  %v949_v58 = vsel %vm452_vm0, %v562_v55, 0 }
  0x13   : > { %s21785_s13 = smov 112   ;;  %s21783_s14 = smov 80  }
  0x14   : > { %v17718_v2 = vld [vmem:[%s21803_s1 + $0x18] ss:$0 sps:$4 sm:$0xff]   ;;  %v17719_v5 = vld [vmem:[%s21803_s1 + $0x10] sm:$0xff]   ;;  %v17720_v7 = vld [vmem:[%s21803_s1 + $0x8] sm:$0xff]   ;;  %s21781_s19 = smov 48   ;;  %s21779_s20 = smov 104  }
  0x15   : > { %v454_v3 = vsel %vm452_vm0, %v17718_v2, 0  ;;  %s404_s30 = scalar_lea.vmem %s21805_s0, %s21774_s25  ;;  %v17721_v10 = vld [vmem:[%s21803_s1] sm:$0xff]   ;;  %17242 = vmatpush3.bf16.msra.mxu1 %v17723_v14  ;;  %s21777_s23 = smov 72  }
  0x16   : > { %17228 = vmatpush3.bf16.msra.mxu0 %v454_v3  ;;  %v410_v6 = vld [vmem:[%s404_s30] sm:$0xff]  ;;  %17247 = vmatprep.subr.mxu1 %v18381_v1  ;;  %s21789_s30 = smov 56   ;;  %s21775_s16 = smov 40  }
  0x17   : > { %17229 = vmatprep.subr.bf16.mxu0 %v18381_v1  ;;  %414 = vperm.xlu0 %17717, %v410_v6   ;;  %s21806_s17 = smov 80   ;;  %s21810_s18 = smov 40  }
  0x1a   : > { %17230 = vmatpush3.bf16.msra.mxu0 %v17719_v5 }
  0x1b   : > { %17231 = vmatprep.subr.bf16.mxu0 %v18381_v1 }
  0x1e   : > { %17232 = vmatpush3.bf16.msra.mxu0 %v17720_v7 }
  0x1f   : > { %17233 = vmatprep.subr.bf16.mxu0 %v18381_v1 }
  0x22   : > { %17234 = vmatpush3.bf16.msra.mxu0 %v17721_v10 }
  0x23   : > { %17267 = vmatprep.subr.bf16.mxu0 %v18381_v1 }
  0x92   : > { %v415_v11 = vpop.permute.xlu0 %414 }
  0x93   : > { %vm416_vm2 = vcmp.eq.s32.totalorder %v412_v8, %v415_v11 }
  0x94   : > { %v14588_v12 = vsel %vm416_vm2, 1.0, %v18381_v1 }
  0x95   : > { %v419_v13 = vpack.c.bf16 %v14588_v12, %v14588_v12 }
  0x97   : > { %17236 = vmatmul.mubr.msk.bf16.vlgmr.msra.gmra.mxu0 %vm448_vm3, %v419_v13 }
  0x98   : > { %17269 = vmatprep.mubr.msk.bf16.mxu0 %vm18382_vm1, %v18381_v1  ;;  %17268 = vmatpush3.bf16.msra.mxu0 %v903_v53 }
  0x99   : > { %17279 = vmatprep.subr.mxu0 %v18381_v1 }
 0x157   : > { %v18511_v15 = vpop.f32.mrf.mxu0 }
 0x158   : > { %v18515_v16 = vpack.c.bf16 %v18511_v15, %v18511_v15 }
 0x159   : > { %v17237_v17 = vpop.f32.mrf.mxu0 }
 0x15a   : > { %17244 = vmatmul.mubr.msk.bf16.vlgmr.msra.gmra.mxu1 %vm518_vm4, %v18515_v16 }
 0x15b   : > { %v493_v18 = vpop.f32.mrf.mxu0  ;;  %17249 = vmatprep.mubr.msk.f32.mxu1 %vm18382_vm1, %v18381_v1 }
 0x15d   : > { %v17238_v19 = vpop.f32.mrf.mxu0 }
 0x21a   : > { %v556_v21 = vpop.f32.mrf.mxu1 }
 0x21b   : > { %v18524_v22 = vadd.f32 %v14594_v20, %v556_v21 }
 0x21c   : > { %v17245_v23 = vpop.f32.mrf.mxu1 }
 0x21d   : > { %568 = vrot.lane.b32.xlu0 %v18524_v22, %s21793_s26 }
 0x21e   : > { %v559_v24 = vpop.f32.mrf.mxu1 }
 0x220   : > { %v17246_v25 = vpop.f32.mrf.mxu1 }
 0x221   : > { %656 = vrot.lane.b32.xlu0 %v18524_v22, %s21787_s27 }
 0x225   : > { %733 = vrot.lane.b32.xlu0 %v18524_v22, %s21791_s28 }
 0x28f   : > { %v569_v26 = vpop.permute.xlu0 %568 }
 0x290   : > { %17248 = vmatpush3.xpose.msk.msra.mxu1 %vm570_vm5, %v569_v26 }
 0x291   : > { %17252 = vmatprep.subr.mxu1 %v18381_v1 }
 0x293   : > { %17250 = vmatmul.mubr.msk.f32.vlgmr.msra.gmra.mxu1 %vm570_vm5, %v18524_v22  ;;  %v657_v27 = vpop.permute.xlu0 %656 }
 0x294   : > { %17253 = vmatpush3.msra.mxu1 %v657_v27  ;;  %17254 = vmatprep.mubr.msk.f32.mxu1 %vm18382_vm1, %v18381_v1 }
 0x295   : > { %17257 = vmatprep.subr.mxu1 %v18381_v1 }
 0x297   : > { %v734_v40 = vpop.permute.xlu0 %733 }
 0x353   : > { %v641_v28 = vpop.f32.mrf.mxu1 }
 0x354   : > { %v645_v29 = vsel %vm570_vm5, %v641_v28, -inf }
 0x355   : > { %646 = vmax.xlane.f32.xlu1 %v645_v29  ;;  %v17251_v30 = vpop.f32.mrf.mxu1  ;;  %v564_v29 = vld [vmem:[%s21764_s3 + $0x8] sm:$0xf] }
 0x356   : > { %v1161_v30 = vsel %vm452_vm0, %v564_v29, 0  ;;  %v1476_v29 = vld [vmem:[%s21768_s7 + $0xd0] sm:$0xff] }
 0x3de   : > { %v647_v31 = vpop.xlane.xlu1 %646 }
 0x3df   : > { %v648_v32 = vsub.f32 %v641_v28, %v647_v31 }
 0x3e1   : > { %v649_v33 = vmul.f32 1.442695, %v648_v32 }
 0x3e3   : > { %18252 = vpow2.f32 %v649_v33 }
 0x3f0   : > { %v18253_v34 = vpop.eup %18252 }
 0x3f1   : > { %v651_v35 = vsel %vm570_vm5, %v18253_v34, 0.0 }
 0x3f2   : > { %652 = vadd.xlane.f32.xlu1 %v651_v35 }
 0x403   : > { %735 = vrot.lane.b32.xlu1 %v18524_v22, %s21795_s29 }
 0x47b   : > { %v653_v36 = vpop.xlane.xlu1 %652 }
 0x47c   : > { %18254 = vrcp.f32 %v653_v36 }
 0x47f   : > { %v736_v39 = vpop.permute.xlu1 %735 }
 0x489   : > { %v18255_v37 = vpop.eup %18254 }
 0x48a   : > { %v655_v38 = vmul.f32 %v18255_v37, %v18253_v34 }
 0x48c   : > { %17255 = vmatmul.mubr.msk.f32.vlgmr.msra.gmra.mxu1 %vm570_vm5, %v655_v38 }
 0x48d   : > { %17258 = vmatpush3.xpose.msk.msra.mxu1 %vm570_vm5, %v736_v39  ;;  %17259 = vmatprep.mubr.msk.f32.mxu1 %vm18382_vm1, %v18381_v1 }
 0x48e   : > { %17262 = vmatprep.subr.mxu1 %v18381_v1 }
 0x490   : > { %17260 = vmatmul.mubr.msk.f32.vlgmr.msra.gmra.mxu1 %vm570_vm5, %v734_v40 }
 0x491   : > { %17264 = vmatprep.mubr.msk.f32.mxu1 %vm18382_vm1, %v18381_v1 }
 0x54c   : > { %v728_v41 = vpop.f32.mrf.mxu1 }
 0x54d   : > { %v732_v59 = vpack.c.bf16 %v728_v41, %v728_v41 }
 0x54e   : > { %v17256_v42 = vpop.f32.mrf.mxu1 }
 0x550   : > { %v807_v43 = vpop.f32.mrf.mxu1 }
 0x551   : > { %v811_v44 = vsel %vm570_vm5, %v807_v43, -inf }
 0x552   : > { %812 = vmax.xlane.f32.xlu0 %v811_v44  ;;  %v17261_v45 = vpop.f32.mrf.mxu1 }
 0x568   : > { %822 = vrot.lane.b32.xlu0 %v18524_v22, %s21789_s30 }
 0x56c   : > { %991 = vrot.lane.b32.xlu0 %v18524_v22, %s21785_s13 }
 0x5db   : > { %v813_v46 = vpop.xlane.xlu0 %812 }
 0x5dc   : > { %v814_v47 = vsub.f32 %v807_v43, %v813_v46 }
 0x5de   : > { %v815_v48 = vmul.f32 1.442695, %v814_v47 }
 0x5df   : > { %v823_v49 = vpop.permute.xlu0 %822 }
 0x5e0   : > { %18256 = vpow2.f32 %v815_v48  ;;  %17263 = vmatpush3.msra.mxu1 %v823_v49 }
 0x5e1   : > { %17273 = vmatprep.subr.bf16.mxu1 %v18381_v1 }
 0x5e3   : > { %v992_v6 = vpop.permute.xlu0 %991 }
 0x5ed   : > { %v18257_v50 = vpop.eup %18256 }
 0x5ee   : > { %v817_v51 = vsel %vm570_vm5, %v18257_v50, 0.0 }
 0x5ef   : > { %818 = vadd.xlane.f32.xlu1 %v817_v51  ;;  %v565_v51 = vld [vmem:[%s21764_s3 + $0xc] sm:$0xf] }
 0x5f0   : > { %v1374_v52 = vsel %vm452_vm0, %v565_v51, 0  ;;  %v1470_v51 = vld [vmem:[%s21768_s7 + $0xa0] sm:$0xff] }
 0x600   : > { %993 = vrot.lane.b32.xlu1 %v18524_v22, %s21783_s14  ;;  %s21808_s14 = smov 104  }
 0x678   : > { %v819_v54 = vpop.xlane.xlu1 %818 }
 0x679   : > { %18258 = vrcp.f32 %v819_v54 }
 0x67c   : > { %v994_v63 = vpop.permute.xlu1 %993 }
 0x686   : > { %v18259_v56 = vpop.eup %18258 }
 0x687   : > { %v821_v57 = vmul.f32 %v18259_v56, %v18257_v50  ;;  %v14614_v56 = vld [vmem:[%s21771_s10 + $0x1] ss:$0 sm:$0xff] }
 0x689   : > { %17265 = vmatmul.mubr.msk.f32.vlgmr.msra.gmra.mxu1 %vm570_vm5, %v821_v57 }
 0x68a   : > { %17274 = vmatpush3.bf16.msra.mxu1 %v949_v58  ;;  %17275 = vmatprep.mubr.msk.bf16.mxu1 %vm18382_vm1, %v18381_v1 }
 0x68b   : > { %17284 = vmatprep.subr.mxu1 %v18381_v1 }
 0x68d   : > { %17276 = vmatmul.mubr.msk.bf16.vlgmr.msra.gmra.mxu1 %vm570_vm5, %v732_v59 }
 0x68e   : > { %17286 = vmatprep.mubr.msk.f32.mxu1 %vm18382_vm1, %v18381_v1 }
 0x749   : > { %v894_v60 = vpop.f32.mrf.mxu1 }
 0x74a   : > { %v898_v61 = vpack.c.bf16 %v894_v60, %v894_v60 }
 0x74b   : > { %v17266_v62 = vpop.f32.mrf.mxu1 }
 0x74c   : > { %17270 = vmatmul.mubr.msk.bf16.vlgmr.msra.gmra.mxu0 %vm570_vm5, %v898_v61 }
 0x74d   : > { %17280 = vmatpush3.xpose.msk.msra.mxu0 %vm570_vm5, %v994_v63  ;;  %v18578_v2 = vpop.f32.mrf.mxu1  ;;  %17281 = vmatprep.mubr.msk.f32.mxu0 %vm18382_vm1, %v18381_v1 }
 0x74e   : > { %17289 = vmatprep.subr.bf16.mxu0 %v18381_v1 }
 0x74f   : > { %v17277_v3 = vpop.f32.mrf.mxu1 }
 0x751   : > { %v988_v5 = vpop.f32.mrf.mxu1 }
 0x753   : > { %v17278_v7 = vpop.f32.mrf.mxu1 }
 0x754   : > { %17282 = vmatmul.mubr.msk.f32.vlgmr.msra.gmra.mxu0 %vm570_vm5, %v992_v6 }
 0x755   : > { %17291 = vmatprep.mubr.msk.bf16.mxu0 %vm18382_vm1, %v18381_v1  ;;  %17290 = vmatpush3.bf16.msra.mxu0 %v1161_v30  ;;  %v1469_v30 = vld [vmem:[%s21768_s7 + $0x98] sm:$0xff] }
 0x756   : > { %17305 = vmatprep.subr.bf16.mxu0 %v18381_v1 }
 0x80c   : > { %v939_v8 = vpop.f32.mrf.mxu0 }
 0x80d   : > { %v986_v43 = vadd.f32 %v18578_v2, %v939_v8 }
 0x80e   : > { %v17271_v9 = vpop.f32.mrf.mxu0 }
 0x80f   : > { %v1466_v9 = vld [vmem:[%s21768_s7 + $0x80] sm:$0xff] }
 0x810   : > { %v942_v10 = vpop.f32.mrf.mxu0 }
 0x811   : > { %v1474_v10 = vld [vmem:[%s21768_s7 + $0xc0] sm:$0xff] }
 0x812   : > { %v17272_v11 = vpop.f32.mrf.mxu0 }
 0x813   : > { %v1467_v11 = vld [vmem:[%s21768_s7 + $0x88] sm:$0xff] }
 0x814   : > { %v1065_v12 = vpop.f32.mrf.mxu0 }
 0x815   : > { %v1069_v13 = vsel %vm570_vm5, %v1065_v12, -inf }
 0x816   : > { %1070 = vmax.xlane.f32.xlu0 %v1069_v13  ;;  %v17283_v14 = vpop.f32.mrf.mxu0  ;;  %v1475_v13 = vld [vmem:[%s21768_s7 + $0xc8] sm:$0xff] }
 0x817   : > { %v14635_v14 = vcombine.low %v1466_v9, %v1474_v10 }
 0x82c   : > { %1080 = vrot.lane.b32.xlu0 %v18524_v22, %s21781_s19  ;;  %s21809_s19 = smov 72  }
 0x830   : > { %1204 = vrot.lane.b32.xlu0 %v18524_v22, %s21779_s20  ;;  %s21816_s20 = smov 88  }
 0x89f   : > { %v1071_v17 = vpop.xlane.xlu0 %1070 }
 0x8a0   : > { %v1072_v18 = vsub.f32 %v1065_v12, %v1071_v17  ;;  %v14636_v12 = vcombine.high %v1466_v9, %v1474_v10  ;;  %v14637_v17 = vcombine.low %v1467_v11, %v1475_v13  ;;  %v1481_v9 = vld [vmem:[%s21768_s7 + $0xf8] sm:$0xff] }
 0x8a2   : > { %v1073_v19 = vmul.f32 1.442695, %v1072_v18  ;;  %v14638_v18 = vcombine.high %v1467_v11, %v1475_v13 }
 0x8a3   : > { %v1081_v20 = vpop.permute.xlu0 %1080 }
 0x8a4   : > { %18260 = vpow2.f32 %v1073_v19  ;;  %17285 = vmatpush3.msra.mxu1 %v1081_v20  ;;  %v1450_v19 = vld [vmem:[%s21768_s7] sm:$0xff] }
 0x8a5   : > { %17295 = vmatprep.subr.mxu1 %v18381_v1  ;;  %v1458_v20 = vld [vmem:[%s21768_s7 + $0x40] sm:$0xff] }
 0x8a7   : > { %v1205_v28 = vpop.permute.xlu0 %1204 }
 0x8b1   : > { %v18261_v21 = vpop.eup %18260 }
 0x8b2   : > { %v1075_v23 = vsel %vm570_vm5, %v18261_v21, 0.0 }
 0x8b3   : > { %1076 = vadd.xlane.f32.xlu1 %v1075_v23  ;;  %v14620_v23 = vcombine.high %v1450_v19, %v1458_v20 }
 0x8c4   : > { %1206 = vrot.lane.b32.xlu1 %v18524_v22, %s21777_s23  ;;  %s21815_s23 = smov 112  }
 0x93c   : > { %v1077_v24 = vpop.xlane.xlu1 %1076 }
 0x93d   : > { %18262 = vrcp.f32 %v1077_v24  ;;  %v1459_v24 = vld [vmem:[%s21768_s7 + $0x48] sm:$0xff] }
 0x940   : > { %v1207_v27 = vpop.permute.xlu1 %1206 }
 0x94a   : > { %v18263_v25 = vpop.eup %18262 }
 0x94b   : > { %v1079_v26 = vmul.f32 %v18263_v25, %v18261_v21  ;;  %v1451_v21 = vld [vmem:[%s21768_s7 + $0x8] sm:$0xff]  ;;  %v14619_v25 = vcombine.low %v1450_v19, %v1458_v20  ;;  %v1465_v19 = vld [vmem:[%s21768_s7 + $0x78] sm:$0xff] }
 0x94d   : > { %17287 = vmatmul.mubr.msk.f32.vlgmr.msra.gmra.mxu1 %vm570_vm5, %v1079_v26  ;;  %v14621_v26 = vcombine.low %v1451_v21, %v1459_v24 }
 0x94e   : > { %17296 = vmatpush3.xpose.msk.msra.mxu1 %vm570_vm5, %v1207_v27  ;;  %17297 = vmatprep.mubr.msk.f32.mxu1 %vm18382_vm1, %v18381_v1  ;;  %v14622_v27 = vcombine.high %v1451_v21, %v1459_v24 }
 0x94f   : > { %17300 = vmatprep.subr.mxu1 %v18381_v1 }
 0x951   : > { %17298 = vmatmul.mubr.msk.f32.vlgmr.msra.gmra.mxu1 %vm570_vm5, %v1205_v28  ;;  %v1468_v28 = vld [vmem:[%s21768_s7 + $0x90] sm:$0xff] }
 0x952   : > { %17302 = vmatprep.mubr.msk.f32.mxu1 %vm18382_vm1, %v18381_v1 }
 0xa0d   : > { %v1152_v31 = vpop.f32.mrf.mxu1 }
 0xa0e   : > { %v1156_v32 = vpack.c.bf16 %v1152_v31, %v1152_v31  ;;  %v14640_v31 = vcombine.high %v1468_v28, %v1476_v29 }
 0xa0f   : > { %v17288_v33 = vpop.f32.mrf.mxu1 }
 0xa10   : > { %17292 = vmatmul.mubr.msk.bf16.vlgmr.msra.gmra.mxu0 %vm570_vm5, %v1156_v32  ;;  %v1477_v32 = vld [vmem:[%s21768_s7 + $0xd8] sm:$0xff]  ;;  %v14639_v33 = vcombine.low %v1468_v28, %v1476_v29 }
 0xa11   : > { %v1278_v34 = vpop.f32.mrf.mxu1  ;;  %17307 = vmatprep.mubr.msk.bf16.mxu0 %vm18382_vm1, %v18381_v1  ;;  %17306 = vmatpush3.bf16.msra.mxu0 %v1374_v52  ;;  %v1478_v52 = vld [vmem:[%s21768_s7 + $0xe0] sm:$0xff]  ;;  %v17725_v28 = vld [vmem:[%s21769_s8 + $0xf8] sm:$0xff]  }
 0xa12   : > { %v1282_v35 = vsel %vm570_vm5, %v1278_v34, -inf  ;;  %1787 = vmatprep.subr.bf16.mxu0 %v14638_v18  ;;  %v1457_v18 = vld [vmem:[%s21768_s7 + $0x38] sm:$0xff] }
 0xa13   : > { %1283 = vmax.xlane.f32.xlu0 %v1282_v35  ;;  %v17299_v36 = vpop.f32.mrf.mxu1  ;;  %v14642_v35 = vcombine.high %v1469_v30, %v1477_v32  ;;  %v14634_v24 = vcombine.high %v1457_v18, %v1465_v19  ;;  %v17726_v29 = vld [vmem:[%s21769_s8 + $0x38] sm:$0xff]  }
 0xa29   : > { %1293 = vrot.lane.b32.xlu0 %v18524_v22, %s21775_s16  ;;  %s21807_s16 = smov 48  }
 0xa9c   : > { %v1284_v37 = vpop.xlane.xlu0 %1283 }
 0xa9d   : > { %v1285_v38 = vsub.f32 %v1278_v34, %v1284_v37  ;;  %v14641_v34 = vcombine.low %v1469_v30, %v1477_v32  ;;  %v17727_v30 = vld [vmem:[%s21769_s8 + $0xb8] sm:$0xff]   ;;  %v17729_v32 = vld [vmem:[%s21769_s8 + $0xf0] sm:$0xff]  }
 0xa9f   : > { %v1286_v39 = vmul.f32 1.442695, %v1285_v38 }
 0xaa0   : > { %v1294_v40 = vpop.permute.xlu0 %1293 }
 0xaa1   : > { %18264 = vpow2.f32 %v1286_v39  ;;  %17301 = vmatpush3.msra.mxu1 %v1294_v40  ;;  %v14615_v40 = vld [vmem:[%s21771_s10 + $0x2] ss:$0 sm:$0xff] }
 0xaa2   : > { %1746 = vmatprep.subr.bf16.mxu1 %v14636_v12 }
 0xaae   : > { %v18265_v41 = vpop.eup %18264 }
 0xaaf   : > { %v1288_v42 = vsel %vm570_vm5, %v18265_v41, 0.0 }
 0xab0   : > { %1289 = vadd.xlane.f32.xlu1 %v1288_v42  ;;  %v14616_v42 = vld [vmem:[%s21771_s10 + $0x3] ss:$0 sm:$0xff] }
 0xad0   : > { %v1197_v44 = vpop.f32.mrf.mxu0 }
 0xad1   : > { %v1203_v45 = vadd.f32 %v1197_v44, %v986_v43  ;;  %v1452_v44 = vld [vmem:[%s21768_s7 + $0x10] sm:$0xff] }
 0xad2   : > { %v17293_v46 = vpop.f32.mrf.mxu0 }
 0xad3   : > { %v1453_v46 = vld [vmem:[%s21768_s7 + $0x18] sm:$0xff] }
 0xad4   : > { %v1200_v47 = vpop.f32.mrf.mxu0 }
 0xad5   : > { %v1461_v47 = vld [vmem:[%s21768_s7 + $0x58] sm:$0xff] }
 0xad6   : > { %v17294_v48 = vpop.f32.mrf.mxu0 }
 0xb39   : > { %v1290_v49 = vpop.xlane.xlu1 %1289 }
 0xb3a   : > { %18266 = vrcp.f32 %v1290_v49 }
 0xb47   : > { %v18267_v22 = vpop.eup %18266 }
 0xb48   : > { %v1292_v50 = vmul.f32 %v18267_v22, %v18265_v41 }
 0xb4a   : > { %17303 = vmatmul.mubr.msk.f32.vlgmr.msra.gmra.mxu1 %vm570_vm5, %v1292_v50  ;;  %v14626_v50 = vcombine.high %v1453_v46, %v1461_v47 }
 0xb4b   : > { %1766 = vmatprep.mubr.bf16.mxu1 %v18380_v0  ;;  %1747 = vmatpush1.bf16.msra.mxu1 %v14635_v14  ;;  %v1456_v14 = vld [vmem:[%s21768_s7 + $0x30] sm:$0xff] }
 0xb4c   : > { %1748 = vmatprep.subr.bf16.mxu1 %v14620_v23 }
 0xb4f   : > { %1749 = vmatpush1.bf16.msra.mxu1 %v14619_v25 }
 0xb50   : > { %1828 = vmatprep.subr.bf16.mxu1 %v14640_v31  ;;  %v17728_v31 = vld [vmem:[%s21769_s8 + $0x70] sm:$0xff]  }
 0xc0a   : > { %v1365_v53 = vpop.f32.mrf.mxu1 }
 0xc0b   : > { %v1369_v54 = vpack.c.bf16 %v1365_v53, %v1365_v53  ;;  %v1471_v53 = vld [vmem:[%s21768_s7 + $0xa8] sm:$0xff] }
 0xc0c   : > { %v17304_v55 = vpop.f32.mrf.mxu1 }
 0xc0d   : > { %17308 = vmatmul.mubr.msk.bf16.vlgmr.msra.gmra.mxu0 %vm570_vm5, %v1369_v54  ;;  %v1479_v54 = vld [vmem:[%s21768_s7 + $0xe8] sm:$0xff] }
 0xc0e   : > { %1807 = vmatprep.mubr.bf16.mxu0 %v18380_v0  ;;  %1788 = vmatpush1.bf16.msra.mxu0 %v14637_v17  ;;  %v1464_v17 = vld [vmem:[%s21768_s7 + $0x70] sm:$0xff] }
 0xc0f   : > { %1789 = vmatprep.subr.bf16.mxu0 %v14622_v27  ;;  %v14632_v23 = vcombine.high %v1456_v14, %v1464_v17  ;;  %v14631_v25 = vcombine.low %v1456_v14, %v1464_v17  ;;  %v17724_v27 = vld [vmem:[%s21769_s8 + $0x78] sm:$0xff]  }
 0xc12   : > { %1790 = vmatpush1.bf16.msra.mxu0 %v14621_v26  ;;  %v14633_v26 = vcombine.low %v1457_v18, %v1465_v19 }
 0xc13   : > { %1869 = vmatprep.subr.bf16.mxu0 %v14642_v35  ;;  %v17732_v35 = vld [vmem:[%s21769_s8 + $0x68] sm:$0xff]  }
 0xccd   : > { %v1410_v57 = vpop.f32.mrf.mxu0 }
 0xcce   : > { %v1416_v58 = vadd.f32 %v1410_v57, %v1203_v45  ;;  %v1460_v45 = vld [vmem:[%s21768_s7 + $0x50] sm:$0xff]  ;;  %v14644_v57 = vcombine.high %v1470_v51, %v1478_v52 }
 0xccf   : > { %v17309_v59 = vpop.f32.mrf.mxu0  ;;  %v14624_v22 = vcombine.high %v1452_v44, %v1460_v45  ;;  %v14623_v55 = vcombine.low %v1452_v44, %v1460_v45  ;;  %v17741_v44 = vld [vmem:[%s21769_s8 + $0xd8] sm:$0xff]  }
 0xcd0   : > { %v1421_v60 = vadd.f32 %v14614_v56, %v1416_v58  ;;  %v14625_v56 = vcombine.low %v1453_v46, %v1461_v47  ;;  %v14646_v58 = vcombine.high %v1471_v53, %v1479_v54  ;;  %v1454_v59 = vld [vmem:[%s21768_s7 + $0x20] sm:$0xff]  ;;  %v17742_v45 = vld [vmem:[%s21769_s8 + $0x18] sm:$0xff]   ;;  %v17744_v47 = vld [vmem:[%s21769_s8 + $0x50] sm:$0xff]  }
 0xcd1   : > { %v1413_v61 = vpop.f32.mrf.mxu0  ;;  %v17743_v46 = vld [vmem:[%s21769_s8 + $0x98] sm:$0xff]  }
 0xcd2   : > { %v1422_v62 = vadd.f32 %v1421_v60, %v18511_v15  ;;  %v1462_v60 = vld [vmem:[%s21768_s7 + $0x60] sm:$0xff]  ;;  %v1455_v61 = vld [vmem:[%s21768_s7 + $0x28] sm:$0xff] }
 0xcd3   : > { %v17310_v63 = vpop.f32.mrf.mxu0  ;;  %v14627_v10 = vcombine.low %v1454_v59, %v1462_v60 }
 0xcd4   : > { %v1425_v2 = vsel %vm518_vm4, %v1422_v62, 0.0  ;;  %v14643_v63 = vcombine.low %v1470_v51, %v1478_v52  ;;  %v17748_v51 = vld [vmem:[%s21769_s8 + $0x48] sm:$0xff]  }
 0xcd5   : > { %1426 = vadd.xlane.f32.xlu1 %v1425_v2  ;;  %v14645_v2 = vcombine.low %v1471_v53, %v1479_v54  ;;  %v17749_v52 = vld [vmem:[%s21769_s8 + $0xc8] sm:$0xff]  }
 0xcd6   : > { %v17750_v53 = vld [vmem:[%s21769_s8 + $0x8] sm:$0xff]  }
 0xcd7   : > { %v17751_v54 = vld [vmem:[%s21769_s8 + $0x88] sm:$0xff]  }
 0xd5e   : > { %v1427_v3 = vpop.xlane.xlu1 %1426 }
 0xd5f   : > { %v1429_v5 = vmul.f32 0.03125, %v1427_v3  ;;  %v14628_v3 = vcombine.high %v1454_v59, %v1462_v60  ;;  %v17756_v59 = vld [vmem:[%s21769_s8 + $0x178] sm:$0xff]  }
 0xd60   : > { %v17757_v60 = vld [vmem:[%s21769_s8 + $0x1f8] sm:$0xff]  }
 0xd61   : > { %v1430_v6 = vsub.f32 %v1422_v62, %v1429_v5  ;;  %v1463_v62 = vld [vmem:[%s21768_s7 + $0x68] sm:$0xff] }
 0xd62   : > { %v14630_v5 = vcombine.high %v1455_v61, %v1463_v62  ;;  %v14629_v11 = vcombine.low %v1455_v61, %v1463_v62  ;;  %v18863_v61 = vshrl.u32 %v411_v4, 7  ;;  %v1482_v62 = vld [vmem:[%s21772_s11] ss:$8 sm:$0xf] }
 0xd63   : > { %v1431_v7 = vmul.f32 %v1430_v6, %v1430_v6 }
 0xd64   : > { %v18883_v4 = vsub.s32 3, %v18863_v61 }
 0xd65   : > { %v1432_v8 = vsel %vm518_vm4, %v1431_v7, 0.0  ;;  %v1480_v7 = vld [vmem:[%s21768_s7 + $0xf0] sm:$0xff] }
 0xd66   : > { %1433 = vadd.xlane.f32.xlu1 %v1432_v8  ;;  %v1473_v8 = vld [vmem:[%s21768_s7 + $0xb8] sm:$0xff] }
 0xd67   : > { %v14650_v13 = vcombine.high %v1473_v8, %v1481_v9  ;;  %v14649_v21 = vcombine.low %v1473_v8, %v1481_v9 }
 0xdef   : > { %v1434_v36 = vpop.xlane.xlu1 %1433 }
 0xdf0   : > { %v1435_v37 = vmul.f32 0.03125, %v1434_v36  ;;  %v17733_v36 = vld [vmem:[%s21769_s8 + $0xe8] sm:$0xff]  }
 0xdf2   : > { %v1436_v38 = vadd.f32 1e-05, %v1435_v37  ;;  %v17734_v37 = vld [vmem:[%s21769_s8 + $0x28] sm:$0xff]  }
 0xdf4   : > { %18268 = vrsqrt.f32 %v1436_v38  ;;  %v17735_v38 = vld [vmem:[%s21769_s8 + $0xa8] sm:$0xff]  }
 0xe01   : > { %v18269_v39 = vpop.eup %18268 }
 0xe02   : > { %v1438_v41 = vmul.f32 %v18269_v39, %v1430_v6  ;;  %v1472_v6 = vld [vmem:[%s21768_s7 + $0xb0] sm:$0xff]  ;;  %v17736_v39 = vld [vmem:[%s21769_s8 + $0x60] sm:$0xff]  }
 0xe03   : > { %v14648_v12 = vcombine.high %v1472_v6, %v1480_v7  ;;  %v14647_v20 = vcombine.low %v1472_v6, %v1480_v7  ;;  %v18880_v6 = vsub.s32 1, %v18863_v61 }
 0xe04   : > { %v1443_v43 = vmul.f32 %v14615_v40, %v1438_v41  ;;  %v17737_v40 = vld [vmem:[%s21769_s8 + $0xe0] sm:$0xff]  }
 0xe05   : > { %v17738_v41 = vld [vmem:[%s21769_s8 + $0x20] sm:$0xff]  }
 0xe06   : > { %v18684_v48 = vadd.f32 %v14616_v42, %v1443_v43  ;;  %v17739_v42 = vld [vmem:[%s21769_s8 + $0xa0] sm:$0xff]   ;;  %v17740_v43 = vld [vmem:[%s21769_s8 + $0x58] sm:$0xff]  }
 0xe08   : > { %v18688_v49 = vpack.c.bf16 %v18684_v48, %v18684_v48 }
 0xe0a   : > { %14651 = vmatmul.mubr.msk.bf16.vlgmr.msra.gmra.mxu1 %vm518_vm4, %v18688_v49  ;;  %14652 = vmatmul.mubr.msk.bf16.vlgmr.msra.gmra.mxu0 %vm518_vm4, %v18688_v49 }
 0xe0b   : > { %1829 = vmatpush1.bf16.msra.mxu1 %v14639_v33  ;;  %1870 = vmatpush1.bf16.msra.mxu0 %v14641_v34  ;;  %v17730_v33 = vld [vmem:[%s21769_s8 + $0x30] sm:$0xff]  }
 0xe0c   : > { %1830 = vmatprep.subr.bf16.mxu1 %v14624_v22  ;;  %1871 = vmatprep.subr.bf16.mxu0 %v14626_v50  ;;  %v17731_v34 = vld [vmem:[%s21769_s8 + $0xb0] sm:$0xff]  }
 0xe0d   : > { %1848 = vmatprep.mubr.bf16.mxu1 %v18380_v0  ;;  %1889 = vmatprep.mubr.bf16.mxu0 %v18380_v0  ;;  %v17746_v22 = vld [vmem:[%s21769_s8 + $0x10] sm:$0xff]  }
 0xe0e   : > { %v17747_v50 = vld [vmem:[%s21769_s8 + $0x90] sm:$0xff]  }
 0xe0f   : > { %1831 = vmatpush1.bf16.msra.mxu1 %v14623_v55  ;;  %1872 = vmatpush1.bf16.msra.mxu0 %v14625_v56  ;;  %v17752_v55 = vld [vmem:[%s21769_s8 + $0x40] sm:$0xff]  }
 0xe10   : > { %1910 = vmatprep.subr.bf16.mxu1 %v14644_v57  ;;  %1951 = vmatprep.subr.bf16.mxu0 %v14646_v58  ;;  %v17753_v56 = vld [vmem:[%s21769_s8 + $0xc0] sm:$0xff]  }
 0xe11   : > { %v17754_v57 = vld [vmem:[%s21769_s8] sm:$0xff]  }
 0xe12   : > { %14653 = vmatmul.mubr.msk.bf16.vlgmr.msra.gmra.mxu1 %vm518_vm4, %v18688_v49  ;;  %14654 = vmatmul.mubr.msk.bf16.vlgmr.msra.gmra.mxu0 %vm518_vm4, %v18688_v49  ;;  %v17755_v58 = vld [vmem:[%s21769_s8 + $0x80] sm:$0xff]  }
 0xe13   : > { %1911 = vmatpush1.bf16.msra.mxu1 %v14643_v63  ;;  %1952 = vmatpush1.bf16.msra.mxu0 %v14645_v2  ;;  %v1483_v63 = vld [vmem:[%s21772_s11] ss:$8 sm:$0xf0] }
 0xe14   : > { %1912 = vmatprep.subr.bf16.mxu1 %v14628_v3  ;;  %1953 = vmatprep.subr.bf16.mxu0 %v14630_v5  ;;  %v18871_v2 = vor.u32 %v1483_v63, %v1482_v62  ;;  %v18874_v3 = vsub.s32 0, %v18863_v61  ;;  %v18877_v5 = vsub.s32 2, %v18863_v61  ;;  %v17766_v62 = vld [vmem:[%s21769_s8 + $0x128] sm:$0xff]  }
 0xe15   : > { %1930 = vmatprep.mubr.bf16.mxu1 %v18380_v0  ;;  %1971 = vmatprep.mubr.bf16.mxu0 %v18380_v0  ;;  %v17767_v63 = vld [vmem:[%s21769_s8 + $0x1a8] sm:$0xff]  }
 0xe16   : > { %v1494_v7 = vrot.slane %v18871_v2, %v18874_v3  ;;  %v1502_v8 = vrot.slane %v18871_v2, %v18877_v5  ;;  %v1498_v9 = vrot.slane %v18871_v2, %v18880_v6 }
 0xe17   : > { %1913 = vmatpush1.bf16.msra.mxu1 %v14627_v10  ;;  %1954 = vmatpush1.bf16.msra.mxu0 %v14629_v11  ;;  %v1506_v10 = vrot.slane %v18871_v2, %v18883_v4 }
 0xe18   : > { %1992 = vmatprep.subr.bf16.mxu1 %v14648_v12  ;;  %2033 = vmatprep.subr.bf16.mxu0 %v14650_v13 }
 0xe1a   : > { %14655 = vmatmul.mubr.msk.bf16.vlgmr.msra.gmra.mxu1 %vm518_vm4, %v18688_v49  ;;  %14656 = vmatmul.mubr.msk.bf16.vlgmr.msra.gmra.mxu0 %vm518_vm4, %v18688_v49 }
 0xe1b   : > { %1993 = vmatpush1.bf16.msra.mxu1 %v14647_v20  ;;  %2034 = vmatpush1.bf16.msra.mxu0 %v14649_v21  ;;  %v18894_v21 = vsub.s32 5, %v18863_v61 }
 0xe1c   : > { %1994 = vmatprep.subr.bf16.mxu1 %v14632_v23  ;;  %2035 = vmatprep.subr.bf16.mxu0 %v14634_v24  ;;  %v18897_v23 = vsub.s32 7, %v18863_v61 }
 0xe1d   : > { %2012 = vmatprep.mubr.bf16.mxu1 %v18380_v0  ;;  %2053 = vmatprep.mubr.bf16.mxu0 %v18380_v0 }
 0xe1f   : > { %1995 = vmatpush1.bf16.msra.mxu1 %v14631_v25  ;;  %2036 = vmatpush1.bf16.msra.mxu0 %v14633_v26 }
 0xe20   : > { %16379 = vmatprep.subr.bf16.mxu1 %v17724_v27  ;;  %16401 = vmatprep.subr.bf16.mxu0 %v17725_v28 }
 0xe22   : > { %14657 = vmatmul.mubr.msk.bf16.vlgmr.msra.gmra.mxu1 %vm518_vm4, %v18688_v49  ;;  %14658 = vmatmul.mubr.msk.bf16.vlgmr.msra.gmra.mxu0 %vm518_vm4, %v18688_v49  ;;  %v17745_v49 = vld [vmem:[%s21769_s8 + $0xd0] sm:$0xff]  }
 0xe23   : > { %16380 = vmatpush3.bf16.msra.mxu1 %v17726_v29  ;;  %16402 = vmatpush3.bf16.msra.mxu0 %v17727_v30 }
 0xe24   : > { %16381 = vmatprep.subr.bf16.mxu1 %v17728_v31  ;;  %16403 = vmatprep.subr.bf16.mxu0 %v17729_v32 }
 0xe27   : > { %16382 = vmatpush3.bf16.msra.mxu1 %v17730_v33  ;;  %16404 = vmatpush3.bf16.msra.mxu0 %v17731_v34  ;;  %v1514_v34 = vrot.slane %v18871_v2, %v18894_v21 }
 0xe28   : > { %16383 = vmatprep.subr.bf16.mxu1 %v17732_v35  ;;  %16405 = vmatprep.subr.bf16.mxu0 %v17733_v36  ;;  %v1522_v35 = vrot.slane %v18871_v2, %v18897_v23  ;;  %v17758_v36 = vld [vmem:[%s21769_s8 + $0x138] sm:$0xff]  }
 0xe2b   : > { %16384 = vmatpush3.bf16.msra.mxu1 %v17734_v37  ;;  %16406 = vmatpush3.bf16.msra.mxu0 %v17735_v38  ;;  %v17759_v37 = vld [vmem:[%s21769_s8 + $0x1b8] sm:$0xff]  }
 0xe2c   : > { %16385 = vmatprep.subr.bf16.mxu1 %v17736_v39  ;;  %16407 = vmatprep.subr.bf16.mxu0 %v17737_v40 }
 0xe2f   : > { %16386 = vmatpush3.bf16.msra.mxu1 %v17738_v41  ;;  %16408 = vmatpush3.bf16.msra.mxu0 %v17739_v42  ;;  %v17760_v42 = vld [vmem:[%s21769_s8 + $0x170] sm:$0xff]  }
 0xe30   : > { %16387 = vmatprep.subr.bf16.mxu1 %v17740_v43  ;;  %16409 = vmatprep.subr.bf16.mxu0 %v17741_v44  ;;  %v17761_v43 = vld [vmem:[%s21769_s8 + $0x1f0] sm:$0xff]  }
 0xe33   : > { %16388 = vmatpush3.bf16.msra.mxu1 %v17742_v45  ;;  %16410 = vmatpush3.bf16.msra.mxu0 %v17743_v46 }
 0xe34   : > { %16389 = vmatprep.subr.bf16.mxu1 %v17744_v47  ;;  %16411 = vmatprep.subr.bf16.mxu0 %v17745_v49  ;;  %v17762_v49 = vld [vmem:[%s21769_s8 + $0x130] sm:$0xff]  }
 0xe37   : > { %16390 = vmatpush3.bf16.msra.mxu1 %v17746_v22  ;;  %16412 = vmatpush3.bf16.msra.mxu0 %v17747_v50  ;;  %v17763_v22 = vld [vmem:[%s21769_s8 + $0x1b0] sm:$0xff]  }
 0xe38   : > { %16391 = vmatprep.subr.bf16.mxu1 %v17748_v51  ;;  %16413 = vmatprep.subr.bf16.mxu0 %v17749_v52  ;;  %v17764_v52 = vld [vmem:[%s21769_s8 + $0x168] sm:$0xff]  }
 0xe3b   : > { %16392 = vmatpush3.bf16.msra.mxu1 %v17750_v53  ;;  %16414 = vmatpush3.bf16.msra.mxu0 %v17751_v54  ;;  %v17765_v53 = vld [vmem:[%s21769_s8 + $0x1e8] sm:$0xff]  }
 0xe3c   : > { %16393 = vmatprep.subr.bf16.mxu1 %v17752_v55  ;;  %16415 = vmatprep.subr.bf16.mxu0 %v17753_v56 }
 0xe3f   : > { %16394 = vmatpush3.bf16.msra.mxu1 %v17754_v57  ;;  %16416 = vmatpush3.bf16.msra.mxu0 %v17755_v58 }
 0xe40   : > { %16423 = vmatprep.subr.bf16.mxu1 %v17756_v59  ;;  %16445 = vmatprep.subr.bf16.mxu0 %v17757_v60  ;;  %v14617_v60 = vld [vmem:[%s21772_s11 + $0x40] ss:$8 sm:$0xf] }
 0xeca   : > { %v1768_v11 = vpop.f32.mrf.mxu1  ;;  %v1809_v12 = vpop.f32.mrf.mxu0 }
 0xecb   : > { %v1769_v13 = vadd.f32 %v1768_v11, %v1494_v7  ;;  %v1810_v14 = vadd.f32 %v1809_v12, %v1502_v8  ;;  %v14618_v7 = vld [vmem:[%s21772_s11 + $0x40] ss:$8 sm:$0xf0] }
 0xecc   : > { %v1770_v17 = vpop.f32.mrf.mxu1  ;;  %v1811_v18 = vpop.f32.mrf.mxu0  ;;  %v17769_v11 = vld [vmem:[%s21769_s8 + $0x1e0] sm:$0xff]  }
 0xecd   : > { %v1771_v19 = vadd.f32 %v1770_v17, %v1498_v9  ;;  %v1812_v20 = vadd.f32 %v1811_v18, %v1506_v10  ;;  %v2062_v24 = vmax.f32 %v1769_v13, 0.0  ;;  %v2064_v25 = vmax.f32 %v1810_v14, 0.0  ;;  %v17768_v10 = vld [vmem:[%s21769_s8 + $0x160] sm:$0xff]  }
 0xece   : > { %v1772_v26 = vpop.f32.mrf.mxu1  ;;  %v1813_v27 = vpop.f32.mrf.mxu0  ;;  %v18954_v14 = vsub.s32 4, %v18863_v61  ;;  %v18957_v17 = vsub.s32 6, %v18863_v61  ;;  %v18959_v18 = vor.u32 %v14618_v7, %v14617_v60  ;;  %v17772_v61 = vld [vmem:[%s21769_s8 + $0x158] sm:$0xff]  }
 0xecf   : > { %v2063_v28 = vmax.f32 %v1771_v19, 0.0  ;;  %v2065_v29 = vmax.f32 %v1812_v20, 0.0  ;;  %v2078_v38 = vpack.c.bf16 %v2062_v24, %v2062_v24  ;;  %v2080_v39 = vpack.c.bf16 %v2064_v25, %v2064_v25  ;;  %v17770_v19 = vld [vmem:[%s21769_s8 + $0x120] sm:$0xff]   ;;  %v17773_v26 = vld [vmem:[%s21769_s8 + $0x1d8] sm:$0xff]  }
 0xed0   : > { %v1773_v30 = vpop.f32.mrf.mxu1  ;;  %v1814_v31 = vpop.f32.mrf.mxu0  ;;  %v17771_v20 = vld [vmem:[%s21769_s8 + $0x1a0] sm:$0xff]   ;;  %v1542_v27 = vrot.slane %v18959_v18, %v18954_v14 }
 0xed1   : > { %v2079_v32 = vpack.c.bf16 %v2063_v28, %v2063_v28  ;;  %v2081_v33 = vpack.c.bf16 %v2065_v29, %v2065_v29  ;;  %v1550_v28 = vrot.slane %v18959_v18, %v18957_v17  ;;  %v17774_v31 = vld [vmem:[%s21769_s8 + $0x118] sm:$0xff]  }
 0xed2   : > { %v18909_v40 = vpop.f32.mrf.mxu1  ;;  %v18911_v41 = vpop.f32.mrf.mxu0 }
 0xed3   : > { %3155 = vmatprep.mubr.bf16.mxu1 %v2079_v32  ;;  %3195 = vmatprep.mubr.bf16.mxu0 %v2081_v33  ;;  %v17775_v32 = vld [vmem:[%s21769_s8 + $0x198] sm:$0xff]  }
 0xed4   : > { %v1852_v44 = vpop.f32.mrf.mxu1  ;;  %v1893_v45 = vpop.f32.mrf.mxu0  ;;  %3156 = vmatmul.mubr.bf16.vlgmr.msra.gmra.mxu1 %v2078_v38  ;;  %3196 = vmatmul.mubr.bf16.vlgmr.msra.gmra.mxu0 %v2080_v39 }
 0xed5   : > { %v1853_v46 = vadd.f32 %v1852_v44, %v1514_v34  ;;  %v1894_v47 = vadd.f32 %v1893_v45, %v1522_v35  ;;  %16424 = vmatpush3.bf16.msra.mxu1 %v17758_v36  ;;  %16446 = vmatpush3.bf16.msra.mxu0 %v17759_v37  ;;  %v17776_v35 = vld [vmem:[%s21769_s8 + $0x150] sm:$0xff]   ;;  %v1510_v45 = vrot.slane %v18871_v2, %v18954_v14 }
 0xed6   : > { %v1854_v50 = vpop.f32.mrf.mxu1  ;;  %v1895_v51 = vpop.f32.mrf.mxu0  ;;  %16425 = vmatprep.subr.bf16.mxu1 %v17760_v42  ;;  %16447 = vmatprep.subr.bf16.mxu0 %v17761_v43  ;;  %v17777_v36 = vld [vmem:[%s21769_s8 + $0x1d0] sm:$0xff]  }
 0xed7   : > { %v2067_v54 = vmax.f32 %v1853_v46, 0.0  ;;  %v2069_v55 = vmax.f32 %v1894_v47, 0.0  ;;  %v17778_v43 = vld [vmem:[%s21769_s8 + $0x110] sm:$0xff]   ;;  %v1518_v46 = vrot.slane %v18871_v2, %v18957_v17  ;;  %v17781_v50 = vld [vmem:[%s21769_s8 + $0x1c8] sm:$0xff]   ;;  %v1530_v51 = vrot.slane %v18959_v18, %v18880_v6 }
 0xed8   : > { %v1855_v56 = vpop.f32.mrf.mxu1  ;;  %v1896_v57 = vpop.f32.mrf.mxu0  ;;  %v17779_v44 = vld [vmem:[%s21769_s8 + $0x190] sm:$0xff]  }
 0xed9   : > { %v2083_v58 = vpack.c.bf16 %v2067_v54, %v2067_v54  ;;  %v2085_v59 = vpack.c.bf16 %v2069_v55, %v2069_v55  ;;  %16426 = vmatpush3.bf16.msra.mxu1 %v17762_v49  ;;  %16448 = vmatpush3.bf16.msra.mxu0 %v17763_v22  ;;  %v17780_v22 = vld [vmem:[%s21769_s8 + $0x148] sm:$0xff]   ;;  %v1851_v56 = vadd.f32 %v18909_v40, %v1510_v45  ;;  %v17786_v40 = vld [vmem:[%s21769_s8 + $0x100] sm:$0xff]   ;;  %v17804_v45 = vld [vmem:[%s21769_s8 + $0x258] sm:$0xff]  }
 0xeda   : > { %v18943_v8 = vpop.f32.mrf.mxu1  ;;  %v18945_v9 = vpop.f32.mrf.mxu0  ;;  %16427 = vmatprep.subr.bf16.mxu1 %v17764_v52  ;;  %16449 = vmatprep.subr.bf16.mxu0 %v17765_v53  ;;  %v1538_v52 = vrot.slane %v18959_v18, %v18883_v4  ;;  %v17782_v54 = vld [vmem:[%s21769_s8 + $0x108] sm:$0xff]   ;;  %v1892_v57 = vadd.f32 %v18911_v41, %v1518_v46  ;;  %v17787_v41 = vld [vmem:[%s21769_s8 + $0x180] sm:$0xff]   ;;  %v17805_v46 = vld [vmem:[%s21769_s8 + $0x2d8] sm:$0xff]  }
 0xedb   : > { %3235 = vmatprep.mubr.bf16.mxu1 %v2083_v58  ;;  %3275 = vmatprep.mubr.bf16.mxu0 %v2085_v59  ;;  %v17783_v55 = vld [vmem:[%s21769_s8 + $0x188] sm:$0xff]   ;;  %v17784_v58 = vld [vmem:[%s21769_s8 + $0x140] sm:$0xff]  }
 0xedc   : > { %v1934_v12 = vpop.f32.mrf.mxu1  ;;  %v1975_v13 = vpop.f32.mrf.mxu0  ;;  %v17785_v59 = vld [vmem:[%s21769_s8 + $0x1c0] sm:$0xff]   ;;  %v2068_v7 = vmax.f32 %v1892_v57, 0.0  ;;  %v1554_v57 = vrot.slane %v18959_v18, %v18897_v23 }
 0xedd   : > { %16428 = vmatpush3.bf16.msra.mxu1 %v17766_v62  ;;  %16450 = vmatpush3.bf16.msra.mxu0 %v17767_v63  ;;  %v1935_v60 = vadd.f32 %v1934_v12, %v1530_v51  ;;  %v1976_v62 = vadd.f32 %v1975_v13, %v1538_v52  ;;  %v2066_v63 = vmax.f32 %v1851_v56, 0.0  ;;  %v17810_v51 = vld [vmem:[%s21769_s8 + $0x210] sm:$0xff]   ;;  %v1526_v52 = vrot.slane %v18959_v18, %v18874_v3 }
 0xede   : > { %v1936_v24 = vpop.f32.mrf.mxu1  ;;  %v1977_v25 = vpop.f32.mrf.mxu0  ;;  %16429 = vmatprep.subr.bf16.mxu1 %v17768_v10  ;;  %16451 = vmatprep.subr.bf16.mxu0 %v17769_v11  ;;  %v17788_v10 = vld [vmem:[%s21769_s8 + $0x278] sm:$0xff]   ;;  %v1546_v56 = vrot.slane %v18959_v18, %v18894_v21 }
 0xedf   : > { %v17789_v11 = vld [vmem:[%s21769_s8 + $0x2f8] sm:$0xff]   ;;  %v2071_v12 = vmax.f32 %v1935_v60, 0.0  ;;  %v2073_v13 = vmax.f32 %v1976_v62, 0.0  ;;  %v2084_v24 = vpack.c.bf16 %v2068_v7, %v2068_v7  ;;  %v17815_v60 = vld [vmem:[%s21769_s8 + $0x288] sm:$0xff]   ;;  %v17816_v62 = vld [vmem:[%s21769_s8 + $0x240] sm:$0xff]  }
 0xee0   : > { %v1937_v29 = vpop.f32.mrf.mxu1  ;;  %v1978_v30 = vpop.f32.mrf.mxu0  ;;  %v17791_v25 = vld [vmem:[%s21769_s8 + $0x2b8] sm:$0xff]  }
 0xee1   : > { %16430 = vmatpush3.bf16.msra.mxu1 %v17770_v19  ;;  %16452 = vmatpush3.bf16.msra.mxu0 %v17771_v20  ;;  %v17790_v19 = vld [vmem:[%s21769_s8 + $0x238] sm:$0xff]   ;;  %v2082_v20 = vpack.c.bf16 %v2066_v63, %v2066_v63  ;;  %v17794_v29 = vld [vmem:[%s21769_s8 + $0x230] sm:$0xff]   ;;  %v17818_v63 = vld [vmem:[%s21769_s8 + $0x200] sm:$0xff]  }
 0xee2   : > { %v2014_v33 = vpop.f32.mrf.mxu1  ;;  %v2055_v34 = vpop.f32.mrf.mxu0  ;;  %16431 = vmatprep.subr.bf16.mxu1 %v17772_v61  ;;  %16453 = vmatprep.subr.bf16.mxu0 %v17773_v26  ;;  %v2087_v61 = vpack.c.bf16 %v2071_v12, %v2071_v12  ;;  %v17792_v26 = vld [vmem:[%s21769_s8 + $0x270] sm:$0xff]  }
 0xee3   : > { %v18989_v37 = vadd.f32 %v2014_v33, %v1542_v27  ;;  %v18991_v38 = vadd.f32 %v2055_v34, %v1550_v28  ;;  %v17793_v27 = vld [vmem:[%s21769_s8 + $0x2f0] sm:$0xff]   ;;  %v2089_v28 = vpack.c.bf16 %v2073_v13, %v2073_v13  ;;  %v17798_v33 = vld [vmem:[%s21769_s8 + $0x228] sm:$0xff]   ;;  %v17822_v13 = vld [vmem:[%s21769_s8 + $0x338] sm:$0xff]  }
 0xee4   : > { %v18993_v39 = vpop.f32.mrf.mxu1  ;;  %v18995_v42 = vpop.f32.mrf.mxu0  ;;  %v17795_v30 = vld [vmem:[%s21769_s8 + $0x2b0] sm:$0xff]   ;;  %v17799_v34 = vld [vmem:[%s21769_s8 + $0x2a8] sm:$0xff]  }
 0xee5   : > { %16432 = vmatpush3.bf16.msra.mxu1 %v17774_v31  ;;  %16454 = vmatpush3.bf16.msra.mxu0 %v17775_v32  ;;  %v17796_v31 = vld [vmem:[%s21769_s8 + $0x268] sm:$0xff]  }
 0xee6   : > { %v2018_v47 = vpop.f32.mrf.mxu1  ;;  %v2059_v49 = vpop.f32.mrf.mxu0  ;;  %16433 = vmatprep.subr.bf16.mxu1 %v17776_v35  ;;  %16455 = vmatprep.subr.bf16.mxu0 %v17777_v36  ;;  %v17797_v32 = vld [vmem:[%s21769_s8 + $0x2e8] sm:$0xff]   ;;  %v17800_v35 = vld [vmem:[%s21769_s8 + $0x260] sm:$0xff]  }
 0xee7   : > { %v17801_v36 = vld [vmem:[%s21769_s8 + $0x2e0] sm:$0xff]   ;;  %v17806_v47 = vld [vmem:[%s21769_s8 + $0x218] sm:$0xff]  }
 0xee8   : > { %v2019_v53 = vpop.f32.mrf.mxu1  ;;  %v2060_v2 = vpop.f32.mrf.mxu0  ;;  %v17807_v49 = vld [vmem:[%s21769_s8 + $0x298] sm:$0xff]  }
 0xee9   : > { %16434 = vmatpush3.bf16.msra.mxu1 %v17778_v43  ;;  %16456 = vmatpush3.bf16.msra.mxu0 %v17779_v44  ;;  %v17802_v43 = vld [vmem:[%s21769_s8 + $0x220] sm:$0xff]   ;;  %v17811_v53 = vld [vmem:[%s21769_s8 + $0x290] sm:$0xff]   ;;  %v17812_v2 = vld [vmem:[%s21769_s8 + $0x248] sm:$0xff]  }
 0xeea   : > { %16435 = vmatprep.subr.bf16.mxu1 %v17780_v22  ;;  %16457 = vmatprep.subr.bf16.mxu0 %v17781_v50  ;;  %v17803_v44 = vld [vmem:[%s21769_s8 + $0x2a0] sm:$0xff]   ;;  %v17808_v22 = vld [vmem:[%s21769_s8 + $0x250] sm:$0xff]  }
 0xeeb   : > { %v17809_v50 = vld [vmem:[%s21769_s8 + $0x2d0] sm:$0xff]  }
 0xeed   : > { %16436 = vmatpush3.bf16.msra.mxu1 %v17782_v54  ;;  %16458 = vmatpush3.bf16.msra.mxu0 %v17783_v55  ;;  %v1534_v54 = vrot.slane %v18959_v18, %v18877_v5  ;;  %v17813_v55 = vld [vmem:[%s21769_s8 + $0x2c8] sm:$0xff]   ;;  %v17817_v18 = vld [vmem:[%s21769_s8 + $0x2c0] sm:$0xff]  }
 0xeee   : > { %16437 = vmatprep.subr.bf16.mxu1 %v17784_v58  ;;  %16459 = vmatprep.subr.bf16.mxu0 %v17785_v59  ;;  %v17814_v58 = vld [vmem:[%s21769_s8 + $0x208] sm:$0xff]   ;;  %v1933_v59 = vadd.f32 %v18943_v8, %v1526_v52  ;;  %v2058_v8 = vadd.f32 %v18995_v42, %v1554_v57  ;;  %v17850_v57 = vld [vmem:[%s21769_s8 + $0x300] sm:$0xff]  }
 0xeef   : > { %v17844_v52 = vld [vmem:[%s21769_s8 + $0x348] sm:$0xff]  }
 0xef0   : > { %v2070_v7 = vmax.f32 %v1933_v59, 0.0  ;;  %v2077_v12 = vmax.f32 %v2058_v8, 0.0  ;;  %v17851_v59 = vld [vmem:[%s21769_s8 + $0x380] sm:$0xff]  }
 0xef1   : > { %16438 = vmatpush3.bf16.msra.mxu1 %v17786_v40  ;;  %16460 = vmatpush3.bf16.msra.mxu0 %v17787_v41  ;;  %v1974_v40 = vadd.f32 %v18945_v9, %v1534_v54  ;;  %v2017_v41 = vadd.f32 %v18993_v39, %v1546_v56  ;;  %v17819_v9 = vld [vmem:[%s21769_s8 + $0x280] sm:$0xff]   ;;  %v17821_v39 = vld [vmem:[%s21769_s8 + $0x3f8] sm:$0xff]   ;;  %v17847_v54 = vld [vmem:[%s21769_s8 + $0x388] sm:$0xff]  }
 0xef2   : > { %16467 = vmatprep.subr.bf16.mxu1 %v17788_v10  ;;  %16489 = vmatprep.subr.bf16.mxu0 %v17789_v11  ;;  %v17820_v10 = vld [vmem:[%s21769_s8 + $0x378] sm:$0xff]   ;;  %v17849_v56 = vld [vmem:[%s21769_s8 + $0x3c0] sm:$0xff]  }
 0xef3   : > { %v2072_v11 = vmax.f32 %v1974_v40, 0.0  ;;  %v2075_v42 = vmax.f32 %v2017_v41, 0.0 }
 0xef4   : > { %3236 = vmatmul.mubr.bf16.vlgmr.msra.gmra.mxu1 %v2082_v20  ;;  %3276 = vmatmul.mubr.bf16.vlgmr.msra.gmra.mxu0 %v2084_v24  ;;  %v17823_v20 = vld [vmem:[%s21769_s8 + $0x3b8] sm:$0xff]  }
 0xef5   : > { %16468 = vmatpush3.bf16.msra.mxu1 %v17790_v19  ;;  %3315 = vmatprep.mubr.bf16.mxu1 %v2087_v61  ;;  %v2086_v19 = vpack.c.bf16 %v2070_v7, %v2070_v7  ;;  %v2088_v24 = vpack.c.bf16 %v2072_v11, %v2072_v11  ;;  %v2091_v61 = vpack.c.bf16 %v2075_v42, %v2075_v42 }
 0xef6   : > { %16490 = vmatpush3.bf16.msra.mxu0 %v17791_v25  ;;  %3355 = vmatprep.mubr.bf16.mxu0 %v2089_v28  ;;  %v17824_v25 = vld [vmem:[%s21769_s8 + $0x370] sm:$0xff]  }
 0xef7   : > { %16469 = vmatprep.subr.bf16.mxu1 %v17792_v26  ;;  %16491 = vmatprep.subr.bf16.mxu0 %v17793_v27  ;;  %v17825_v26 = vld [vmem:[%s21769_s8 + $0x3f0] sm:$0xff]   ;;  %v2093_v27 = vpack.c.bf16 %v2077_v12, %v2077_v12 }
 0xef8   : > { %v17826_v28 = vld [vmem:[%s21769_s8 + $0x330] sm:$0xff]  }
 0xef9   : > { %16470 = vmatpush3.bf16.msra.mxu1 %v17794_v29  ;;  %v17827_v29 = vld [vmem:[%s21769_s8 + $0x3b0] sm:$0xff]  }
 0xefa   : > { %16492 = vmatpush3.bf16.msra.mxu0 %v17795_v30  ;;  %16471 = vmatprep.subr.bf16.mxu1 %v17796_v31  ;;  %v17828_v30 = vld [vmem:[%s21769_s8 + $0x368] sm:$0xff]  }
 0xefb   : > { %16493 = vmatprep.subr.bf16.mxu0 %v17797_v32  ;;  %v17829_v31 = vld [vmem:[%s21769_s8 + $0x3e8] sm:$0xff]  }
 0xefc   : > { %v17830_v32 = vld [vmem:[%s21769_s8 + $0x328] sm:$0xff]  }
 0xefd   : > { %16472 = vmatpush3.bf16.msra.mxu1 %v17798_v33  ;;  %v17831_v33 = vld [vmem:[%s21769_s8 + $0x3a8] sm:$0xff]  }
 0xefe   : > { %16494 = vmatpush3.bf16.msra.mxu0 %v17799_v34  ;;  %16473 = vmatprep.subr.bf16.mxu1 %v17800_v35  ;;  %v17832_v34 = vld [vmem:[%s21769_s8 + $0x360] sm:$0xff]  }
 0xeff   : > { %16495 = vmatprep.subr.bf16.mxu0 %v17801_v36  ;;  %v17833_v35 = vld [vmem:[%s21769_s8 + $0x3e0] sm:$0xff]  }
 0xf00   : > { %v17834_v36 = vld [vmem:[%s21769_s8 + $0x320] sm:$0xff]  }
 0xf01   : > { %16474 = vmatpush3.bf16.msra.mxu1 %v17802_v43  ;;  %v17835_v43 = vld [vmem:[%s21769_s8 + $0x3a0] sm:$0xff]  }
 0xf02   : > { %16496 = vmatpush3.bf16.msra.mxu0 %v17803_v44  ;;  %16475 = vmatprep.subr.bf16.mxu1 %v17804_v45  ;;  %v17836_v44 = vld [vmem:[%s21769_s8 + $0x358] sm:$0xff]  }
 0xf03   : > { %16497 = vmatprep.subr.bf16.mxu0 %v17805_v46  ;;  %v17837_v45 = vld [vmem:[%s21769_s8 + $0x3d8] sm:$0xff]  }
 0xf04   : > { %v17838_v46 = vld [vmem:[%s21769_s8 + $0x318] sm:$0xff]  }
 0xf05   : > { %16476 = vmatpush3.bf16.msra.mxu1 %v17806_v47  ;;  %v17839_v47 = vld [vmem:[%s21769_s8 + $0x398] sm:$0xff]  }
 0xf06   : > { %16498 = vmatpush3.bf16.msra.mxu0 %v17807_v49  ;;  %16477 = vmatprep.subr.bf16.mxu1 %v17808_v22  ;;  %v17840_v49 = vld [vmem:[%s21769_s8 + $0x350] sm:$0xff]  }
 0xf07   : > { %16499 = vmatprep.subr.bf16.mxu0 %v17809_v50  ;;  %v17841_v22 = vld [vmem:[%s21769_s8 + $0x3d0] sm:$0xff]  }
 0xf08   : > { %v17842_v50 = vld [vmem:[%s21769_s8 + $0x310] sm:$0xff]  }
 0xf09   : > { %16478 = vmatpush3.bf16.msra.mxu1 %v17810_v51  ;;  %v17843_v51 = vld [vmem:[%s21769_s8 + $0x390] sm:$0xff]  }
 0xf0a   : > { %16500 = vmatpush3.bf16.msra.mxu0 %v17811_v53  ;;  %16479 = vmatprep.subr.bf16.mxu1 %v17812_v2  ;;  %v17845_v53 = vld [vmem:[%s21769_s8 + $0x3c8] sm:$0xff]  }
 0xf0b   : > { %16501 = vmatprep.subr.bf16.mxu0 %v17813_v55  ;;  %v17846_v2 = vld [vmem:[%s21769_s8 + $0x308] sm:$0xff]   ;;  %v17848_v55 = vld [vmem:[%s21769_s8 + $0x340] sm:$0xff]  }
 0xf0d   : > { %16480 = vmatpush3.bf16.msra.mxu1 %v17814_v58  ;;  %v2074_v58 = vmax.f32 %v18989_v37, 0.0 }
 0xf0e   : > { %16502 = vmatpush3.bf16.msra.mxu0 %v17815_v60  ;;  %16481 = vmatprep.subr.bf16.mxu1 %v17816_v62  ;;  %v2076_v60 = vmax.f32 %v18991_v38, 0.0  ;;  %v14659_v38 = vld [vmem:[%s21771_s10 + $0x4] ss:$0 sm:$0xff] }
 0xf0f   : > { %16503 = vmatprep.subr.bf16.mxu0 %v17817_v18  ;;  %v2090_v62 = vpack.c.bf16 %v2074_v58, %v2074_v58 }
 0xf10   : > { %v2092_v40 = vpack.c.bf16 %v2076_v60, %v2076_v60 }
 0xf11   : > { %16482 = vmatpush3.bf16.msra.mxu1 %v17818_v63 }
 0xf12   : > { %16504 = vmatpush3.bf16.msra.mxu0 %v17819_v9  ;;  %16511 = vmatprep.subr.bf16.mxu1 %v17820_v10 }
 0xf13   : > { %16533 = vmatprep.subr.bf16.mxu0 %v17821_v39 }
 0xf14   : > { %3316 = vmatmul.mubr.bf16.vlgmr.msra.gmra.mxu1 %v2086_v19 }
 0xf15   : > { %3356 = vmatmul.mubr.bf16.vlgmr.msra.gmra.mxu0 %v2088_v24  ;;  %16512 = vmatpush3.bf16.msra.mxu1 %v17822_v13 }
 0xf16   : > { %3395 = vmatprep.mubr.bf16.mxu1 %v2091_v61  ;;  %16534 = vmatpush3.bf16.msra.mxu0 %v17823_v20 }
 0xf17   : > { %3435 = vmatprep.mubr.bf16.mxu0 %v2093_v27  ;;  %16513 = vmatprep.subr.bf16.mxu1 %v17824_v25 }
 0xf18   : > { %16535 = vmatprep.subr.bf16.mxu0 %v17825_v26 }
 0xf19   : > { %16514 = vmatpush3.bf16.msra.mxu1 %v17826_v28 }
 0xf1a   : > { %16536 = vmatpush3.bf16.msra.mxu0 %v17827_v29  ;;  %16515 = vmatprep.subr.bf16.mxu1 %v17828_v30 }
 0xf1b   : > { %16537 = vmatprep.subr.bf16.mxu0 %v17829_v31 }
 0xf1d   : > { %16516 = vmatpush3.bf16.msra.mxu1 %v17830_v32 }
 0xf1e   : > { %16538 = vmatpush3.bf16.msra.mxu0 %v17831_v33  ;;  %16517 = vmatprep.subr.bf16.mxu1 %v17832_v34 }
 0xf1f   : > { %16539 = vmatprep.subr.bf16.mxu0 %v17833_v35 }
 0xf21   : > { %16518 = vmatpush3.bf16.msra.mxu1 %v17834_v36 }
 0xf22   : > { %16540 = vmatpush3.bf16.msra.mxu0 %v17835_v43  ;;  %16519 = vmatprep.subr.bf16.mxu1 %v17836_v44 }
 0xf23   : > { %16541 = vmatprep.subr.bf16.mxu0 %v17837_v45 }
 0xf25   : > { %16520 = vmatpush3.bf16.msra.mxu1 %v17838_v46 }
 0xf26   : > { %16542 = vmatpush3.bf16.msra.mxu0 %v17839_v47  ;;  %16521 = vmatprep.subr.bf16.mxu1 %v17840_v49 }
 0xf27   : > { %16543 = vmatprep.subr.bf16.mxu0 %v17841_v22 }
 0xf29   : > { %16522 = vmatpush3.bf16.msra.mxu1 %v17842_v50 }
 0xf2a   : > { %16544 = vmatpush3.bf16.msra.mxu0 %v17843_v51  ;;  %16523 = vmatprep.subr.bf16.mxu1 %v17844_v52 }
 0xf2b   : > { %16545 = vmatprep.subr.bf16.mxu0 %v17845_v53 }
 0xf2d   : > { %16524 = vmatpush3.bf16.msra.mxu1 %v17846_v2 }
 0xf2e   : > { %16546 = vmatpush3.bf16.msra.mxu0 %v17847_v54  ;;  %16525 = vmatprep.subr.bf16.mxu1 %v17848_v55 }
 0xf2f   : > { %16547 = vmatprep.subr.bf16.mxu0 %v17849_v56 }
 0xf31   : > { %16526 = vmatpush3.bf16.msra.mxu1 %v17850_v57 }
 0xf32   : > { %16548 = vmatpush3.bf16.msra.mxu0 %v17851_v59  ;;  %17311 = vmatprep.subr.bf16.mxu1 %v18381_v1 }
 0xf33   : > { %17319 = vmatprep.subr.mxu0 %v18381_v1 }
 0xf34   : > { %3396 = vmatmul.mubr.bf16.vlgmr.msra.gmra.mxu1 %v2090_v62 }
 0xf35   : > { %3436 = vmatmul.mubr.bf16.vlgmr.msra.gmra.mxu0 %v2092_v40  ;;  %17315 = vmatprep.mubr.msk.bf16.mxu1 %vm18382_vm1, %v18381_v1 }
 0xf36   : > { %17321 = vmatprep.mubr.msk.f32.mxu0 %vm18382_vm1, %v18381_v1 }
 0xf94   : > { %v16395_v37 = vpop.f32.mrf.mxu1  ;;  %v16417_v18 = vpop.f32.mrf.mxu0 }
 0xf96   : > { %v16396_v41 = vpop.f32.mrf.mxu1  ;;  %v16418_v8 = vpop.f32.mrf.mxu0 }
 0xf97   : > { %v16397_v63 = vadd.f32 %v16396_v41, %v16395_v37  ;;  %v16419_v11 = vadd.f32 %v16418_v8, %v16417_v18 }
 0xf98   : > { %v16398_v7 = vpop.f32.mrf.mxu1  ;;  %v16420_v9 = vpop.f32.mrf.mxu0 }
 0xf99   : > { %v3158_v10 = vadd.f32 %v16397_v63, %v14659_v38  ;;  %v17852_v63 = vld [vmem:[%s21763_s2 + $0x18] sm:$0xff]   ;;  %v17853_v7 = vld [vmem:[%s21763_s2 + $0x10] sm:$0xff]  }
 0xf9a   : > { %v16399_v39 = vpop.f32.mrf.mxu1  ;;  %v16421_v42 = vpop.f32.mrf.mxu0  ;;  %17312 = vmatpush3.bf16.msra.mxu1 %v17852_v63 }
 0xf9b   : > { %v3198_v12 = vadd.f32 %v16419_v11, %v3158_v10  ;;  %17313 = vmatprep.subr.bf16.mxu1 %v18381_v1  ;;  %v14788_v39 = vld [vmem:[%s21771_s10 + $0x5] ss:$0 sm:$0xff] }
 0xf9e   : > { %17314 = vmatpush3.bf16.msra.mxu1 %v17853_v7 }
 0xf9f   : > { %17329 = vmatprep.subr.mxu1 %v18381_v1 }
 0xfb4   : > { %v16439_v13 = vpop.f32.mrf.mxu1  ;;  %v16461_v19 = vpop.f32.mrf.mxu0 }
 0xfb6   : > { %v16440_v20 = vpop.f32.mrf.mxu1  ;;  %v16462_v24 = vpop.f32.mrf.mxu0 }
 0xfb7   : > { %v16441_v36 = vadd.f32 %v16440_v20, %v16439_v13  ;;  %v16463_v44 = vadd.f32 %v16462_v24, %v16461_v19  ;;  %v14794_v24 = vld [vmem:[%s21771_s10 + $0x7] ss:$0 sm:$0xff] }
 0xfb8   : > { %v16442_v25 = vpop.f32.mrf.mxu1  ;;  %v16464_v61 = vpop.f32.mrf.mxu0 }
 0xfb9   : > { %v3238_v43 = vadd.f32 %v16441_v36, %v3198_v12  ;;  %v14789_v12 = vld [vmem:[%s21771_s10 + $0x6] ss:$0 sm:$0xff] }
 0xfba   : > { %v16443_v26 = vpop.f32.mrf.mxu1  ;;  %v16465_v27 = vpop.f32.mrf.mxu0 }
 0xfbb   : > { %v3278_v46 = vadd.f32 %v16463_v44, %v3238_v43 }
 0xfd4   : > { %v16483_v28 = vpop.f32.mrf.mxu1 }
 0xfd5   : > { %v16505_v29 = vpop.f32.mrf.mxu0 }
 0xfd6   : > { %v16484_v30 = vpop.f32.mrf.mxu1 }
 0xfd7   : > { %v16506_v31 = vpop.f32.mrf.mxu0  ;;  %v16485_v45 = vadd.f32 %v16484_v30, %v16483_v28 }
 0xfd8   : > { %v16486_v32 = vpop.f32.mrf.mxu1  ;;  %v16507_v22 = vadd.f32 %v16506_v31, %v16505_v29 }
 0xfd9   : > { %v16508_v33 = vpop.f32.mrf.mxu0  ;;  %v3318_v47 = vadd.f32 %v16485_v45, %v3278_v46 }
 0xfda   : > { %v16487_v34 = vpop.f32.mrf.mxu1 }
 0xfdb   : > { %v16509_v35 = vpop.f32.mrf.mxu0  ;;  %v3358_v52 = vadd.f32 %v16507_v22, %v3318_v47 }
 0xff4   : > { %v16527_v49 = vpop.f32.mrf.mxu1 }
 0xff5   : > { %v16549_v50 = vpop.f32.mrf.mxu0 }
 0xff6   : > { %v16528_v51 = vpop.f32.mrf.mxu1 }
 0xff7   : > { %v16529_v53 = vadd.f32 %v16528_v51, %v16527_v49  ;;  %v16550_v2 = vpop.f32.mrf.mxu0 }
 0xff8   : > { %v16530_v54 = vpop.f32.mrf.mxu1  ;;  %v16551_v56 = vadd.f32 %v16550_v2, %v16549_v50 }
 0xff9   : > { %v3398_v55 = vadd.f32 %v16529_v53, %v3358_v52  ;;  %v16552_v57 = vpop.f32.mrf.mxu0 }
 0xffa   : > { %v16531_v58 = vpop.f32.mrf.mxu1 }
 0xffb   : > { %v3438_v59 = vadd.f32 %v16551_v56, %v3398_v55  ;;  %v16553_v60 = vpop.f32.mrf.mxu0 }
 0xffd   : > { %v3443_v62 = vadd.f32 %v3438_v59, %v18684_v48 }
 0xfff   : > { %v3446_v40 = vsel %vm518_vm4, %v3443_v62, 0.0 }
0x1000   : > { %3447 = vadd.xlane.f32.xlu1 %v3446_v40 }
0x1089   : > { %v3448_v37 = vpop.xlane.xlu1 %3447 }
0x108a   : > { %v3449_v18 = vmul.f32 0.03125, %v3448_v37  ;;  %v14799_v37 = vld [vmem:[%s21764_s3 + $0x14] sm:$0xf] }
0x108c   : > { %v3450_v38 = vsub.f32 %v3443_v62, %v3449_v18  ;;  %v14798_v62 = vld [vmem:[%s21764_s3 + $0x10] sm:$0xf]  ;;  %v3876_v18 = vsel %vm452_vm0, %v14799_v37, 0 }
0x108d   : > { %v3922_v40 = vsel %vm452_vm0, %v14798_v62, 0 }
0x108e   : > { %v3451_v41 = vmul.f32 %v3450_v38, %v3450_v38 }
0x1090   : > { %v3452_v8 = vsel %vm518_vm4, %v3451_v41, 0.0 }
0x1091   : > { %3453 = vadd.xlane.f32.xlu1 %v3452_v8 }
0x111a   : > { %v3454_v48 = vpop.xlane.xlu1 %3453 }
0x111b   : > { %v3455_v9 = vmul.f32 0.03125, %v3454_v48 }
0x111d   : > { %v3456_v10 = vadd.f32 1e-05, %v3455_v9 }
0x111f   : > { %18270 = vrsqrt.f32 %v3456_v10 }
0x112c   : > { %v18271_v11 = vpop.eup %18270 }
0x112d   : > { %v3458_v42 = vmul.f32 %v18271_v11, %v3450_v38 }
0x112f   : > { %v3463_v13 = vmul.f32 %v14788_v39, %v3458_v42 }
0x1131   : > { %v19269_v19 = vadd.f32 %v14789_v12, %v3463_v13 }
0x1133   : > { %v3469_v20 = vpack.c.bf16 %v19269_v19, %v19269_v19 }
0x1135   : > { %17316 = vmatmul.mubr.msk.bf16.vlgmr.msra.gmra.mxu1 %vm518_vm4, %v3469_v20 }
0x1136   : > { %17331 = vmatprep.mubr.msk.f32.mxu1 %vm18382_vm1, %v18381_v1 }
0x11f5   : > { %v3529_v25 = vpop.f32.mrf.mxu1 }
0x11f6   : > { %v19279_v61 = vadd.f32 %v14794_v24, %v3529_v25 }
0x11f7   : > { %v17317_v26 = vpop.f32.mrf.mxu1 }
0x11f8   : > { %3708 = vrot.lane.b32.xlu1 %v19279_v61, %s21795_s29  ;;  %3542 = vrot.lane.b32.xlu0 %v19279_v61, %s21793_s26  ;;  %s21811_s26 = smov 96  }
0x11f9   : > { %v3532_v27 = vpop.f32.mrf.mxu1 }
0x11fb   : > { %v17318_v28 = vpop.f32.mrf.mxu1 }
0x11fc   : > { %3706 = vrot.lane.b32.xlu0 %v19279_v61, %s21791_s28  ;;  %s21812_s28 = smov 120  }
0x126a   : > { %v3709_v29 = vpop.permute.xlu1 %3708  ;;  %v3543_v30 = vpop.permute.xlu0 %3542 }
0x126b   : > { %17320 = vmatpush3.xpose.msk.msra.mxu0 %vm570_vm5, %v3543_v30  ;;  %17330 = vmatpush3.xpose.msk.msra.mxu1 %vm570_vm5, %v3709_v29 }
0x126c   : > { %17324 = vmatprep.subr.mxu0 %v18381_v1  ;;  %17339 = vmatprep.subr.bf16.mxu1 %v18381_v1 }
0x126e   : > { %17322 = vmatmul.mubr.msk.f32.vlgmr.msra.gmra.mxu0 %vm570_vm5, %v19279_v61  ;;  %v3707_v31 = vpop.permute.xlu0 %3706 }
0x126f   : > { %17332 = vmatmul.mubr.msk.f32.vlgmr.msra.gmra.mxu1 %vm570_vm5, %v3707_v31  ;;  %17326 = vmatprep.mubr.msk.f32.mxu0 %vm18382_vm1, %v18381_v1 }
0x1270   : > { %17341 = vmatprep.mubr.msk.bf16.mxu1 %vm18382_vm1, %v18381_v1  ;;  %17340 = vmatpush3.bf16.msra.mxu1 %v3876_v18 }
0x1271   : > { %17351 = vmatprep.subr.mxu1 %v18381_v1 }
0x132e   : > { %v3614_v32 = vpop.f32.mrf.mxu0 }
0x132f   : > { %v3780_v33 = vpop.f32.mrf.mxu1  ;;  %v3618_v34 = vsel %vm570_vm5, %v3614_v32, -inf }
0x1330   : > { %3619 = vmax.xlane.f32.xlu0 %v3618_v34  ;;  %v17323_v35 = vpop.f32.mrf.mxu0  ;;  %v3784_v36 = vsel %vm570_vm5, %v3780_v33, -inf }
0x1331   : > { %3785 = vmax.xlane.f32.xlu1 %v3784_v36  ;;  %v17333_v43 = vpop.f32.mrf.mxu1 }
0x1342   : > { %3795 = vrot.lane.b32.xlu1 %v19279_v61, %s21789_s30  ;;  %s21814_s30 = smov 64  }
0x1346   : > { %3964 = vrot.lane.b32.xlu1 %v19279_v61, %s21785_s13 }
0x13b9   : > { %v3620_v44 = vpop.xlane.xlu0 %3619 }
0x13ba   : > { %v3621_v45 = vsub.f32 %v3614_v32, %v3620_v44  ;;  %v3786_v46 = vpop.xlane.xlu1 %3785 }
0x13bb   : > { %v3787_v47 = vsub.f32 %v3780_v33, %v3786_v46 }
0x13bc   : > { %v3622_v49 = vmul.f32 1.442695, %v3621_v45 }
0x13bd   : > { %v3788_v22 = vmul.f32 1.442695, %v3787_v47  ;;  %v14800_v47 = vld [vmem:[%s21764_s3 + $0x18] sm:$0xf] }
0x13be   : > { %18272 = vpow2.f32 %v3622_v49  ;;  %v3796_v58 = vpop.permute.xlu1 %3795  ;;  %v4134_v49 = vsel %vm452_vm0, %v14800_v47, 0 }
0x13bf   : > { %18274 = vpow2.f32 %v3788_v22 }
0x13c2   : > { %v3965_v10 = vpop.permute.xlu1 %3964 }
0x13cb   : > { %v18273_v50 = vpop.eup %18272 }
0x13cc   : > { %v3624_v51 = vsel %vm570_vm5, %v18273_v50, 0.0  ;;  %v18275_v52 = vpop.eup %18274 }
0x13cd   : > { %3625 = vadd.xlane.f32.xlu0 %v3624_v51  ;;  %v3790_v53 = vsel %vm570_vm5, %v18275_v52, 0.0 }
0x13d1   : > { %3791 = vadd.xlane.f32.xlu0 %v3790_v53 }
0x13e7   : > { %3629 = vrot.lane.b32.xlu0 %v19279_v61, %s21787_s27  ;;  %s21813_s27 = smov 56  }
0x13eb   : > { %3966 = vrot.lane.b32.xlu0 %v19279_v61, %s21806_s17 }
0x1456   : > { %v3626_v2 = vpop.xlane.xlu0 %3625 }
0x1457   : > { %18276 = vrcp.f32 %v3626_v2 }
0x145a   : > { %v3792_v54 = vpop.xlane.xlu0 %3791 }
0x145b   : > { %18278 = vrcp.f32 %v3792_v54 }
0x145e   : > { %v3630_v55 = vpop.permute.xlu0 %3629 }
0x145f   : > { %17325 = vmatpush3.msra.mxu0 %v3630_v55 }
0x1460   : > { %17334 = vmatprep.subr.mxu0 %v18381_v1 }
0x1462   : > { %v3967_v9 = vpop.permute.xlu0 %3966 }
0x1464   : > { %v18277_v56 = vpop.eup %18276 }
0x1465   : > { %v3628_v57 = vmul.f32 %v18277_v56, %v18273_v50 }
0x1467   : > { %17327 = vmatmul.mubr.msk.f32.vlgmr.msra.gmra.mxu0 %vm570_vm5, %v3628_v57 }
0x1468   : > { %v18279_v59 = vpop.eup %18278  ;;  %17335 = vmatpush3.msra.mxu0 %v3796_v58  ;;  %17336 = vmatprep.mubr.msk.f32.mxu0 %vm18382_vm1, %v18381_v1 }
0x1469   : > { %v3794_v60 = vmul.f32 %v18279_v59, %v18275_v52  ;;  %17345 = vmatprep.subr.bf16.mxu0 %v18381_v1 }
0x146b   : > { %17337 = vmatmul.mubr.msk.f32.vlgmr.msra.gmra.mxu0 %vm570_vm5, %v3794_v60 }
0x146c   : > { %17347 = vmatprep.mubr.msk.bf16.mxu0 %vm18382_vm1, %v18381_v1  ;;  %17346 = vmatpush3.bf16.msra.mxu0 %v3922_v40 }
0x146d   : > { %17356 = vmatprep.subr.mxu0 %v18381_v1 }
0x1527   : > { %v3701_v38 = vpop.f32.mrf.mxu0 }
0x1528   : > { %v3705_v41 = vpack.c.bf16 %v3701_v38, %v3701_v38 }
0x1529   : > { %v17328_v8 = vpop.f32.mrf.mxu0 }
0x152a   : > { %17348 = vmatmul.mubr.msk.bf16.vlgmr.msra.gmra.mxu0 %vm570_vm5, %v3705_v41 }
0x152b   : > { %v3867_v63 = vpop.f32.mrf.mxu0  ;;  %17358 = vmatprep.mubr.msk.f32.mxu0 %vm18382_vm1, %v18381_v1 }
0x152c   : > { %v3871_v7 = vpack.c.bf16 %v3867_v63, %v3867_v63  ;;  %v14801_v63 = vld [vmem:[%s21764_s3 + $0x1c] sm:$0xf] }
0x152d   : > { %v17338_v48 = vpop.f32.mrf.mxu0 }
0x152e   : > { %17342 = vmatmul.mubr.msk.bf16.vlgmr.msra.gmra.mxu1 %vm570_vm5, %v3871_v7 }
0x152f   : > { %17352 = vmatpush3.xpose.msk.msra.mxu1 %vm570_vm5, %v3967_v9  ;;  %17353 = vmatprep.mubr.msk.f32.mxu1 %vm18382_vm1, %v18381_v1 }
0x1530   : > { %17361 = vmatprep.subr.bf16.mxu1 %v18381_v1 }
0x1536   : > { %17354 = vmatmul.mubr.msk.f32.vlgmr.msra.gmra.mxu1 %vm570_vm5, %v3965_v10  ;;  %v14818_v10 = vld [vmem:[%s21771_s10 + $0x8] ss:$0 sm:$0xff] }
0x1537   : > { %17363 = vmatprep.mubr.msk.bf16.mxu1 %vm18382_vm1, %v18381_v1  ;;  %17362 = vmatpush3.bf16.msra.mxu1 %v4134_v49  ;;  %v14830_v49 = vld [vmem:[%s21768_s7 + $0x148] sm:$0xff] }
0x1538   : > { %17377 = vmatprep.subr.bf16.mxu1 %v18381_v1 }
0x15ea   : > { %v3958_v11 = vpop.f32.mrf.mxu0 }
0x15ec   : > { %v17349_v39 = vpop.f32.mrf.mxu0 }
0x15ee   : > { %v3912_v42 = vpop.f32.mrf.mxu1  ;;  %v3961_v12 = vpop.f32.mrf.mxu0 }
0x15ef   : > { %v3959_v13 = vadd.f32 %v3958_v11, %v3912_v42 }
0x15f0   : > { %v17343_v20 = vpop.f32.mrf.mxu1  ;;  %v17350_v24 = vpop.f32.mrf.mxu0 }
0x15f2   : > { %v3915_v25 = vpop.f32.mrf.mxu1 }
0x15f4   : > { %v17344_v26 = vpop.f32.mrf.mxu1 }
0x15f6   : > { %v4038_v27 = vpop.f32.mrf.mxu1 }
0x15f7   : > { %v4042_v28 = vsel %vm570_vm5, %v4038_v27, -inf }
0x15f8   : > { %4043 = vmax.xlane.f32.xlu0 %v4042_v28  ;;  %v17355_v29 = vpop.f32.mrf.mxu1 }
0x160e   : > { %4053 = vrot.lane.b32.xlu0 %v19279_v61, %s21807_s16 }
0x1612   : > { %4177 = vrot.lane.b32.xlu0 %v19279_v61, %s21808_s14 }
0x1681   : > { %v4044_v30 = vpop.xlane.xlu0 %4043 }
0x1682   : > { %v4045_v31 = vsub.f32 %v4038_v27, %v4044_v30 }
0x1684   : > { %v4046_v32 = vmul.f32 1.442695, %v4045_v31  ;;  %v14837_v31 = vld [vmem:[%s21768_s7 + $0x180] sm:$0xff] }
0x1685   : > { %v4054_v33 = vpop.permute.xlu0 %4053 }
0x1686   : > { %18280 = vpow2.f32 %v4046_v32  ;;  %17357 = vmatpush3.msra.mxu0 %v4054_v33  ;;  %v14845_v32 = vld [vmem:[%s21768_s7 + $0x1c0] sm:$0xff] }
0x1687   : > { %17367 = vmatprep.subr.mxu0 %v18381_v1  ;;  %v14874_v33 = vcombine.high %v14837_v31, %v14845_v32 }
0x1689   : > { %v4178_v46 = vpop.permute.xlu0 %4177 }
0x1693   : > { %v18281_v34 = vpop.eup %18280 }
0x1694   : > { %v4048_v35 = vsel %vm570_vm5, %v18281_v34, 0.0 }
0x1695   : > { %4049 = vadd.xlane.f32.xlu1 %v4048_v35  ;;  %v14873_v35 = vcombine.low %v14837_v31, %v14845_v32 }
0x16a6   : > { %4179 = vrot.lane.b32.xlu1 %v19279_v61, %s21809_s19 }
0x171e   : > { %v4050_v36 = vpop.xlane.xlu1 %4049 }
0x171f   : > { %18282 = vrcp.f32 %v4050_v36 }
0x1722   : > { %v4180_v45 = vpop.permute.xlu1 %4179 }
0x172c   : > { %v18283_v43 = vpop.eup %18282 }
0x172d   : > { %v4052_v44 = vmul.f32 %v18283_v43, %v18281_v34  ;;  %v14846_v34 = vld [vmem:[%s21768_s7 + $0x1c8] sm:$0xff] }
0x172f   : > { %17359 = vmatmul.mubr.msk.f32.vlgmr.msra.gmra.mxu0 %vm570_vm5, %v4052_v44  ;;  %v14821_v44 = vld [vmem:[%s21768_s7 + $0x100] sm:$0xff] }
0x1730   : > { %17368 = vmatpush3.xpose.msk.msra.mxu0 %vm570_vm5, %v4180_v45  ;;  %17369 = vmatprep.mubr.msk.f32.mxu0 %vm18382_vm1, %v18381_v1  ;;  %v14829_v45 = vld [vmem:[%s21768_s7 + $0x140] sm:$0xff] }
0x1731   : > { %17372 = vmatprep.subr.mxu0 %v18381_v1  ;;  %v14858_v47 = vcombine.high %v14821_v44, %v14829_v45 }
0x1733   : > { %17370 = vmatmul.mubr.msk.f32.vlgmr.msra.gmra.mxu0 %vm570_vm5, %v4178_v46  ;;  %v14822_v46 = vld [vmem:[%s21768_s7 + $0x108] sm:$0xff] }
0x1734   : > { %17374 = vmatprep.mubr.msk.f32.mxu0 %vm18382_vm1, %v18381_v1 }
0x17ef   : > { %v4125_v22 = vpop.f32.mrf.mxu0 }
0x17f0   : > { %v4129_v50 = vpack.c.bf16 %v4125_v22, %v4125_v22  ;;  %v14857_v22 = vcombine.low %v14821_v44, %v14829_v45 }
0x17f1   : > { %v17360_v51 = vpop.f32.mrf.mxu0 }
0x17f2   : > { %17364 = vmatmul.mubr.msk.bf16.vlgmr.msra.gmra.mxu1 %vm570_vm5, %v4129_v50  ;;  %v14859_v50 = vcombine.low %v14822_v46, %v14830_v49  ;;  %v14860_v51 = vcombine.high %v14822_v46, %v14830_v49  ;;  %v14827_v49 = vld [vmem:[%s21768_s7 + $0x130] sm:$0xff] }
0x17f3   : > { %v4251_v52 = vpop.f32.mrf.mxu0  ;;  %17379 = vmatprep.mubr.msk.bf16.mxu1 %vm18382_vm1, %v18381_v1 }
0x17f4   : > { %v4255_v53 = vsel %vm570_vm5, %v4251_v52, -inf }
0x17f5   : > { %4256 = vmax.xlane.f32.xlu1 %v4255_v53  ;;  %v17371_v2 = vpop.f32.mrf.mxu0  ;;  %v14847_v53 = vld [vmem:[%s21768_s7 + $0x1d0] sm:$0xff] }
0x17f6   : > { %v14840_v2 = vld [vmem:[%s21768_s7 + $0x198] sm:$0xff] }
0x187e   : > { %v4257_v54 = vpop.xlane.xlu1 %4256 }
0x187f   : > { %v4258_v55 = vsub.f32 %v4251_v52, %v4257_v54  ;;  %v14839_v52 = vld [vmem:[%s21768_s7 + $0x190] sm:$0xff] }
0x1880   : > { %v14877_v54 = vcombine.low %v14839_v52, %v14847_v53 }
0x1881   : > { %v4259_v56 = vmul.f32 1.442695, %v4258_v55  ;;  %v14878_v55 = vcombine.high %v14839_v52, %v14847_v53 }
0x1883   : > { %18284 = vpow2.f32 %v4259_v56  ;;  %v14848_v56 = vld [vmem:[%s21768_s7 + $0x1d8] sm:$0xff] }
0x1890   : > { %v18285_v57 = vpop.eup %18284 }
0x1891   : > { %v4261_v58 = vsel %vm570_vm5, %v18285_v57, 0.0 }
0x1892   : > { %4262 = vadd.xlane.f32.xlu0 %v4261_v58  ;;  %v14880_v58 = vcombine.high %v14840_v2, %v14848_v56 }
0x18a8   : > { %4266 = vrot.lane.b32.xlu0 %v19279_v61, %s21810_s18  ;;  %v4347_v61 = vsel %vm452_vm0, %v14801_v63, 0  ;;  %v14831_v63 = vld [vmem:[%s21768_s7 + $0x150] sm:$0xff] }
0x18a9   : > { %17378 = vmatpush3.bf16.msra.mxu1 %v4347_v61  ;;  %v14824_v61 = vld [vmem:[%s21768_s7 + $0x118] sm:$0xff] }
0x18b2   : > { %v4170_v59 = vpop.f32.mrf.mxu1 }
0x18b3   : > { %v4176_v60 = vadd.f32 %v4170_v59, %v3959_v13 }
0x18b4   : > { %v17365_v62 = vpop.f32.mrf.mxu1 }
0x18b6   : > { %v4173_v40 = vpop.f32.mrf.mxu1 }
0x18b8   : > { %v17366_v37 = vpop.f32.mrf.mxu1 }
0x18b9   : > { %v14819_v37 = vld [vmem:[%s21771_s10 + $0x9] ss:$0 sm:$0xff] }
0x191b   : > { %v4263_v18 = vpop.xlane.xlu0 %4262 }
0x191c   : > { %18286 = vrcp.f32 %v4263_v18 }
0x191f   : > { %v4267_v38 = vpop.permute.xlu0 %4266 }
0x1920   : > { %17373 = vmatpush3.msra.mxu0 %v4267_v38  ;;  %v14820_v38 = vld [vmem:[%s21771_s10 + $0xa] ss:$0 sm:$0xff] }
0x1921   : > { %4720 = vmatprep.subr.bf16.mxu0 %v14874_v33 }
0x1929   : > { %v18287_v41 = vpop.eup %18286 }
0x192a   : > { %v4265_v8 = vmul.f32 %v18287_v41, %v18285_v57  ;;  %v14879_v57 = vcombine.low %v14840_v2, %v14848_v56 }
0x192c   : > { %17375 = vmatmul.mubr.msk.f32.vlgmr.msra.gmra.mxu0 %vm570_vm5, %v4265_v8  ;;  %v14823_v8 = vld [vmem:[%s21768_s7 + $0x110] sm:$0xff] }
0x192d   : > { %4740 = vmatprep.mubr.bf16.mxu0 %v18380_v0  ;;  %4721 = vmatpush1.bf16.msra.mxu0 %v14873_v35  ;;  %v14851_v35 = vld [vmem:[%s21768_s7 + $0x1f0] sm:$0xff] }
0x192e   : > { %4722 = vmatprep.subr.bf16.mxu0 %v14858_v47 }
0x1931   : > { %4723 = vmatpush1.bf16.msra.mxu0 %v14857_v22  ;;  %v14835_v22 = vld [vmem:[%s21768_s7 + $0x170] sm:$0xff] }
0x1932   : > { %4802 = vmatprep.subr.bf16.mxu0 %v14878_v55  ;;  %v14870_v2 = vcombine.high %v14827_v49, %v14835_v22  ;;  %v14869_v55 = vcombine.low %v14827_v49, %v14835_v22 }
0x19ec   : > { %v4338_v7 = vpop.f32.mrf.mxu0 }
0x19ed   : > { %v4342_v48 = vpack.c.bf16 %v4338_v7, %v4338_v7  ;;  %v14832_v7 = vld [vmem:[%s21768_s7 + $0x158] sm:$0xff] }
0x19ee   : > { %v17376_v9 = vpop.f32.mrf.mxu0 }
0x19ef   : > { %17380 = vmatmul.mubr.msk.bf16.vlgmr.msra.gmra.mxu1 %vm570_vm5, %v4342_v48 }
0x19f0   : > { %4781 = vmatprep.mubr.bf16.mxu1 %v18380_v0 }
0x1aaf   : > { %v4383_v11 = vpop.f32.mrf.mxu1 }
0x1ab0   : > { %v4389_v39 = vadd.f32 %v4383_v11, %v4176_v60  ;;  %v14864_v11 = vcombine.high %v14824_v61, %v14832_v7 }
0x1ab1   : > { %v17381_v42 = vpop.f32.mrf.mxu1 }
0x1ab2   : > { %v4394_v12 = vadd.f32 %v14818_v10, %v4389_v39  ;;  %v14862_v10 = vcombine.high %v14823_v8, %v14831_v63  ;;  %v14841_v39 = vld [vmem:[%s21768_s7 + $0x1a0] sm:$0xff] }
0x1ab3   : > { %v4386_v13 = vpop.f32.mrf.mxu1  ;;  %v14849_v42 = vld [vmem:[%s21768_s7 + $0x1e0] sm:$0xff] }
0x1ab4   : > { %v4395_v20 = vadd.f32 %v4394_v12, %v19269_v19  ;;  %v14838_v19 = vld [vmem:[%s21768_s7 + $0x188] sm:$0xff]  ;;  %v14881_v31 = vcombine.low %v14841_v39, %v14849_v42 }
0x1ab5   : > { %v17382_v24 = vpop.f32.mrf.mxu1  ;;  %v14875_v36 = vcombine.low %v14838_v19, %v14846_v34  ;;  %v14876_v43 = vcombine.high %v14838_v19, %v14846_v34  ;;  %v14842_v12 = vld [vmem:[%s21768_s7 + $0x1a8] sm:$0xff]  ;;  %v14843_v34 = vld [vmem:[%s21768_s7 + $0x1b0] sm:$0xff] }
0x1ab6   : > { %v4398_v25 = vsel %vm518_vm4, %v4395_v20, 0.0  ;;  %v14850_v13 = vld [vmem:[%s21768_s7 + $0x1e8] sm:$0xff]  ;;  %v14863_v24 = vcombine.low %v14824_v61, %v14832_v7  ;;  %v14886_v46 = vcombine.high %v14843_v34, %v14851_v35  ;;  %v14885_v52 = vcombine.low %v14843_v34, %v14851_v35  ;;  %v17866_v61 = vld [vmem:[%s21769_s8 + $0x460] sm:$0xff]   ;;  %v17887_v34 = vld [vmem:[%s21769_s8 + $0x5f8] sm:$0xff]  }
0x1ab7   : > { %4399 = vadd.xlane.f32.xlu1 %v4398_v25  ;;  %4761 = vmatprep.subr.bf16.mxu1 %v14876_v43  ;;  %v14882_v25 = vcombine.high %v14841_v39, %v14849_v42  ;;  %v14883_v32 = vcombine.low %v14842_v12, %v14850_v13  ;;  %v14852_v43 = vld [vmem:[%s21768_s7 + $0x1f8] sm:$0xff]  ;;  %v17867_v7 = vld [vmem:[%s21769_s8 + $0x4e0] sm:$0xff]  }
0x1ab8   : > { %4762 = vmatpush1.bf16.msra.mxu1 %v14875_v36  ;;  %v14844_v36 = vld [vmem:[%s21768_s7 + $0x1b8] sm:$0xff] }
0x1ab9   : > { %4763 = vmatprep.subr.bf16.mxu1 %v14860_v51  ;;  %v14888_v47 = vcombine.high %v14844_v36, %v14852_v43  ;;  %v14836_v51 = vld [vmem:[%s21768_s7 + $0x178] sm:$0xff]  ;;  %v14887_v53 = vcombine.low %v14844_v36, %v14852_v43 }
0x1aba   : > { %v17871_v39 = vld [vmem:[%s21769_s8 + $0x4d8] sm:$0xff]  }
0x1abb   : > { %v17872_v42 = vld [vmem:[%s21769_s8 + $0x418] sm:$0xff]  }
0x1abc   : > { %4764 = vmatpush1.bf16.msra.mxu1 %v14859_v50  ;;  %v14828_v50 = vld [vmem:[%s21768_s7 + $0x138] sm:$0xff] }
0x1abd   : > { %4843 = vmatprep.subr.bf16.mxu1 %v14880_v58  ;;  %v14871_v56 = vcombine.low %v14828_v50, %v14836_v51  ;;  %v17855_v58 = vld [vmem:[%s21769_s8 + $0x4f8] sm:$0xff]  }
0x1abe   : > { %v14853_v35 = vld [vmem:[%s21772_s11 + $0x1] ss:$8 sm:$0xf] }
0x1abf   : > { %v14854_v36 = vld [vmem:[%s21772_s11 + $0x1] ss:$8 sm:$0xf0] }
0x1ac0   : > { %v19620_v43 = vor.u32 %v14854_v36, %v14853_v35  ;;  %v14855_v35 = vld [vmem:[%s21772_s11 + $0x41] ss:$8 sm:$0xf] }
0x1ac1   : > { %v17896_v36 = vld [vmem:[%s21769_s8 + $0x528] sm:$0xff]  }
0x1b40   : > { %v4400_v26 = vpop.xlane.xlu1 %4399 }
0x1b41   : > { %v4401_v27 = vmul.f32 0.03125, %v4400_v26  ;;  %v14884_v26 = vcombine.high %v14842_v12, %v14850_v13  ;;  %v17873_v12 = vld [vmem:[%s21769_s8 + $0x498] sm:$0xff]   ;;  %v17874_v13 = vld [vmem:[%s21769_s8 + $0x450] sm:$0xff]  }
0x1b43   : > { %v4402_v28 = vsub.f32 %v4395_v20, %v4401_v27  ;;  %v14861_v20 = vcombine.low %v14823_v8, %v14831_v63  ;;  %v14825_v27 = vld [vmem:[%s21768_s7 + $0x120] sm:$0xff]  ;;  %v17864_v8 = vld [vmem:[%s21769_s8 + $0x428] sm:$0xff]  }
0x1b44   : > { %v17865_v63 = vld [vmem:[%s21769_s8 + $0x4a8] sm:$0xff]  }
0x1b45   : > { %v4403_v29 = vmul.f32 %v4402_v28, %v4402_v28 }
0x1b47   : > { %v4404_v30 = vsel %vm518_vm4, %v4403_v29, 0.0  ;;  %v14826_v29 = vld [vmem:[%s21768_s7 + $0x128] sm:$0xff] }
0x1b48   : > { %4405 = vadd.xlane.f32.xlu1 %v4404_v30  ;;  %v14834_v30 = vld [vmem:[%s21768_s7 + $0x168] sm:$0xff] }
0x1b49   : > { %v14868_v33 = vcombine.high %v14826_v29, %v14834_v30  ;;  %v14867_v45 = vcombine.low %v14826_v29, %v14834_v30  ;;  %v17881_v29 = vld [vmem:[%s21769_s8 + $0x488] sm:$0xff]   ;;  %v17882_v30 = vld [vmem:[%s21769_s8 + $0x440] sm:$0xff]  }
0x1bd1   : > { %v4406_v59 = vpop.xlane.xlu1 %4405 }
0x1bd2   : > { %v4407_v60 = vmul.f32 0.03125, %v4406_v59  ;;  %v17856_v59 = vld [vmem:[%s21769_s8 + $0x438] sm:$0xff]  }
0x1bd4   : > { %v4408_v62 = vadd.f32 1e-05, %v4407_v60  ;;  %v17857_v60 = vld [vmem:[%s21769_s8 + $0x4b8] sm:$0xff]  }
0x1bd6   : > { %18288 = vrsqrt.f32 %v4408_v62  ;;  %v17858_v62 = vld [vmem:[%s21769_s8 + $0x470] sm:$0xff]  }
0x1be3   : > { %v18289_v40 = vpop.eup %18288 }
0x1be4   : > { %v4410_v18 = vmul.f32 %v18289_v40, %v4402_v28  ;;  %v14833_v28 = vld [vmem:[%s21768_s7 + $0x160] sm:$0xff]  ;;  %v17859_v40 = vld [vmem:[%s21769_s8 + $0x4f0] sm:$0xff]  }
0x1be5   : > { %v14866_v19 = vcombine.high %v14825_v27, %v14833_v28  ;;  %v14865_v44 = vcombine.low %v14825_v27, %v14833_v28  ;;  %v17879_v27 = vld [vmem:[%s21769_s8 + $0x4c8] sm:$0xff]  }
0x1be6   : > { %v4415_v41 = vmul.f32 %v14819_v37, %v4410_v18  ;;  %v17860_v37 = vld [vmem:[%s21769_s8 + $0x430] sm:$0xff]   ;;  %v17880_v28 = vld [vmem:[%s21769_s8 + $0x408] sm:$0xff]  }
0x1be7   : > { %v17861_v18 = vld [vmem:[%s21769_s8 + $0x4b0] sm:$0xff]  }
0x1be8   : > { %v19436_v48 = vadd.f32 %v14820_v38, %v4415_v41  ;;  %v17862_v38 = vld [vmem:[%s21769_s8 + $0x468] sm:$0xff]  }
0x1be9   : > { %v17863_v41 = vld [vmem:[%s21769_s8 + $0x4e8] sm:$0xff]  }
0x1bea   : > { %v19440_v9 = vpack.c.bf16 %v19436_v48, %v19436_v48 }
0x1bec   : > { %14889 = vmatmul.mubr.msk.bf16.vlgmr.msra.gmra.mxu0 %vm518_vm4, %v19440_v9  ;;  %14890 = vmatmul.mubr.msk.bf16.vlgmr.msra.gmra.mxu1 %vm518_vm4, %v19440_v9 }
0x1bed   : > { %4803 = vmatpush1.bf16.msra.mxu0 %v14877_v54  ;;  %4844 = vmatpush1.bf16.msra.mxu1 %v14879_v57  ;;  %v14872_v54 = vcombine.high %v14828_v50, %v14836_v51  ;;  %v17854_v57 = vld [vmem:[%s21769_s8 + $0x478] sm:$0xff]  }
0x1bee   : > { %4804 = vmatprep.subr.bf16.mxu0 %v14862_v10  ;;  %4845 = vmatprep.subr.bf16.mxu1 %v14864_v11  ;;  %v17869_v10 = vld [vmem:[%s21769_s8 + $0x4a0] sm:$0xff]   ;;  %v17870_v11 = vld [vmem:[%s21769_s8 + $0x458] sm:$0xff]  }
0x1bef   : > { %4822 = vmatprep.mubr.bf16.mxu0 %v18380_v0  ;;  %4863 = vmatprep.mubr.bf16.mxu1 %v18380_v0 }
0x1bf1   : > { %4805 = vmatpush1.bf16.msra.mxu0 %v14861_v20  ;;  %4846 = vmatpush1.bf16.msra.mxu1 %v14863_v24  ;;  %v17875_v20 = vld [vmem:[%s21769_s8 + $0x4d0] sm:$0xff]  }
0x1bf2   : > { %4884 = vmatprep.subr.bf16.mxu0 %v14882_v25  ;;  %4925 = vmatprep.subr.bf16.mxu1 %v14884_v26  ;;  %v17876_v24 = vld [vmem:[%s21769_s8 + $0x410] sm:$0xff]   ;;  %v17878_v26 = vld [vmem:[%s21769_s8 + $0x448] sm:$0xff]  }
0x1bf3   : > { %v17877_v25 = vld [vmem:[%s21769_s8 + $0x490] sm:$0xff]  }
0x1bf4   : > { %14891 = vmatmul.mubr.msk.bf16.vlgmr.msra.gmra.mxu0 %vm518_vm4, %v19440_v9  ;;  %14892 = vmatmul.mubr.msk.bf16.vlgmr.msra.gmra.mxu1 %vm518_vm4, %v19440_v9 }
0x1bf5   : > { %4885 = vmatpush1.bf16.msra.mxu0 %v14881_v31  ;;  %4926 = vmatpush1.bf16.msra.mxu1 %v14883_v32  ;;  %v17883_v31 = vld [vmem:[%s21769_s8 + $0x4c0] sm:$0xff]  }
0x1bf6   : > { %4886 = vmatprep.subr.bf16.mxu0 %v14866_v19  ;;  %4927 = vmatprep.subr.bf16.mxu1 %v14868_v33  ;;  %v17884_v32 = vld [vmem:[%s21769_s8 + $0x400] sm:$0xff]   ;;  %v17886_v33 = vld [vmem:[%s21769_s8 + $0x578] sm:$0xff]  }
0x1bf7   : > { %4904 = vmatprep.mubr.bf16.mxu0 %v18380_v0  ;;  %4945 = vmatprep.mubr.bf16.mxu1 %v18380_v0  ;;  %v17885_v19 = vld [vmem:[%s21769_s8 + $0x480] sm:$0xff]  }
0x1bf9   : > { %4887 = vmatpush1.bf16.msra.mxu0 %v14865_v44  ;;  %4928 = vmatpush1.bf16.msra.mxu1 %v14867_v45  ;;  %v4468_v44 = vrot.slane %v19620_v43, %v18874_v3  ;;  %v4476_v45 = vrot.slane %v19620_v43, %v18877_v5 }
0x1bfa   : > { %4966 = vmatprep.subr.bf16.mxu0 %v14886_v46  ;;  %5007 = vmatprep.subr.bf16.mxu1 %v14888_v47  ;;  %v4472_v46 = vrot.slane %v19620_v43, %v18880_v6  ;;  %v4480_v47 = vrot.slane %v19620_v43, %v18883_v4 }
0x1bfc   : > { %14893 = vmatmul.mubr.msk.bf16.vlgmr.msra.gmra.mxu0 %vm518_vm4, %v19440_v9  ;;  %14894 = vmatmul.mubr.msk.bf16.vlgmr.msra.gmra.mxu1 %vm518_vm4, %v19440_v9 }
0x1bfd   : > { %4967 = vmatpush1.bf16.msra.mxu0 %v14885_v52  ;;  %5008 = vmatpush1.bf16.msra.mxu1 %v14887_v53 }
0x1bfe   : > { %4968 = vmatprep.subr.bf16.mxu0 %v14870_v2  ;;  %5009 = vmatprep.subr.bf16.mxu1 %v14872_v54 }
0x1bff   : > { %4986 = vmatprep.mubr.bf16.mxu0 %v18380_v0  ;;  %5027 = vmatprep.mubr.bf16.mxu1 %v18380_v0 }
0x1c01   : > { %4969 = vmatpush1.bf16.msra.mxu0 %v14869_v55  ;;  %5010 = vmatpush1.bf16.msra.mxu1 %v14871_v56 }
0x1c02   : > { %16582 = vmatprep.subr.bf16.mxu0 %v17854_v57  ;;  %16604 = vmatprep.subr.bf16.mxu1 %v17855_v58 }
0x1c04   : > { %14895 = vmatmul.mubr.msk.bf16.vlgmr.msra.gmra.mxu0 %vm518_vm4, %v19440_v9  ;;  %14896 = vmatmul.mubr.msk.bf16.vlgmr.msra.gmra.mxu1 %vm518_vm4, %v19440_v9  ;;  %v17868_v9 = vld [vmem:[%s21769_s8 + $0x420] sm:$0xff]  }
0x1c05   : > { %16583 = vmatpush3.bf16.msra.mxu0 %v17856_v59  ;;  %16605 = vmatpush3.bf16.msra.mxu1 %v17857_v60 }
0x1c06   : > { %16584 = vmatprep.subr.bf16.mxu0 %v17858_v62  ;;  %16606 = vmatprep.subr.bf16.mxu1 %v17859_v40 }
0x1c09   : > { %16585 = vmatpush3.bf16.msra.mxu0 %v17860_v37  ;;  %16607 = vmatpush3.bf16.msra.mxu1 %v17861_v18 }
0x1c0a   : > { %16586 = vmatprep.subr.bf16.mxu0 %v17862_v38  ;;  %16608 = vmatprep.subr.bf16.mxu1 %v17863_v41  ;;  %v4488_v38 = vrot.slane %v19620_v43, %v18894_v21  ;;  %v4496_v41 = vrot.slane %v19620_v43, %v18897_v23 }
0x1c0d   : > { %16587 = vmatpush3.bf16.msra.mxu0 %v17864_v8  ;;  %16609 = vmatpush3.bf16.msra.mxu1 %v17865_v63  ;;  %v17888_v8 = vld [vmem:[%s21769_s8 + $0x538] sm:$0xff]  }
0x1c0e   : > { %16588 = vmatprep.subr.bf16.mxu0 %v17866_v61  ;;  %16610 = vmatprep.subr.bf16.mxu1 %v17867_v7  ;;  %v17889_v63 = vld [vmem:[%s21769_s8 + $0x5b8] sm:$0xff]  }
0x1c11   : > { %16589 = vmatpush3.bf16.msra.mxu0 %v17868_v9  ;;  %16611 = vmatpush3.bf16.msra.mxu1 %v17869_v10 }
0x1c12   : > { %16590 = vmatprep.subr.bf16.mxu0 %v17870_v11  ;;  %16612 = vmatprep.subr.bf16.mxu1 %v17871_v39  ;;  %v17890_v11 = vld [vmem:[%s21769_s8 + $0x570] sm:$0xff]  }
0x1c13   : > { %v17891_v39 = vld [vmem:[%s21769_s8 + $0x5f0] sm:$0xff]  }
0x1c15   : > { %16591 = vmatpush3.bf16.msra.mxu0 %v17872_v42  ;;  %16613 = vmatpush3.bf16.msra.mxu1 %v17873_v12 }
0x1c16   : > { %16592 = vmatprep.subr.bf16.mxu0 %v17874_v13  ;;  %16614 = vmatprep.subr.bf16.mxu1 %v17875_v20 }
0x1c19   : > { %16593 = vmatpush3.bf16.msra.mxu0 %v17876_v24  ;;  %16615 = vmatpush3.bf16.msra.mxu1 %v17877_v25  ;;  %v17892_v24 = vld [vmem:[%s21769_s8 + $0x530] sm:$0xff]  }
0x1c1a   : > { %16594 = vmatprep.subr.bf16.mxu0 %v17878_v26  ;;  %16616 = vmatprep.subr.bf16.mxu1 %v17879_v27  ;;  %v17893_v25 = vld [vmem:[%s21769_s8 + $0x5b0] sm:$0xff]  }
0x1c1d   : > { %16595 = vmatpush3.bf16.msra.mxu0 %v17880_v28  ;;  %16617 = vmatpush3.bf16.msra.mxu1 %v17881_v29  ;;  %v17894_v28 = vld [vmem:[%s21769_s8 + $0x568] sm:$0xff]  }
0x1c1e   : > { %16596 = vmatprep.subr.bf16.mxu0 %v17882_v30  ;;  %16618 = vmatprep.subr.bf16.mxu1 %v17883_v31  ;;  %v17895_v29 = vld [vmem:[%s21769_s8 + $0x5e8] sm:$0xff]  }
0x1c21   : > { %16597 = vmatpush3.bf16.msra.mxu0 %v17884_v32  ;;  %16619 = vmatpush3.bf16.msra.mxu1 %v17885_v19 }
0x1c22   : > { %16626 = vmatprep.subr.bf16.mxu0 %v17886_v33  ;;  %16648 = vmatprep.subr.bf16.mxu1 %v17887_v34 }
0x1cac   : > { %v4742_v49 = vpop.f32.mrf.mxu0  ;;  %v4783_v22 = vpop.f32.mrf.mxu1 }
0x1cad   : > { %v4743_v50 = vadd.f32 %v4742_v49, %v4468_v44  ;;  %v4784_v51 = vadd.f32 %v4783_v22, %v4476_v45  ;;  %v17897_v44 = vld [vmem:[%s21769_s8 + $0x5a8] sm:$0xff]   ;;  %v17898_v49 = vld [vmem:[%s21769_s8 + $0x560] sm:$0xff]  }
0x1cae   : > { %v4744_v52 = vpop.f32.mrf.mxu0  ;;  %v4785_v53 = vpop.f32.mrf.mxu1  ;;  %v14856_v45 = vld [vmem:[%s21772_s11 + $0x41] ss:$8 sm:$0xf0] }
0x1caf   : > { %v4745_v2 = vadd.f32 %v4744_v52, %v4472_v46  ;;  %v4786_v54 = vadd.f32 %v4785_v53, %v4480_v47  ;;  %v5036_v55 = vmax.f32 %v4743_v50, 0.0  ;;  %v5038_v56 = vmax.f32 %v4784_v51, 0.0  ;;  %v17899_v22 = vld [vmem:[%s21769_s8 + $0x5e0] sm:$0xff]  }
0x1cb0   : > { %v4746_v57 = vpop.f32.mrf.mxu0  ;;  %v4787_v58 = vpop.f32.mrf.mxu1  ;;  %v19684_v52 = vor.u32 %v14856_v45, %v14855_v35  ;;  %v17900_v53 = vld [vmem:[%s21769_s8 + $0x520] sm:$0xff]  }
0x1cb1   : > { %v5037_v59 = vmax.f32 %v4745_v2, 0.0  ;;  %v5039_v60 = vmax.f32 %v4786_v54, 0.0  ;;  %v5052_v61 = vpack.c.bf16 %v5036_v55, %v5036_v55  ;;  %v5054_v7 = vpack.c.bf16 %v5038_v56, %v5038_v56  ;;  %v17901_v2 = vld [vmem:[%s21769_s8 + $0x5a0] sm:$0xff]   ;;  %v17902_v56 = vld [vmem:[%s21769_s8 + $0x558] sm:$0xff]  }
0x1cb2   : > { %v4747_v62 = vpop.f32.mrf.mxu0  ;;  %v4788_v40 = vpop.f32.mrf.mxu1  ;;  %v17903_v57 = vld [vmem:[%s21769_s8 + $0x5d8] sm:$0xff]   ;;  %v4516_v58 = vrot.slane %v19684_v52, %v18954_v14 }
0x1cb3   : > { %v5053_v37 = vpack.c.bf16 %v5037_v59, %v5037_v59  ;;  %v5055_v18 = vpack.c.bf16 %v5039_v60, %v5039_v60  ;;  %v4524_v59 = vrot.slane %v19684_v52, %v18957_v17  ;;  %v17904_v40 = vld [vmem:[%s21769_s8 + $0x518] sm:$0xff]  }
0x1cb4   : > { %v19640_v9 = vpop.f32.mrf.mxu0  ;;  %v19642_v10 = vpop.f32.mrf.mxu1 }
0x1cb5   : > { %6130 = vmatprep.mubr.bf16.mxu0 %v5053_v37  ;;  %6170 = vmatprep.mubr.bf16.mxu1 %v5055_v18  ;;  %v17905_v37 = vld [vmem:[%s21769_s8 + $0x598] sm:$0xff]  }
0x1cb6   : > { %v4826_v42 = vpop.f32.mrf.mxu0  ;;  %v4867_v12 = vpop.f32.mrf.mxu1  ;;  %6131 = vmatmul.mubr.bf16.vlgmr.msra.gmra.mxu0 %v5052_v61  ;;  %6171 = vmatmul.mubr.bf16.vlgmr.msra.gmra.mxu1 %v5054_v7 }
0x1cb7   : > { %v4827_v13 = vadd.f32 %v4826_v42, %v4488_v38  ;;  %v4868_v20 = vadd.f32 %v4867_v12, %v4496_v41  ;;  %16627 = vmatpush3.bf16.msra.mxu0 %v17888_v8  ;;  %16649 = vmatpush3.bf16.msra.mxu1 %v17889_v63  ;;  %v17906_v41 = vld [vmem:[%s21769_s8 + $0x550] sm:$0xff]   ;;  %v4484_v12 = vrot.slane %v19620_v43, %v18954_v14 }
0x1cb8   : > { %v4828_v26 = vpop.f32.mrf.mxu0  ;;  %v4869_v27 = vpop.f32.mrf.mxu1  ;;  %16628 = vmatprep.subr.bf16.mxu0 %v17890_v11  ;;  %16650 = vmatprep.subr.bf16.mxu1 %v17891_v39  ;;  %v17907_v8 = vld [vmem:[%s21769_s8 + $0x5d0] sm:$0xff]  }
0x1cb9   : > { %v5041_v30 = vmax.f32 %v4827_v13, 0.0  ;;  %v5043_v31 = vmax.f32 %v4868_v20, 0.0  ;;  %v17908_v39 = vld [vmem:[%s21769_s8 + $0x510] sm:$0xff]   ;;  %v4492_v13 = vrot.slane %v19620_v43, %v18957_v17  ;;  %v17911_v26 = vld [vmem:[%s21769_s8 + $0x5c8] sm:$0xff]   ;;  %v4504_v27 = vrot.slane %v19684_v52, %v18880_v6 }
0x1cba   : > { %v4829_v32 = vpop.f32.mrf.mxu0  ;;  %v4870_v19 = vpop.f32.mrf.mxu1  ;;  %v17909_v42 = vld [vmem:[%s21769_s8 + $0x590] sm:$0xff]  }
0x1cbb   : > { %v5057_v33 = vpack.c.bf16 %v5041_v30, %v5041_v30  ;;  %v5059_v34 = vpack.c.bf16 %v5043_v31, %v5043_v31  ;;  %16629 = vmatpush3.bf16.msra.mxu0 %v17892_v24  ;;  %16651 = vmatpush3.bf16.msra.mxu1 %v17893_v25  ;;  %v17910_v25 = vld [vmem:[%s21769_s8 + $0x548] sm:$0xff]   ;;  %v4825_v32 = vadd.f32 %v19640_v9, %v4484_v12  ;;  %v17916_v9 = vld [vmem:[%s21769_s8 + $0x500] sm:$0xff]   ;;  %v17934_v12 = vld [vmem:[%s21769_s8 + $0x658] sm:$0xff]  }
0x1cbc   : > { %v19674_v46 = vpop.f32.mrf.mxu0  ;;  %v19676_v47 = vpop.f32.mrf.mxu1  ;;  %16630 = vmatprep.subr.bf16.mxu0 %v17894_v28  ;;  %16652 = vmatprep.subr.bf16.mxu1 %v17895_v29  ;;  %v4512_v28 = vrot.slane %v19684_v52, %v18883_v4  ;;  %v17912_v30 = vld [vmem:[%s21769_s8 + $0x508] sm:$0xff]   ;;  %v4866_v19 = vadd.f32 %v19642_v10, %v4492_v13  ;;  %v17917_v10 = vld [vmem:[%s21769_s8 + $0x580] sm:$0xff]   ;;  %v17935_v13 = vld [vmem:[%s21769_s8 + $0x6d8] sm:$0xff]  }
0x1cbd   : > { %6210 = vmatprep.mubr.bf16.mxu0 %v5057_v33  ;;  %6250 = vmatprep.mubr.bf16.mxu1 %v5059_v34  ;;  %v17913_v31 = vld [vmem:[%s21769_s8 + $0x588] sm:$0xff]   ;;  %v17914_v33 = vld [vmem:[%s21769_s8 + $0x540] sm:$0xff]  }
0x1cbe   : > { %v4908_v50 = vpop.f32.mrf.mxu0  ;;  %v4949_v51 = vpop.f32.mrf.mxu1  ;;  %v17915_v34 = vld [vmem:[%s21769_s8 + $0x5c0] sm:$0xff]   ;;  %v5042_v45 = vmax.f32 %v4866_v19, 0.0  ;;  %v4528_v19 = vrot.slane %v19684_v52, %v18897_v23 }
0x1cbf   : > { %16631 = vmatpush3.bf16.msra.mxu0 %v17896_v36  ;;  %16653 = vmatpush3.bf16.msra.mxu1 %v17897_v44  ;;  %v4909_v35 = vadd.f32 %v4908_v50, %v4504_v27  ;;  %v4950_v36 = vadd.f32 %v4949_v51, %v4512_v28  ;;  %v5040_v44 = vmax.f32 %v4825_v32, 0.0  ;;  %v17940_v27 = vld [vmem:[%s21769_s8 + $0x610] sm:$0xff]   ;;  %v4500_v28 = vrot.slane %v19684_v52, %v18874_v3 }
0x1cc0   : > { %v4910_v54 = vpop.f32.mrf.mxu0  ;;  %v4951_v55 = vpop.f32.mrf.mxu1  ;;  %16632 = vmatprep.subr.bf16.mxu0 %v17898_v49  ;;  %16654 = vmatprep.subr.bf16.mxu1 %v17899_v22  ;;  %v17918_v49 = vld [vmem:[%s21769_s8 + $0x678] sm:$0xff]   ;;  %v4520_v32 = vrot.slane %v19684_v52, %v18894_v21 }
0x1cc1   : > { %v17919_v22 = vld [vmem:[%s21769_s8 + $0x6f8] sm:$0xff]   ;;  %v5045_v50 = vmax.f32 %v4909_v35, 0.0  ;;  %v5047_v51 = vmax.f32 %v4950_v36, 0.0  ;;  %v5058_v54 = vpack.c.bf16 %v5042_v45, %v5042_v45  ;;  %v17945_v35 = vld [vmem:[%s21769_s8 + $0x688] sm:$0xff]   ;;  %v17946_v36 = vld [vmem:[%s21769_s8 + $0x640] sm:$0xff]  }
0x1cc2   : > { %v4911_v60 = vpop.f32.mrf.mxu0  ;;  %v4952_v62 = vpop.f32.mrf.mxu1  ;;  %v17921_v55 = vld [vmem:[%s21769_s8 + $0x6b8] sm:$0xff]  }
0x1cc3   : > { %16633 = vmatpush3.bf16.msra.mxu0 %v17900_v53  ;;  %16655 = vmatpush3.bf16.msra.mxu1 %v17901_v2  ;;  %v17920_v53 = vld [vmem:[%s21769_s8 + $0x638] sm:$0xff]   ;;  %v5056_v2 = vpack.c.bf16 %v5040_v44, %v5040_v44  ;;  %v17924_v60 = vld [vmem:[%s21769_s8 + $0x630] sm:$0xff]   ;;  %v17948_v44 = vld [vmem:[%s21769_s8 + $0x600] sm:$0xff]  }
0x1cc4   : > { %v4988_v18 = vpop.f32.mrf.mxu0  ;;  %v5029_v38 = vpop.f32.mrf.mxu1  ;;  %16634 = vmatprep.subr.bf16.mxu0 %v17902_v56  ;;  %16656 = vmatprep.subr.bf16.mxu1 %v17903_v57  ;;  %v5061_v56 = vpack.c.bf16 %v5045_v50, %v5045_v50  ;;  %v17922_v57 = vld [vmem:[%s21769_s8 + $0x670] sm:$0xff]  }
0x1cc5   : > { %v19714_v63 = vadd.f32 %v4988_v18, %v4516_v58  ;;  %v19716_v61 = vadd.f32 %v5029_v38, %v4524_v59  ;;  %v17923_v58 = vld [vmem:[%s21769_s8 + $0x6f0] sm:$0xff]   ;;  %v5063_v59 = vpack.c.bf16 %v5047_v51, %v5047_v51  ;;  %v17928_v18 = vld [vmem:[%s21769_s8 + $0x628] sm:$0xff]   ;;  %v17952_v51 = vld [vmem:[%s21769_s8 + $0x738] sm:$0xff]  }
0x1cc6   : > { %v19718_v7 = vpop.f32.mrf.mxu0  ;;  %v19720_v11 = vpop.f32.mrf.mxu1  ;;  %v17925_v62 = vld [vmem:[%s21769_s8 + $0x6b0] sm:$0xff]   ;;  %v17929_v38 = vld [vmem:[%s21769_s8 + $0x6a8] sm:$0xff]  }
0x1cc7   : > { %16635 = vmatpush3.bf16.msra.mxu0 %v17904_v40  ;;  %16657 = vmatpush3.bf16.msra.mxu1 %v17905_v37  ;;  %v17926_v40 = vld [vmem:[%s21769_s8 + $0x668] sm:$0xff]  }
0x1cc8   : > { %v4992_v20 = vpop.f32.mrf.mxu0  ;;  %v5033_v24 = vpop.f32.mrf.mxu1  ;;  %16636 = vmatprep.subr.bf16.mxu0 %v17906_v41  ;;  %16658 = vmatprep.subr.bf16.mxu1 %v17907_v8  ;;  %v17927_v37 = vld [vmem:[%s21769_s8 + $0x6e8] sm:$0xff]   ;;  %v17930_v41 = vld [vmem:[%s21769_s8 + $0x660] sm:$0xff]  }
0x1cc9   : > { %v17931_v8 = vld [vmem:[%s21769_s8 + $0x6e0] sm:$0xff]   ;;  %v17936_v20 = vld [vmem:[%s21769_s8 + $0x618] sm:$0xff]  }
0x1cca   : > { %v4993_v29 = vpop.f32.mrf.mxu0  ;;  %v5034_v43 = vpop.f32.mrf.mxu1  ;;  %v17937_v24 = vld [vmem:[%s21769_s8 + $0x698] sm:$0xff]  }
0x1ccb   : > { %16637 = vmatpush3.bf16.msra.mxu0 %v17908_v39  ;;  %16659 = vmatpush3.bf16.msra.mxu1 %v17909_v42  ;;  %v17932_v39 = vld [vmem:[%s21769_s8 + $0x620] sm:$0xff]   ;;  %v17941_v29 = vld [vmem:[%s21769_s8 + $0x690] sm:$0xff]   ;;  %v17942_v43 = vld [vmem:[%s21769_s8 + $0x648] sm:$0xff]  }
0x1ccc   : > { %16638 = vmatprep.subr.bf16.mxu0 %v17910_v25  ;;  %16660 = vmatprep.subr.bf16.mxu1 %v17911_v26  ;;  %v17933_v42 = vld [vmem:[%s21769_s8 + $0x6a0] sm:$0xff]   ;;  %v17938_v25 = vld [vmem:[%s21769_s8 + $0x650] sm:$0xff]  }
0x1ccd   : > { %v17939_v26 = vld [vmem:[%s21769_s8 + $0x6d0] sm:$0xff]  }
0x1ccf   : > { %16639 = vmatpush3.bf16.msra.mxu0 %v17912_v30  ;;  %16661 = vmatpush3.bf16.msra.mxu1 %v17913_v31  ;;  %v4508_v30 = vrot.slane %v19684_v52, %v18877_v5  ;;  %v17943_v31 = vld [vmem:[%s21769_s8 + $0x6c8] sm:$0xff]   ;;  %v17947_v52 = vld [vmem:[%s21769_s8 + $0x6c0] sm:$0xff]  }
0x1cd0   : > { %16640 = vmatprep.subr.bf16.mxu0 %v17914_v33  ;;  %16662 = vmatprep.subr.bf16.mxu1 %v17915_v34  ;;  %v17944_v33 = vld [vmem:[%s21769_s8 + $0x608] sm:$0xff]   ;;  %v4907_v34 = vadd.f32 %v19674_v46, %v4500_v28  ;;  %v5032_v46 = vadd.f32 %v19720_v11, %v4528_v19  ;;  %v17980_v19 = vld [vmem:[%s21769_s8 + $0x700] sm:$0xff]  }
0x1cd1   : > { %v17974_v28 = vld [vmem:[%s21769_s8 + $0x748] sm:$0xff]  }
0x1cd2   : > { %v5044_v45 = vmax.f32 %v4907_v34, 0.0  ;;  %v5051_v50 = vmax.f32 %v5032_v46, 0.0  ;;  %v17981_v34 = vld [vmem:[%s21769_s8 + $0x780] sm:$0xff]   ;;  %v15153_v46 = vld [vmem:[%s21771_s10 + $0xb] ss:$0 sm:$0xff] }
0x1cd3   : > { %16641 = vmatpush3.bf16.msra.mxu0 %v17916_v9  ;;  %16663 = vmatpush3.bf16.msra.mxu1 %v17917_v10  ;;  %v4948_v9 = vadd.f32 %v19676_v47, %v4508_v30  ;;  %v4991_v10 = vadd.f32 %v19718_v7, %v4520_v32  ;;  %v17949_v47 = vld [vmem:[%s21769_s8 + $0x680] sm:$0xff]   ;;  %v17951_v7 = vld [vmem:[%s21769_s8 + $0x7f8] sm:$0xff]   ;;  %v17977_v30 = vld [vmem:[%s21769_s8 + $0x788] sm:$0xff]  }
0x1cd4   : > { %16670 = vmatprep.subr.bf16.mxu0 %v17918_v49  ;;  %16692 = vmatprep.subr.bf16.mxu1 %v17919_v22  ;;  %v17950_v49 = vld [vmem:[%s21769_s8 + $0x778] sm:$0xff]   ;;  %v17979_v32 = vld [vmem:[%s21769_s8 + $0x7c0] sm:$0xff]  }
0x1cd5   : > { %v5046_v22 = vmax.f32 %v4948_v9, 0.0  ;;  %v5049_v11 = vmax.f32 %v4991_v10, 0.0 }
0x1cd6   : > { %6211 = vmatmul.mubr.bf16.vlgmr.msra.gmra.mxu0 %v5056_v2  ;;  %6251 = vmatmul.mubr.bf16.vlgmr.msra.gmra.mxu1 %v5058_v54  ;;  %v17953_v2 = vld [vmem:[%s21769_s8 + $0x7b8] sm:$0xff]  }
0x1cd7   : > { %16671 = vmatpush3.bf16.msra.mxu0 %v17920_v53  ;;  %6290 = vmatprep.mubr.bf16.mxu0 %v5061_v56  ;;  %v5060_v53 = vpack.c.bf16 %v5044_v45, %v5044_v45  ;;  %v5062_v54 = vpack.c.bf16 %v5046_v22, %v5046_v22  ;;  %v5065_v56 = vpack.c.bf16 %v5049_v11, %v5049_v11 }
0x1cd8   : > { %16693 = vmatpush3.bf16.msra.mxu1 %v17921_v55  ;;  %6330 = vmatprep.mubr.bf16.mxu1 %v5063_v59  ;;  %v17954_v55 = vld [vmem:[%s21769_s8 + $0x770] sm:$0xff]  }
0x1cd9   : > { %16672 = vmatprep.subr.bf16.mxu0 %v17922_v57  ;;  %16694 = vmatprep.subr.bf16.mxu1 %v17923_v58  ;;  %v17955_v57 = vld [vmem:[%s21769_s8 + $0x7f0] sm:$0xff]   ;;  %v5067_v58 = vpack.c.bf16 %v5051_v50, %v5051_v50 }
0x1cda   : > { %v17956_v59 = vld [vmem:[%s21769_s8 + $0x730] sm:$0xff]  }
0x1cdb   : > { %16673 = vmatpush3.bf16.msra.mxu0 %v17924_v60  ;;  %v17957_v60 = vld [vmem:[%s21769_s8 + $0x7b0] sm:$0xff]  }
0x1cdc   : > { %16695 = vmatpush3.bf16.msra.mxu1 %v17925_v62  ;;  %16674 = vmatprep.subr.bf16.mxu0 %v17926_v40  ;;  %v17958_v62 = vld [vmem:[%s21769_s8 + $0x768] sm:$0xff]  }
0x1cdd   : > { %16696 = vmatprep.subr.bf16.mxu1 %v17927_v37  ;;  %v17959_v40 = vld [vmem:[%s21769_s8 + $0x7e8] sm:$0xff]  }
0x1cde   : > { %v17960_v37 = vld [vmem:[%s21769_s8 + $0x728] sm:$0xff]  }
0x1cdf   : > { %16675 = vmatpush3.bf16.msra.mxu0 %v17928_v18  ;;  %v17961_v18 = vld [vmem:[%s21769_s8 + $0x7a8] sm:$0xff]  }
0x1ce0   : > { %16697 = vmatpush3.bf16.msra.mxu1 %v17929_v38  ;;  %16676 = vmatprep.subr.bf16.mxu0 %v17930_v41  ;;  %v17962_v38 = vld [vmem:[%s21769_s8 + $0x760] sm:$0xff]  }
0x1ce1   : > { %16698 = vmatprep.subr.bf16.mxu1 %v17931_v8  ;;  %v17963_v41 = vld [vmem:[%s21769_s8 + $0x7e0] sm:$0xff]  }
0x1ce2   : > { %v17964_v8 = vld [vmem:[%s21769_s8 + $0x720] sm:$0xff]  }
0x1ce3   : > { %16677 = vmatpush3.bf16.msra.mxu0 %v17932_v39  ;;  %v17965_v39 = vld [vmem:[%s21769_s8 + $0x7a0] sm:$0xff]  }
0x1ce4   : > { %16699 = vmatpush3.bf16.msra.mxu1 %v17933_v42  ;;  %16678 = vmatprep.subr.bf16.mxu0 %v17934_v12  ;;  %v17966_v42 = vld [vmem:[%s21769_s8 + $0x758] sm:$0xff]  }
0x1ce5   : > { %16700 = vmatprep.subr.bf16.mxu1 %v17935_v13  ;;  %v17967_v12 = vld [vmem:[%s21769_s8 + $0x7d8] sm:$0xff]  }
0x1ce6   : > { %v17968_v13 = vld [vmem:[%s21769_s8 + $0x718] sm:$0xff]  }
0x1ce7   : > { %16679 = vmatpush3.bf16.msra.mxu0 %v17936_v20  ;;  %v17969_v20 = vld [vmem:[%s21769_s8 + $0x798] sm:$0xff]  }
0x1ce8   : > { %16701 = vmatpush3.bf16.msra.mxu1 %v17937_v24  ;;  %16680 = vmatprep.subr.bf16.mxu0 %v17938_v25  ;;  %v17970_v24 = vld [vmem:[%s21769_s8 + $0x750] sm:$0xff]  }
0x1ce9   : > { %16702 = vmatprep.subr.bf16.mxu1 %v17939_v26  ;;  %v17971_v25 = vld [vmem:[%s21769_s8 + $0x7d0] sm:$0xff]  }
0x1cea   : > { %v17972_v26 = vld [vmem:[%s21769_s8 + $0x710] sm:$0xff]  }
0x1ceb   : > { %16681 = vmatpush3.bf16.msra.mxu0 %v17940_v27  ;;  %v17973_v27 = vld [vmem:[%s21769_s8 + $0x790] sm:$0xff]  }
0x1cec   : > { %16703 = vmatpush3.bf16.msra.mxu1 %v17941_v29  ;;  %16682 = vmatprep.subr.bf16.mxu0 %v17942_v43  ;;  %v17975_v29 = vld [vmem:[%s21769_s8 + $0x7c8] sm:$0xff]  }
0x1ced   : > { %16704 = vmatprep.subr.bf16.mxu1 %v17943_v31  ;;  %v17976_v43 = vld [vmem:[%s21769_s8 + $0x708] sm:$0xff]   ;;  %v17978_v31 = vld [vmem:[%s21769_s8 + $0x740] sm:$0xff]  }
0x1cef   : > { %16683 = vmatpush3.bf16.msra.mxu0 %v17944_v33  ;;  %v5048_v33 = vmax.f32 %v19714_v63, 0.0  ;;  %v17983_v63 = vld [vmem:[%s21763_s2 + $0x20] sm:$0xff]  }
0x1cf0   : > { %16705 = vmatpush3.bf16.msra.mxu1 %v17945_v35  ;;  %16684 = vmatprep.subr.bf16.mxu0 %v17946_v36  ;;  %v5050_v35 = vmax.f32 %v19716_v61, 0.0  ;;  %v17982_v36 = vld [vmem:[%s21763_s2 + $0x28] sm:$0xff]  }
0x1cf1   : > { %16706 = vmatprep.subr.bf16.mxu1 %v17947_v52  ;;  %v5064_v9 = vpack.c.bf16 %v5048_v33, %v5048_v33 }
0x1cf2   : > { %v5066_v52 = vpack.c.bf16 %v5050_v35, %v5050_v35  ;;  %v15290_v35 = vld [vmem:[%s21771_s10 + $0x10] ss:$0 sm:$0xff] }
0x1cf3   : > { %16685 = vmatpush3.bf16.msra.mxu0 %v17948_v44 }
0x1cf4   : > { %16707 = vmatpush3.bf16.msra.mxu1 %v17949_v47  ;;  %16714 = vmatprep.subr.bf16.mxu0 %v17950_v49 }
0x1cf5   : > { %16736 = vmatprep.subr.bf16.mxu1 %v17951_v7 }
0x1cf6   : > { %6291 = vmatmul.mubr.bf16.vlgmr.msra.gmra.mxu0 %v5060_v53 }
0x1cf7   : > { %6331 = vmatmul.mubr.bf16.vlgmr.msra.gmra.mxu1 %v5062_v54  ;;  %16715 = vmatpush3.bf16.msra.mxu0 %v17952_v51 }
0x1cf8   : > { %6370 = vmatprep.mubr.bf16.mxu0 %v5065_v56  ;;  %16737 = vmatpush3.bf16.msra.mxu1 %v17953_v2 }
0x1cf9   : > { %6410 = vmatprep.mubr.bf16.mxu1 %v5067_v58  ;;  %16716 = vmatprep.subr.bf16.mxu0 %v17954_v55 }
0x1cfa   : > { %16738 = vmatprep.subr.bf16.mxu1 %v17955_v57 }
0x1cfb   : > { %16717 = vmatpush3.bf16.msra.mxu0 %v17956_v59 }
0x1cfc   : > { %16739 = vmatpush3.bf16.msra.mxu1 %v17957_v60  ;;  %16718 = vmatprep.subr.bf16.mxu0 %v17958_v62 }
0x1cfd   : > { %16740 = vmatprep.subr.bf16.mxu1 %v17959_v40 }
0x1cff   : > { %16719 = vmatpush3.bf16.msra.mxu0 %v17960_v37 }
0x1d00   : > { %16741 = vmatpush3.bf16.msra.mxu1 %v17961_v18  ;;  %16720 = vmatprep.subr.bf16.mxu0 %v17962_v38 }
0x1d01   : > { %16742 = vmatprep.subr.bf16.mxu1 %v17963_v41 }
0x1d03   : > { %16721 = vmatpush3.bf16.msra.mxu0 %v17964_v8 }
0x1d04   : > { %16743 = vmatpush3.bf16.msra.mxu1 %v17965_v39  ;;  %16722 = vmatprep.subr.bf16.mxu0 %v17966_v42 }
0x1d05   : > { %16744 = vmatprep.subr.bf16.mxu1 %v17967_v12 }
0x1d07   : > { %16723 = vmatpush3.bf16.msra.mxu0 %v17968_v13 }
0x1d08   : > { %16745 = vmatpush3.bf16.msra.mxu1 %v17969_v20  ;;  %16724 = vmatprep.subr.bf16.mxu0 %v17970_v24 }
0x1d09   : > { %16746 = vmatprep.subr.bf16.mxu1 %v17971_v25 }
0x1d0b   : > { %16725 = vmatpush3.bf16.msra.mxu0 %v17972_v26 }
0x1d0c   : > { %16747 = vmatpush3.bf16.msra.mxu1 %v17973_v27  ;;  %16726 = vmatprep.subr.bf16.mxu0 %v17974_v28 }
0x1d0d   : > { %16748 = vmatprep.subr.bf16.mxu1 %v17975_v29 }
0x1d0f   : > { %16727 = vmatpush3.bf16.msra.mxu0 %v17976_v43 }
0x1d10   : > { %16749 = vmatpush3.bf16.msra.mxu1 %v17977_v30  ;;  %16728 = vmatprep.subr.bf16.mxu0 %v17978_v31 }
0x1d11   : > { %16750 = vmatprep.subr.bf16.mxu1 %v17979_v32 }
0x1d13   : > { %16729 = vmatpush3.bf16.msra.mxu0 %v17980_v19 }
0x1d14   : > { %16751 = vmatpush3.bf16.msra.mxu1 %v17981_v34  ;;  %17383 = vmatprep.subr.bf16.mxu0 %v18381_v1 }
0x1d15   : > { %17391 = vmatprep.subr.mxu1 %v18381_v1 }
0x1d16   : > { %6371 = vmatmul.mubr.bf16.vlgmr.msra.gmra.mxu0 %v5064_v9 }
0x1d17   : > { %6411 = vmatmul.mubr.bf16.vlgmr.msra.gmra.mxu1 %v5066_v52  ;;  %17384 = vmatpush3.bf16.msra.mxu0 %v17982_v36 }
0x1d18   : > { %17385 = vmatprep.subr.bf16.mxu0 %v18381_v1  ;;  %17387 = vmatprep.mubr.msk.bf16.mxu0 %vm18382_vm1, %v18381_v1 }
0x1d19   : > { %17393 = vmatprep.mubr.msk.f32.mxu1 %vm18382_vm1, %v18381_v1 }
0x1d1b   : > { %17386 = vmatpush3.bf16.msra.mxu0 %v17983_v63 }
0x1d1c   : > { %17401 = vmatprep.subr.mxu0 %v18381_v1 }
0x1d1e   : > { %17388 = vmatmul.mubr.msk.bf16.vlgmr.msra.gmra.mxu0 %vm518_vm4, %v18515_v16 }
0x1d1f   : > { %17403 = vmatprep.mubr.msk.f32.mxu0 %vm18382_vm1, %v18381_v1 }
0x1d76   : > { %v16598_v61 = vpop.f32.mrf.mxu0  ;;  %v16620_v10 = vpop.f32.mrf.mxu1 }
0x1d78   : > { %v16599_v44 = vpop.f32.mrf.mxu0  ;;  %v16621_v45 = vpop.f32.mrf.mxu1 }
0x1d79   : > { %v16600_v47 = vadd.f32 %v16599_v44, %v16598_v61  ;;  %v16622_v11 = vadd.f32 %v16621_v45, %v16620_v10 }
0x1d7a   : > { %v16601_v49 = vpop.f32.mrf.mxu0  ;;  %v16623_v22 = vpop.f32.mrf.mxu1 }
0x1d7b   : > { %v6133_v7 = vadd.f32 %v16600_v47, %v15153_v46 }
0x1d7c   : > { %v16602_v50 = vpop.f32.mrf.mxu0  ;;  %v16624_v51 = vpop.f32.mrf.mxu1 }
0x1d7d   : > { %v6173_v53 = vadd.f32 %v16622_v11, %v6133_v7 }
0x1d96   : > { %v16642_v16 = vpop.f32.mrf.mxu0  ;;  %v16664_v2 = vpop.f32.mrf.mxu1 }
0x1d98   : > { %v16643_v54 = vpop.f32.mrf.mxu0  ;;  %v16665_v55 = vpop.f32.mrf.mxu1 }
0x1d99   : > { %v16644_v56 = vadd.f32 %v16643_v54, %v16642_v16  ;;  %v16666_v57 = vadd.f32 %v16665_v55, %v16664_v2 }
0x1d9a   : > { %v16645_v58 = vpop.f32.mrf.mxu0  ;;  %v16667_v59 = vpop.f32.mrf.mxu1 }
0x1d9b   : > { %v6213_v60 = vadd.f32 %v16644_v56, %v6173_v53 }
0x1d9c   : > { %v16646_v62 = vpop.f32.mrf.mxu0  ;;  %v16668_v40 = vpop.f32.mrf.mxu1 }
0x1d9d   : > { %v6253_v37 = vadd.f32 %v16666_v57, %v6213_v60 }
0x1db6   : > { %v16686_v18 = vpop.f32.mrf.mxu0 }
0x1db7   : > { %v16708_v38 = vpop.f32.mrf.mxu1 }
0x1db8   : > { %v16687_v41 = vpop.f32.mrf.mxu0 }
0x1db9   : > { %v16688_v8 = vadd.f32 %v16687_v41, %v16686_v18  ;;  %v16709_v39 = vpop.f32.mrf.mxu1 }
0x1dba   : > { %v16710_v42 = vadd.f32 %v16709_v39, %v16708_v38  ;;  %v16689_v12 = vpop.f32.mrf.mxu0 }
0x1dbb   : > { %v6293_v13 = vadd.f32 %v16688_v8, %v6253_v37  ;;  %v16711_v20 = vpop.f32.mrf.mxu1 }
0x1dbc   : > { %v16690_v24 = vpop.f32.mrf.mxu0 }
0x1dbd   : > { %v6333_v25 = vadd.f32 %v16710_v42, %v6293_v13  ;;  %v16712_v26 = vpop.f32.mrf.mxu1  ;;  %v15294_v42 = vld [vmem:[%s21764_s3 + $0x20] sm:$0xf]  ;;  %v15295_v13 = vld [vmem:[%s21764_s3 + $0x24] sm:$0xf] }
0x1dbe   : > { %v6919_v12 = vsel %vm452_vm0, %v15294_v42, 0  ;;  %v6873_v20 = vsel %vm452_vm0, %v15295_v13, 0 }
0x1dd6   : > { %v16730_v27 = vpop.f32.mrf.mxu0 }
0x1dd7   : > { %v16752_v28 = vpop.f32.mrf.mxu1 }
0x1dd8   : > { %v16731_v29 = vpop.f32.mrf.mxu0 }
0x1dd9   : > { %v16732_v43 = vadd.f32 %v16731_v29, %v16730_v27  ;;  %v16753_v30 = vpop.f32.mrf.mxu1 }
0x1dda   : > { %v16754_v31 = vadd.f32 %v16753_v30, %v16752_v28  ;;  %v16733_v32 = vpop.f32.mrf.mxu0 }
0x1ddb   : > { %v6373_v19 = vadd.f32 %v16732_v43, %v6333_v25  ;;  %v16755_v33 = vpop.f32.mrf.mxu1 }
0x1ddc   : > { %v16734_v34 = vpop.f32.mrf.mxu0 }
0x1ddd   : > { %v19992_v36 = vadd.f32 %v16754_v31, %v6373_v19  ;;  %v16756_v9 = vpop.f32.mrf.mxu1 }
0x1dde   : > { %v6526_v52 = vpop.f32.mrf.mxu0 }
0x1ddf   : > { %v19994_v63 = vadd.f32 %v15290_v35, %v6526_v52 }
0x1de0   : > { %v17389_v61 = vpop.f32.mrf.mxu0 }
0x1de1   : > { %6705 = vrot.lane.b32.xlu0 %v19994_v63, %s21795_s29  ;;  %6539 = vrot.lane.b32.xlu1 %v19994_v63, %s21811_s26 }
0x1de2   : > { %v6529_v10 = vpop.f32.mrf.mxu0 }
0x1de4   : > { %v17390_v46 = vpop.f32.mrf.mxu0 }
0x1de5   : > { %6703 = vrot.lane.b32.xlu0 %v19994_v63, %s21812_s28 }
0x1e53   : > { %v6706_v44 = vpop.permute.xlu0 %6705  ;;  %v6540_v45 = vpop.permute.xlu1 %6539 }
0x1e54   : > { %17392 = vmatpush3.xpose.msk.msra.mxu1 %vm570_vm5, %v6540_v45  ;;  %17402 = vmatpush3.xpose.msk.msra.mxu0 %vm570_vm5, %v6706_v44 }
0x1e55   : > { %17396 = vmatprep.subr.mxu1 %v18381_v1  ;;  %17411 = vmatprep.subr.bf16.mxu0 %v18381_v1 }
0x1e57   : > { %v6704_v47 = vpop.permute.xlu0 %6703  ;;  %17394 = vmatmul.mubr.msk.f32.vlgmr.msra.gmra.mxu1 %vm570_vm5, %v19994_v63 }
0x1e58   : > { %17404 = vmatmul.mubr.msk.f32.vlgmr.msra.gmra.mxu0 %vm570_vm5, %v6704_v47  ;;  %17398 = vmatprep.mubr.msk.f32.mxu1 %vm18382_vm1, %v18381_v1 }
0x1e59   : > { %17413 = vmatprep.mubr.msk.bf16.mxu0 %vm18382_vm1, %v18381_v1  ;;  %17412 = vmatpush3.bf16.msra.mxu0 %v6873_v20 }
0x1e5a   : > { %17423 = vmatprep.subr.mxu0 %v18381_v1 }
0x1f17   : > { %v6611_v49 = vpop.f32.mrf.mxu1 }
0x1f18   : > { %v6777_v22 = vpop.f32.mrf.mxu0  ;;  %v6615_v7 = vsel %vm570_vm5, %v6611_v49, -inf }
0x1f19   : > { %6616 = vmax.xlane.f32.xlu1 %v6615_v7  ;;  %v17395_v11 = vpop.f32.mrf.mxu1  ;;  %v6781_v50 = vsel %vm570_vm5, %v6777_v22, -inf }
0x1f1a   : > { %6782 = vmax.xlane.f32.xlu0 %v6781_v50  ;;  %v17405_v51 = vpop.f32.mrf.mxu0 }
0x1fa2   : > { %v6617_v53 = vpop.xlane.xlu1 %6616 }
0x1fa3   : > { %v6618_v16 = vsub.f32 %v6611_v49, %v6617_v53  ;;  %v6783_v2 = vpop.xlane.xlu0 %6782 }
0x1fa4   : > { %v6784_v54 = vsub.f32 %v6777_v22, %v6783_v2 }
0x1fa5   : > { %v6619_v55 = vmul.f32 1.442695, %v6618_v16 }
0x1fa6   : > { %v6785_v56 = vmul.f32 1.442695, %v6784_v54  ;;  %v15296_v54 = vld [vmem:[%s21764_s3 + $0x28] sm:$0xf] }
0x1fa7   : > { %18290 = vpow2.f32 %v6619_v55  ;;  %v7131_v55 = vsel %vm452_vm0, %v15296_v54, 0 }
0x1fa8   : > { %18292 = vpow2.f32 %v6785_v56 }
0x1fb4   : > { %v18291_v57 = vpop.eup %18290 }
0x1fb5   : > { %v18293_v58 = vpop.eup %18292  ;;  %v6621_v59 = vsel %vm570_vm5, %v18291_v57, 0.0 }
0x1fb6   : > { %6622 = vadd.xlane.f32.xlu0 %v6621_v59  ;;  %v6787_v60 = vsel %vm570_vm5, %v18293_v58, 0.0 }
0x1fb7   : > { %6788 = vadd.xlane.f32.xlu1 %v6787_v60 }
0x1fc8   : > { %6792 = vrot.lane.b32.xlu1 %v19994_v63, %s21813_s27 }
0x1fcc   : > { %6963 = vrot.lane.b32.xlu1 %v19994_v63, %s21806_s17  ;;  %6626 = vrot.lane.b32.xlu0 %v19994_v63, %s21814_s30 }
0x1fd0   : > { %6961 = vrot.lane.b32.xlu0 %v19994_v63, %s21815_s23 }
0x203f   : > { %v6623_v62 = vpop.xlane.xlu0 %6622 }
0x2040   : > { %18294 = vrcp.f32 %v6623_v62  ;;  %v6789_v40 = vpop.xlane.xlu1 %6788 }
0x2041   : > { %18296 = vrcp.f32 %v6789_v40 }
0x2043   : > { %v6627_v37 = vpop.permute.xlu0 %6626 }
0x2044   : > { %17397 = vmatpush3.msra.mxu1 %v6627_v37  ;;  %v6793_v8 = vpop.permute.xlu1 %6792 }
0x2045   : > { %17406 = vmatprep.subr.mxu1 %v18381_v1 }
0x2047   : > { %v6962_v30 = vpop.permute.xlu0 %6961 }
0x2048   : > { %v6964_v43 = vpop.permute.xlu1 %6963 }
0x204d   : > { %v18295_v18 = vpop.eup %18294 }
0x204e   : > { %v6625_v38 = vmul.f32 %v18295_v18, %v18291_v57  ;;  %v18297_v41 = vpop.eup %18296 }
0x204f   : > { %v6791_v39 = vmul.f32 %v18297_v41, %v18293_v58 }
0x2050   : > { %17399 = vmatmul.mubr.msk.f32.vlgmr.msra.gmra.mxu1 %vm570_vm5, %v6625_v38 }
0x2051   : > { %17407 = vmatpush3.msra.mxu1 %v6793_v8  ;;  %17408 = vmatprep.mubr.msk.f32.mxu1 %vm18382_vm1, %v18381_v1 }
0x2052   : > { %17417 = vmatprep.subr.bf16.mxu1 %v18381_v1 }
0x2054   : > { %17409 = vmatmul.mubr.msk.f32.vlgmr.msra.gmra.mxu1 %vm570_vm5, %v6791_v39  ;;  %v6418_v39 = vadd.f32 %v19992_v36, %v19436_v48  ;;  %v15297_v36 = vld [vmem:[%s21764_s3 + $0x2c] sm:$0xf] }
0x2055   : > { %17419 = vmatprep.mubr.msk.bf16.mxu1 %vm18382_vm1, %v18381_v1  ;;  %17418 = vmatpush3.bf16.msra.mxu1 %v6919_v12 }
0x2056   : > { %17428 = vmatprep.subr.mxu1 %v18381_v1  ;;  %v6421_v42 = vsel %vm518_vm4, %v6418_v39, 0.0 }
0x2110   : > { %v6698_v24 = vpop.f32.mrf.mxu1 }
0x2111   : > { %v6702_v25 = vpack.c.bf16 %v6698_v24, %v6698_v24 }
0x2112   : > { %v17400_v26 = vpop.f32.mrf.mxu1 }
0x2113   : > { %17420 = vmatmul.mubr.msk.bf16.vlgmr.msra.gmra.mxu1 %vm570_vm5, %v6702_v25 }
0x2114   : > { %v6864_v27 = vpop.f32.mrf.mxu1  ;;  %17430 = vmatprep.mubr.msk.f32.mxu1 %vm18382_vm1, %v18381_v1 }
0x2115   : > { %v6868_v28 = vpack.c.bf16 %v6864_v27, %v6864_v27 }
0x2116   : > { %v17410_v29 = vpop.f32.mrf.mxu1 }
0x2117   : > { %17414 = vmatmul.mubr.msk.bf16.vlgmr.msra.gmra.mxu0 %vm570_vm5, %v6868_v28 }
0x2118   : > { %17424 = vmatpush3.xpose.msk.msra.mxu0 %vm570_vm5, %v6964_v43  ;;  %17425 = vmatprep.mubr.msk.f32.mxu0 %vm18382_vm1, %v18381_v1 }
0x2119   : > { %17433 = vmatprep.subr.bf16.mxu0 %v18381_v1 }
0x211f   : > { %17426 = vmatmul.mubr.msk.f32.vlgmr.msra.gmra.mxu0 %vm570_vm5, %v6962_v30 }
0x2120   : > { %17435 = vmatprep.mubr.msk.bf16.mxu0 %vm18382_vm1, %v18381_v1  ;;  %17434 = vmatpush3.bf16.msra.mxu0 %v7131_v55 }
0x2121   : > { %17449 = vmatprep.subr.bf16.mxu0 %v18381_v1 }
0x21d3   : > { %v6955_v31 = vpop.f32.mrf.mxu1 }
0x21d5   : > { %v17421_v32 = vpop.f32.mrf.mxu1 }
0x21d7   : > { %v6909_v19 = vpop.f32.mrf.mxu0  ;;  %v6958_v33 = vpop.f32.mrf.mxu1 }
0x21d8   : > { %v6956_v34 = vadd.f32 %v6955_v31, %v6909_v19  ;;  %v7344_v31 = vsel %vm452_vm0, %v15297_v36, 0 }
0x21d9   : > { %v17415_v35 = vpop.f32.mrf.mxu0  ;;  %v17422_v9 = vpop.f32.mrf.mxu1 }
0x21da   : > { %v15282_v35 = vld [vmem:[%s21771_s10 + $0xc] ss:$0 sm:$0xff] }
0x21db   : > { %v6912_v52 = vpop.f32.mrf.mxu0 }
0x21dc   : > { %v15283_v52 = vld [vmem:[%s21771_s10 + $0xd] ss:$0 sm:$0xff] }
0x21dd   : > { %v17416_v61 = vpop.f32.mrf.mxu0 }
0x21df   : > { %v7035_v10 = vpop.f32.mrf.mxu0 }
0x21e0   : > { %v7039_v46 = vsel %vm570_vm5, %v7035_v10, -inf }
0x21e1   : > { %7040 = vmax.xlane.f32.xlu1 %v7039_v46  ;;  %v17427_v44 = vpop.f32.mrf.mxu0 }
0x21f2   : > { %7176 = vrot.lane.b32.xlu1 %v19994_v63, %s21809_s19 }
0x21f6   : > { %7174 = vrot.lane.b32.xlu1 %v19994_v63, %s21808_s14 }
0x226a   : > { %v7041_v45 = vpop.xlane.xlu1 %7040 }
0x226b   : > { %v7042_v47 = vsub.f32 %v7035_v10, %v7041_v45 }
0x226d   : > { %v7043_v49 = vmul.f32 1.442695, %v7042_v47 }
0x226e   : > { %v7177_v53 = vpop.permute.xlu1 %7176 }
0x226f   : > { %18298 = vpow2.f32 %v7043_v49 }
0x2272   : > { %v7175_v2 = vpop.permute.xlu1 %7174 }
0x227c   : > { %v18299_v22 = vpop.eup %18298 }
0x227d   : > { %v7045_v7 = vsel %vm570_vm5, %v18299_v22, 0.0 }
0x227e   : > { %7046 = vadd.xlane.f32.xlu0 %v7045_v7 }
0x2294   : > { %7050 = vrot.lane.b32.xlu0 %v19994_v63, %s21807_s16 }
0x2307   : > { %v7047_v11 = vpop.xlane.xlu0 %7046 }
0x2308   : > { %18300 = vrcp.f32 %v7047_v11 }
0x230b   : > { %v7051_v50 = vpop.permute.xlu0 %7050 }
0x230c   : > { %17429 = vmatpush3.msra.mxu1 %v7051_v50 }
0x230d   : > { %17439 = vmatprep.subr.mxu1 %v18381_v1 }
0x2315   : > { %v18301_v51 = vpop.eup %18300 }
0x2316   : > { %v7049_v16 = vmul.f32 %v18301_v51, %v18299_v22  ;;  %v17984_v51 = vld [vmem:[%s21766_s5 + $0x8] sm:$0xff]  }
0x2318   : > { %17431 = vmatmul.mubr.msk.f32.vlgmr.msra.gmra.mxu1 %vm570_vm5, %v7049_v16  ;;  %v15314_v16 = vld [vmem:[%s21771_s10 + $0x11] ss:$0 sm:$0xff] }
0x2319   : > { %17440 = vmatpush3.xpose.msk.msra.mxu1 %vm570_vm5, %v7177_v53  ;;  %17441 = vmatprep.mubr.msk.f32.mxu1 %vm18382_vm1, %v18381_v1  ;;  %v17985_v53 = vld [vmem:[%s21766_s5] sm:$0xff]  }
0x231a   : > { %17444 = vmatprep.subr.mxu1 %v18381_v1 }
0x231c   : > { %17442 = vmatmul.mubr.msk.f32.vlgmr.msra.gmra.mxu1 %vm570_vm5, %v7175_v2 }
0x231d   : > { %17446 = vmatprep.mubr.msk.f32.mxu1 %vm18382_vm1, %v18381_v1 }
0x23d8   : > { %v7122_v56 = vpop.f32.mrf.mxu1 }
0x23d9   : > { %v7126_v57 = vpack.c.bf16 %v7122_v56, %v7122_v56 }
0x23da   : > { %v17432_v58 = vpop.f32.mrf.mxu1 }
0x23db   : > { %17436 = vmatmul.mubr.msk.bf16.vlgmr.msra.gmra.mxu0 %vm570_vm5, %v7126_v57 }
0x23dc   : > { %v7248_v59 = vpop.f32.mrf.mxu1  ;;  %17451 = vmatprep.mubr.msk.bf16.mxu0 %vm18382_vm1, %v18381_v1  ;;  %17450 = vmatpush3.bf16.msra.mxu0 %v7344_v31 }
0x23dd   : > { %v7252_v60 = vsel %vm570_vm5, %v7248_v59, -inf  ;;  %17463 = vmatprep.subr.bf16.mxu0 %v18381_v1 }
0x23de   : > { %7253 = vmax.xlane.f32.xlu0 %v7252_v60  ;;  %v17443_v62 = vpop.f32.mrf.mxu1 }
0x23f4   : > { %7263 = vrot.lane.b32.xlu0 %v19994_v63, %s21810_s18 }
0x2467   : > { %v7254_v40 = vpop.xlane.xlu0 %7253 }
0x2468   : > { %v7255_v37 = vsub.f32 %v7248_v59, %v7254_v40 }
0x246a   : > { %v7256_v18 = vmul.f32 1.442695, %v7255_v37 }
0x246b   : > { %v7264_v38 = vpop.permute.xlu0 %7263 }
0x246c   : > { %18302 = vpow2.f32 %v7256_v18  ;;  %17445 = vmatpush3.msra.mxu1 %v7264_v38  ;;  %v15284_v38 = vld [vmem:[%s21771_s10 + $0xe] ss:$0 sm:$0xff] }
0x246d   : > { %17455 = vmatprep.subr.bf16.mxu1 %v18381_v1 }
0x2479   : > { %v18303_v41 = vpop.eup %18302 }
0x247a   : > { %v7258_v8 = vsel %vm570_vm5, %v18303_v41, 0.0 }
0x247b   : > { %7259 = vadd.xlane.f32.xlu1 %v7258_v8  ;;  %v15285_v8 = vld [vmem:[%s21771_s10 + $0xf] ss:$0 sm:$0xff] }
0x247f   : > { %6422 = vadd.xlane.f32.xlu1 %v6421_v42 }
0x249b   : > { %v7167_v12 = vpop.f32.mrf.mxu0 }
0x249c   : > { %v7173_v63 = vadd.f32 %v7167_v12, %v6956_v34 }
0x249d   : > { %v17437_v13 = vpop.f32.mrf.mxu0 }
0x249f   : > { %v7170_v20 = vpop.f32.mrf.mxu0 }
0x24a1   : > { %v17438_v24 = vpop.f32.mrf.mxu0 }
0x2504   : > { %v7260_v25 = vpop.xlane.xlu1 %7259 }
0x2505   : > { %18304 = vrcp.f32 %v7260_v25  ;;  %v17986_v25 = vld [vmem:[%s21765_s4 + $0x8] sm:$0xff]  }
0x2508   : > { %v6423_v26 = vpop.xlane.xlu1 %6422 }
0x2509   : > { %v6424_v27 = vmul.f32 0.03125, %v6423_v26  ;;  %v17987_v26 = vld [vmem:[%s21765_s4] sm:$0xff]  }
0x250b   : > { %v6425_v28 = vsub.f32 %v6418_v39, %v6424_v27  ;;  %v15321_v27 = vld [vmem:[%s21771_s10 + $0x15] ss:$0 sm:$0xff] }
0x250d   : > { %v6426_v29 = vmul.f32 %v6425_v28, %v6425_v28 }
0x250f   : > { %v6427_v43 = vsel %vm518_vm4, %v6426_v29, 0.0 }
0x2510   : > { %6428 = vadd.xlane.f32.xlu1 %v6427_v43 }
0x2512   : > { %v18305_v30 = vpop.eup %18304 }
0x2513   : > { %v7262_v48 = vmul.f32 %v18305_v30, %v18303_v41 }
0x2515   : > { %17447 = vmatmul.mubr.msk.f32.vlgmr.msra.gmra.mxu1 %vm570_vm5, %v7262_v48 }
0x2516   : > { %17459 = vmatprep.mubr.msk.bf16.mxu1 %vm18382_vm1, %v18381_v1  ;;  %17456 = vmatpush3.bf16.msra.mxu1 %v17986_v25 }
0x2517   : > { %17457 = vmatprep.subr.bf16.mxu1 %v18381_v1 }
0x251a   : > { %17458 = vmatpush3.bf16.msra.mxu1 %v17987_v26 }
0x251b   : > { %17471 = vmatprep.subr.mxu1 %v18381_v1 }
0x2599   : > { %v6429_v32 = vpop.xlane.xlu1 %6428 }
0x259a   : > { %v6430_v19 = vmul.f32 0.03125, %v6429_v32 }
0x259c   : > { %v6431_v33 = vadd.f32 1e-05, %v6430_v19 }
0x259e   : > { %18306 = vrsqrt.f32 %v6431_v33  ;;  %v15315_v33 = vld [vmem:[%s21771_s10 + $0x12] ss:$0 sm:$0xff] }
0x25ab   : > { %v18307_v34 = vpop.eup %18306 }
0x25ac   : > { %v6433_v9 = vmul.f32 %v18307_v34, %v6425_v28 }
0x25ae   : > { %v6438_v61 = vmul.f32 %v15282_v35, %v6433_v9  ;;  %v15316_v35 = vld [vmem:[%s21771_s10 + $0x13] ss:$0 sm:$0xff] }
0x25b0   : > { %v6443_v10 = vadd.f32 %v15283_v52, %v6438_v61 }
0x25b2   : > { %v6446_v46 = vsel %vm518_vm4, %v6443_v10, 0.0 }
0x25b3   : > { %6447 = vadd.xlane.f32.xlu1 %v6446_v46 }
0x25d5   : > { %v7335_v44 = vpop.f32.mrf.mxu1 }
0x25d6   : > { %v7339_v45 = vpack.c.bf16 %v7335_v44, %v7335_v44 }
0x25d7   : > { %v17448_v47 = vpop.f32.mrf.mxu1 }
0x25d8   : > { %17452 = vmatmul.mubr.msk.bf16.vlgmr.msra.gmra.mxu0 %vm570_vm5, %v7339_v45 }
0x25d9   : > { %17467 = vmatprep.mubr.msk.bf16.mxu0 %vm18382_vm1, %v18381_v1  ;;  %17464 = vmatpush3.bf16.msra.mxu0 %v17984_v51 }
0x25da   : > { %17465 = vmatprep.subr.bf16.mxu0 %v18381_v1 }
0x25dd   : > { %17466 = vmatpush3.bf16.msra.mxu0 %v17985_v53 }
0x25de   : > { %17476 = vmatprep.subr.mxu0 %v18381_v1 }
0x263c   : > { %v6448_v49 = vpop.xlane.xlu1 %6447 }
0x263d   : > { %v6449_v22 = vmul.f32 0.03125, %v6448_v49 }
0x263f   : > { %v6450_v7 = vsub.f32 %v6443_v10, %v6449_v22  ;;  %v15317_v10 = vld [vmem:[%s21771_s10 + $0x14] ss:$0 sm:$0xff] }
0x2641   : > { %v6451_v11 = vmul.f32 %v6450_v7, %v6450_v7 }
0x2643   : > { %v6452_v50 = vsel %vm518_vm4, %v6451_v11, 0.0 }
0x2644   : > { %6453 = vadd.xlane.f32.xlu0 %v6452_v50 }
0x2698   : > { %v7380_v2 = vpop.f32.mrf.mxu0 }
0x2699   : > { %v7386_v54 = vadd.f32 %v7380_v2, %v7173_v63 }
0x269a   : > { %v17453_v55 = vpop.f32.mrf.mxu0 }
0x269b   : > { %v7391_v56 = vadd.f32 %v15314_v16, %v7386_v54 }
0x269c   : > { %v7383_v57 = vpop.f32.mrf.mxu0 }
0x269d   : > { %v7392_v58 = vadd.f32 %v7391_v56, %v18511_v15 }
0x269e   : > { %v17454_v59 = vpop.f32.mrf.mxu0 }
0x269f   : > { %v7395_v60 = vsel %vm518_vm4, %v7392_v58, 0.0 }
0x26a0   : > { %7396 = vadd.xlane.f32.xlu1 %v7395_v60 }
0x26cd   : > { %v6454_v62 = vpop.xlane.xlu0 %6453 }
0x26ce   : > { %v6455_v40 = vmul.f32 0.03125, %v6454_v62 }
0x26d0   : > { %v6456_v37 = vadd.f32 1e-05, %v6455_v40 }
0x26d2   : > { %18308 = vrsqrt.f32 %v6456_v37 }
0x26df   : > { %v18309_v18 = vpop.eup %18308 }
0x26e0   : > { %v6458_v41 = vmul.f32 %v18309_v18, %v6450_v7 }
0x26e2   : > { %v6463_v39 = vmul.f32 %v15284_v38, %v6458_v41 }
0x26e4   : > { %v6468_v15 = vadd.f32 %v15285_v8, %v6463_v39 }
0x26e6   : > { %v20126_v42 = vpack.c.bf16 %v6468_v15, %v6468_v15 }
0x26e8   : > { %17468 = vmatmul.mubr.msk.bf16.vlgmr.msra.gmra.mxu0 %vm518_vm4, %v20126_v42 }
0x26e9   : > { %17478 = vmatprep.mubr.msk.f32.mxu0 %vm18382_vm1, %v18381_v1 }
0x2729   : > { %v7397_v12 = vpop.xlane.xlu1 %7396 }
0x272a   : > { %v7398_v63 = vmul.f32 0.03125, %v7397_v12 }
0x272c   : > { %v7399_v13 = vsub.f32 %v7392_v58, %v7398_v63 }
0x272e   : > { %v7400_v20 = vmul.f32 %v7399_v13, %v7399_v13 }
0x2730   : > { %v7401_v24 = vsel %vm518_vm4, %v7400_v20, 0.0 }
0x2731   : > { %7402 = vadd.xlane.f32.xlu1 %v7401_v24  ;;  %v7548_v24 = vld [vmem:[%s21767_s6 + $0x4] sm:$0xf] }
0x2732   : > { %v7886_v25 = vsel %vm452_vm0, %v7548_v24, 0 }
0x27a8   : > { %v7541_v28 = vpop.f32.mrf.mxu0 }
0x27a9   : > { %v20144_v29 = vadd.f32 %v15321_v27, %v7541_v28 }
0x27aa   : > { %v17469_v43 = vpop.f32.mrf.mxu0 }
0x27ab   : > { %7718 = vrot.lane.b32.xlu1 %v20144_v29, %s21812_s28 }
0x27ac   : > { %v7544_v30 = vpop.f32.mrf.mxu0 }
0x27ae   : > { %v17470_v48 = vpop.f32.mrf.mxu0 }
0x27ba   : > { %v7403_v36 = vpop.xlane.xlu1 %7402 }
0x27bb   : > { %v7404_v31 = vmul.f32 0.03125, %v7403_v36 }
0x27bd   : > { %v7405_v32 = vadd.f32 1e-05, %v7404_v31 }
0x27bf   : > { %18310 = vrsqrt.f32 %v7405_v32 }
0x27cc   : > { %v18311_v19 = vpop.eup %18310 }
0x27cd   : > { %v7407_v34 = vmul.f32 %v18311_v19, %v7399_v13  ;;  %v7547_v13 = vld [vmem:[%s21767_s6] sm:$0xf] }
0x27ce   : > { %v7932_v20 = vsel %vm452_vm0, %v7547_v13, 0 }
0x27cf   : > { %v7412_v9 = vmul.f32 %v15315_v33, %v7407_v34 }
0x27d1   : > { %v20154_v52 = vadd.f32 %v15316_v35, %v7412_v9 }
0x27d3   : > { %v7418_v61 = vpack.c.bf16 %v20154_v52, %v20154_v52 }
0x27d5   : > { %17460 = vmatmul.mubr.msk.bf16.vlgmr.msra.gmra.mxu1 %vm518_vm4, %v7418_v61 }
0x27d6   : > { %17472 = vmatpush3.xpose.msk.msra.mxu1 %vm570_vm5, %v20144_v29  ;;  %17473 = vmatprep.mubr.msk.f32.mxu1 %vm18382_vm1, %v18381_v1 }
0x27d7   : > { %17481 = vmatprep.subr.mxu1 %v18381_v1 }
0x281d   : > { %v7719_v47 = vpop.permute.xlu1 %7718 }
0x2895   : > { %v7477_v46 = vpop.f32.mrf.mxu1 }
0x2896   : > { %v20167_v44 = vadd.f32 %v15317_v10, %v7477_v46 }
0x2897   : > { %v17461_v45 = vpop.f32.mrf.mxu1 }
0x2898   : > { %7716 = vrot.lane.b32.xlu1 %v20167_v44, %s21812_s28  ;;  %17474 = vmatmul.mubr.msk.f32.vlgmr.msra.gmra.mxu1 %vm570_vm5, %v20167_v44 }
0x2899   : > { %17482 = vmatpush3.xpose.msk.msra.mxu1 %vm570_vm5, %v7719_v47  ;;  %v7480_v49 = vpop.f32.mrf.mxu1  ;;  %17483 = vmatprep.mubr.msk.f32.mxu1 %vm18382_vm1, %v18381_v1 }
0x289a   : > { %17491 = vmatprep.subr.bf16.mxu1 %v18381_v1 }
0x289b   : > { %v17462_v22 = vpop.f32.mrf.mxu1 }
0x290a   : > { %v7717_v7 = vpop.permute.xlu1 %7716 }
0x290b   : > { %17484 = vmatmul.mubr.msk.f32.vlgmr.msra.gmra.mxu1 %vm570_vm5, %v7717_v7 }
0x290c   : > { %17493 = vmatprep.mubr.msk.bf16.mxu1 %vm18382_vm1, %v18381_v1  ;;  %17492 = vmatpush3.bf16.msra.mxu1 %v7886_v25 }
0x290d   : > { %17503 = vmatprep.subr.mxu1 %v18381_v1 }
0x2958   : > { %v7624_v11 = vpop.f32.mrf.mxu1 }
0x2959   : > { %v7628_v50 = vsel %vm570_vm5, %v7624_v11, -inf }
0x295a   : > { %7629 = vmax.xlane.f32.xlu1 %v7628_v50  ;;  %v17475_v51 = vpop.f32.mrf.mxu1 }
0x296b   : > { %7805 = vrot.lane.b32.xlu1 %v20144_v29, %s21816_s20 }
0x29cb   : > { %v7790_v53 = vpop.f32.mrf.mxu1 }
0x29cc   : > { %v7794_v16 = vsel %vm570_vm5, %v7790_v53, -inf }
0x29cd   : > { %7795 = vmax.xlane.f32.xlu0 %v7794_v16  ;;  %v17485_v2 = vpop.f32.mrf.mxu1 }
0x29e3   : > { %v7630_v54 = vpop.xlane.xlu1 %7629 }
0x29e4   : > { %v7631_v55 = vsub.f32 %v7624_v11, %v7630_v54 }
0x29e6   : > { %v7632_v56 = vmul.f32 1.442695, %v7631_v55 }
0x29e7   : > { %v7806_v15 = vpop.permute.xlu1 %7805 }
0x29e8   : > { %18312 = vpow2.f32 %v7632_v56  ;;  %v7549_v56 = vld [vmem:[%s21767_s6 + $0x8] sm:$0xf] }
0x29f5   : > { %v18313_v57 = vpop.eup %18312 }
0x29f6   : > { %v7634_v58 = vsel %vm570_vm5, %v18313_v57, 0.0 }
0x29f7   : > { %7635 = vadd.xlane.f32.xlu0 %v7634_v58 }
0x2a56   : > { %v7796_v59 = vpop.xlane.xlu0 %7795 }
0x2a57   : > { %v7797_v60 = vsub.f32 %v7790_v53, %v7796_v59 }
0x2a59   : > { %v7798_v62 = vmul.f32 1.442695, %v7797_v60 }
0x2a5b   : > { %18314 = vpow2.f32 %v7798_v62 }
0x2a68   : > { %v18315_v40 = vpop.eup %18314 }
0x2a69   : > { %v7800_v37 = vsel %vm570_vm5, %v18315_v40, 0.0 }
0x2a6a   : > { %7801 = vadd.xlane.f32.xlu0 %v7800_v37 }
0x2a80   : > { %7639 = vrot.lane.b32.xlu0 %v20144_v29, %s21811_s26  ;;  %v7636_v18 = vpop.xlane.xlu0 %7635 }
0x2a81   : > { %18316 = vrcp.f32 %v7636_v18 }
0x2a84   : > { %7976 = vrot.lane.b32.xlu0 %v20144_v29, %s21815_s23 }
0x2a88   : > { %7974 = vrot.lane.b32.xlu0 %v20167_v44, %s21815_s23 }
0x2a8e   : > { %v18317_v41 = vpop.eup %18316 }
0x2a8f   : > { %v7638_v8 = vmul.f32 %v18317_v41, %v18313_v57  ;;  %v8144_v57 = vsel %vm452_vm0, %v7549_v56, 0  ;;  %v15353_v56 = vld [vmem:[%s21768_s7 + $0x248] sm:$0xff] }
0x2af3   : > { %v7802_v38 = vpop.xlane.xlu0 %7801 }
0x2af4   : > { %18318 = vrcp.f32 %v7802_v38 }
0x2af7   : > { %v7640_v39 = vpop.permute.xlu0 %7639 }
0x2af8   : > { %17477 = vmatpush3.msra.mxu0 %v7640_v39 }
0x2af9   : > { %17479 = vmatmul.mubr.msk.f32.vlgmr.msra.gmra.mxu0 %vm570_vm5, %v7638_v8  ;;  %17486 = vmatprep.subr.mxu0 %v18381_v1 }
0x2afa   : > { %17487 = vmatpush3.msra.mxu0 %v7806_v15  ;;  %17488 = vmatprep.mubr.msk.f32.mxu0 %vm18382_vm1, %v18381_v1 }
0x2afb   : > { %17497 = vmatprep.subr.bf16.mxu0 %v18381_v1  ;;  %v7977_v36 = vpop.permute.xlu0 %7976 }
0x2aff   : > { %v7975_v31 = vpop.permute.xlu0 %7974 }
0x2b01   : > { %v18319_v12 = vpop.eup %18318 }
0x2b02   : > { %v7804_v63 = vmul.f32 %v18319_v12, %v18315_v40 }
0x2b04   : > { %17489 = vmatmul.mubr.msk.f32.vlgmr.msra.gmra.mxu0 %vm570_vm5, %v7804_v63 }
0x2b05   : > { %17499 = vmatprep.mubr.msk.bf16.mxu0 %vm18382_vm1, %v18381_v1  ;;  %17498 = vmatpush3.bf16.msra.mxu0 %v7932_v20 }
0x2b06   : > { %17508 = vmatprep.subr.mxu0 %v18381_v1 }
0x2bb9   : > { %v7711_v26 = vpop.f32.mrf.mxu0 }
0x2bba   : > { %v7715_v27 = vpack.c.bf16 %v7711_v26, %v7711_v26 }
0x2bbb   : > { %v17480_v28 = vpop.f32.mrf.mxu0 }
0x2bbc   : > { %17500 = vmatmul.mubr.msk.bf16.vlgmr.msra.gmra.mxu0 %vm570_vm5, %v7715_v27 }
0x2bbd   : > { %17510 = vmatprep.mubr.msk.f32.mxu0 %vm18382_vm1, %v18381_v1 }
0x2bc4   : > { %v7877_v43 = vpop.f32.mrf.mxu0 }
0x2bc5   : > { %v7881_v30 = vpack.c.bf16 %v7877_v43, %v7877_v43 }
0x2bc6   : > { %v17490_v48 = vpop.f32.mrf.mxu0 }
0x2bc7   : > { %17494 = vmatmul.mubr.msk.bf16.vlgmr.msra.gmra.mxu1 %vm570_vm5, %v7881_v30 }
0x2bc8   : > { %17504 = vmatpush3.xpose.msk.msra.mxu1 %vm570_vm5, %v7977_v36  ;;  %17505 = vmatprep.mubr.msk.f32.mxu1 %vm18382_vm1, %v18381_v1  ;;  %v15341_v36 = vld [vmem:[%s21771_s10 + $0x16] ss:$0 sm:$0xff] }
0x2bc9   : > { %17513 = vmatprep.subr.bf16.mxu1 %v18381_v1 }
0x2bcf   : > { %17506 = vmatmul.mubr.msk.f32.vlgmr.msra.gmra.mxu1 %vm570_vm5, %v7975_v31 }
0x2bd0   : > { %17515 = vmatprep.mubr.msk.bf16.mxu1 %vm18382_vm1, %v18381_v1  ;;  %17514 = vmatpush3.bf16.msra.mxu1 %v8144_v57 }
0x2bd1   : > { %17529 = vmatprep.subr.bf16.mxu1 %v18381_v1 }
0x2c7c   : > { %v7968_v32 = vpop.f32.mrf.mxu0 }
0x2c7e   : > { %v17501_v19 = vpop.f32.mrf.mxu0 }
0x2c80   : > { %v7971_v33 = vpop.f32.mrf.mxu0 }
0x2c82   : > { %v17502_v34 = vpop.f32.mrf.mxu0 }
0x2c87   : > { %v7922_v35 = vpop.f32.mrf.mxu1 }
0x2c88   : > { %v7969_v9 = vadd.f32 %v7968_v32, %v7922_v35 }
0x2c89   : > { %v17495_v61 = vpop.f32.mrf.mxu1 }
0x2c8b   : > { %v7925_v10 = vpop.f32.mrf.mxu1 }
0x2c8d   : > { %v17496_v46 = vpop.f32.mrf.mxu1 }
0x2c8f   : > { %v8048_v45 = vpop.f32.mrf.mxu1 }
0x2c90   : > { %v8052_v47 = vsel %vm570_vm5, %v8048_v45, -inf }
0x2c91   : > { %8053 = vmax.xlane.f32.xlu0 %v8052_v47  ;;  %v17507_v49 = vpop.f32.mrf.mxu1 }
0x2ca7   : > { %8063 = vrot.lane.b32.xlu0 %v20144_v29, %s21806_s17 }
0x2cab   : > { %8187 = vrot.lane.b32.xlu0 %v20167_v44, %s21808_s14 }
0x2d1a   : > { %v8054_v22 = vpop.xlane.xlu0 %8053 }
0x2d1b   : > { %v8055_v7 = vsub.f32 %v8048_v45, %v8054_v22  ;;  %v15360_v22 = vld [vmem:[%s21768_s7 + $0x280] sm:$0xff] }
0x2d1d   : > { %v8056_v11 = vmul.f32 1.442695, %v8055_v7  ;;  %v15368_v7 = vld [vmem:[%s21768_s7 + $0x2c0] sm:$0xff] }
0x2d1e   : > { %v8064_v50 = vpop.permute.xlu0 %8063 }
0x2d1f   : > { %18320 = vpow2.f32 %v8056_v11  ;;  %17509 = vmatpush3.msra.mxu0 %v8064_v50  ;;  %v15397_v11 = vcombine.high %v15360_v22, %v15368_v7  ;;  %v15369_v50 = vld [vmem:[%s21768_s7 + $0x2c8] sm:$0xff] }
0x2d20   : > { %17519 = vmatprep.subr.mxu0 %v18381_v1 }
0x2d22   : > { %v8188_v55 = vpop.permute.xlu0 %8187 }
0x2d2c   : > { %v18321_v51 = vpop.eup %18320 }
0x2d2d   : > { %v8058_v53 = vsel %vm570_vm5, %v18321_v51, 0.0 }
0x2d2e   : > { %8059 = vadd.xlane.f32.xlu1 %v8058_v53 }
0x2d3f   : > { %8189 = vrot.lane.b32.xlu1 %v20144_v29, %s21808_s14 }
0x2db7   : > { %v8060_v16 = vpop.xlane.xlu1 %8059 }
0x2db8   : > { %18322 = vrcp.f32 %v8060_v16 }
0x2dbb   : > { %v8190_v44 = vpop.permute.xlu1 %8189 }
0x2dc5   : > { %v18323_v2 = vpop.eup %18322 }
0x2dc6   : > { %v8062_v54 = vmul.f32 %v18323_v2, %v18321_v51  ;;  %v15396_v51 = vcombine.low %v15360_v22, %v15368_v7  ;;  %v15344_v2 = vld [vmem:[%s21768_s7 + $0x200] sm:$0xff] }
0x2dc8   : > { %17511 = vmatmul.mubr.msk.f32.vlgmr.msra.gmra.mxu0 %vm570_vm5, %v8062_v54  ;;  %v15352_v54 = vld [vmem:[%s21768_s7 + $0x240] sm:$0xff] }
0x2dc9   : > { %17520 = vmatpush3.xpose.msk.msra.mxu0 %vm570_vm5, %v8190_v44  ;;  %17521 = vmatprep.mubr.msk.f32.mxu0 %vm18382_vm1, %v18381_v1  ;;  %v15345_v44 = vld [vmem:[%s21768_s7 + $0x208] sm:$0xff]  ;;  %v15380_v57 = vcombine.low %v15344_v2, %v15352_v54 }
0x2dca   : > { %17524 = vmatprep.subr.mxu0 %v18381_v1 }
0x2dcc   : > { %17522 = vmatmul.mubr.msk.f32.vlgmr.msra.gmra.mxu0 %vm570_vm5, %v8188_v55  ;;  %v15381_v55 = vcombine.high %v15344_v2, %v15352_v54 }
0x2dcd   : > { %17526 = vmatprep.mubr.msk.f32.mxu0 %vm18382_vm1, %v18381_v1 }
0x2e88   : > { %v8135_v58 = vpop.f32.mrf.mxu0 }
0x2e89   : > { %v8139_v59 = vpack.c.bf16 %v8135_v58, %v8135_v58  ;;  %v15382_v58 = vcombine.low %v15345_v44, %v15353_v56 }
0x2e8a   : > { %v17512_v60 = vpop.f32.mrf.mxu0 }
0x2e8b   : > { %17516 = vmatmul.mubr.msk.bf16.vlgmr.msra.gmra.mxu1 %vm570_vm5, %v8139_v59  ;;  %v15383_v59 = vcombine.high %v15345_v44, %v15353_v56  ;;  %v15362_v60 = vld [vmem:[%s21768_s7 + $0x290] sm:$0xff] }
0x2e8c   : > { %v8261_v62 = vpop.f32.mrf.mxu0  ;;  %17531 = vmatprep.mubr.msk.bf16.mxu1 %vm18382_vm1, %v18381_v1  ;;  %v15358_v56 = vld [vmem:[%s21768_s7 + $0x270] sm:$0xff] }
0x2e8d   : > { %v8265_v40 = vsel %vm570_vm5, %v8261_v62, -inf }
0x2e8e   : > { %8266 = vmax.xlane.f32.xlu0 %v8265_v40  ;;  %v17523_v37 = vpop.f32.mrf.mxu0  ;;  %v15363_v40 = vld [vmem:[%s21768_s7 + $0x298] sm:$0xff] }
0x2ea4   : > { %8276 = vrot.lane.b32.xlu0 %v20144_v29, %s21809_s19  ;;  %v7550_v29 = vld [vmem:[%s21767_s6 + $0xc] sm:$0xf] }
0x2ea5   : > { %v8357_v28 = vsel %vm452_vm0, %v7550_v29, 0  ;;  %v15347_v29 = vld [vmem:[%s21768_s7 + $0x218] sm:$0xff] }
0x2ea6   : > { %17530 = vmatpush3.bf16.msra.mxu1 %v8357_v28  ;;  %v15355_v28 = vld [vmem:[%s21768_s7 + $0x258] sm:$0xff] }
0x2f17   : > { %v8267_v18 = vpop.xlane.xlu0 %8266 }
0x2f18   : > { %v8268_v38 = vsub.f32 %v8261_v62, %v8267_v18  ;;  %v15370_v62 = vld [vmem:[%s21768_s7 + $0x2d0] sm:$0xff] }
0x2f19   : > { %v15400_v37 = vcombine.low %v15362_v60, %v15370_v62  ;;  %v15401_v18 = vcombine.high %v15362_v60, %v15370_v62 }
0x2f1a   : > { %v8269_v41 = vmul.f32 1.442695, %v8268_v38  ;;  %v15371_v38 = vld [vmem:[%s21768_s7 + $0x2d8] sm:$0xff] }
0x2f1b   : > { %v8277_v8 = vpop.permute.xlu0 %8276 }
0x2f1c   : > { %18324 = vpow2.f32 %v8269_v41  ;;  %17525 = vmatpush3.msra.mxu0 %v8277_v8  ;;  %v15402_v41 = vcombine.low %v15363_v40, %v15371_v38  ;;  %v15403_v8 = vcombine.high %v15363_v40, %v15371_v38  ;;  %v17988_v38 = vld [vmem:[%s21769_s8 + $0x878] sm:$0xff]  }
0x2f1d   : > { %8730 = vmatprep.subr.bf16.mxu0 %v15397_v11  ;;  %v15366_v11 = vld [vmem:[%s21768_s7 + $0x2b0] sm:$0xff] }
0x2f29   : > { %v18325_v39 = vpop.eup %18324 }
0x2f2a   : > { %v8271_v15 = vsel %vm570_vm5, %v18325_v39, 0.0 }
0x2f2b   : > { %8272 = vadd.xlane.f32.xlu1 %v8271_v15 }
0x2f4b   : > { %v8180_v12 = vpop.f32.mrf.mxu1 }
0x2f4c   : > { %v8186_v63 = vadd.f32 %v8180_v12, %v7969_v9 }
0x2f4d   : > { %v17517_v13 = vpop.f32.mrf.mxu1 }
0x2f4e   : > { %v15342_v13 = vld [vmem:[%s21771_s10 + $0x17] ss:$0 sm:$0xff] }
0x2f4f   : > { %v8183_v20 = vpop.f32.mrf.mxu1 }
0x2f51   : > { %v17518_v24 = vpop.f32.mrf.mxu1 }
0x2f52   : > { %v15343_v24 = vld [vmem:[%s21771_s10 + $0x18] ss:$0 sm:$0xff] }
0x2fb4   : > { %v8273_v25 = vpop.xlane.xlu1 %8272 }
0x2fb5   : > { %18326 = vrcp.f32 %v8273_v25 }
0x2fc2   : > { %v18327_v26 = vpop.eup %18326 }
0x2fc3   : > { %v8275_v27 = vmul.f32 %v18327_v26, %v18325_v39  ;;  %v15346_v26 = vld [vmem:[%s21768_s7 + $0x210] sm:$0xff] }
0x2fc5   : > { %17527 = vmatmul.mubr.msk.f32.vlgmr.msra.gmra.mxu0 %vm570_vm5, %v8275_v27  ;;  %v15354_v27 = vld [vmem:[%s21768_s7 + $0x250] sm:$0xff] }
0x2fc6   : > { %8750 = vmatprep.mubr.bf16.mxu0 %v18380_v0  ;;  %8731 = vmatpush1.bf16.msra.mxu0 %v15396_v51  ;;  %v15367_v51 = vld [vmem:[%s21768_s7 + $0x2b8] sm:$0xff] }
0x2fc7   : > { %8732 = vmatprep.subr.bf16.mxu0 %v15381_v55  ;;  %v15350_v55 = vld [vmem:[%s21768_s7 + $0x230] sm:$0xff] }
0x2fc8   : > { %v15393_v62 = vcombine.high %v15350_v55, %v15358_v56 }
0x2fca   : > { %8733 = vmatpush1.bf16.msra.mxu0 %v15380_v57  ;;  %v15351_v57 = vld [vmem:[%s21768_s7 + $0x238] sm:$0xff] }
0x2fcb   : > { %8812 = vmatprep.subr.bf16.mxu0 %v15401_v18 }
0x3085   : > { %v8348_v43 = vpop.f32.mrf.mxu0 }
0x3086   : > { %v8352_v30 = vpack.c.bf16 %v8348_v43, %v8348_v43 }
0x3087   : > { %v17528_v48 = vpop.f32.mrf.mxu0 }
0x3088   : > { %17532 = vmatmul.mubr.msk.bf16.vlgmr.msra.gmra.mxu1 %vm570_vm5, %v8352_v30  ;;  %v15385_v48 = vcombine.high %v15346_v26, %v15354_v27 }
0x3089   : > { %8791 = vmatprep.mubr.bf16.mxu1 %v18380_v0 }
0x3148   : > { %v8393_v31 = vpop.f32.mrf.mxu1 }
0x3149   : > { %v8399_v32 = vadd.f32 %v8393_v31, %v8186_v63  ;;  %v15364_v31 = vld [vmem:[%s21768_s7 + $0x2a0] sm:$0xff] }
0x314a   : > { %v17533_v19 = vpop.f32.mrf.mxu1 }
0x314b   : > { %v8404_v33 = vadd.f32 %v15341_v36, %v8399_v32  ;;  %v15387_v36 = vcombine.high %v15347_v29, %v15355_v28  ;;  %v15372_v32 = vld [vmem:[%s21768_s7 + $0x2e0] sm:$0xff]  ;;  %v15365_v19 = vld [vmem:[%s21768_s7 + $0x2a8] sm:$0xff] }
0x314c   : > { %v8396_v34 = vpop.f32.mrf.mxu1 }
0x314d   : > { %v8405_v35 = vadd.f32 %v8404_v33, %v20154_v52  ;;  %v15361_v52 = vld [vmem:[%s21768_s7 + $0x288] sm:$0xff]  ;;  %v15384_v34 = vcombine.low %v15346_v26, %v15354_v27  ;;  %v18000_v27 = vld [vmem:[%s21769_s8 + $0x860] sm:$0xff]  }
0x314e   : > { %v17534_v9 = vpop.f32.mrf.mxu1  ;;  %v15398_v53 = vcombine.low %v15361_v52, %v15369_v50  ;;  %v15399_v16 = vcombine.high %v15361_v52, %v15369_v50  ;;  %v15373_v33 = vld [vmem:[%s21768_s7 + $0x2e8] sm:$0xff]  ;;  %v15374_v50 = vld [vmem:[%s21768_s7 + $0x2f0] sm:$0xff] }
0x314f   : > { %v8408_v61 = vsel %vm518_vm4, %v8405_v35, 0.0  ;;  %v15405_v9 = vcombine.high %v15364_v31, %v15372_v32  ;;  %v15406_v22 = vcombine.low %v15365_v19, %v15373_v33  ;;  %v15409_v54 = vcombine.high %v15366_v11, %v15374_v50  ;;  %v17999_v26 = vld [vmem:[%s21769_s8 + $0x8a8] sm:$0xff]  }
0x3150   : > { %8409 = vadd.xlane.f32.xlu1 %v8408_v61  ;;  %8771 = vmatprep.subr.bf16.mxu1 %v15399_v16  ;;  %v15407_v61 = vcombine.high %v15365_v19, %v15373_v33  ;;  %v18008_v19 = vld [vmem:[%s21769_s8 + $0x850] sm:$0xff]  }
0x3151   : > { %8772 = vmatpush1.bf16.msra.mxu1 %v15398_v53  ;;  %v15375_v53 = vld [vmem:[%s21768_s7 + $0x2f8] sm:$0xff]  ;;  %v18009_v33 = vld [vmem:[%s21769_s8 + $0x8d0] sm:$0xff]  }
0x3152   : > { %8773 = vmatprep.subr.bf16.mxu1 %v15383_v59  ;;  %v15411_v44 = vcombine.high %v15367_v51, %v15375_v53  ;;  %v15408_v59 = vcombine.low %v15366_v11, %v15374_v50  ;;  %v15410_v60 = vcombine.low %v15367_v51, %v15375_v53  ;;  %v15376_v11 = vld [vmem:[%s21772_s11 + $0x2] ss:$8 sm:$0xf] }
0x3153   : > { %v15377_v50 = vld [vmem:[%s21772_s11 + $0x2] ss:$8 sm:$0xf0] }
0x3154   : > { %v20502_v51 = vor.u32 %v15377_v50, %v15376_v11  ;;  %v18030_v11 = vld [vmem:[%s21769_s8 + $0x928] sm:$0xff]  }
0x3155   : > { %8774 = vmatpush1.bf16.msra.mxu1 %v15382_v58  ;;  %v15359_v58 = vld [vmem:[%s21768_s7 + $0x278] sm:$0xff]  ;;  %v18031_v50 = vld [vmem:[%s21769_s8 + $0x9a8] sm:$0xff]  }
0x3156   : > { %8853 = vmatprep.subr.bf16.mxu1 %v15403_v8  ;;  %v15395_v40 = vcombine.high %v15351_v57, %v15359_v58  ;;  %v15394_v18 = vcombine.low %v15351_v57, %v15359_v58  ;;  %v17990_v8 = vld [vmem:[%s21769_s8 + $0x838] sm:$0xff]   ;;  %v8478_v53 = vrot.slane %v20502_v51, %v18874_v3 }
0x31d9   : > { %v8410_v10 = vpop.xlane.xlu1 %8409 }
0x31da   : > { %v8411_v46 = vmul.f32 0.03125, %v8410_v10  ;;  %v15348_v10 = vld [vmem:[%s21768_s7 + $0x220] sm:$0xff] }
0x31dc   : > { %v8412_v45 = vsub.f32 %v8405_v35, %v8411_v46  ;;  %v15386_v35 = vcombine.low %v15347_v29, %v15355_v28  ;;  %v15356_v46 = vld [vmem:[%s21768_s7 + $0x260] sm:$0xff] }
0x31dd   : > { %v15389_v7 = vcombine.high %v15348_v10, %v15356_v46  ;;  %v15388_v16 = vcombine.low %v15348_v10, %v15356_v46  ;;  %v18001_v29 = vld [vmem:[%s21769_s8 + $0x8e0] sm:$0xff]   ;;  %v18014_v10 = vld [vmem:[%s21769_s8 + $0x808] sm:$0xff]  }
0x31de   : > { %v8413_v47 = vmul.f32 %v8412_v45, %v8412_v45  ;;  %v18002_v28 = vld [vmem:[%s21769_s8 + $0x820] sm:$0xff]   ;;  %v18015_v46 = vld [vmem:[%s21769_s8 + $0x888] sm:$0xff]  }
0x31e0   : > { %v8414_v49 = vsel %vm518_vm4, %v8413_v47, 0.0  ;;  %v15357_v47 = vld [vmem:[%s21768_s7 + $0x268] sm:$0xff] }
0x31e1   : > { %8415 = vadd.xlane.f32.xlu1 %v8414_v49  ;;  %v15404_v49 = vcombine.low %v15364_v31, %v15372_v32  ;;  %v18006_v31 = vld [vmem:[%s21769_s8 + $0x818] sm:$0xff]  }
0x31e2   : > { %v18007_v32 = vld [vmem:[%s21769_s8 + $0x898] sm:$0xff]  }
0x326a   : > { %v8416_v39 = vpop.xlane.xlu1 %8415 }
0x326b   : > { %v8417_v15 = vmul.f32 0.03125, %v8416_v39  ;;  %v17991_v39 = vld [vmem:[%s21769_s8 + $0x8b8] sm:$0xff]  }
0x326d   : > { %v8418_v12 = vadd.f32 1e-05, %v8417_v15  ;;  %v17992_v15 = vld [vmem:[%s21769_s8 + $0x870] sm:$0xff]  }
0x326f   : > { %18328 = vrsqrt.f32 %v8418_v12  ;;  %v17993_v12 = vld [vmem:[%s21769_s8 + $0x8f0] sm:$0xff]  }
0x327c   : > { %v18329_v63 = vpop.eup %18328 }
0x327d   : > { %v8420_v20 = vmul.f32 %v18329_v63, %v8412_v45  ;;  %v15349_v45 = vld [vmem:[%s21768_s7 + $0x228] sm:$0xff]  ;;  %v17994_v63 = vld [vmem:[%s21769_s8 + $0x830] sm:$0xff]  }
0x327e   : > { %v15391_v52 = vcombine.high %v15349_v45, %v15357_v47  ;;  %v15390_v2 = vcombine.low %v15349_v45, %v15357_v47  ;;  %v18016_v45 = vld [vmem:[%s21769_s8 + $0x840] sm:$0xff]  }
0x327f   : > { %v8425_v25 = vmul.f32 %v15342_v13, %v8420_v20  ;;  %v17995_v13 = vld [vmem:[%s21769_s8 + $0x8b0] sm:$0xff]   ;;  %v17996_v20 = vld [vmem:[%s21769_s8 + $0x868] sm:$0xff]   ;;  %v18017_v47 = vld [vmem:[%s21769_s8 + $0x8c0] sm:$0xff]  }
0x3281   : > { %v20318_v43 = vadd.f32 %v15343_v24, %v8425_v25  ;;  %v17997_v24 = vld [vmem:[%s21769_s8 + $0x8e8] sm:$0xff]  }
0x3282   : > { %v17998_v25 = vld [vmem:[%s21769_s8 + $0x828] sm:$0xff]  }
0x3283   : > { %v20322_v30 = vpack.c.bf16 %v20318_v43, %v20318_v43 }
0x3285   : > { %15412 = vmatmul.mubr.msk.bf16.vlgmr.msra.gmra.mxu0 %vm518_vm4, %v20322_v30  ;;  %15413 = vmatmul.mubr.msk.bf16.vlgmr.msra.gmra.mxu1 %vm518_vm4, %v20322_v30 }
0x3286   : > { %8813 = vmatpush1.bf16.msra.mxu0 %v15400_v37  ;;  %8854 = vmatpush1.bf16.msra.mxu1 %v15402_v41  ;;  %v15392_v37 = vcombine.low %v15350_v55, %v15358_v56  ;;  %v17989_v41 = vld [vmem:[%s21769_s8 + $0x8f8] sm:$0xff]  }
0x3287   : > { %8814 = vmatprep.subr.bf16.mxu0 %v15385_v48  ;;  %8855 = vmatprep.subr.bf16.mxu1 %v15387_v36  ;;  %v18004_v48 = vld [vmem:[%s21769_s8 + $0x858] sm:$0xff]  }
0x3288   : > { %8832 = vmatprep.mubr.bf16.mxu0 %v18380_v0  ;;  %8873 = vmatprep.mubr.bf16.mxu1 %v18380_v0  ;;  %v18005_v36 = vld [vmem:[%s21769_s8 + $0x8d8] sm:$0xff]  }
0x328a   : > { %8815 = vmatpush1.bf16.msra.mxu0 %v15384_v34  ;;  %8856 = vmatpush1.bf16.msra.mxu1 %v15386_v35  ;;  %v18010_v34 = vld [vmem:[%s21769_s8 + $0x810] sm:$0xff]  }
0x328b   : > { %8894 = vmatprep.subr.bf16.mxu0 %v15405_v9  ;;  %8935 = vmatprep.subr.bf16.mxu1 %v15407_v61  ;;  %v18011_v35 = vld [vmem:[%s21769_s8 + $0x890] sm:$0xff]   ;;  %v18012_v9 = vld [vmem:[%s21769_s8 + $0x848] sm:$0xff]  }
0x328c   : > { %v18013_v61 = vld [vmem:[%s21769_s8 + $0x8c8] sm:$0xff]  }
0x328d   : > { %15414 = vmatmul.mubr.msk.bf16.vlgmr.msra.gmra.mxu0 %vm518_vm4, %v20322_v30  ;;  %15415 = vmatmul.mubr.msk.bf16.vlgmr.msra.gmra.mxu1 %vm518_vm4, %v20322_v30 }
0x328e   : > { %8895 = vmatpush1.bf16.msra.mxu0 %v15404_v49  ;;  %8936 = vmatpush1.bf16.msra.mxu1 %v15406_v22  ;;  %v18018_v49 = vld [vmem:[%s21769_s8 + $0x800] sm:$0xff]  }
0x328f   : > { %8896 = vmatprep.subr.bf16.mxu0 %v15389_v7  ;;  %8937 = vmatprep.subr.bf16.mxu1 %v15391_v52  ;;  %v18019_v22 = vld [vmem:[%s21769_s8 + $0x880] sm:$0xff]   ;;  %v18020_v7 = vld [vmem:[%s21769_s8 + $0x978] sm:$0xff]  }
0x3290   : > { %8914 = vmatprep.mubr.bf16.mxu0 %v18380_v0  ;;  %8955 = vmatprep.mubr.bf16.mxu1 %v18380_v0  ;;  %v18021_v52 = vld [vmem:[%s21769_s8 + $0x9f8] sm:$0xff]  }
0x3292   : > { %8897 = vmatpush1.bf16.msra.mxu0 %v15388_v16  ;;  %8938 = vmatpush1.bf16.msra.mxu1 %v15390_v2  ;;  %v8486_v16 = vrot.slane %v20502_v51, %v18877_v5  ;;  %v8482_v2 = vrot.slane %v20502_v51, %v18880_v6 }
0x3293   : > { %8976 = vmatprep.subr.bf16.mxu0 %v15409_v54  ;;  %9017 = vmatprep.subr.bf16.mxu1 %v15411_v44  ;;  %v8490_v54 = vrot.slane %v20502_v51, %v18883_v4 }
0x3295   : > { %15416 = vmatmul.mubr.msk.bf16.vlgmr.msra.gmra.mxu0 %vm518_vm4, %v20322_v30  ;;  %15417 = vmatmul.mubr.msk.bf16.vlgmr.msra.gmra.mxu1 %vm518_vm4, %v20322_v30 }
0x3296   : > { %8977 = vmatpush1.bf16.msra.mxu0 %v15408_v59  ;;  %9018 = vmatpush1.bf16.msra.mxu1 %v15410_v60 }
0x3297   : > { %8978 = vmatprep.subr.bf16.mxu0 %v15393_v62  ;;  %9019 = vmatprep.subr.bf16.mxu1 %v15395_v40 }
0x3298   : > { %8996 = vmatprep.mubr.bf16.mxu0 %v18380_v0  ;;  %9037 = vmatprep.mubr.bf16.mxu1 %v18380_v0 }
0x329a   : > { %8979 = vmatpush1.bf16.msra.mxu0 %v15392_v37  ;;  %9020 = vmatpush1.bf16.msra.mxu1 %v15394_v18 }
0x329b   : > { %16815 = vmatprep.subr.bf16.mxu0 %v17988_v38  ;;  %16837 = vmatprep.subr.bf16.mxu1 %v17989_v41 }
0x329d   : > { %15418 = vmatmul.mubr.msk.bf16.vlgmr.msra.gmra.mxu0 %vm518_vm4, %v20322_v30  ;;  %15419 = vmatmul.mubr.msk.bf16.vlgmr.msra.gmra.mxu1 %vm518_vm4, %v20322_v30  ;;  %v18003_v30 = vld [vmem:[%s21769_s8 + $0x8a0] sm:$0xff]  }
0x329e   : > { %16816 = vmatpush3.bf16.msra.mxu0 %v17990_v8  ;;  %16838 = vmatpush3.bf16.msra.mxu1 %v17991_v39 }
0x329f   : > { %16817 = vmatprep.subr.bf16.mxu0 %v17992_v15  ;;  %16839 = vmatprep.subr.bf16.mxu1 %v17993_v12 }
0x32a2   : > { %16818 = vmatpush3.bf16.msra.mxu0 %v17994_v63  ;;  %16840 = vmatpush3.bf16.msra.mxu1 %v17995_v13  ;;  %v8498_v13 = vrot.slane %v20502_v51, %v18894_v21 }
0x32a3   : > { %16819 = vmatprep.subr.bf16.mxu0 %v17996_v20  ;;  %16841 = vmatprep.subr.bf16.mxu1 %v17997_v24  ;;  %v8506_v20 = vrot.slane %v20502_v51, %v18897_v23  ;;  %v18022_v24 = vld [vmem:[%s21769_s8 + $0x938] sm:$0xff]  }
0x32a6   : > { %16820 = vmatpush3.bf16.msra.mxu0 %v17998_v25  ;;  %16842 = vmatpush3.bf16.msra.mxu1 %v17999_v26  ;;  %v18023_v25 = vld [vmem:[%s21769_s8 + $0x9b8] sm:$0xff]  }
0x32a7   : > { %16821 = vmatprep.subr.bf16.mxu0 %v18000_v27  ;;  %16843 = vmatprep.subr.bf16.mxu1 %v18001_v29 }
0x32aa   : > { %16822 = vmatpush3.bf16.msra.mxu0 %v18002_v28  ;;  %16844 = vmatpush3.bf16.msra.mxu1 %v18003_v30  ;;  %v18024_v30 = vld [vmem:[%s21769_s8 + $0x970] sm:$0xff]  }
0x32ab   : > { %16823 = vmatprep.subr.bf16.mxu0 %v18004_v48  ;;  %16845 = vmatprep.subr.bf16.mxu1 %v18005_v36  ;;  %v18025_v48 = vld [vmem:[%s21769_s8 + $0x9f0] sm:$0xff]  }
0x32ae   : > { %16824 = vmatpush3.bf16.msra.mxu0 %v18006_v31  ;;  %16846 = vmatpush3.bf16.msra.mxu1 %v18007_v32 }
0x32af   : > { %16825 = vmatprep.subr.bf16.mxu0 %v18008_v19  ;;  %16847 = vmatprep.subr.bf16.mxu1 %v18009_v33  ;;  %v18026_v33 = vld [vmem:[%s21769_s8 + $0x930] sm:$0xff]  }
0x32b2   : > { %16826 = vmatpush3.bf16.msra.mxu0 %v18010_v34  ;;  %16848 = vmatpush3.bf16.msra.mxu1 %v18011_v35  ;;  %v18027_v34 = vld [vmem:[%s21769_s8 + $0x9b0] sm:$0xff]  }
0x32b3   : > { %16827 = vmatprep.subr.bf16.mxu0 %v18012_v9  ;;  %16849 = vmatprep.subr.bf16.mxu1 %v18013_v61  ;;  %v18028_v61 = vld [vmem:[%s21769_s8 + $0x968] sm:$0xff]  }
0x32b6   : > { %16828 = vmatpush3.bf16.msra.mxu0 %v18014_v10  ;;  %16850 = vmatpush3.bf16.msra.mxu1 %v18015_v46  ;;  %v18029_v10 = vld [vmem:[%s21769_s8 + $0x9e8] sm:$0xff]  }
0x32b7   : > { %16829 = vmatprep.subr.bf16.mxu0 %v18016_v45  ;;  %16851 = vmatprep.subr.bf16.mxu1 %v18017_v47 }
0x32ba   : > { %16830 = vmatpush3.bf16.msra.mxu0 %v18018_v49  ;;  %16852 = vmatpush3.bf16.msra.mxu1 %v18019_v22 }
0x32bb   : > { %16859 = vmatprep.subr.bf16.mxu0 %v18020_v7  ;;  %16881 = vmatprep.subr.bf16.mxu1 %v18021_v52  ;;  %v15378_v52 = vld [vmem:[%s21772_s11 + $0x42] ss:$8 sm:$0xf] }
0x3345   : > { %v8752_v44 = vpop.f32.mrf.mxu0  ;;  %v8793_v55 = vpop.f32.mrf.mxu1 }
0x3346   : > { %v8753_v56 = vadd.f32 %v8752_v44, %v8478_v53  ;;  %v8794_v57 = vadd.f32 %v8793_v55, %v8486_v16  ;;  %v15379_v53 = vld [vmem:[%s21772_s11 + $0x42] ss:$8 sm:$0xf0] }
0x3347   : > { %v8754_v58 = vpop.f32.mrf.mxu0  ;;  %v8795_v59 = vpop.f32.mrf.mxu1  ;;  %v18033_v44 = vld [vmem:[%s21769_s8 + $0x9e0] sm:$0xff]  }
0x3348   : > { %v8755_v60 = vadd.f32 %v8754_v58, %v8482_v2  ;;  %v8796_v62 = vadd.f32 %v8795_v59, %v8490_v54  ;;  %v9046_v40 = vmax.f32 %v8753_v56, 0.0  ;;  %v9048_v37 = vmax.f32 %v8794_v57, 0.0  ;;  %v18032_v54 = vld [vmem:[%s21769_s8 + $0x960] sm:$0xff]  }
0x3349   : > { %v8756_v18 = vpop.f32.mrf.mxu0  ;;  %v8797_v38 = vpop.f32.mrf.mxu1  ;;  %v20566_v57 = vor.u32 %v15379_v53, %v15378_v52  ;;  %v18034_v58 = vld [vmem:[%s21769_s8 + $0x920] sm:$0xff]   ;;  %v18052_v53 = vld [vmem:[%s21769_s8 + $0xa78] sm:$0xff]  }
0x334a   : > { %v9047_v41 = vmax.f32 %v8755_v60, 0.0  ;;  %v9049_v8 = vmax.f32 %v8796_v62, 0.0  ;;  %v9062_v26 = vpack.c.bf16 %v9046_v40, %v9046_v40  ;;  %v9064_v27 = vpack.c.bf16 %v9048_v37, %v9048_v37  ;;  %v18035_v59 = vld [vmem:[%s21769_s8 + $0x9a0] sm:$0xff]   ;;  %v18036_v40 = vld [vmem:[%s21769_s8 + $0x958] sm:$0xff]  }
0x334b   : > { %v8757_v39 = vpop.f32.mrf.mxu0  ;;  %v8798_v15 = vpop.f32.mrf.mxu1  ;;  %v18037_v37 = vld [vmem:[%s21769_s8 + $0x9d8] sm:$0xff]   ;;  %v8526_v18 = vrot.slane %v20566_v57, %v18954_v14  ;;  %v8534_v38 = vrot.slane %v20566_v57, %v18957_v17 }
0x334c   : > { %v9063_v12 = vpack.c.bf16 %v9047_v41, %v9047_v41  ;;  %v9065_v63 = vpack.c.bf16 %v9049_v8, %v9049_v8  ;;  %v18038_v39 = vld [vmem:[%s21769_s8 + $0x918] sm:$0xff]  }
0x334d   : > { %v20522_v29 = vpop.f32.mrf.mxu0  ;;  %v20524_v28 = vpop.f32.mrf.mxu1  ;;  %v18039_v15 = vld [vmem:[%s21769_s8 + $0x998] sm:$0xff]  }
0x334e   : > { %10140 = vmatprep.mubr.bf16.mxu0 %v9063_v12  ;;  %10180 = vmatprep.mubr.bf16.mxu1 %v9065_v63 }
0x334f   : > { %v8836_v36 = vpop.f32.mrf.mxu0  ;;  %v8877_v31 = vpop.f32.mrf.mxu1  ;;  %10141 = vmatmul.mubr.bf16.vlgmr.msra.gmra.mxu0 %v9062_v26  ;;  %10181 = vmatmul.mubr.bf16.vlgmr.msra.gmra.mxu1 %v9064_v27 }
0x3350   : > { %v8837_v32 = vadd.f32 %v8836_v36, %v8498_v13  ;;  %v8878_v19 = vadd.f32 %v8877_v31, %v8506_v20  ;;  %16860 = vmatpush3.bf16.msra.mxu0 %v18022_v24  ;;  %16882 = vmatpush3.bf16.msra.mxu1 %v18023_v25  ;;  %v18040_v13 = vld [vmem:[%s21769_s8 + $0x950] sm:$0xff]   ;;  %v8494_v36 = vrot.slane %v20502_v51, %v18954_v14 }
0x3351   : > { %v8838_v35 = vpop.f32.mrf.mxu0  ;;  %v8879_v9 = vpop.f32.mrf.mxu1  ;;  %16861 = vmatprep.subr.bf16.mxu0 %v18024_v30  ;;  %16883 = vmatprep.subr.bf16.mxu1 %v18025_v48  ;;  %v18041_v20 = vld [vmem:[%s21769_s8 + $0x9d0] sm:$0xff]   ;;  %v8502_v31 = vrot.slane %v20502_v51, %v18957_v17 }
0x3352   : > { %v9051_v46 = vmax.f32 %v8837_v32, 0.0  ;;  %v9053_v45 = vmax.f32 %v8878_v19, 0.0  ;;  %v18042_v30 = vld [vmem:[%s21769_s8 + $0x910] sm:$0xff]   ;;  %v8514_v35 = vrot.slane %v20566_v57, %v18880_v6  ;;  %v8522_v9 = vrot.slane %v20566_v57, %v18883_v4 }
0x3353   : > { %v8839_v47 = vpop.f32.mrf.mxu0  ;;  %v8880_v49 = vpop.f32.mrf.mxu1  ;;  %v18043_v48 = vld [vmem:[%s21769_s8 + $0x990] sm:$0xff]  }
0x3354   : > { %v9067_v22 = vpack.c.bf16 %v9051_v46, %v9051_v46  ;;  %v9069_v7 = vpack.c.bf16 %v9053_v45, %v9053_v45  ;;  %16862 = vmatpush3.bf16.msra.mxu0 %v18026_v33  ;;  %16884 = vmatpush3.bf16.msra.mxu1 %v18027_v34  ;;  %v18044_v33 = vld [vmem:[%s21769_s8 + $0x948] sm:$0xff]   ;;  %v8835_v45 = vadd.f32 %v20522_v29, %v8494_v36  ;;  %v18048_v49 = vld [vmem:[%s21769_s8 + $0x940] sm:$0xff]   ;;  %v18069_v36 = vld [vmem:[%s21769_s8 + $0xad8] sm:$0xff]  }
0x3355   : > { %v20556_v16 = vpop.f32.mrf.mxu0  ;;  %v20558_v2 = vpop.f32.mrf.mxu1  ;;  %16863 = vmatprep.subr.bf16.mxu0 %v18028_v61  ;;  %16885 = vmatprep.subr.bf16.mxu1 %v18029_v10  ;;  %v18045_v34 = vld [vmem:[%s21769_s8 + $0x9c8] sm:$0xff]   ;;  %v8876_v47 = vadd.f32 %v20524_v28, %v8502_v31  ;;  %v18050_v29 = vld [vmem:[%s21769_s8 + $0x900] sm:$0xff]   ;;  %v18070_v31 = vld [vmem:[%s21769_s8 + $0xa18] sm:$0xff]  }
0x3356   : > { %10220 = vmatprep.mubr.bf16.mxu0 %v9067_v22  ;;  %10260 = vmatprep.mubr.bf16.mxu1 %v9069_v7  ;;  %v18046_v10 = vld [vmem:[%s21769_s8 + $0x908] sm:$0xff]   ;;  %v18049_v22 = vld [vmem:[%s21769_s8 + $0x9c0] sm:$0xff]  }
0x3357   : > { %v8918_v55 = vpop.f32.mrf.mxu0  ;;  %v8959_v56 = vpop.f32.mrf.mxu1  ;;  %v18047_v46 = vld [vmem:[%s21769_s8 + $0x988] sm:$0xff]   ;;  %v18051_v28 = vld [vmem:[%s21769_s8 + $0x980] sm:$0xff]  }
0x3358   : > { %16864 = vmatpush3.bf16.msra.mxu0 %v18030_v11  ;;  %16886 = vmatpush3.bf16.msra.mxu1 %v18031_v50  ;;  %v8919_v7 = vadd.f32 %v8918_v55, %v8514_v35  ;;  %v8960_v52 = vadd.f32 %v8959_v56, %v8522_v9  ;;  %v9050_v11 = vmax.f32 %v8835_v45, 0.0  ;;  %v9052_v50 = vmax.f32 %v8876_v47, 0.0  ;;  %v18054_v56 = vld [vmem:[%s21769_s8 + $0xa38] sm:$0xff]   ;;  %v18075_v9 = vld [vmem:[%s21769_s8 + $0xa90] sm:$0xff]   ;;  %v18078_v47 = vld [vmem:[%s21769_s8 + $0xa08] sm:$0xff]  }
0x3359   : > { %v8920_v60 = vpop.f32.mrf.mxu0  ;;  %v8961_v62 = vpop.f32.mrf.mxu1  ;;  %16865 = vmatprep.subr.bf16.mxu0 %v18032_v54  ;;  %16887 = vmatprep.subr.bf16.mxu1 %v18033_v44  ;;  %v18053_v54 = vld [vmem:[%s21769_s8 + $0xaf8] sm:$0xff]   ;;  %v8510_v35 = vrot.slane %v20566_v57, %v18874_v3  ;;  %v8538_v45 = vrot.slane %v20566_v57, %v18897_v23 }
0x335a   : > { %v9055_v44 = vmax.f32 %v8919_v7, 0.0  ;;  %v9057_v55 = vmax.f32 %v8960_v52, 0.0  ;;  %v18055_v60 = vld [vmem:[%s21769_s8 + $0xab8] sm:$0xff]   ;;  %v18080_v7 = vld [vmem:[%s21769_s8 + $0xa40] sm:$0xff]  }
0x335b   : > { %v8921_v41 = vpop.f32.mrf.mxu0  ;;  %v8962_v8 = vpop.f32.mrf.mxu1 }
0x335c   : > { %16866 = vmatpush3.bf16.msra.mxu0 %v18034_v58  ;;  %16888 = vmatpush3.bf16.msra.mxu1 %v18035_v59  ;;  %v9066_v58 = vpack.c.bf16 %v9050_v11, %v9050_v11  ;;  %v9068_v59 = vpack.c.bf16 %v9052_v50, %v9052_v50  ;;  %v9071_v62 = vpack.c.bf16 %v9055_v44, %v9055_v44  ;;  %v18059_v41 = vld [vmem:[%s21769_s8 + $0xab0] sm:$0xff]   ;;  %v18060_v8 = vld [vmem:[%s21769_s8 + $0xa68] sm:$0xff]   ;;  %v18084_v50 = vld [vmem:[%s21769_s8 + $0xb78] sm:$0xff]  }
0x335d   : > { %v8998_v12 = vpop.f32.mrf.mxu0  ;;  %v9039_v63 = vpop.f32.mrf.mxu1  ;;  %16867 = vmatprep.subr.bf16.mxu0 %v18036_v40  ;;  %16889 = vmatprep.subr.bf16.mxu1 %v18037_v37  ;;  %v18056_v40 = vld [vmem:[%s21769_s8 + $0xa70] sm:$0xff]   ;;  %v18086_v44 = vld [vmem:[%s21769_s8 + $0xb38] sm:$0xff]  }
0x335e   : > { %v20596_v24 = vadd.f32 %v8998_v12, %v8526_v18  ;;  %v20598_v25 = vadd.f32 %v9039_v63, %v8534_v38  ;;  %v18057_v37 = vld [vmem:[%s21769_s8 + $0xaf0] sm:$0xff]   ;;  %v9073_v18 = vpack.c.bf16 %v9057_v55, %v9057_v55  ;;  %v18063_v12 = vld [vmem:[%s21769_s8 + $0xaa8] sm:$0xff]   ;;  %v18064_v63 = vld [vmem:[%s21769_s8 + $0xa60] sm:$0xff]  }
0x335f   : > { %v20600_v26 = vpop.f32.mrf.mxu0  ;;  %v20602_v27 = vpop.f32.mrf.mxu1  ;;  %v18058_v38 = vld [vmem:[%s21769_s8 + $0xa30] sm:$0xff]  }
0x3360   : > { %16868 = vmatpush3.bf16.msra.mxu0 %v18038_v39  ;;  %16890 = vmatpush3.bf16.msra.mxu1 %v18039_v15  ;;  %v18061_v39 = vld [vmem:[%s21769_s8 + $0xae8] sm:$0xff]  }
0x3361   : > { %v9002_v32 = vpop.f32.mrf.mxu0  ;;  %v9043_v19 = vpop.f32.mrf.mxu1  ;;  %16869 = vmatprep.subr.bf16.mxu0 %v18040_v13  ;;  %16891 = vmatprep.subr.bf16.mxu1 %v18041_v20  ;;  %v18062_v15 = vld [vmem:[%s21769_s8 + $0xa28] sm:$0xff]   ;;  %v18065_v13 = vld [vmem:[%s21769_s8 + $0xae0] sm:$0xff]  }
0x3362   : > { %v18066_v20 = vld [vmem:[%s21769_s8 + $0xa20] sm:$0xff]   ;;  %v18071_v32 = vld [vmem:[%s21769_s8 + $0xa98] sm:$0xff]   ;;  %v18072_v19 = vld [vmem:[%s21769_s8 + $0xa50] sm:$0xff]  }
0x3363   : > { %v9003_v61 = vpop.f32.mrf.mxu0  ;;  %v9044_v51 = vpop.f32.mrf.mxu1 }
0x3364   : > { %16870 = vmatpush3.bf16.msra.mxu0 %v18042_v30  ;;  %16892 = vmatpush3.bf16.msra.mxu1 %v18043_v48  ;;  %v18067_v30 = vld [vmem:[%s21769_s8 + $0xaa0] sm:$0xff]   ;;  %v18068_v48 = vld [vmem:[%s21769_s8 + $0xa58] sm:$0xff]   ;;  %v18076_v61 = vld [vmem:[%s21769_s8 + $0xa48] sm:$0xff]   ;;  %v8518_v51 = vrot.slane %v20566_v57, %v18877_v5 }
0x3365   : > { %16871 = vmatprep.subr.bf16.mxu0 %v18044_v33  ;;  %16893 = vmatprep.subr.bf16.mxu1 %v18045_v34  ;;  %v18073_v33 = vld [vmem:[%s21769_s8 + $0xad0] sm:$0xff]  }
0x3366   : > { %v18074_v34 = vld [vmem:[%s21769_s8 + $0xa10] sm:$0xff]   ;;  %v8958_v52 = vadd.f32 %v20558_v2, %v8518_v51  ;;  %v18083_v2 = vld [vmem:[%s21769_s8 + $0xa80] sm:$0xff]  }
0x3367   : > { %v18112_v51 = vld [vmem:[%s21769_s8 + $0xb40] sm:$0xff]  }
0x3368   : > { %16872 = vmatpush3.bf16.msra.mxu0 %v18046_v10  ;;  %16894 = vmatpush3.bf16.msra.mxu1 %v18047_v46  ;;  %v18077_v10 = vld [vmem:[%s21769_s8 + $0xac8] sm:$0xff]   ;;  %v8530_v46 = vrot.slane %v20566_v57, %v18894_v21  ;;  %v18081_v57 = vld [vmem:[%s21769_s8 + $0xac0] sm:$0xff]  }
0x3369   : > { %16873 = vmatprep.subr.bf16.mxu0 %v18048_v49  ;;  %16895 = vmatprep.subr.bf16.mxu1 %v18049_v22  ;;  %v8917_v49 = vadd.f32 %v20556_v16, %v8510_v35  ;;  %v18079_v22 = vld [vmem:[%s21769_s8 + $0xa88] sm:$0xff]   ;;  %v9042_v16 = vadd.f32 %v20602_v27, %v8538_v45  ;;  %v9058_v45 = vmax.f32 %v20596_v24, 0.0 }
0x336a   : > { %v18109_v35 = vld [vmem:[%s21769_s8 + $0xbc8] sm:$0xff]  }
0x336b   : > { %v9054_v11 = vmax.f32 %v8917_v49, 0.0  ;;  %v9060_v49 = vmax.f32 %v20598_v25, 0.0  ;;  %v15676_v25 = vld [vmem:[%s21771_s10 + $0x19] ss:$0 sm:$0xff] }
0x336c   : > { %16874 = vmatpush3.bf16.msra.mxu0 %v18050_v29  ;;  %16896 = vmatpush3.bf16.msra.mxu1 %v18051_v28  ;;  %v9001_v29 = vadd.f32 %v20600_v26, %v8530_v46  ;;  %v18082_v28 = vld [vmem:[%s21769_s8 + $0xa00] sm:$0xff]   ;;  %v18085_v26 = vld [vmem:[%s21769_s8 + $0xbf8] sm:$0xff]  }
0x336d   : > { %16903 = vmatprep.subr.bf16.mxu0 %v18052_v53  ;;  %16925 = vmatprep.subr.bf16.mxu1 %v18053_v54  ;;  %v9056_v53 = vmax.f32 %v8958_v52, 0.0  ;;  %v9061_v54 = vmax.f32 %v9042_v16, 0.0  ;;  %v9070_v55 = vpack.c.bf16 %v9054_v11, %v9054_v11  ;;  %v18114_v46 = vld [vmem:[%s21769_s8 + $0xb00] sm:$0xff]  }
0x336e   : > { %v9059_v27 = vmax.f32 %v9001_v29, 0.0 }
0x336f   : > { %10221 = vmatmul.mubr.bf16.vlgmr.msra.gmra.mxu0 %v9066_v58  ;;  %10261 = vmatmul.mubr.bf16.vlgmr.msra.gmra.mxu1 %v9068_v59  ;;  %v9072_v58 = vpack.c.bf16 %v9056_v53, %v9056_v53  ;;  %v18088_v59 = vld [vmem:[%s21769_s8 + $0xb70] sm:$0xff]  }
0x3370   : > { %16904 = vmatpush3.bf16.msra.mxu0 %v18054_v56  ;;  %10300 = vmatprep.mubr.bf16.mxu0 %v9071_v62  ;;  %v18087_v56 = vld [vmem:[%s21769_s8 + $0xbb8] sm:$0xff]   ;;  %v18089_v62 = vld [vmem:[%s21769_s8 + $0xbf0] sm:$0xff]  }
0x3371   : > { %16926 = vmatpush3.bf16.msra.mxu1 %v18055_v60  ;;  %10340 = vmatprep.mubr.bf16.mxu1 %v9073_v18  ;;  %v9075_v60 = vpack.c.bf16 %v9059_v27, %v9059_v27  ;;  %v18091_v18 = vld [vmem:[%s21769_s8 + $0xbb0] sm:$0xff]  }
0x3372   : > { %16905 = vmatprep.subr.bf16.mxu0 %v18056_v40  ;;  %16927 = vmatprep.subr.bf16.mxu1 %v18057_v37  ;;  %v9077_v40 = vpack.c.bf16 %v9061_v54, %v9061_v54  ;;  %v18090_v37 = vld [vmem:[%s21769_s8 + $0xb30] sm:$0xff]  }
0x3374   : > { %16906 = vmatpush3.bf16.msra.mxu0 %v18058_v38  ;;  %v18092_v38 = vld [vmem:[%s21769_s8 + $0xb68] sm:$0xff]  }
0x3375   : > { %16928 = vmatpush3.bf16.msra.mxu1 %v18059_v41  ;;  %16907 = vmatprep.subr.bf16.mxu0 %v18060_v8  ;;  %v18093_v41 = vld [vmem:[%s21769_s8 + $0xbe8] sm:$0xff]  }
0x3376   : > { %16929 = vmatprep.subr.bf16.mxu1 %v18061_v39  ;;  %v18094_v8 = vld [vmem:[%s21769_s8 + $0xb28] sm:$0xff]  }
0x3377   : > { %v18095_v39 = vld [vmem:[%s21769_s8 + $0xba8] sm:$0xff]  }
0x3378   : > { %16908 = vmatpush3.bf16.msra.mxu0 %v18062_v15  ;;  %v18096_v15 = vld [vmem:[%s21769_s8 + $0xb60] sm:$0xff]  }
0x3379   : > { %16930 = vmatpush3.bf16.msra.mxu1 %v18063_v12  ;;  %16909 = vmatprep.subr.bf16.mxu0 %v18064_v63  ;;  %v18097_v12 = vld [vmem:[%s21769_s8 + $0xbe0] sm:$0xff]  }
0x337a   : > { %16931 = vmatprep.subr.bf16.mxu1 %v18065_v13  ;;  %v18098_v63 = vld [vmem:[%s21769_s8 + $0xb20] sm:$0xff]  }
0x337b   : > { %v18099_v13 = vld [vmem:[%s21769_s8 + $0xba0] sm:$0xff]  }
0x337c   : > { %16910 = vmatpush3.bf16.msra.mxu0 %v18066_v20  ;;  %v18100_v20 = vld [vmem:[%s21769_s8 + $0xb58] sm:$0xff]  }
0x337d   : > { %16932 = vmatpush3.bf16.msra.mxu1 %v18067_v30  ;;  %16911 = vmatprep.subr.bf16.mxu0 %v18068_v48  ;;  %v18101_v30 = vld [vmem:[%s21769_s8 + $0xbd8] sm:$0xff]  }
0x337e   : > { %16933 = vmatprep.subr.bf16.mxu1 %v18069_v36  ;;  %v18102_v48 = vld [vmem:[%s21769_s8 + $0xb18] sm:$0xff]  }
0x337f   : > { %v18103_v36 = vld [vmem:[%s21769_s8 + $0xb98] sm:$0xff]  }
0x3380   : > { %16912 = vmatpush3.bf16.msra.mxu0 %v18070_v31  ;;  %v18104_v31 = vld [vmem:[%s21769_s8 + $0xb50] sm:$0xff]  }
0x3381   : > { %16934 = vmatpush3.bf16.msra.mxu1 %v18071_v32  ;;  %16913 = vmatprep.subr.bf16.mxu0 %v18072_v19  ;;  %v18105_v32 = vld [vmem:[%s21769_s8 + $0xbd0] sm:$0xff]  }
0x3382   : > { %16935 = vmatprep.subr.bf16.mxu1 %v18073_v33  ;;  %v18106_v19 = vld [vmem:[%s21769_s8 + $0xb10] sm:$0xff]  }
0x3383   : > { %v18107_v33 = vld [vmem:[%s21769_s8 + $0xb90] sm:$0xff]  }
0x3384   : > { %16914 = vmatpush3.bf16.msra.mxu0 %v18074_v34  ;;  %v18108_v34 = vld [vmem:[%s21769_s8 + $0xb48] sm:$0xff]  }
0x3385   : > { %16936 = vmatpush3.bf16.msra.mxu1 %v18075_v9  ;;  %16915 = vmatprep.subr.bf16.mxu0 %v18076_v61  ;;  %v18110_v9 = vld [vmem:[%s21769_s8 + $0xb08] sm:$0xff]  }
0x3386   : > { %16937 = vmatprep.subr.bf16.mxu1 %v18077_v10  ;;  %v18111_v61 = vld [vmem:[%s21769_s8 + $0xb88] sm:$0xff]   ;;  %v18113_v10 = vld [vmem:[%s21769_s8 + $0xbc0] sm:$0xff]  }
0x3388   : > { %16916 = vmatpush3.bf16.msra.mxu0 %v18078_v47  ;;  %v18115_v47 = vld [vmem:[%s21769_s8 + $0xb80] sm:$0xff]  }
0x3389   : > { %16938 = vmatpush3.bf16.msra.mxu1 %v18079_v22  ;;  %16917 = vmatprep.subr.bf16.mxu0 %v18080_v7  ;;  %v9074_v22 = vpack.c.bf16 %v9058_v45, %v9058_v45  ;;  %v9076_v7 = vpack.c.bf16 %v9060_v49, %v9060_v49 }
0x338a   : > { %16939 = vmatprep.subr.bf16.mxu1 %v18081_v57 }
0x338c   : > { %16918 = vmatpush3.bf16.msra.mxu0 %v18082_v28 }
0x338d   : > { %16940 = vmatpush3.bf16.msra.mxu1 %v18083_v2  ;;  %16947 = vmatprep.subr.bf16.mxu0 %v18084_v50 }
0x338e   : > { %16969 = vmatprep.subr.bf16.mxu1 %v18085_v26 }
0x338f   : > { %10301 = vmatmul.mubr.bf16.vlgmr.msra.gmra.mxu0 %v9070_v55 }
0x3390   : > { %10341 = vmatmul.mubr.bf16.vlgmr.msra.gmra.mxu1 %v9072_v58  ;;  %16948 = vmatpush3.bf16.msra.mxu0 %v18086_v44 }
0x3391   : > { %10380 = vmatprep.mubr.bf16.mxu0 %v9075_v60  ;;  %16970 = vmatpush3.bf16.msra.mxu1 %v18087_v56 }
0x3392   : > { %10420 = vmatprep.mubr.bf16.mxu1 %v9077_v40  ;;  %16949 = vmatprep.subr.bf16.mxu0 %v18088_v59 }
0x3393   : > { %16971 = vmatprep.subr.bf16.mxu1 %v18089_v62 }
0x3394   : > { %16950 = vmatpush3.bf16.msra.mxu0 %v18090_v37 }
0x3395   : > { %16972 = vmatpush3.bf16.msra.mxu1 %v18091_v18  ;;  %16951 = vmatprep.subr.bf16.mxu0 %v18092_v38 }
0x3396   : > { %16973 = vmatprep.subr.bf16.mxu1 %v18093_v41 }
0x3398   : > { %16952 = vmatpush3.bf16.msra.mxu0 %v18094_v8 }
0x3399   : > { %16974 = vmatpush3.bf16.msra.mxu1 %v18095_v39  ;;  %16953 = vmatprep.subr.bf16.mxu0 %v18096_v15 }
0x339a   : > { %16975 = vmatprep.subr.bf16.mxu1 %v18097_v12 }
0x339c   : > { %16954 = vmatpush3.bf16.msra.mxu0 %v18098_v63 }
0x339d   : > { %16976 = vmatpush3.bf16.msra.mxu1 %v18099_v13  ;;  %16955 = vmatprep.subr.bf16.mxu0 %v18100_v20 }
0x339e   : > { %16977 = vmatprep.subr.bf16.mxu1 %v18101_v30 }
0x33a0   : > { %16956 = vmatpush3.bf16.msra.mxu0 %v18102_v48 }
0x33a1   : > { %16978 = vmatpush3.bf16.msra.mxu1 %v18103_v36  ;;  %16957 = vmatprep.subr.bf16.mxu0 %v18104_v31 }
0x33a2   : > { %16979 = vmatprep.subr.bf16.mxu1 %v18105_v32 }
0x33a4   : > { %16958 = vmatpush3.bf16.msra.mxu0 %v18106_v19 }
0x33a5   : > { %16980 = vmatpush3.bf16.msra.mxu1 %v18107_v33  ;;  %16959 = vmatprep.subr.bf16.mxu0 %v18108_v34 }
0x33a6   : > { %16981 = vmatprep.subr.bf16.mxu1 %v18109_v35 }
0x33a8   : > { %16960 = vmatpush3.bf16.msra.mxu0 %v18110_v9 }
0x33a9   : > { %16982 = vmatpush3.bf16.msra.mxu1 %v18111_v61  ;;  %16961 = vmatprep.subr.bf16.mxu0 %v18112_v51 }
0x33aa   : > { %16983 = vmatprep.subr.bf16.mxu1 %v18113_v10 }
0x33ac   : > { %16962 = vmatpush3.bf16.msra.mxu0 %v18114_v46 }
0x33ad   : > { %16984 = vmatpush3.bf16.msra.mxu1 %v18115_v47  ;;  %17535 = vmatprep.subr.bf16.mxu0 %v18381_v1 }
0x33ae   : > { %17543 = vmatprep.subr.mxu1 %v18381_v1 }
0x33af   : > { %10381 = vmatmul.mubr.bf16.vlgmr.msra.gmra.mxu0 %v9074_v22 }
0x33b0   : > { %10421 = vmatmul.mubr.bf16.vlgmr.msra.gmra.mxu1 %v9076_v7  ;;  %17539 = vmatprep.mubr.msk.bf16.mxu0 %vm18382_vm1, %v18381_v1 }
0x33b1   : > { %17545 = vmatprep.mubr.msk.f32.mxu1 %vm18382_vm1, %v18381_v1 }
0x340f   : > { %v16831_v24 = vpop.f32.mrf.mxu0  ;;  %v16853_v52 = vpop.f32.mrf.mxu1 }
0x3411   : > { %v16832_v57 = vpop.f32.mrf.mxu0  ;;  %v16854_v29 = vpop.f32.mrf.mxu1 }
0x3412   : > { %v16833_v16 = vadd.f32 %v16832_v57, %v16831_v24  ;;  %v16855_v28 = vadd.f32 %v16854_v29, %v16853_v52  ;;  %v18116_v29 = vld [vmem:[%s21763_s2 + $0x38] sm:$0xff]  }
0x3413   : > { %v16834_v11 = vpop.f32.mrf.mxu0  ;;  %v16856_v2 = vpop.f32.mrf.mxu1  ;;  %17536 = vmatpush3.bf16.msra.mxu0 %v18116_v29 }
0x3414   : > { %v10143_v50 = vadd.f32 %v16833_v16, %v15676_v25  ;;  %v18117_v16 = vld [vmem:[%s21763_s2 + $0x30] sm:$0xff]   ;;  %17537 = vmatprep.subr.bf16.mxu0 %v18381_v1 }
0x3415   : > { %v16835_v53 = vpop.f32.mrf.mxu0  ;;  %v16857_v26 = vpop.f32.mrf.mxu1 }
0x3416   : > { %v10183_v27 = vadd.f32 %v16855_v28, %v10143_v50  ;;  %v15805_v50 = vld [vmem:[%s21771_s10 + $0x1a] ss:$0 sm:$0xff]  ;;  %v15806_v26 = vld [vmem:[%s21771_s10 + $0x1b] ss:$0 sm:$0xff] }
0x3417   : > { %17538 = vmatpush3.bf16.msra.mxu0 %v18117_v16 }
0x3418   : > { %17553 = vmatprep.subr.mxu0 %v18381_v1 }
0x342f   : > { %v16875_v54 = vpop.f32.mrf.mxu0  ;;  %v16897_v44 = vpop.f32.mrf.mxu1 }
0x3431   : > { %v16876_v55 = vpop.f32.mrf.mxu0  ;;  %v16898_v56 = vpop.f32.mrf.mxu1 }
0x3432   : > { %v16877_v12 = vadd.f32 %v16876_v55, %v16875_v54  ;;  %v16899_v13 = vadd.f32 %v16898_v56, %v16897_v44  ;;  %v15811_v55 = vld [vmem:[%s21771_s10 + $0x1c] ss:$0 sm:$0xff] }
0x3433   : > { %v16878_v58 = vpop.f32.mrf.mxu0  ;;  %v16900_v59 = vpop.f32.mrf.mxu1 }
0x3434   : > { %v10223_v63 = vadd.f32 %v16877_v12, %v10183_v27 }
0x3435   : > { %v16879_v60 = vpop.f32.mrf.mxu0  ;;  %v16901_v62 = vpop.f32.mrf.mxu1 }
0x3436   : > { %v10263_v30 = vadd.f32 %v16899_v13, %v10223_v63 }
0x344f   : > { %v16919_v40 = vpop.f32.mrf.mxu0 }
0x3450   : > { %v16941_v37 = vpop.f32.mrf.mxu1 }
0x3451   : > { %v16920_v18 = vpop.f32.mrf.mxu0 }
0x3452   : > { %v16942_v38 = vpop.f32.mrf.mxu1  ;;  %v16921_v20 = vadd.f32 %v16920_v18, %v16919_v40 }
0x3453   : > { %v16922_v41 = vpop.f32.mrf.mxu0  ;;  %v16943_v31 = vadd.f32 %v16942_v38, %v16941_v37 }
0x3454   : > { %v16944_v8 = vpop.f32.mrf.mxu1  ;;  %v10303_v48 = vadd.f32 %v16921_v20, %v10263_v30 }
0x3455   : > { %v16923_v39 = vpop.f32.mrf.mxu0 }
0x3456   : > { %v16945_v15 = vpop.f32.mrf.mxu1  ;;  %v10343_v33 = vadd.f32 %v16943_v31, %v10303_v48 }
0x346f   : > { %v16963_v36 = vpop.f32.mrf.mxu0 }
0x3470   : > { %v16985_v32 = vpop.f32.mrf.mxu1 }
0x3471   : > { %v16964_v19 = vpop.f32.mrf.mxu0 }
0x3472   : > { %v16965_v34 = vadd.f32 %v16964_v19, %v16963_v36  ;;  %v16986_v35 = vpop.f32.mrf.mxu1 }
0x3473   : > { %v16966_v9 = vpop.f32.mrf.mxu0  ;;  %v16987_v51 = vadd.f32 %v16986_v35, %v16985_v32 }
0x3474   : > { %v10383_v61 = vadd.f32 %v16965_v34, %v10343_v33  ;;  %v16988_v10 = vpop.f32.mrf.mxu1 }
0x3475   : > { %v16967_v46 = vpop.f32.mrf.mxu0 }
0x3476   : > { %v10423_v45 = vadd.f32 %v16987_v51, %v10383_v61  ;;  %v16989_v47 = vpop.f32.mrf.mxu1 }
0x3477   : > { %v15815_v47 = vld [vmem:[%s21764_s3 + $0x30] sm:$0xf] }
0x3478   : > { %v10428_v49 = vadd.f32 %v10423_v45, %v20318_v43 }
0x347a   : > { %v10431_v22 = vsel %vm518_vm4, %v10428_v49, 0.0 }
0x347b   : > { %10432 = vadd.xlane.f32.xlu1 %v10431_v22  ;;  %v15816_v22 = vld [vmem:[%s21764_s3 + $0x34] sm:$0xf] }
0x3504   : > { %v10433_v7 = vpop.xlane.xlu1 %10432 }
0x3505   : > { %v10434_v24 = vmul.f32 0.03125, %v10433_v7  ;;  %v10861_v7 = vsel %vm452_vm0, %v15816_v22, 0 }
0x3507   : > { %v10435_v52 = vsub.f32 %v10428_v49, %v10434_v24  ;;  %v10907_v49 = vsel %vm452_vm0, %v15815_v47, 0 }
0x3509   : > { %v10436_v25 = vmul.f32 %v10435_v52, %v10435_v52 }
0x350b   : > { %v10437_v57 = vsel %vm518_vm4, %v10436_v25, 0.0 }
0x350c   : > { %10438 = vadd.xlane.f32.xlu1 %v10437_v57 }
0x3595   : > { %v10439_v43 = vpop.xlane.xlu1 %10438 }
0x3596   : > { %v10440_v28 = vmul.f32 0.03125, %v10439_v43 }
0x3598   : > { %v10441_v11 = vadd.f32 1e-05, %v10440_v28 }
0x359a   : > { %18330 = vrsqrt.f32 %v10441_v11 }
0x35a7   : > { %v18331_v2 = vpop.eup %18330 }
0x35a8   : > { %v10443_v53 = vmul.f32 %v18331_v2, %v10435_v52 }
0x35aa   : > { %v10448_v27 = vmul.f32 %v15805_v50, %v10443_v53 }
0x35ac   : > { %v20876_v54 = vadd.f32 %v15806_v26, %v10448_v27 }
0x35ae   : > { %v10454_v44 = vpack.c.bf16 %v20876_v54, %v20876_v54 }
0x35b0   : > { %17540 = vmatmul.mubr.msk.bf16.vlgmr.msra.gmra.mxu0 %vm518_vm4, %v10454_v44 }
0x35b1   : > { %17555 = vmatprep.mubr.msk.f32.mxu0 %vm18382_vm1, %v18381_v1 }
0x3670   : > { %v10514_v56 = vpop.f32.mrf.mxu0 }
0x3671   : > { %v20886_v58 = vadd.f32 %v15811_v55, %v10514_v56 }
0x3672   : > { %v17541_v59 = vpop.f32.mrf.mxu0 }
0x3673   : > { %10693 = vrot.lane.b32.xlu1 %v20886_v58, %s21816_s20  ;;  %10527 = vrot.lane.b32.xlu0 %v20886_v58, %s21811_s26 }
0x3674   : > { %v10517_v60 = vpop.f32.mrf.mxu0 }
0x3676   : > { %v17542_v62 = vpop.f32.mrf.mxu0 }
0x3677   : > { %10691 = vrot.lane.b32.xlu0 %v20886_v58, %s21812_s28 }
0x36e5   : > { %v10694_v40 = vpop.permute.xlu1 %10693  ;;  %v10528_v37 = vpop.permute.xlu0 %10527 }
0x36e6   : > { %17544 = vmatpush3.xpose.msk.msra.mxu1 %vm570_vm5, %v10528_v37  ;;  %17554 = vmatpush3.xpose.msk.msra.mxu0 %vm570_vm5, %v10694_v40 }
0x36e7   : > { %17548 = vmatprep.subr.mxu1 %v18381_v1  ;;  %17563 = vmatprep.subr.bf16.mxu0 %v18381_v1 }
0x36e9   : > { %17546 = vmatmul.mubr.msk.f32.vlgmr.msra.gmra.mxu1 %vm570_vm5, %v20886_v58  ;;  %v10692_v18 = vpop.permute.xlu0 %10691 }
0x36ea   : > { %17556 = vmatmul.mubr.msk.f32.vlgmr.msra.gmra.mxu0 %vm570_vm5, %v10692_v18  ;;  %17550 = vmatprep.mubr.msk.f32.mxu1 %vm18382_vm1, %v18381_v1 }
0x36eb   : > { %17565 = vmatprep.mubr.msk.bf16.mxu0 %vm18382_vm1, %v18381_v1  ;;  %17564 = vmatpush3.bf16.msra.mxu0 %v10861_v7 }
0x36ec   : > { %17575 = vmatprep.subr.mxu0 %v18381_v1 }
0x37a9   : > { %v10599_v38 = vpop.f32.mrf.mxu1 }
0x37aa   : > { %v10765_v41 = vpop.f32.mrf.mxu0  ;;  %v10603_v8 = vsel %vm570_vm5, %v10599_v38, -inf }
0x37ab   : > { %10604 = vmax.xlane.f32.xlu0 %v10603_v8  ;;  %v17547_v39 = vpop.f32.mrf.mxu1  ;;  %v10769_v15 = vsel %vm570_vm5, %v10765_v41, -inf }
0x37ac   : > { %10770 = vmax.xlane.f32.xlu1 %v10769_v15  ;;  %v17557_v12 = vpop.f32.mrf.mxu0 }
0x37bd   : > { %10780 = vrot.lane.b32.xlu1 %v20886_v58, %s21813_s27 }
0x37c1   : > { %10949 = vrot.lane.b32.xlu1 %v20886_v58, %s21815_s23 }
0x3834   : > { %v10605_v63 = vpop.xlane.xlu0 %10604 }
0x3835   : > { %v10606_v13 = vsub.f32 %v10599_v38, %v10605_v63  ;;  %v10771_v20 = vpop.xlane.xlu1 %10770 }
0x3836   : > { %v10772_v30 = vsub.f32 %v10765_v41, %v10771_v20  ;;  %v15817_v20 = vld [vmem:[%s21764_s3 + $0x38] sm:$0xf] }
0x3837   : > { %v10607_v48 = vmul.f32 1.442695, %v10606_v13 }
0x3838   : > { %v10773_v36 = vmul.f32 1.442695, %v10772_v30  ;;  %v11119_v30 = vsel %vm452_vm0, %v15817_v20, 0 }
0x3839   : > { %18332 = vpow2.f32 %v10607_v48  ;;  %v10781_v10 = vpop.permute.xlu1 %10780 }
0x383a   : > { %18334 = vpow2.f32 %v10773_v36 }
0x383d   : > { %v10950_v28 = vpop.permute.xlu1 %10949 }
0x3846   : > { %v18333_v31 = vpop.eup %18332 }
0x3847   : > { %v10609_v32 = vsel %vm570_vm5, %v18333_v31, 0.0  ;;  %v18335_v19 = vpop.eup %18334 }
0x3848   : > { %10610 = vadd.xlane.f32.xlu0 %v10609_v32  ;;  %v10775_v33 = vsel %vm570_vm5, %v18335_v19, 0.0 }
0x384c   : > { %10776 = vadd.xlane.f32.xlu0 %v10775_v33 }
0x3862   : > { %10614 = vrot.lane.b32.xlu0 %v20886_v58, %s21814_s30 }
0x3866   : > { %10951 = vrot.lane.b32.xlu0 %v20886_v58, %s21806_s17 }
0x38d1   : > { %v10611_v34 = vpop.xlane.xlu0 %10610 }
0x38d2   : > { %18336 = vrcp.f32 %v10611_v34 }
0x38d5   : > { %v10777_v35 = vpop.xlane.xlu0 %10776 }
0x38d6   : > { %18338 = vrcp.f32 %v10777_v35 }
0x38d9   : > { %v10615_v9 = vpop.permute.xlu0 %10614 }
0x38da   : > { %17549 = vmatpush3.msra.mxu1 %v10615_v9 }
0x38db   : > { %17558 = vmatprep.subr.mxu1 %v18381_v1 }
0x38dd   : > { %v10952_v43 = vpop.permute.xlu0 %10951 }
0x38df   : > { %v18337_v61 = vpop.eup %18336 }
0x38e0   : > { %v10613_v51 = vmul.f32 %v18337_v61, %v18333_v31 }
0x38e2   : > { %17551 = vmatmul.mubr.msk.f32.vlgmr.msra.gmra.mxu1 %vm570_vm5, %v10613_v51 }
0x38e3   : > { %v18339_v46 = vpop.eup %18338  ;;  %17559 = vmatpush3.msra.mxu1 %v10781_v10  ;;  %17560 = vmatprep.mubr.msk.f32.mxu1 %vm18382_vm1, %v18381_v1 }
0x38e4   : > { %v10779_v45 = vmul.f32 %v18339_v46, %v18335_v19  ;;  %17569 = vmatprep.subr.bf16.mxu1 %v18381_v1 }
0x38e6   : > { %17561 = vmatmul.mubr.msk.f32.vlgmr.msra.gmra.mxu1 %vm570_vm5, %v10779_v45 }
0x38e7   : > { %17571 = vmatprep.mubr.msk.bf16.mxu1 %vm18382_vm1, %v18381_v1  ;;  %17570 = vmatpush3.bf16.msra.mxu1 %v10907_v49 }
0x38e8   : > { %17580 = vmatprep.subr.mxu1 %v18381_v1 }
0x39a2   : > { %v10686_v24 = vpop.f32.mrf.mxu1 }
0x39a3   : > { %v10690_v52 = vpack.c.bf16 %v10686_v24, %v10686_v24 }
0x39a4   : > { %v17552_v25 = vpop.f32.mrf.mxu1 }
0x39a5   : > { %17572 = vmatmul.mubr.msk.bf16.vlgmr.msra.gmra.mxu1 %vm570_vm5, %v10690_v52 }
0x39a6   : > { %v10852_v57 = vpop.f32.mrf.mxu1  ;;  %17582 = vmatprep.mubr.msk.f32.mxu1 %vm18382_vm1, %v18381_v1 }
0x39a7   : > { %v10856_v29 = vpack.c.bf16 %v10852_v57, %v10852_v57 }
0x39a8   : > { %v17562_v16 = vpop.f32.mrf.mxu1 }
0x39a9   : > { %17566 = vmatmul.mubr.msk.bf16.vlgmr.msra.gmra.mxu0 %vm570_vm5, %v10856_v29  ;;  %v18118_v29 = vld [vmem:[%s21766_s5 + $0x18] sm:$0xff]  }
0x39aa   : > { %17576 = vmatpush3.xpose.msk.msra.mxu0 %vm570_vm5, %v10952_v43  ;;  %17577 = vmatprep.mubr.msk.f32.mxu0 %vm18382_vm1, %v18381_v1 }
0x39ab   : > { %17585 = vmatprep.subr.bf16.mxu0 %v18381_v1 }
0x39b1   : > { %17578 = vmatmul.mubr.msk.f32.vlgmr.msra.gmra.mxu0 %vm570_vm5, %v10950_v28  ;;  %v18119_v28 = vld [vmem:[%s21766_s5 + $0x10] sm:$0xff]  }
0x39b2   : > { %17587 = vmatprep.mubr.msk.bf16.mxu0 %vm18382_vm1, %v18381_v1  ;;  %17586 = vmatpush3.bf16.msra.mxu0 %v11119_v30  ;;  %v15836_v30 = vld [vmem:[%s21771_s10 + $0x1e] ss:$0 sm:$0xff] }
0x39b3   : > { %17601 = vmatprep.subr.bf16.mxu0 %v18381_v1 }
0x3a65   : > { %v10943_v11 = vpop.f32.mrf.mxu1 }
0x3a67   : > { %v17573_v2 = vpop.f32.mrf.mxu1 }
0x3a69   : > { %v10897_v50 = vpop.f32.mrf.mxu0  ;;  %v10946_v53 = vpop.f32.mrf.mxu1 }
0x3a6a   : > { %v10944_v26 = vadd.f32 %v10943_v11, %v10897_v50  ;;  %v15835_v11 = vld [vmem:[%s21771_s10 + $0x1d] ss:$0 sm:$0xff] }
0x3a6b   : > { %v17567_v27 = vpop.f32.mrf.mxu0  ;;  %v17574_v44 = vpop.f32.mrf.mxu1 }
0x3a6d   : > { %v10900_v55 = vpop.f32.mrf.mxu0 }
0x3a6f   : > { %v17568_v56 = vpop.f32.mrf.mxu0 }
0x3a71   : > { %v11023_v59 = vpop.f32.mrf.mxu0 }
0x3a72   : > { %v11027_v60 = vsel %vm570_vm5, %v11023_v59, -inf }
0x3a73   : > { %11028 = vmax.xlane.f32.xlu0 %v11027_v60  ;;  %v17579_v62 = vpop.f32.mrf.mxu0 }
0x3a89   : > { %11038 = vrot.lane.b32.xlu0 %v20886_v58, %s21807_s16 }
0x3a8d   : > { %11162 = vrot.lane.b32.xlu0 %v20886_v58, %s21808_s14 }
0x3afc   : > { %v11029_v40 = vpop.xlane.xlu0 %11028 }
0x3afd   : > { %v11030_v37 = vsub.f32 %v11023_v59, %v11029_v40 }
0x3aff   : > { %v11031_v18 = vmul.f32 1.442695, %v11030_v37 }
0x3b00   : > { %v11039_v38 = vpop.permute.xlu0 %11038 }
0x3b01   : > { %18340 = vpow2.f32 %v11031_v18  ;;  %17581 = vmatpush3.msra.mxu1 %v11039_v38 }
0x3b02   : > { %17591 = vmatprep.subr.mxu1 %v18381_v1 }
0x3b04   : > { %v11163_v13 = vpop.permute.xlu0 %11162 }
0x3b0e   : > { %v18341_v41 = vpop.eup %18340 }
0x3b0f   : > { %v11033_v8 = vsel %vm570_vm5, %v18341_v41, 0.0 }
0x3b10   : > { %11034 = vadd.xlane.f32.xlu1 %v11033_v8  ;;  %v15850_v8 = vld [vmem:[%s21771_s10 + $0x21] ss:$0 sm:$0xff] }
0x3b21   : > { %11164 = vrot.lane.b32.xlu1 %v20886_v58, %s21809_s19 }
0x3b99   : > { %v11035_v39 = vpop.xlane.xlu1 %11034 }
0x3b9a   : > { %18342 = vrcp.f32 %v11035_v39  ;;  %v18120_v39 = vld [vmem:[%s21765_s4 + $0x18] sm:$0xff]  }
0x3b9d   : > { %v11165_v63 = vpop.permute.xlu1 %11164 }
0x3ba7   : > { %v18343_v15 = vpop.eup %18342 }
0x3ba8   : > { %v11037_v12 = vmul.f32 %v18343_v15, %v18341_v41  ;;  %v18121_v15 = vld [vmem:[%s21765_s4 + $0x10] sm:$0xff]  }
0x3baa   : > { %17583 = vmatmul.mubr.msk.f32.vlgmr.msra.gmra.mxu1 %vm570_vm5, %v11037_v12 }
0x3bab   : > { %17592 = vmatpush3.xpose.msk.msra.mxu1 %vm570_vm5, %v11165_v63  ;;  %17593 = vmatprep.mubr.msk.f32.mxu1 %vm18382_vm1, %v18381_v1 }
0x3bac   : > { %17596 = vmatprep.subr.mxu1 %v18381_v1 }
0x3bae   : > { %17594 = vmatmul.mubr.msk.f32.vlgmr.msra.gmra.mxu1 %vm570_vm5, %v11163_v13 }
0x3baf   : > { %17598 = vmatprep.mubr.msk.f32.mxu1 %vm18382_vm1, %v18381_v1 }
0x3c6a   : > { %v11110_v48 = vpop.f32.mrf.mxu1 }
0x3c6b   : > { %v11114_v36 = vpack.c.bf16 %v11110_v48, %v11110_v48 }
0x3c6c   : > { %v17584_v31 = vpop.f32.mrf.mxu1 }
0x3c6d   : > { %17588 = vmatmul.mubr.msk.bf16.vlgmr.msra.gmra.mxu0 %vm570_vm5, %v11114_v36  ;;  %v15837_v36 = vld [vmem:[%s21771_s10 + $0x1f] ss:$0 sm:$0xff] }
0x3c6e   : > { %v11236_v32 = vpop.f32.mrf.mxu1  ;;  %17603 = vmatprep.mubr.msk.bf16.mxu0 %vm18382_vm1, %v18381_v1 }
0x3c6f   : > { %v11240_v19 = vsel %vm570_vm5, %v11236_v32, -inf }
0x3c70   : > { %11241 = vmax.xlane.f32.xlu1 %v11240_v19  ;;  %v17595_v33 = vpop.f32.mrf.mxu1 }
0x3c71   : > { %v15842_v33 = vld [vmem:[%s21771_s10 + $0x20] ss:$0 sm:$0xff] }
0x3cf9   : > { %v11242_v34 = vpop.xlane.xlu1 %11241 }
0x3cfa   : > { %v11243_v35 = vsub.f32 %v11236_v32, %v11242_v34 }
0x3cfc   : > { %v11244_v9 = vmul.f32 1.442695, %v11243_v35 }
0x3cfe   : > { %18344 = vpow2.f32 %v11244_v9 }
0x3d0b   : > { %v18345_v61 = vpop.eup %18344 }
0x3d0c   : > { %v11246_v51 = vsel %vm570_vm5, %v18345_v61, 0.0 }
0x3d0d   : > { %11247 = vadd.xlane.f32.xlu0 %v11246_v51 }
0x3d23   : > { %11251 = vrot.lane.b32.xlu0 %v20886_v58, %s21810_s18  ;;  %v15818_v58 = vld [vmem:[%s21764_s3 + $0x3c] sm:$0xf]  ;;  %s21817_s18 = sld [smem:[#allocation3_spill]] }
0x3d24   : > { %v11332_v25 = vsel %vm452_vm0, %v15818_v58, 0 }
0x3d25   : > { %17602 = vmatpush3.bf16.msra.mxu0 %v11332_v25 }
0x3d26   : > { %17615 = vmatprep.subr.bf16.mxu0 %v18381_v1 }
0x3d2d   : > { %v11155_v10 = vpop.f32.mrf.mxu0 }
0x3d2e   : > { %v11161_v46 = vadd.f32 %v11155_v10, %v10944_v26 }
0x3d2f   : > { %v17589_v45 = vpop.f32.mrf.mxu0 }
0x3d31   : > { %v11158_v47 = vpop.f32.mrf.mxu0 }
0x3d33   : > { %v17590_v49 = vpop.f32.mrf.mxu0 }
0x3d96   : > { %v11248_v22 = vpop.xlane.xlu0 %11247 }
0x3d97   : > { %18346 = vrcp.f32 %v11248_v22 }
0x3d9a   : > { %v11252_v7 = vpop.permute.xlu0 %11251 }
0x3d9b   : > { %17597 = vmatpush3.msra.mxu1 %v11252_v7 }
0x3d9c   : > { %17607 = vmatprep.subr.bf16.mxu1 %v18381_v1 }
0x3da4   : > { %v18347_v24 = vpop.eup %18346 }
0x3da5   : > { %v11250_v52 = vmul.f32 %v18347_v24, %v18345_v61 }
0x3da7   : > { %17599 = vmatmul.mubr.msk.f32.vlgmr.msra.gmra.mxu1 %vm570_vm5, %v11250_v52 }
0x3da8   : > { %17611 = vmatprep.mubr.msk.bf16.mxu1 %vm18382_vm1, %v18381_v1  ;;  %17608 = vmatpush3.bf16.msra.mxu1 %v18120_v39 }
0x3da9   : > { %17609 = vmatprep.subr.bf16.mxu1 %v18381_v1 }
0x3dac   : > { %17610 = vmatpush3.bf16.msra.mxu1 %v18121_v15 }
0x3dad   : > { %17623 = vmatprep.subr.mxu1 %v18381_v1 }
0x3e67   : > { %v11323_v57 = vpop.f32.mrf.mxu1 }
0x3e68   : > { %v11327_v16 = vpack.c.bf16 %v11323_v57, %v11323_v57 }
0x3e69   : > { %v17600_v43 = vpop.f32.mrf.mxu1 }
0x3e6a   : > { %17604 = vmatmul.mubr.msk.bf16.vlgmr.msra.gmra.mxu0 %vm570_vm5, %v11327_v16 }
0x3e6b   : > { %17616 = vmatpush3.bf16.msra.mxu0 %v18118_v29  ;;  %17619 = vmatprep.mubr.msk.bf16.mxu0 %vm18382_vm1, %v18381_v1 }
0x3e6c   : > { %17617 = vmatprep.subr.bf16.mxu0 %v18381_v1 }
0x3e6f   : > { %17618 = vmatpush3.bf16.msra.mxu0 %v18119_v28 }
0x3e70   : > { %17628 = vmatprep.subr.mxu0 %v18381_v1 }
0x3e72   : > { %17620 = vmatmul.mubr.msk.bf16.vlgmr.msra.gmra.mxu0 %vm518_vm4, %v20126_v42 }
0x3e73   : > { %17630 = vmatprep.mubr.msk.f32.mxu0 %vm18382_vm1, %v18381_v1 }
0x3f2a   : > { %v11368_v2 = vpop.f32.mrf.mxu0 }
0x3f2b   : > { %v11374_v50 = vadd.f32 %v11368_v2, %v11161_v46 }
0x3f2c   : > { %v17605_v53 = vpop.f32.mrf.mxu0 }
0x3f2d   : > { %v11379_v26 = vadd.f32 %v15835_v11, %v11374_v50 }
0x3f2e   : > { %v11371_v27 = vpop.f32.mrf.mxu0 }
0x3f2f   : > { %v11380_v44 = vadd.f32 %v11379_v26, %v20876_v54 }
0x3f30   : > { %v17606_v55 = vpop.f32.mrf.mxu0 }
0x3f31   : > { %v11383_v56 = vsel %vm518_vm4, %v11380_v44, 0.0 }
0x3f32   : > { %11384 = vadd.xlane.f32.xlu1 %v11383_v56  ;;  %v11528_v59 = vpop.f32.mrf.mxu0 }
0x3f33   : > { %v21008_v54 = vadd.f32 %v15850_v8, %v11528_v59 }
0x3f34   : > { %v17621_v42 = vpop.f32.mrf.mxu0 }
0x3f35   : > { %v15854_v42 = vld [vmem:[%s21767_s6 + $0x10] sm:$0xf] }
0x3f36   : > { %v11531_v60 = vpop.f32.mrf.mxu0 }
0x3f38   : > { %v17622_v62 = vpop.f32.mrf.mxu0 }
0x3fbb   : > { %v11385_v40 = vpop.xlane.xlu1 %11384 }
0x3fbc   : > { %v11386_v37 = vmul.f32 0.03125, %v11385_v40  ;;  %v11920_v40 = vsel %vm452_vm0, %v15854_v42, 0 }
0x3fbe   : > { %v11387_v18 = vsub.f32 %v11380_v44, %v11386_v37  ;;  %v15855_v44 = vld [vmem:[%s21767_s6 + $0x14] sm:$0xf] }
0x3fbf   : > { %v11874_v55 = vsel %vm452_vm0, %v15855_v44, 0 }
0x3fc0   : > { %v11388_v38 = vmul.f32 %v11387_v18, %v11387_v18 }
0x3fc2   : > { %v11389_v41 = vsel %vm518_vm4, %v11388_v38, 0.0 }
0x3fc3   : > { %11390 = vadd.xlane.f32.xlu1 %v11389_v41 }
0x3fd4   : > { %11706 = vrot.lane.b32.xlu1 %v21008_v54, %s21812_s28 }
0x404c   : > { %v11391_v12 = vpop.xlane.xlu1 %11390 }
0x404d   : > { %v11392_v63 = vmul.f32 0.03125, %v11391_v12 }
0x404f   : > { %v11393_v13 = vadd.f32 1e-05, %v11392_v63 }
0x4050   : > { %v11707_v61 = vpop.permute.xlu1 %11706 }
0x4051   : > { %18348 = vrsqrt.f32 %v11393_v13 }
0x405e   : > { %v18349_v20 = vpop.eup %18348 }
0x405f   : > { %v11395_v48 = vmul.f32 %v18349_v20, %v11387_v18 }
0x4061   : > { %v11400_v31 = vmul.f32 %v15836_v30, %v11395_v48 }
0x4063   : > { %v21026_v32 = vadd.f32 %v15837_v36, %v11400_v31 }
0x4065   : > { %v11406_v19 = vpack.c.bf16 %v21026_v32, %v21026_v32 }
0x4067   : > { %17612 = vmatmul.mubr.msk.bf16.vlgmr.msra.gmra.mxu1 %vm518_vm4, %v11406_v19 }
0x4068   : > { %17624 = vmatpush3.xpose.msk.msra.mxu1 %vm570_vm5, %v21008_v54  ;;  %17625 = vmatprep.mubr.msk.f32.mxu1 %vm18382_vm1, %v18381_v1 }
0x4069   : > { %17633 = vmatprep.subr.mxu1 %v18381_v1 }
0x4127   : > { %v11466_v34 = vpop.f32.mrf.mxu1 }
0x4128   : > { %v21039_v35 = vadd.f32 %v15842_v33, %v11466_v34 }
0x4129   : > { %v17613_v9 = vpop.f32.mrf.mxu1 }
0x412a   : > { %11704 = vrot.lane.b32.xlu0 %v21039_v35, %s21812_s28  ;;  %17626 = vmatmul.mubr.msk.f32.vlgmr.msra.gmra.mxu1 %vm570_vm5, %v21039_v35 }
0x412b   : > { %17634 = vmatpush3.xpose.msk.msra.mxu1 %vm570_vm5, %v11707_v61  ;;  %v11469_v51 = vpop.f32.mrf.mxu1  ;;  %17635 = vmatprep.mubr.msk.f32.mxu1 %vm18382_vm1, %v18381_v1 }
0x412c   : > { %17643 = vmatprep.subr.bf16.mxu1 %v18381_v1 }
0x412d   : > { %v17614_v10 = vpop.f32.mrf.mxu1 }
0x419c   : > { %v11705_v46 = vpop.permute.xlu0 %11704 }
0x419d   : > { %17636 = vmatmul.mubr.msk.f32.vlgmr.msra.gmra.mxu1 %vm570_vm5, %v11705_v46 }
0x419e   : > { %17645 = vmatprep.mubr.msk.bf16.mxu1 %vm18382_vm1, %v18381_v1  ;;  %17644 = vmatpush3.bf16.msra.mxu1 %v11874_v55 }
0x419f   : > { %17655 = vmatprep.subr.mxu1 %v18381_v1 }
0x41ea   : > { %v11612_v45 = vpop.f32.mrf.mxu1 }
0x41eb   : > { %v11616_v47 = vsel %vm570_vm5, %v11612_v45, -inf }
0x41ec   : > { %11617 = vmax.xlane.f32.xlu0 %v11616_v47  ;;  %v17627_v49 = vpop.f32.mrf.mxu1 }
0x425d   : > { %v11778_v22 = vpop.f32.mrf.mxu1 }
0x425e   : > { %v11782_v7 = vsel %vm570_vm5, %v11778_v22, -inf }
0x425f   : > { %11783 = vmax.xlane.f32.xlu1 %v11782_v7  ;;  %v17637_v24 = vpop.f32.mrf.mxu1 }
0x4270   : > { %11627 = vrot.lane.b32.xlu1 %v21008_v54, %s21811_s26  ;;  %s21818_s26 = sshll.u32 %s21817_s18, 3 }
0x4274   : > { %11964 = vrot.lane.b32.xlu1 %v21008_v54, %s21815_s23 }
0x4275   : > { %v11618_v52 = vpop.xlane.xlu0 %11617 }
0x4276   : > { %v11619_v58 = vsub.f32 %v11612_v45, %v11618_v52  ;;  %v15856_v52 = vld [vmem:[%s21767_s6 + $0x18] sm:$0xf] }
0x4278   : > { %v11620_v25 = vmul.f32 1.442695, %v11619_v58  ;;  %11962 = vrot.lane.b32.xlu1 %v21039_v35, %s21815_s23  ;;  %v12132_v58 = vsel %vm452_vm0, %v15856_v52, 0  ;;  %v15886_v52 = vld [vmem:[%s21768_s7 + $0x348] sm:$0xff] }
0x427a   : > { %18350 = vpow2.f32 %v11620_v25 }
0x4287   : > { %v18351_v57 = vpop.eup %18350 }
0x4288   : > { %v11622_v29 = vsel %vm570_vm5, %v18351_v57, 0.0 }
0x4289   : > { %11623 = vadd.xlane.f32.xlu0 %v11622_v29 }
0x42e8   : > { %v11784_v16 = vpop.xlane.xlu1 %11783 }
0x42e9   : > { %v11785_v43 = vsub.f32 %v11778_v22, %v11784_v16 }
0x42eb   : > { %v11786_v28 = vmul.f32 1.442695, %v11785_v43 }
0x42ec   : > { %v11628_v11 = vpop.permute.xlu1 %11627 }
0x42ed   : > { %18352 = vpow2.f32 %v11786_v28  ;;  %17629 = vmatpush3.msra.mxu0 %v11628_v11 }
0x42ee   : > { %17638 = vmatprep.subr.mxu0 %v18381_v1 }
0x42f0   : > { %v11965_v15 = vpop.permute.xlu1 %11964 }
0x42f4   : > { %v11963_v12 = vpop.permute.xlu1 %11962 }
0x42fa   : > { %v18353_v2 = vpop.eup %18352 }
0x42fb   : > { %v11788_v50 = vsel %vm570_vm5, %v18353_v2, 0.0 }
0x42fc   : > { %11789 = vadd.xlane.f32.xlu0 %v11788_v50 }
0x4312   : > { %v11624_v53 = vpop.xlane.xlu0 %11623  ;;  %11793 = vrot.lane.b32.xlu0 %v21008_v54, %s21816_s20  ;;  %s21819_s20 = sld [smem:[#allocation6_spill]] }
0x4313   : > { %18354 = vrcp.f32 %v11624_v53 }
0x4320   : > { %v18355_v26 = vpop.eup %18354 }
0x4321   : > { %v11626_v27 = vmul.f32 %v18355_v26, %v18351_v57 }
0x4323   : > { %17631 = vmatmul.mubr.msk.f32.vlgmr.msra.gmra.mxu0 %vm570_vm5, %v11626_v27 }
0x4324   : > { %17640 = vmatprep.mubr.msk.f32.mxu0 %vm18382_vm1, %v18381_v1 }
0x4385   : > { %v11790_v56 = vpop.xlane.xlu0 %11789 }
0x4386   : > { %18356 = vrcp.f32 %v11790_v56 }
0x4389   : > { %v11794_v59 = vpop.permute.xlu0 %11793 }
0x438a   : > { %17639 = vmatpush3.msra.mxu0 %v11794_v59 }
0x438b   : > { %17649 = vmatprep.subr.bf16.mxu0 %v18381_v1 }
0x4393   : > { %v18357_v60 = vpop.eup %18356 }
0x4394   : > { %v11792_v62 = vmul.f32 %v18357_v60, %v18353_v2 }
0x4396   : > { %17641 = vmatmul.mubr.msk.f32.vlgmr.msra.gmra.mxu0 %vm570_vm5, %v11792_v62 }
0x4397   : > { %17650 = vmatpush3.bf16.msra.mxu0 %v11920_v40  ;;  %17651 = vmatprep.mubr.msk.bf16.mxu0 %vm18382_vm1, %v18381_v1 }
0x4398   : > { %17660 = vmatprep.subr.mxu0 %v18381_v1 }
0x43e3   : > { %v11699_v37 = vpop.f32.mrf.mxu0 }
0x43e4   : > { %v11703_v18 = vpack.c.bf16 %v11699_v37, %v11699_v37 }
0x43e5   : > { %v17632_v38 = vpop.f32.mrf.mxu0 }
0x43e6   : > { %17652 = vmatmul.mubr.msk.bf16.vlgmr.msra.gmra.mxu0 %vm570_vm5, %v11703_v18 }
0x43e7   : > { %17662 = vmatprep.mubr.msk.f32.mxu0 %vm18382_vm1, %v18381_v1 }
0x4456   : > { %v11865_v41 = vpop.f32.mrf.mxu0 }
0x4457   : > { %v11869_v8 = vpack.c.bf16 %v11865_v41, %v11865_v41 }
0x4458   : > { %v17642_v39 = vpop.f32.mrf.mxu0 }
0x4459   : > { %17646 = vmatmul.mubr.msk.bf16.vlgmr.msra.gmra.mxu1 %vm570_vm5, %v11869_v8  ;;  %v15874_v39 = vld [vmem:[%s21771_s10 + $0x22] ss:$0 sm:$0xff] }
0x445a   : > { %17656 = vmatpush3.xpose.msk.msra.mxu1 %vm570_vm5, %v11965_v15  ;;  %17657 = vmatprep.mubr.msk.f32.mxu1 %vm18382_vm1, %v18381_v1 }
0x445b   : > { %17665 = vmatprep.subr.bf16.mxu1 %v18381_v1 }
0x4461   : > { %17658 = vmatmul.mubr.msk.f32.vlgmr.msra.gmra.mxu1 %vm570_vm5, %v11963_v12 }
0x4462   : > { %17667 = vmatprep.mubr.msk.bf16.mxu1 %vm18382_vm1, %v18381_v1  ;;  %17666 = vmatpush3.bf16.msra.mxu1 %v12132_v58 }
0x4463   : > { %17681 = vmatprep.subr.bf16.mxu1 %v18381_v1 }
0x44a6   : > { %v11956_v63 = vpop.f32.mrf.mxu0 }
0x44a8   : > { %v17653_v13 = vpop.f32.mrf.mxu0 }
0x44aa   : > { %v11959_v20 = vpop.f32.mrf.mxu0 }
0x44ac   : > { %v17654_v30 = vpop.f32.mrf.mxu0 }
0x4519   : > { %v11910_v48 = vpop.f32.mrf.mxu1 }
0x451a   : > { %v11957_v27 = vadd.f32 %v11956_v63, %v11910_v48 }
0x451b   : > { %v17647_v36 = vpop.f32.mrf.mxu1 }
0x451d   : > { %v11913_v31 = vpop.f32.mrf.mxu1 }
0x451f   : > { %v17648_v19 = vpop.f32.mrf.mxu1 }
0x4521   : > { %v12036_v33 = vpop.f32.mrf.mxu1 }
0x4522   : > { %v12040_v34 = vsel %vm570_vm5, %v12036_v33, -inf }
0x4523   : > { %12041 = vmax.xlane.f32.xlu0 %v12040_v34  ;;  %v17659_v9 = vpop.f32.mrf.mxu1 }
0x4539   : > { %12051 = vrot.lane.b32.xlu0 %v21008_v54, %s21806_s17  ;;  %s408_s17 = scalar_lea.vmem %s21819_s20, %s21818_s26 }
0x453d   : > { %12175 = vrot.lane.b32.xlu0 %v21039_v35, %s21808_s14 }
0x45ac   : > { %v12042_v61 = vpop.xlane.xlu0 %12041 }
0x45ad   : > { %v12043_v51 = vsub.f32 %v12036_v33, %v12042_v61  ;;  %v15893_v61 = vld [vmem:[%s21768_s7 + $0x380] sm:$0xff] }
0x45af   : > { %v12044_v10 = vmul.f32 1.442695, %v12043_v51  ;;  %v15901_v51 = vld [vmem:[%s21768_s7 + $0x3c0] sm:$0xff] }
0x45b0   : > { %v12052_v46 = vpop.permute.xlu0 %12051 }
0x45b1   : > { %18358 = vpow2.f32 %v12044_v10  ;;  %17661 = vmatpush3.msra.mxu0 %v12052_v46  ;;  %v15930_v10 = vcombine.high %v15893_v61, %v15901_v51  ;;  %v15902_v46 = vld [vmem:[%s21768_s7 + $0x3c8] sm:$0xff] }
0x45b2   : > { %17671 = vmatprep.subr.mxu0 %v18381_v1 }
0x45b4   : > { %v12176_v24 = vpop.permute.xlu0 %12175 }
0x45be   : > { %v18359_v45 = vpop.eup %18358 }
0x45bf   : > { %v12046_v47 = vsel %vm570_vm5, %v18359_v45, 0.0 }
0x45c0   : > { %12047 = vadd.xlane.f32.xlu1 %v12046_v47 }
0x45d1   : > { %12177 = vrot.lane.b32.xlu1 %v21008_v54, %s21808_s14 }
0x4649   : > { %v12048_v49 = vpop.xlane.xlu1 %12047 }
0x464a   : > { %18360 = vrcp.f32 %v12048_v49 }
0x464d   : > { %v12178_v35 = vpop.permute.xlu1 %12177 }
0x4657   : > { %v18361_v22 = vpop.eup %18360 }
0x4658   : > { %v12050_v7 = vmul.f32 %v18361_v22, %v18359_v45  ;;  %v15929_v45 = vcombine.low %v15893_v61, %v15901_v51  ;;  %v15877_v22 = vld [vmem:[%s21768_s7 + $0x300] sm:$0xff] }
0x465a   : > { %17663 = vmatmul.mubr.msk.f32.vlgmr.msra.gmra.mxu0 %vm570_vm5, %v12050_v7  ;;  %v15885_v7 = vld [vmem:[%s21768_s7 + $0x340] sm:$0xff] }
0x465b   : > { %17672 = vmatpush3.xpose.msk.msra.mxu0 %vm570_vm5, %v12178_v35  ;;  %17673 = vmatprep.mubr.msk.f32.mxu0 %vm18382_vm1, %v18381_v1  ;;  %v15878_v35 = vld [vmem:[%s21768_s7 + $0x308] sm:$0xff]  ;;  %v15913_v58 = vcombine.low %v15877_v22, %v15885_v7 }
0x465c   : > { %17676 = vmatprep.subr.mxu0 %v18381_v1 }
0x465e   : > { %17674 = vmatmul.mubr.msk.f32.vlgmr.msra.gmra.mxu0 %vm570_vm5, %v12176_v24  ;;  %v15914_v24 = vcombine.high %v15877_v22, %v15885_v7 }
0x465f   : > { %17678 = vmatprep.mubr.msk.f32.mxu0 %vm18382_vm1, %v18381_v1 }
0x471a   : > { %v12123_v25 = vpop.f32.mrf.mxu0 }
0x471b   : > { %v12127_v57 = vpack.c.bf16 %v12123_v25, %v12123_v25  ;;  %v15915_v25 = vcombine.low %v15878_v35, %v15886_v52 }
0x471c   : > { %v17664_v29 = vpop.f32.mrf.mxu0 }
0x471d   : > { %17668 = vmatmul.mubr.msk.bf16.vlgmr.msra.gmra.mxu1 %vm570_vm5, %v12127_v57  ;;  %v15916_v57 = vcombine.high %v15878_v35, %v15886_v52  ;;  %v15895_v29 = vld [vmem:[%s21768_s7 + $0x390] sm:$0xff]  ;;  %v15884_v52 = vld [vmem:[%s21768_s7 + $0x338] sm:$0xff] }
0x471e   : > { %v12249_v16 = vpop.f32.mrf.mxu0  ;;  %17683 = vmatprep.mubr.msk.bf16.mxu1 %vm18382_vm1, %v18381_v1  ;;  %v15883_v35 = vld [vmem:[%s21768_s7 + $0x330] sm:$0xff] }
0x471f   : > { %v12253_v43 = vsel %vm570_vm5, %v12249_v16, -inf }
0x4720   : > { %12254 = vmax.xlane.f32.xlu1 %v12253_v43  ;;  %v17675_v28 = vpop.f32.mrf.mxu0  ;;  %v15896_v43 = vld [vmem:[%s21768_s7 + $0x398] sm:$0xff] }
0x47a9   : > { %v12255_v11 = vpop.xlane.xlu1 %12254 }
0x47aa   : > { %v12256_v2 = vsub.f32 %v12249_v16, %v12255_v11  ;;  %v15903_v16 = vld [vmem:[%s21768_s7 + $0x3d0] sm:$0xff] }
0x47ab   : > { %v15933_v28 = vcombine.low %v15895_v29, %v15903_v16  ;;  %v15934_v11 = vcombine.high %v15895_v29, %v15903_v16 }
0x47ac   : > { %v12257_v50 = vmul.f32 1.442695, %v12256_v2  ;;  %v15904_v2 = vld [vmem:[%s21768_s7 + $0x3d8] sm:$0xff] }
0x47ae   : > { %18362 = vpow2.f32 %v12257_v50  ;;  %v15935_v50 = vcombine.low %v15896_v43, %v15904_v2 }
0x47bb   : > { %v18363_v53 = vpop.eup %18362 }
0x47bc   : > { %v12259_v26 = vsel %vm570_vm5, %v18363_v53, 0.0 }
0x47bd   : > { %12260 = vadd.xlane.f32.xlu0 %v12259_v26 }
0x47d3   : > { %12264 = vrot.lane.b32.xlu0 %v21008_v54, %s21809_s19  ;;  %v15857_v54 = vld [vmem:[%s21767_s6 + $0x1c] sm:$0xf] }
0x47d4   : > { %v12345_v18 = vsel %vm452_vm0, %v15857_v54, 0  ;;  %v15888_v54 = vld [vmem:[%s21768_s7 + $0x358] sm:$0xff] }
0x47d5   : > { %17682 = vmatpush3.bf16.msra.mxu1 %v12345_v18 }
0x47dd   : > { %v12168_v44 = vpop.f32.mrf.mxu1 }
0x47de   : > { %v12174_v55 = vadd.f32 %v12168_v44, %v11957_v27 }
0x47df   : > { %v17669_v56 = vpop.f32.mrf.mxu1 }
0x47e0   : > { %v15875_v56 = vld [vmem:[%s21771_s10 + $0x23] ss:$0 sm:$0xff] }
0x47e1   : > { %v12171_v59 = vpop.f32.mrf.mxu1 }
0x47e3   : > { %v17670_v42 = vpop.f32.mrf.mxu1 }
0x47e4   : > { %v15876_v42 = vld [vmem:[%s21771_s10 + $0x24] ss:$0 sm:$0xff] }
0x4846   : > { %v12261_v60 = vpop.xlane.xlu0 %12260 }
0x4847   : > { %18364 = vrcp.f32 %v12261_v60 }
0x484a   : > { %v12265_v62 = vpop.permute.xlu0 %12264 }
0x484b   : > { %17677 = vmatpush3.msra.mxu0 %v12265_v62  ;;  %v15879_v62 = vld [vmem:[%s21768_s7 + $0x310] sm:$0xff] }
0x484c   : > { %12718 = vmatprep.subr.bf16.mxu0 %v15930_v10  ;;  %v15907_v10 = vld [vmem:[%s21768_s7 + $0x3f0] sm:$0xff] }
0x4854   : > { %v18365_v40 = vpop.eup %18364 }
0x4855   : > { %v12263_v37 = vmul.f32 %v18365_v40, %v18363_v53  ;;  %v15936_v53 = vcombine.high %v15896_v43, %v15904_v2  ;;  %v15887_v40 = vld [vmem:[%s21768_s7 + $0x350] sm:$0xff]  ;;  %v18123_v2 = vld [vmem:[%s21769_s8 + $0xcf8] sm:$0xff]  }
0x4857   : > { %17679 = vmatmul.mubr.msk.f32.vlgmr.msra.gmra.mxu0 %vm570_vm5, %v12263_v37  ;;  %v15880_v37 = vld [vmem:[%s21768_s7 + $0x318] sm:$0xff] }
0x4858   : > { %12738 = vmatprep.mubr.bf16.mxu0 %v18380_v0  ;;  %12719 = vmatpush1.bf16.msra.mxu0 %v15929_v45  ;;  %v15908_v45 = vld [vmem:[%s21768_s7 + $0x3f8] sm:$0xff] }
0x4859   : > { %12720 = vmatprep.subr.bf16.mxu0 %v15914_v24  ;;  %v15891_v24 = vld [vmem:[%s21768_s7 + $0x370] sm:$0xff] }
0x485a   : > { %v15926_v29 = vcombine.high %v15883_v35, %v15891_v24  ;;  %v15925_v43 = vcombine.low %v15883_v35, %v15891_v24 }
0x485c   : > { %12721 = vmatpush1.bf16.msra.mxu0 %v15913_v58  ;;  %v15892_v58 = vld [vmem:[%s21768_s7 + $0x378] sm:$0xff] }
0x485d   : > { %12800 = vmatprep.subr.bf16.mxu0 %v15934_v11  ;;  %v15928_v16 = vcombine.high %v15884_v52, %v15892_v58  ;;  %v18122_v11 = vld [vmem:[%s21769_s8 + $0xc78] sm:$0xff]  }
0x4917   : > { %v12336_v38 = vpop.f32.mrf.mxu0 }
0x4918   : > { %v12340_v41 = vpack.c.bf16 %v12336_v38, %v12336_v38 }
0x4919   : > { %v17680_v8 = vpop.f32.mrf.mxu0 }
0x491a   : > { %17684 = vmatmul.mubr.msk.bf16.vlgmr.msra.gmra.mxu1 %vm570_vm5, %v12340_v41  ;;  %v15918_v41 = vcombine.high %v15879_v62, %v15887_v40  ;;  %v15920_v8 = vcombine.high %v15880_v37, %v15888_v54 }
0x491b   : > { %12779 = vmatprep.mubr.bf16.mxu1 %v18380_v0 }
0x49da   : > { %v12381_v15 = vpop.f32.mrf.mxu1 }
0x49db   : > { %v12387_v12 = vadd.f32 %v12381_v15, %v12174_v55  ;;  %v15905_v15 = vld [vmem:[%s21768_s7 + $0x3e0] sm:$0xff] }
0x49dc   : > { %v17685_v63 = vpop.f32.mrf.mxu1 }
0x49dd   : > { %v12392_v13 = vadd.f32 %v15874_v39, %v12387_v12  ;;  %v15897_v39 = vld [vmem:[%s21768_s7 + $0x3a0] sm:$0xff]  ;;  %v15898_v12 = vld [vmem:[%s21768_s7 + $0x3a8] sm:$0xff] }
0x49de   : > { %v12384_v20 = vpop.f32.mrf.mxu1  ;;  %v15906_v63 = vld [vmem:[%s21768_s7 + $0x3e8] sm:$0xff] }
0x49df   : > { %v12393_v30 = vadd.f32 %v12392_v13, %v21026_v32  ;;  %v15894_v32 = vld [vmem:[%s21768_s7 + $0x388] sm:$0xff]  ;;  %v15917_v13 = vcombine.low %v15879_v62, %v15887_v40  ;;  %v15919_v20 = vcombine.low %v15880_v37, %v15888_v54  ;;  %v18135_v62 = vld [vmem:[%s21769_s8 + $0xce0] sm:$0xff]   ;;  %v18138_v54 = vld [vmem:[%s21769_s8 + $0xc58] sm:$0xff]  }
0x49e0   : > { %v17686_v48 = vpop.f32.mrf.mxu1  ;;  %v15931_v47 = vcombine.low %v15894_v32, %v15902_v46  ;;  %v15932_v49 = vcombine.high %v15894_v32, %v15902_v46  ;;  %v15899_v32 = vld [vmem:[%s21768_s7 + $0x3b0] sm:$0xff]  ;;  %v15900_v46 = vld [vmem:[%s21768_s7 + $0x3b8] sm:$0xff]  ;;  %v18136_v40 = vld [vmem:[%s21769_s8 + $0xc20] sm:$0xff]  }
0x49e1   : > { %v12396_v36 = vsel %vm518_vm4, %v12393_v30, 0.0  ;;  %v15940_v48 = vcombine.high %v15898_v12, %v15906_v63  ;;  %v15942_v22 = vcombine.high %v15899_v32, %v15907_v10  ;;  %v15944_v7 = vcombine.high %v15900_v46, %v15908_v45  ;;  %v18137_v37 = vld [vmem:[%s21769_s8 + $0xca0] sm:$0xff]  }
0x49e2   : > { %12397 = vadd.xlane.f32.xlu1 %v12396_v36  ;;  %12759 = vmatprep.subr.bf16.mxu1 %v15932_v49  ;;  %v15881_v36 = vld [vmem:[%s21768_s7 + $0x320] sm:$0xff] }
0x49e3   : > { %12760 = vmatpush1.bf16.msra.mxu1 %v15931_v47 }
0x49e4   : > { %12761 = vmatprep.subr.bf16.mxu1 %v15916_v57  ;;  %v15943_v57 = vcombine.low %v15900_v46, %v15908_v45 }
0x49e7   : > { %12762 = vmatpush1.bf16.msra.mxu1 %v15915_v25  ;;  %v15941_v25 = vcombine.low %v15899_v32, %v15907_v10 }
0x49e8   : > { %12841 = vmatprep.subr.bf16.mxu1 %v15936_v53  ;;  %v18125_v53 = vld [vmem:[%s21769_s8 + $0xcb8] sm:$0xff]  }
0x4a6b   : > { %v12398_v31 = vpop.xlane.xlu1 %12397 }
0x4a6c   : > { %v12399_v19 = vmul.f32 0.03125, %v12398_v31  ;;  %v15889_v31 = vld [vmem:[%s21768_s7 + $0x360] sm:$0xff] }
0x4a6d   : > { %v15922_v61 = vcombine.high %v15881_v36, %v15889_v31  ;;  %v15921_v47 = vcombine.low %v15881_v36, %v15889_v31  ;;  %v18150_v36 = vld [vmem:[%s21769_s8 + $0xc40] sm:$0xff]  }
0x4a6e   : > { %v12400_v33 = vsub.f32 %v12393_v30, %v12399_v19  ;;  %v15938_v30 = vcombine.high %v15897_v39, %v15905_v15  ;;  %v15882_v19 = vld [vmem:[%s21768_s7 + $0x328] sm:$0xff]  ;;  %v18151_v31 = vld [vmem:[%s21769_s8 + $0xcc0] sm:$0xff]  }
0x4a70   : > { %v12401_v34 = vmul.f32 %v12400_v33, %v12400_v33 }
0x4a72   : > { %v12402_v9 = vsel %vm518_vm4, %v12401_v34, 0.0  ;;  %v15937_v34 = vcombine.low %v15897_v39, %v15905_v15  ;;  %v18142_v39 = vld [vmem:[%s21769_s8 + $0xc50] sm:$0xff]  }
0x4a73   : > { %12403 = vadd.xlane.f32.xlu1 %v12402_v9  ;;  %v15939_v9 = vcombine.low %v15898_v12, %v15906_v63  ;;  %v18143_v15 = vld [vmem:[%s21769_s8 + $0xcd0] sm:$0xff]  }
0x4a74   : > { %v18144_v12 = vld [vmem:[%s21769_s8 + $0xc10] sm:$0xff]  }
0x4a75   : > { %v18145_v63 = vld [vmem:[%s21769_s8 + $0xc90] sm:$0xff]  }
0x4afc   : > { %v12404_v26 = vpop.xlane.xlu1 %12403 }
0x4afd   : > { %v12405_v27 = vmul.f32 0.03125, %v12404_v26  ;;  %v18126_v26 = vld [vmem:[%s21769_s8 + $0xc70] sm:$0xff]  }
0x4aff   : > { %v12406_v44 = vadd.f32 1e-05, %v12405_v27  ;;  %v18128_v27 = vld [vmem:[%s21769_s8 + $0xc30] sm:$0xff]  }
0x4b01   : > { %18366 = vrsqrt.f32 %v12406_v44  ;;  %v18129_v44 = vld [vmem:[%s21769_s8 + $0xcb0] sm:$0xff]  }
0x4b0e   : > { %v18367_v55 = vpop.eup %18366 }
0x4b0f   : > { %v12408_v59 = vmul.f32 %v18367_v55, %v12400_v33  ;;  %v15890_v33 = vld [vmem:[%s21768_s7 + $0x368] sm:$0xff] }
0x4b10   : > { %v15924_v51 = vcombine.high %v15882_v19, %v15890_v33  ;;  %v15923_v49 = vcombine.low %v15882_v19, %v15890_v33  ;;  %v18130_v55 = vld [vmem:[%s21769_s8 + $0xc68] sm:$0xff]   ;;  %v18152_v19 = vld [vmem:[%s21769_s8 + $0xc00] sm:$0xff]  }
0x4b11   : > { %v12413_v60 = vmul.f32 %v15875_v56, %v12408_v59  ;;  %v18131_v56 = vld [vmem:[%s21769_s8 + $0xce8] sm:$0xff]   ;;  %v18153_v33 = vld [vmem:[%s21769_s8 + $0xc80] sm:$0xff]  }
0x4b12   : > { %v18132_v59 = vld [vmem:[%s21769_s8 + $0xc28] sm:$0xff]  }
0x4b13   : > { %v21190_v18 = vadd.f32 %v15876_v42, %v12413_v60  ;;  %v18133_v42 = vld [vmem:[%s21769_s8 + $0xca8] sm:$0xff]   ;;  %v18134_v60 = vld [vmem:[%s21769_s8 + $0xc60] sm:$0xff]  }
0x4b15   : > { %v21194_v38 = vpack.c.bf16 %v21190_v18, %v21190_v18 }
0x4b17   : > { %15945 = vmatmul.mubr.msk.bf16.vlgmr.msra.gmra.mxu0 %vm518_vm4, %v21194_v38  ;;  %15946 = vmatmul.mubr.msk.bf16.vlgmr.msra.gmra.mxu1 %vm518_vm4, %v21194_v38 }
0x4b18   : > { %12801 = vmatpush1.bf16.msra.mxu0 %v15933_v28  ;;  %12842 = vmatpush1.bf16.msra.mxu1 %v15935_v50  ;;  %v15927_v28 = vcombine.low %v15884_v52, %v15892_v58  ;;  %v18124_v50 = vld [vmem:[%s21769_s8 + $0xc38] sm:$0xff]  }
0x4b19   : > { %12802 = vmatprep.subr.bf16.mxu0 %v15918_v41  ;;  %12843 = vmatprep.subr.bf16.mxu1 %v15920_v8  ;;  %v18140_v41 = vld [vmem:[%s21769_s8 + $0xc18] sm:$0xff]  }
0x4b1a   : > { %12820 = vmatprep.mubr.bf16.mxu0 %v18380_v0  ;;  %12861 = vmatprep.mubr.bf16.mxu1 %v18380_v0  ;;  %v18141_v8 = vld [vmem:[%s21769_s8 + $0xc98] sm:$0xff]  }
0x4b1c   : > { %12803 = vmatpush1.bf16.msra.mxu0 %v15917_v13  ;;  %12844 = vmatpush1.bf16.msra.mxu1 %v15919_v20  ;;  %v18146_v13 = vld [vmem:[%s21769_s8 + $0xc48] sm:$0xff]  }
0x4b1d   : > { %12882 = vmatprep.subr.bf16.mxu0 %v15938_v30  ;;  %12923 = vmatprep.subr.bf16.mxu1 %v15940_v48  ;;  %v18147_v20 = vld [vmem:[%s21769_s8 + $0xcc8] sm:$0xff]  }
0x4b1e   : > { %v18148_v30 = vld [vmem:[%s21769_s8 + $0xc08] sm:$0xff]  }
0x4b1f   : > { %15947 = vmatmul.mubr.msk.bf16.vlgmr.msra.gmra.mxu0 %vm518_vm4, %v21194_v38  ;;  %15948 = vmatmul.mubr.msk.bf16.vlgmr.msra.gmra.mxu1 %vm518_vm4, %v21194_v38  ;;  %v18149_v48 = vld [vmem:[%s21769_s8 + $0xc88] sm:$0xff]  }
0x4b20   : > { %12883 = vmatpush1.bf16.msra.mxu0 %v15937_v34  ;;  %12924 = vmatpush1.bf16.msra.mxu1 %v15939_v9  ;;  %v18154_v34 = vld [vmem:[%s21769_s8 + $0xd78] sm:$0xff]  }
0x4b21   : > { %12884 = vmatprep.subr.bf16.mxu0 %v15922_v61  ;;  %12925 = vmatprep.subr.bf16.mxu1 %v15924_v51  ;;  %v18155_v9 = vld [vmem:[%s21769_s8 + $0xdf8] sm:$0xff]  }
0x4b22   : > { %12902 = vmatprep.mubr.bf16.mxu0 %v18380_v0  ;;  %12943 = vmatprep.mubr.bf16.mxu1 %v18380_v0  ;;  %v15909_v61 = vld [vmem:[%s21772_s11 + $0x3] ss:$8 sm:$0xf] }
0x4b23   : > { %v15910_v51 = vld [vmem:[%s21772_s11 + $0x3] ss:$8 sm:$0xf0] }
0x4b24   : > { %12885 = vmatpush1.bf16.msra.mxu0 %v15921_v47  ;;  %12926 = vmatpush1.bf16.msra.mxu1 %v15923_v49  ;;  %v21374_v32 = vor.u32 %v15910_v51, %v15909_v61  ;;  %v15912_v61 = vld [vmem:[%s21772_s11 + $0x43] ss:$8 sm:$0xf0] }
0x4b25   : > { %12964 = vmatprep.subr.bf16.mxu0 %v15942_v22  ;;  %13005 = vmatprep.subr.bf16.mxu1 %v15944_v7 }
0x4b26   : > { %v12466_v10 = vrot.slane %v21374_v32, %v18874_v3  ;;  %v12474_v46 = vrot.slane %v21374_v32, %v18877_v5  ;;  %v12470_v45 = vrot.slane %v21374_v32, %v18880_v6  ;;  %v12478_v47 = vrot.slane %v21374_v32, %v18883_v4 }
0x4b27   : > { %15949 = vmatmul.mubr.msk.bf16.vlgmr.msra.gmra.mxu0 %vm518_vm4, %v21194_v38  ;;  %15950 = vmatmul.mubr.msk.bf16.vlgmr.msra.gmra.mxu1 %vm518_vm4, %v21194_v38 }
0x4b28   : > { %12965 = vmatpush1.bf16.msra.mxu0 %v15941_v25  ;;  %13006 = vmatpush1.bf16.msra.mxu1 %v15943_v57 }
0x4b29   : > { %12966 = vmatprep.subr.bf16.mxu0 %v15926_v29  ;;  %13007 = vmatprep.subr.bf16.mxu1 %v15928_v16 }
0x4b2a   : > { %12984 = vmatprep.mubr.bf16.mxu0 %v18380_v0  ;;  %13025 = vmatprep.mubr.bf16.mxu1 %v18380_v0  ;;  %v18127_v0 = vld [vmem:[%s21769_s8 + $0xcf0] sm:$0xff]  }
0x4b2c   : > { %12967 = vmatpush1.bf16.msra.mxu0 %v15925_v43  ;;  %13008 = vmatpush1.bf16.msra.mxu1 %v15927_v28 }
0x4b2d   : > { %17048 = vmatprep.subr.bf16.mxu0 %v18122_v11  ;;  %17070 = vmatprep.subr.bf16.mxu1 %v18123_v2 }
0x4b2f   : > { %15951 = vmatmul.mubr.msk.bf16.vlgmr.msra.gmra.mxu0 %vm518_vm4, %v21194_v38  ;;  %15952 = vmatmul.mubr.msk.bf16.vlgmr.msra.gmra.mxu1 %vm518_vm4, %v21194_v38  ;;  %v18139_v38 = vld [vmem:[%s21769_s8 + $0xcd8] sm:$0xff]  }
0x4b30   : > { %17049 = vmatpush3.bf16.msra.mxu0 %v18124_v50  ;;  %17071 = vmatpush3.bf16.msra.mxu1 %v18125_v53 }
0x4b31   : > { %17050 = vmatprep.subr.bf16.mxu0 %v18126_v26  ;;  %17072 = vmatprep.subr.bf16.mxu1 %v18127_v0  ;;  %v12486_v0 = vrot.slane %v21374_v32, %v18894_v21 }
0x4b34   : > { %17051 = vmatpush3.bf16.msra.mxu0 %v18128_v27  ;;  %17073 = vmatpush3.bf16.msra.mxu1 %v18129_v44  ;;  %v12494_v27 = vrot.slane %v21374_v32, %v18897_v23  ;;  %v18156_v44 = vld [vmem:[%s21769_s8 + $0xd38] sm:$0xff]  }
0x4b35   : > { %17052 = vmatprep.subr.bf16.mxu0 %v18130_v55  ;;  %17074 = vmatprep.subr.bf16.mxu1 %v18131_v56  ;;  %v18157_v55 = vld [vmem:[%s21769_s8 + $0xdb8] sm:$0xff]  }
0x4b38   : > { %17053 = vmatpush3.bf16.msra.mxu0 %v18132_v59  ;;  %17075 = vmatpush3.bf16.msra.mxu1 %v18133_v42 }
0x4b39   : > { %17054 = vmatprep.subr.bf16.mxu0 %v18134_v60  ;;  %17076 = vmatprep.subr.bf16.mxu1 %v18135_v62  ;;  %v18158_v62 = vld [vmem:[%s21769_s8 + $0xd70] sm:$0xff]  }
0x4b3c   : > { %17055 = vmatpush3.bf16.msra.mxu0 %v18136_v40  ;;  %17077 = vmatpush3.bf16.msra.mxu1 %v18137_v37  ;;  %v18159_v40 = vld [vmem:[%s21769_s8 + $0xdf0] sm:$0xff]  }
0x4b3d   : > { %17056 = vmatprep.subr.bf16.mxu0 %v18138_v54  ;;  %17078 = vmatprep.subr.bf16.mxu1 %v18139_v38 }
0x4b40   : > { %17057 = vmatpush3.bf16.msra.mxu0 %v18140_v41  ;;  %17079 = vmatpush3.bf16.msra.mxu1 %v18141_v8  ;;  %v18160_v8 = vld [vmem:[%s21769_s8 + $0xd30] sm:$0xff]  }
0x4b41   : > { %17058 = vmatprep.subr.bf16.mxu0 %v18142_v39  ;;  %17080 = vmatprep.subr.bf16.mxu1 %v18143_v15  ;;  %v18161_v39 = vld [vmem:[%s21769_s8 + $0xdb0] sm:$0xff]  }
0x4b44   : > { %17059 = vmatpush3.bf16.msra.mxu0 %v18144_v12  ;;  %17081 = vmatpush3.bf16.msra.mxu1 %v18145_v63  ;;  %v18162_v63 = vld [vmem:[%s21769_s8 + $0xd68] sm:$0xff]  }
0x4b45   : > { %17060 = vmatprep.subr.bf16.mxu0 %v18146_v13  ;;  %17082 = vmatprep.subr.bf16.mxu1 %v18147_v20  ;;  %v18163_v13 = vld [vmem:[%s21769_s8 + $0xde8] sm:$0xff]  }
0x4b48   : > { %17061 = vmatpush3.bf16.msra.mxu0 %v18148_v30  ;;  %17083 = vmatpush3.bf16.msra.mxu1 %v18149_v48 }
0x4b49   : > { %17062 = vmatprep.subr.bf16.mxu0 %v18150_v36  ;;  %17084 = vmatprep.subr.bf16.mxu1 %v18151_v31 }
0x4b4c   : > { %17063 = vmatpush3.bf16.msra.mxu0 %v18152_v19  ;;  %17085 = vmatpush3.bf16.msra.mxu1 %v18153_v33  ;;  %v15911_v33 = vld [vmem:[%s21772_s11 + $0x43] ss:$8 sm:$0xf] }
0x4b4d   : > { %17092 = vmatprep.subr.bf16.mxu0 %v18154_v34  ;;  %17114 = vmatprep.subr.bf16.mxu1 %v18155_v9  ;;  %v18164_v34 = vld [vmem:[%s21769_s8 + $0xd28] sm:$0xff]  }
0x4b4e   : > { %v18165_v9 = vld [vmem:[%s21769_s8 + $0xda8] sm:$0xff]  }
0x4bd7   : > { %v12740_v49 = vpop.f32.mrf.mxu0  ;;  %v12781_v22 = vpop.f32.mrf.mxu1 }
0x4bd8   : > { %v12741_v7 = vadd.f32 %v12740_v49, %v12466_v10  ;;  %v12782_v35 = vadd.f32 %v12781_v22, %v12474_v46  ;;  %v18166_v46 = vld [vmem:[%s21769_s8 + $0xd60] sm:$0xff]   ;;  %v21438_v22 = vor.u32 %v15912_v61, %v15911_v33 }
0x4bd9   : > { %v12742_v24 = vpop.f32.mrf.mxu0  ;;  %v12783_v52 = vpop.f32.mrf.mxu1 }
0x4bda   : > { %v12743_v58 = vadd.f32 %v12742_v24, %v12470_v45  ;;  %v12784_v25 = vadd.f32 %v12783_v52, %v12478_v47  ;;  %v13034_v57 = vmax.f32 %v12741_v7, 0.0  ;;  %v13036_v29 = vmax.f32 %v12782_v35, 0.0  ;;  %v18167_v45 = vld [vmem:[%s21769_s8 + $0xde0] sm:$0xff]  }
0x4bdb   : > { %v12744_v16 = vpop.f32.mrf.mxu0  ;;  %v12785_v43 = vpop.f32.mrf.mxu1  ;;  %v18168_v7 = vld [vmem:[%s21769_s8 + $0xd20] sm:$0xff]  }
0x4bdc   : > { %v13035_v28 = vmax.f32 %v12743_v58, 0.0  ;;  %v13037_v11 = vmax.f32 %v12784_v25, 0.0  ;;  %v13050_v56 = vpack.c.bf16 %v13034_v57, %v13034_v57  ;;  %v13052_v59 = vpack.c.bf16 %v13036_v29, %v13036_v29  ;;  %v18169_v35 = vld [vmem:[%s21769_s8 + $0xda0] sm:$0xff]   ;;  %v18170_v58 = vld [vmem:[%s21769_s8 + $0xd58] sm:$0xff]  }
0x4bdd   : > { %v12745_v2 = vpop.f32.mrf.mxu0  ;;  %v12786_v50 = vpop.f32.mrf.mxu1  ;;  %v18171_v25 = vld [vmem:[%s21769_s8 + $0xdd8] sm:$0xff]   ;;  %v12514_v57 = vrot.slane %v21438_v22, %v18954_v14  ;;  %v12522_v29 = vrot.slane %v21438_v22, %v18957_v17 }
0x4bde   : > { %v13051_v53 = vpack.c.bf16 %v13035_v28, %v13035_v28  ;;  %v13053_v26 = vpack.c.bf16 %v13037_v11, %v13037_v11  ;;  %v18172_v28 = vld [vmem:[%s21769_s8 + $0xd18] sm:$0xff]  }
0x4bdf   : > { %v21394_v42 = vpop.f32.mrf.mxu0  ;;  %v21396_v60 = vpop.f32.mrf.mxu1  ;;  %v18173_v11 = vld [vmem:[%s21769_s8 + $0xd98] sm:$0xff]  }
0x4be0   : > { %14128 = vmatprep.mubr.bf16.mxu0 %v13051_v53  ;;  %14168 = vmatprep.mubr.bf16.mxu1 %v13053_v26  ;;  %v18174_v53 = vld [vmem:[%s21769_s8 + $0xd50] sm:$0xff]  }
0x4be1   : > { %v12824_v37 = vpop.f32.mrf.mxu0  ;;  %v12865_v54 = vpop.f32.mrf.mxu1  ;;  %14129 = vmatmul.mubr.bf16.vlgmr.msra.gmra.mxu0 %v13050_v56  ;;  %14169 = vmatmul.mubr.bf16.vlgmr.msra.gmra.mxu1 %v13052_v59  ;;  %v18175_v26 = vld [vmem:[%s21769_s8 + $0xdd0] sm:$0xff]  }
0x4be2   : > { %v12825_v38 = vadd.f32 %v12824_v37, %v12486_v0  ;;  %v12866_v41 = vadd.f32 %v12865_v54, %v12494_v27  ;;  %17093 = vmatpush3.bf16.msra.mxu0 %v18156_v44  ;;  %17115 = vmatpush3.bf16.msra.mxu1 %v18157_v55  ;;  %v18176_v56 = vld [vmem:[%s21769_s8 + $0xd10] sm:$0xff]  }
0x4be3   : > { %v12826_v15 = vpop.f32.mrf.mxu0  ;;  %v12867_v12 = vpop.f32.mrf.mxu1  ;;  %17094 = vmatprep.subr.bf16.mxu0 %v18158_v62  ;;  %17116 = vmatprep.subr.bf16.mxu1 %v18159_v40  ;;  %v18177_v59 = vld [vmem:[%s21769_s8 + $0xd90] sm:$0xff]   ;;  %v12482_v62 = vrot.slane %v21374_v32, %v18954_v14  ;;  %v12490_v40 = vrot.slane %v21374_v32, %v18957_v17  ;;  %v12510_v14 = vrot.slane %v21438_v22, %v18883_v4  ;;  %v18180_v32 = vld [vmem:[%s21769_s8 + $0xd08] sm:$0xff]   ;;  %v18183_v4 = vld [vmem:[%s21769_s8 + $0xdc0] sm:$0xff]  }
0x4be4   : > { %v13039_v20 = vmax.f32 %v12825_v38, 0.0  ;;  %v13041_v30 = vmax.f32 %v12866_v41, 0.0  ;;  %v18178_v38 = vld [vmem:[%s21769_s8 + $0xd48] sm:$0xff]  }
0x4be5   : > { %v12827_v48 = vpop.f32.mrf.mxu0  ;;  %v12868_v36 = vpop.f32.mrf.mxu1  ;;  %v18179_v41 = vld [vmem:[%s21769_s8 + $0xdc8] sm:$0xff]   ;;  %v12823_v12 = vadd.f32 %v21394_v42, %v12482_v62  ;;  %v18184_v42 = vld [vmem:[%s21769_s8 + $0xd00] sm:$0xff]   ;;  %v12498_v62 = vrot.slane %v21438_v22, %v18874_v3  ;;  %v12518_v3 = vrot.slane %v21438_v22, %v18894_v21 }
0x4be6   : > { %v13055_v31 = vpack.c.bf16 %v13039_v20, %v13039_v20  ;;  %v13057_v19 = vpack.c.bf16 %v13041_v30, %v13041_v30  ;;  %17095 = vmatpush3.bf16.msra.mxu0 %v18160_v8  ;;  %17117 = vmatpush3.bf16.msra.mxu1 %v18161_v39  ;;  %v12502_v8 = vrot.slane %v21438_v22, %v18880_v6  ;;  %v18181_v15 = vld [vmem:[%s21769_s8 + $0xd88] sm:$0xff]   ;;  %v18182_v6 = vld [vmem:[%s21769_s8 + $0xd40] sm:$0xff]   ;;  %v18186_v36 = vld [vmem:[%s21769_s8 + $0xe78] sm:$0xff]  }
0x4be7   : > { %v21428_v51 = vpop.f32.mrf.mxu0  ;;  %v21430_v10 = vpop.f32.mrf.mxu1  ;;  %17096 = vmatprep.subr.bf16.mxu0 %v18162_v63  ;;  %17118 = vmatprep.subr.bf16.mxu1 %v18163_v13  ;;  %v12864_v63 = vadd.f32 %v21396_v60, %v12490_v40  ;;  %v18185_v60 = vld [vmem:[%s21769_s8 + $0xd80] sm:$0xff]   ;;  %v13038_v30 = vmax.f32 %v12823_v12, 0.0  ;;  %v18209_v40 = vld [vmem:[%s21769_s8 + $0xe90] sm:$0xff]  }
0x4be8   : > { %14208 = vmatprep.mubr.bf16.mxu0 %v13055_v31  ;;  %14248 = vmatprep.mubr.bf16.mxu1 %v13057_v19  ;;  %v18187_v31 = vld [vmem:[%s21769_s8 + $0xef8] sm:$0xff]   ;;  %v18214_v21 = vld [vmem:[%s21769_s8 + $0xe40] sm:$0xff]  }
0x4be9   : > { %v12906_v47 = vpop.f32.mrf.mxu0  ;;  %v12947_v49 = vpop.f32.mrf.mxu1  ;;  %v13040_v48 = vmax.f32 %v12864_v63, 0.0 }
0x4bea   : > { %17097 = vmatpush3.bf16.msra.mxu0 %v18164_v34  ;;  %17119 = vmatpush3.bf16.msra.mxu1 %v18165_v9  ;;  %v12907_v13 = vadd.f32 %v12906_v47, %v12502_v8  ;;  %v12948_v20 = vadd.f32 %v12947_v49, %v12510_v14  ;;  %v18188_v34 = vld [vmem:[%s21769_s8 + $0xe38] sm:$0xff]   ;;  %v13054_v9 = vpack.c.bf16 %v13038_v30, %v13038_v30  ;;  %v18190_v47 = vld [vmem:[%s21769_s8 + $0xe70] sm:$0xff]   ;;  %v18212_v8 = vld [vmem:[%s21769_s8 + $0xe08] sm:$0xff]  }
0x4beb   : > { %v12908_v24 = vpop.f32.mrf.mxu0  ;;  %v12949_v52 = vpop.f32.mrf.mxu1  ;;  %17098 = vmatprep.subr.bf16.mxu0 %v18166_v46  ;;  %17120 = vmatprep.subr.bf16.mxu1 %v18167_v45  ;;  %v13056_v61 = vpack.c.bf16 %v13040_v48, %v13040_v48  ;;  %v18189_v46 = vld [vmem:[%s21769_s8 + $0xeb8] sm:$0xff]   ;;  %v18191_v49 = vld [vmem:[%s21769_s8 + $0xef0] sm:$0xff]   ;;  %v12905_v14 = vadd.f32 %v21428_v51, %v12498_v62 }
0x4bec   : > { %v13043_v19 = vmax.f32 %v12907_v13, 0.0  ;;  %v13045_v33 = vmax.f32 %v12948_v20, 0.0  ;;  %v18193_v24 = vld [vmem:[%s21769_s8 + $0xeb0] sm:$0xff]   ;;  %v18194_v52 = vld [vmem:[%s21769_s8 + $0xe68] sm:$0xff]   ;;  %v18221_v13 = vld [vmem:[%s21769_s8 + $0xfb8] sm:$0xff]  }
0x4bed   : > { %v12909_v16 = vpop.f32.mrf.mxu0  ;;  %v12950_v43 = vpop.f32.mrf.mxu1  ;;  %v18223_v30 = vld [vmem:[%s21769_s8 + $0xff0] sm:$0xff]  }
0x4bee   : > { %17099 = vmatpush3.bf16.msra.mxu0 %v18168_v7  ;;  %17121 = vmatpush3.bf16.msra.mxu1 %v18169_v35  ;;  %v13059_v45 = vpack.c.bf16 %v13043_v19, %v13043_v19  ;;  %v13061_v7 = vpack.c.bf16 %v13045_v33, %v13045_v33  ;;  %v18192_v35 = vld [vmem:[%s21769_s8 + $0xe30] sm:$0xff]   ;;  %v18199_v16 = vld [vmem:[%s21769_s8 + $0xee0] sm:$0xff]   ;;  %v18226_v19 = vld [vmem:[%s21769_s8 + $0xf68] sm:$0xff]  }
0x4bef   : > { %v12986_v2 = vpop.f32.mrf.mxu0  ;;  %v13027_v50 = vpop.f32.mrf.mxu1  ;;  %17100 = vmatprep.subr.bf16.mxu0 %v18170_v58  ;;  %17122 = vmatprep.subr.bf16.mxu1 %v18171_v25  ;;  %v18195_v58 = vld [vmem:[%s21769_s8 + $0xee8] sm:$0xff]   ;;  %v18200_v43 = vld [vmem:[%s21769_s8 + $0xe20] sm:$0xff]  }
0x4bf0   : > { %v21468_v0 = vadd.f32 %v12986_v2, %v12514_v57  ;;  %v21470_v27 = vadd.f32 %v13027_v50, %v12522_v29  ;;  %v18196_v25 = vld [vmem:[%s21769_s8 + $0xe28] sm:$0xff]   ;;  %v18198_v29 = vld [vmem:[%s21769_s8 + $0xe60] sm:$0xff]   ;;  %v18203_v2 = vld [vmem:[%s21769_s8 + $0xed8] sm:$0xff]  }
0x4bf1   : > { %v21472_v44 = vpop.f32.mrf.mxu0  ;;  %v21474_v55 = vpop.f32.mrf.mxu1  ;;  %v18197_v57 = vld [vmem:[%s21769_s8 + $0xea8] sm:$0xff]   ;;  %v18204_v50 = vld [vmem:[%s21769_s8 + $0xe18] sm:$0xff]  }
0x4bf2   : > { %17101 = vmatpush3.bf16.msra.mxu0 %v18172_v28  ;;  %17123 = vmatpush3.bf16.msra.mxu1 %v18173_v11  ;;  %v18201_v28 = vld [vmem:[%s21769_s8 + $0xea0] sm:$0xff]   ;;  %v18202_v11 = vld [vmem:[%s21769_s8 + $0xe58] sm:$0xff]   ;;  %v18227_v33 = vld [vmem:[%s21769_s8 + $0xfe8] sm:$0xff]  }
0x4bf3   : > { %v12990_v37 = vpop.f32.mrf.mxu0  ;;  %v13031_v54 = vpop.f32.mrf.mxu1  ;;  %17102 = vmatprep.subr.bf16.mxu0 %v18174_v53  ;;  %17124 = vmatprep.subr.bf16.mxu1 %v18175_v26  ;;  %v18205_v53 = vld [vmem:[%s21769_s8 + $0xe98] sm:$0xff]   ;;  %v18206_v26 = vld [vmem:[%s21769_s8 + $0xe50] sm:$0xff]  }
0x4bf4   : > { %v18210_v37 = vld [vmem:[%s21769_s8 + $0xe48] sm:$0xff]   ;;  %v12506_v54 = vrot.slane %v21438_v22, %v18877_v5 }
0x4bf5   : > { %v12991_v39 = vpop.f32.mrf.mxu0  ;;  %v13032_v17 = vpop.f32.mrf.mxu1  ;;  %v18213_v5 = vld [vmem:[%s21769_s8 + $0xe88] sm:$0xff]  }
0x4bf6   : > { %17103 = vmatpush3.bf16.msra.mxu0 %v18176_v56  ;;  %17125 = vmatpush3.bf16.msra.mxu1 %v18177_v59  ;;  %v18207_v56 = vld [vmem:[%s21769_s8 + $0xed0] sm:$0xff]   ;;  %v12946_v39 = vadd.f32 %v21430_v10, %v12506_v54  ;;  %v18216_v17 = vld [vmem:[%s21769_s8 + $0xe00] sm:$0xff]  }
0x4bf7   : > { %17104 = vmatprep.subr.bf16.mxu0 %v18178_v38  ;;  %17126 = vmatprep.subr.bf16.mxu1 %v18179_v41  ;;  %v18208_v59 = vld [vmem:[%s21769_s8 + $0xe10] sm:$0xff]   ;;  %v18211_v38 = vld [vmem:[%s21769_s8 + $0xec8] sm:$0xff]   ;;  %v12526_v41 = vrot.slane %v21438_v22, %v18897_v23  ;;  %v18215_v23 = vld [vmem:[%s21769_s8 + $0xec0] sm:$0xff]   ;;  %v12989_v22 = vadd.f32 %v21472_v44, %v12518_v3 }
0x4bf8   : > { %v18217_v10 = vld [vmem:[%s21769_s8 + $0xe80] sm:$0xff]   ;;  %v13044_v12 = vmax.f32 %v12946_v39, 0.0  ;;  %v18219_v44 = vld [vmem:[%s21769_s8 + $0xff8] sm:$0xff]  }
0x4bf9   : > { %v13030_v51 = vadd.f32 %v21474_v55, %v12526_v41  ;;  %v13047_v55 = vmax.f32 %v12989_v22, 0.0 }
0x4bfa   : > { %17105 = vmatpush3.bf16.msra.mxu0 %v18180_v32  ;;  %17127 = vmatpush3.bf16.msra.mxu1 %v18181_v15  ;;  %v13042_v32 = vmax.f32 %v12905_v14, 0.0  ;;  %v18218_v15 = vld [vmem:[%s21769_s8 + $0xf78] sm:$0xff]   ;;  %v13060_v20 = vpack.c.bf16 %v13044_v12, %v13044_v12 }
0x4bfb   : > { %17106 = vmatprep.subr.bf16.mxu0 %v18182_v6  ;;  %17128 = vmatprep.subr.bf16.mxu1 %v18183_v4  ;;  %v13049_v63 = vmax.f32 %v13030_v51, 0.0  ;;  %v18220_v6 = vld [vmem:[%s21769_s8 + $0xf38] sm:$0xff]  }
0x4bfc   : > { %v13058_v4 = vpack.c.bf16 %v13042_v32, %v13042_v32 }
0x4bfd   : > { %v13065_v48 = vpack.c.bf16 %v13049_v63, %v13049_v63 }
0x4bfe   : > { %17107 = vmatpush3.bf16.msra.mxu0 %v18184_v42  ;;  %17129 = vmatpush3.bf16.msra.mxu1 %v18185_v60  ;;  %v18222_v42 = vld [vmem:[%s21769_s8 + $0xf70] sm:$0xff]   ;;  %v13063_v60 = vpack.c.bf16 %v13047_v55, %v13047_v55 }
0x4bff   : > { %17136 = vmatprep.subr.bf16.mxu0 %v18186_v36  ;;  %17158 = vmatprep.subr.bf16.mxu1 %v18187_v31  ;;  %v18224_v36 = vld [vmem:[%s21769_s8 + $0xf30] sm:$0xff]  }
0x4c00   : > { %v18225_v31 = vld [vmem:[%s21769_s8 + $0xfb0] sm:$0xff]  }
0x4c01   : > { %14209 = vmatmul.mubr.bf16.vlgmr.msra.gmra.mxu0 %v13054_v9  ;;  %14249 = vmatmul.mubr.bf16.vlgmr.msra.gmra.mxu1 %v13056_v61  ;;  %v18229_v9 = vld [vmem:[%s21769_s8 + $0xfa8] sm:$0xff]   ;;  %v18230_v61 = vld [vmem:[%s21769_s8 + $0xf60] sm:$0xff]  }
0x4c02   : > { %17137 = vmatpush3.bf16.msra.mxu0 %v18188_v34  ;;  %14288 = vmatprep.mubr.bf16.mxu0 %v13059_v45  ;;  %v18228_v34 = vld [vmem:[%s21769_s8 + $0xf28] sm:$0xff]   ;;  %v18232_v45 = vld [vmem:[%s21769_s8 + $0xf20] sm:$0xff]  }
0x4c03   : > { %17159 = vmatpush3.bf16.msra.mxu1 %v18189_v46  ;;  %14328 = vmatprep.mubr.bf16.mxu1 %v13061_v7  ;;  %v18231_v46 = vld [vmem:[%s21769_s8 + $0xfe0] sm:$0xff]   ;;  %v18235_v7 = vld [vmem:[%s21769_s8 + $0xfd8] sm:$0xff]  }
0x4c04   : > { %17138 = vmatprep.subr.bf16.mxu0 %v18190_v47  ;;  %17160 = vmatprep.subr.bf16.mxu1 %v18191_v49  ;;  %v18233_v47 = vld [vmem:[%s21769_s8 + $0xfa0] sm:$0xff]   ;;  %v18234_v49 = vld [vmem:[%s21769_s8 + $0xf58] sm:$0xff]  }
0x4c06   : > { %17139 = vmatpush3.bf16.msra.mxu0 %v18192_v35  ;;  %v18236_v35 = vld [vmem:[%s21769_s8 + $0xf18] sm:$0xff]  }
0x4c07   : > { %17161 = vmatpush3.bf16.msra.mxu1 %v18193_v24  ;;  %17140 = vmatprep.subr.bf16.mxu0 %v18194_v52  ;;  %v18237_v24 = vld [vmem:[%s21769_s8 + $0xf98] sm:$0xff]   ;;  %v18238_v52 = vld [vmem:[%s21769_s8 + $0xf50] sm:$0xff]  }
0x4c08   : > { %17162 = vmatprep.subr.bf16.mxu1 %v18195_v58  ;;  %v18239_v58 = vld [vmem:[%s21769_s8 + $0xfd0] sm:$0xff]  }
0x4c0a   : > { %17141 = vmatpush3.bf16.msra.mxu0 %v18196_v25  ;;  %v18240_v25 = vld [vmem:[%s21769_s8 + $0xf10] sm:$0xff]  }
0x4c0b   : > { %17163 = vmatpush3.bf16.msra.mxu1 %v18197_v57  ;;  %17142 = vmatprep.subr.bf16.mxu0 %v18198_v29  ;;  %v18241_v57 = vld [vmem:[%s21769_s8 + $0xf90] sm:$0xff]   ;;  %v18242_v29 = vld [vmem:[%s21769_s8 + $0xf48] sm:$0xff]  }
0x4c0c   : > { %17164 = vmatprep.subr.bf16.mxu1 %v18199_v16  ;;  %v18243_v16 = vld [vmem:[%s21769_s8 + $0xfc8] sm:$0xff]  }
0x4c0e   : > { %17143 = vmatpush3.bf16.msra.mxu0 %v18200_v43  ;;  %v18244_v43 = vld [vmem:[%s21769_s8 + $0xf08] sm:$0xff]  }
0x4c0f   : > { %17165 = vmatpush3.bf16.msra.mxu1 %v18201_v28  ;;  %17144 = vmatprep.subr.bf16.mxu0 %v18202_v11  ;;  %v18245_v28 = vld [vmem:[%s21769_s8 + $0xf88] sm:$0xff]   ;;  %v18246_v11 = vld [vmem:[%s21769_s8 + $0xf40] sm:$0xff]  }
0x4c10   : > { %17166 = vmatprep.subr.bf16.mxu1 %v18203_v2  ;;  %v18247_v2 = vld [vmem:[%s21769_s8 + $0xfc0] sm:$0xff]  }
0x4c12   : > { %17145 = vmatpush3.bf16.msra.mxu0 %v18204_v50  ;;  %v18248_v50 = vld [vmem:[%s21769_s8 + $0xf00] sm:$0xff]  }
0x4c13   : > { %17167 = vmatpush3.bf16.msra.mxu1 %v18205_v53  ;;  %17146 = vmatprep.subr.bf16.mxu0 %v18206_v26  ;;  %v13046_v53 = vmax.f32 %v21468_v0, 0.0  ;;  %v18249_v26 = vld [vmem:[%s21769_s8 + $0xf80] sm:$0xff]  }
0x4c14   : > { %17168 = vmatprep.subr.bf16.mxu1 %v18207_v56  ;;  %v13048_v56 = vmax.f32 %v21470_v27, 0.0 }
0x4c16   : > { %17147 = vmatpush3.bf16.msra.mxu0 %v18208_v59  ;;  %v13062_v59 = vpack.c.bf16 %v13046_v53, %v13046_v53  ;;  %v13064_v62 = vpack.c.bf16 %v13048_v56, %v13048_v56 }
0x4c17   : > { %17169 = vmatpush3.bf16.msra.mxu1 %v18209_v40  ;;  %17148 = vmatprep.subr.bf16.mxu0 %v18210_v37  ;;  %v16209_v37 = vld [vmem:[%s21771_s10 + $0x25] ss:$0 sm:$0xff] }
0x4c18   : > { %17170 = vmatprep.subr.bf16.mxu1 %v18211_v38 }
0x4c1a   : > { %17149 = vmatpush3.bf16.msra.mxu0 %v18212_v8 }
0x4c1b   : > { %17171 = vmatpush3.bf16.msra.mxu1 %v18213_v5  ;;  %17150 = vmatprep.subr.bf16.mxu0 %v18214_v21 }
0x4c1c   : > { %17172 = vmatprep.subr.bf16.mxu1 %v18215_v23 }
0x4c1e   : > { %17151 = vmatpush3.bf16.msra.mxu0 %v18216_v17 }
0x4c1f   : > { %17173 = vmatpush3.bf16.msra.mxu1 %v18217_v10  ;;  %17180 = vmatprep.subr.bf16.mxu0 %v18218_v15 }
0x4c20   : > { %17202 = vmatprep.subr.bf16.mxu1 %v18219_v44 }
0x4c21   : > { %14289 = vmatmul.mubr.bf16.vlgmr.msra.gmra.mxu0 %v13058_v4 }
0x4c22   : > { %14329 = vmatmul.mubr.bf16.vlgmr.msra.gmra.mxu1 %v13060_v20  ;;  %17181 = vmatpush3.bf16.msra.mxu0 %v18220_v6 }
0x4c23   : > { %14368 = vmatprep.mubr.bf16.mxu0 %v13063_v60  ;;  %17203 = vmatpush3.bf16.msra.mxu1 %v18221_v13 }
0x4c24   : > { %14408 = vmatprep.mubr.bf16.mxu1 %v13065_v48  ;;  %17182 = vmatprep.subr.bf16.mxu0 %v18222_v42 }
0x4c25   : > { %17204 = vmatprep.subr.bf16.mxu1 %v18223_v30 }
0x4c26   : > { %17183 = vmatpush3.bf16.msra.mxu0 %v18224_v36 }
0x4c27   : > { %17205 = vmatpush3.bf16.msra.mxu1 %v18225_v31  ;;  %17184 = vmatprep.subr.bf16.mxu0 %v18226_v19 }
0x4c28   : > { %17206 = vmatprep.subr.bf16.mxu1 %v18227_v33 }
0x4c2a   : > { %17185 = vmatpush3.bf16.msra.mxu0 %v18228_v34 }
0x4c2b   : > { %17207 = vmatpush3.bf16.msra.mxu1 %v18229_v9  ;;  %17186 = vmatprep.subr.bf16.mxu0 %v18230_v61 }
0x4c2c   : > { %17208 = vmatprep.subr.bf16.mxu1 %v18231_v46 }
0x4c2e   : > { %17187 = vmatpush3.bf16.msra.mxu0 %v18232_v45 }
0x4c2f   : > { %17209 = vmatpush3.bf16.msra.mxu1 %v18233_v47  ;;  %17188 = vmatprep.subr.bf16.mxu0 %v18234_v49 }
0x4c30   : > { %17210 = vmatprep.subr.bf16.mxu1 %v18235_v7 }
0x4c32   : > { %17189 = vmatpush3.bf16.msra.mxu0 %v18236_v35 }
0x4c33   : > { %17211 = vmatpush3.bf16.msra.mxu1 %v18237_v24  ;;  %17190 = vmatprep.subr.bf16.mxu0 %v18238_v52 }
0x4c34   : > { %17212 = vmatprep.subr.bf16.mxu1 %v18239_v58 }
0x4c36   : > { %17191 = vmatpush3.bf16.msra.mxu0 %v18240_v25 }
0x4c37   : > { %17213 = vmatpush3.bf16.msra.mxu1 %v18241_v57  ;;  %17192 = vmatprep.subr.bf16.mxu0 %v18242_v29 }
0x4c38   : > { %17214 = vmatprep.subr.bf16.mxu1 %v18243_v16 }
0x4c3a   : > { %17193 = vmatpush3.bf16.msra.mxu0 %v18244_v43 }
0x4c3b   : > { %17215 = vmatpush3.bf16.msra.mxu1 %v18245_v28  ;;  %17194 = vmatprep.subr.bf16.mxu0 %v18246_v11 }
0x4c3c   : > { %17216 = vmatprep.subr.bf16.mxu1 %v18247_v2 }
0x4c3e   : > { %17195 = vmatpush3.bf16.msra.mxu0 %v18248_v50 }
0x4c3f   : > { %17217 = vmatpush3.bf16.msra.mxu1 %v18249_v26  ;;  %17687 = vmatprep.subr.bf16.mxu0 %v18381_v1 }
0x4c41   : > { %14369 = vmatmul.mubr.bf16.vlgmr.msra.gmra.mxu0 %v13062_v59  ;;  %v16338_v59 = vld [vmem:[%s21771_s10 + $0x26] ss:$0 sm:$0xff] }
0x4c42   : > { %14409 = vmatmul.mubr.bf16.vlgmr.msra.gmra.mxu1 %v13064_v62  ;;  %17691 = vmatprep.mubr.msk.bf16.mxu0 %vm18382_vm1, %v18381_v1  ;;  %v16339_v62 = vld [vmem:[%s21771_s10 + $0x27] ss:$0 sm:$0xff] }
0x4ca1   : > { %v17064_v0 = vpop.f32.mrf.mxu0  ;;  %v17086_v40 = vpop.f32.mrf.mxu1 }
0x4ca3   : > { %v17065_v54 = vpop.f32.mrf.mxu0  ;;  %v17087_v27 = vpop.f32.mrf.mxu1 }
0x4ca4   : > { %v17066_v38 = vadd.f32 %v17065_v54, %v17064_v0  ;;  %v17088_v3 = vadd.f32 %v17087_v27, %v17086_v40 }
0x4ca5   : > { %v17067_v41 = vpop.f32.mrf.mxu0  ;;  %v17089_v8 = vpop.f32.mrf.mxu1 }
0x4ca6   : > { %v14131_v14 = vadd.f32 %v17066_v38, %v16209_v37  ;;  %v18250_v8 = vld [vmem:[%s21770_s9 + $0x8] sm:$0xff]  }
0x4ca7   : > { %v17068_v5 = vpop.f32.mrf.mxu0  ;;  %v17090_v21 = vpop.f32.mrf.mxu1  ;;  %17688 = vmatpush3.bf16.msra.mxu0 %v18250_v8 }
0x4ca8   : > { %v14171_v39 = vadd.f32 %v17088_v3, %v14131_v14  ;;  %v18251_v14 = vld [vmem:[%s21770_s9] sm:$0xff]   ;;  %17689 = vmatprep.subr.bf16.mxu0 %v18381_v1 }
0x4cab   : > { %17690 = vmatpush3.bf16.msra.mxu0 %v18251_v14 }
0x4cc1   : > { %v17108_v23 = vpop.f32.mrf.mxu0  ;;  %v17130_v22 = vpop.f32.mrf.mxu1 }
0x4cc3   : > { %v17109_v51 = vpop.f32.mrf.mxu0  ;;  %v17131_v17 = vpop.f32.mrf.mxu1 }
0x4cc4   : > { %v17110_v60 = vadd.f32 %v17109_v51, %v17108_v23  ;;  %v17132_v48 = vadd.f32 %v17131_v17, %v17130_v22  ;;  %v16340_v22 = vld [vmem:[%s21771_s10 + $0x28] ss:$0 sm:$0xff]  ;;  %v16341_v17 = vld [vmem:[%s21771_s10 + $0x29] ss:$0 sm:$0xff] }
0x4cc5   : > { %v17111_v32 = vpop.f32.mrf.mxu0  ;;  %v17133_v10 = vpop.f32.mrf.mxu1 }
0x4cc6   : > { %v14211_v30 = vadd.f32 %v17110_v60, %v14171_v39 }
0x4cc7   : > { %v17112_v15 = vpop.f32.mrf.mxu0  ;;  %v17134_v12 = vpop.f32.mrf.mxu1 }
0x4cc8   : > { %v14251_v31 = vadd.f32 %v17132_v48, %v14211_v30 }
0x4ce1   : > { %v17152_v44 = vpop.f32.mrf.mxu0 }
0x4ce2   : > { %v17174_v55 = vpop.f32.mrf.mxu1 }
0x4ce3   : > { %v17153_v63 = vpop.f32.mrf.mxu0 }
0x4ce4   : > { %v17175_v6 = vpop.f32.mrf.mxu1  ;;  %v17154_v36 = vadd.f32 %v17153_v63, %v17152_v44 }
0x4ce5   : > { %v17155_v4 = vpop.f32.mrf.mxu0  ;;  %v17176_v34 = vadd.f32 %v17175_v6, %v17174_v55 }
0x4ce6   : > { %v17177_v13 = vpop.f32.mrf.mxu1  ;;  %v14291_v19 = vadd.f32 %v17154_v36, %v14251_v31 }
0x4ce7   : > { %v17156_v20 = vpop.f32.mrf.mxu0 }
0x4ce8   : > { %v17178_v42 = vpop.f32.mrf.mxu1  ;;  %v14331_v46 = vadd.f32 %v17176_v34, %v14291_v19 }
0x4d01   : > { %v17196_v33 = vpop.f32.mrf.mxu0 }
0x4d02   : > { %v17218_v9 = vpop.f32.mrf.mxu1 }
0x4d03   : > { %v17197_v61 = vpop.f32.mrf.mxu0 }
0x4d04   : > { %v17198_v45 = vadd.f32 %v17197_v61, %v17196_v33  ;;  %v17219_v47 = vpop.f32.mrf.mxu1 }
0x4d05   : > { %v17199_v49 = vpop.f32.mrf.mxu0  ;;  %v17220_v35 = vadd.f32 %v17219_v47, %v17218_v9 }
0x4d06   : > { %v14371_v7 = vadd.f32 %v17198_v45, %v14331_v46  ;;  %v17221_v24 = vpop.f32.mrf.mxu1 }
0x4d07   : > { %v17200_v52 = vpop.f32.mrf.mxu0 }
0x4d08   : > { %v14411_v58 = vadd.f32 %v17220_v35, %v14371_v7  ;;  %v17222_v25 = vpop.f32.mrf.mxu1 }
0x4d0a   : > { %v14416_v57 = vadd.f32 %v14411_v58, %v21190_v18 }
0x4d0c   : > { %v14419_v29 = vsel %vm518_vm4, %v14416_v57, 0.0 }
0x4d0d   : > { %14420 = vadd.xlane.f32.xlu1 %v14419_v29 }
0x4d96   : > { %v14421_v16 = vpop.xlane.xlu1 %14420 }
0x4d97   : > { %v14422_v43 = vmul.f32 0.03125, %v14421_v16 }
0x4d99   : > { %v14423_v28 = vsub.f32 %v14416_v57, %v14422_v43 }
0x4d9b   : > { %v14424_v11 = vmul.f32 %v14423_v28, %v14423_v28 }
0x4d9d   : > { %v14425_v2 = vsel %vm518_vm4, %v14424_v11, 0.0 }
0x4d9e   : > { %14426 = vadd.xlane.f32.xlu1 %v14425_v2 }
0x4e27   : > { %v14427_v50 = vpop.xlane.xlu1 %14426 }
0x4e28   : > { %v14428_v53 = vmul.f32 0.03125, %v14427_v50 }
0x4e2a   : > { %v14429_v26 = vadd.f32 1e-05, %v14428_v53 }
0x4e2c   : > { %18368 = vrsqrt.f32 %v14429_v26 }
0x4e39   : > { %v18369_v56 = vpop.eup %18368 }
0x4e3a   : > { %v14431_v18 = vmul.f32 %v18369_v56, %v14423_v28 }
0x4e3c   : > { %v14436_v0 = vmul.f32 %v16338_v59, %v14431_v18 }
0x4e3e   : > { %v14441_v40 = vadd.f32 %v16339_v62, %v14436_v0 }
0x4e40   : > { %v14444_v37 = vsel %vm518_vm4, %v14441_v40, 0.0 }
0x4e41   : > { %14445 = vadd.xlane.f32.xlu1 %v14444_v37 }
0x4eca   : > { %v14446_v54 = vpop.xlane.xlu1 %14445 }
0x4ecb   : > { %v14447_v27 = vmul.f32 0.03125, %v14446_v54 }
0x4ecd   : > { %v14448_v38 = vsub.f32 %v14441_v40, %v14447_v27 }
0x4ecf   : > { %v14449_v3 = vmul.f32 %v14448_v38, %v14448_v38 }
0x4ed1   : > { %v14450_v41 = vsel %vm518_vm4, %v14449_v3, 0.0 }
0x4ed2   : > { %14451 = vadd.xlane.f32.xlu0 %v14450_v41 }
0x4f5b   : > { %v14452_v5 = vpop.xlane.xlu0 %14451 }
0x4f5c   : > { %v14453_v21 = vmul.f32 0.03125, %v14452_v5 }
0x4f5e   : > { %v14454_v39 = vadd.f32 1e-05, %v14453_v21 }
0x4f60   : > { %18370 = vrsqrt.f32 %v14454_v39 }
0x4f6d   : > { %v18371_v23 = vpop.eup %18370 }
0x4f6e   : > { %v14456_v51 = vmul.f32 %v18371_v23, %v14448_v38 }
0x4f70   : > { %v14461_v32 = vmul.f32 %v16340_v22, %v14456_v51 }
0x4f72   : > { %v14466_v10 = vadd.f32 %v16341_v17, %v14461_v32 }
0x4f74   : > { %v14467_v15 = vpack.c.bf16 %v14466_v10, %v14466_v10 }
0x4f76   : > { %17692 = vmatmul.mubr.msk.bf16.vlgmr.msra.gmra.mxu0 %vm518_vm4, %v14467_v15 }
0x5036   : > { %v14521_v1 = vpop.f32.mrf.mxu0 }
0x5037   : > { %14527 = vst [vmem:[%s408_s17] sm:$0xff] %v14521_v1 }
0x5038   : > { %v17693_v12 = vpop.f32.mrf.mxu0 }
0x503a   : > { %v14524_v44 = vpop.f32.mrf.mxu0 }
0x503c   : > { %v17694_v55 = vpop.f32.mrf.mxu0 }
0x503d PF: > { %s21820_s14 = sld [smem:[#allocation2_spill]] }
0x5043   : > { %s22_s21 = sadd.s32 1, %s21820_s14  }
0x5044   : > { %p19_p4 = scmp.ge.s32.totalorder %s22_s21, 4  }
0x5046   :  { %21 = sbr.rel (!%p19_p4) target bundleno = 4 (0x4), region = 120 }

</bundles_post_ra>
